<compile_context>
chip_gen: v7x
topology: tpu7x:2x2x1
jax: 0.10.0
libtpu: 0.0.40
codegen_flags: <defaults>
</compile_context>

<pallas_src>
import functools
import math

import jax
import jax.numpy as jnp
from jax.experimental import pallas as pl
from jax.experimental.pallas import tpu as pltpu

HEADS = 8
NUM_VIEWS = 12       # PositionalEmbedding(feature_dim, 12); MLP input = feature_dim * 12
LN_EPS = 1e-12


# ----------------------------------------------------------------------------
# Fused kernel: pos-emb + self-attention + residual + LayerNorm (chunked)
#               -> flattened VMEM scratch -> 4-layer MLP on the full block
# ----------------------------------------------------------------------------
def _scorer_kernel(x_ref, pos_ref, wqv_ref, wkT_ref, wo_ref, bo_ref,
                   gamma_ref, beta_ref,
                   w1_ref, b1_ref, w2_ref, b2_ref, w3_ref, b3_ref,
                   w4_ref, b4_ref, out_ref, y_scr):
    CS, D = pos_ref.shape                     # CS = CHUNK_C * S rows per chunk
    Bblk, SD = y_scr.shape
    S = SD // D                               # number of views (12)
    C = CS // S                               # samples per chunk (power of two)
    hd = D // HEADS
    n_chunks = Bblk // C
    scale = 1.0 / math.sqrt(D)                # PyTorch divides by sqrt(embed_size)

    # Additive softmax mask: within a chunk, row = s*C + sample, so two rows
    # belong to the same sample iff (row % C) matches.  Cross-sample entries
    # get -1e30 so the block-diagonal softmax is exactly per-sample.
    r_ids = jax.lax.broadcasted_iota(jnp.int32, (CS, CS), 0)
    c_ids = jax.lax.broadcasted_iota(jnp.int32, (CS, CS), 1)
    neg_mask = jnp.where((r_ids & (C - 1)) == (c_ids & (C - 1)),
                         jnp.float32(0.0), jnp.float32(-1e30))

    pos = pos_ref[...]
    wqv = wqv_ref[...]
    wkT = wkT_ref[...]
    wo = wo_ref[...]
    bo = bo_ref[...]
    gamma = gamma_ref[...]
    beta = beta_ref[...]

    # TODO(synk): `mask` argument of SelfAttention not implemented (forward uses mask=None).
    def chunk_body(c, carry):
        r0 = pl.multiple_of(c * CS, CS)
        xe = x_ref[pl.ds(r0, CS), :] + pos                            # (CS, D)

        # fused q/v projection (block-diagonal weights), K emitted pre-transposed.
        qv = jnp.dot(xe, wqv, preferred_element_type=jnp.float32)     # (CS, 2D)
        kT = jnp.dot(wkT, xe.T, preferred_element_type=jnp.float32)   # (D, CS)

        attn = jnp.zeros((CS, D), jnp.float32)
        for h in range(HEADS):
            lo = h * hd
            q_h = qv[:, lo:lo + hd]                                   # (CS, hd)
            e = jnp.dot(q_h, kT[lo:lo + hd, :],
                        preferred_element_type=jnp.float32) * scale + neg_mask
            e = e - jnp.max(e, axis=-1, keepdims=True)
            p = jnp.exp(e)
            p = p * pl.reciprocal(jnp.sum(p, axis=-1, keepdims=True), approx=True)
            v_h = qv[:, D + lo:D + lo + hd]                           # (CS, hd)
            ctx = jnp.dot(p, v_h, preferred_element_type=jnp.float32)  # (CS, hd)
            # fc_out folded per head: Wo^T rows for this head's features.
            attn = attn + jnp.dot(ctx, wo[lo:lo + hd, :],
                                  preferred_element_type=jnp.float32)  # (CS, D)
        attn = attn + bo

        # residual + LayerNorm(eps=1e-12)
        res = xe + attn
        mu = jnp.mean(res, axis=-1, keepdims=True)
        var = jnp.mean((res - mu) ** 2, axis=-1, keepdims=True)
        y = (res - mu) * jax.lax.rsqrt(var + LN_EPS) * gamma + beta    # (CS, D)

        # Flatten per sample: rows are position-major (row = s*C + sample), so
        # concatenating the S position slabs along lanes reproduces torch's
        # .view(B, -1) column order exactly.
        y_flat = jnp.concatenate([y[s * C:(s + 1) * C, :] for s in range(S)],
                                 axis=-1)                              # (C, S*D)
        y_scr[pl.ds(pl.multiple_of(c * C, C), C), :] = y_flat
        return carry

    jax.lax.fori_loop(0, n_chunks, chunk_body, 0)

    # ---- MLP head on the full block (M = Bblk): bf16 operands, f32 accumulation ----
    # TODO(synk): nn.Dropout layers treated as identity (inference semantics).
    y = y_scr[...]                                                     # (Bblk, S*D)
    h = jnp.dot(y.astype(jnp.bfloat16), w1_ref[...],
                preferred_element_type=jnp.float32) + b1_ref[...]      # (Bblk, 1536)
    h = jnp.dot(h.astype(jnp.bfloat16), w2_ref[...],
                preferred_element_type=jnp.float32) + b2_ref[...]      # (Bblk, 384)
    h = jnp.dot(h.astype(jnp.bfloat16), w3_ref[...],
                preferred_element_type=jnp.float32) + b3_ref[...]      # (Bblk, 64)
    # Final 64 -> 1 layer, produced lane-dense: (1,64) x (Bblk,64)^T -> (1, Bblk)
    score = jnp.einsum("no,bo->nb", w4_ref[...], h,
                       preferred_element_type=jnp.float32)             # (1, Bblk)
    out_ref[0] = score + b4_ref[...]


# ----------------------------------------------------------------------------
# One-time weight layout (outside jit): block-diagonal q/k/v weights,
# transposes, bf16 cast of the large MLP weights.
# ----------------------------------------------------------------------------
def prep_params(p, *, chunk_c=8, mlp_dtype=jnp.bfloat16):
    D = p["Wo"].shape[0]
    S = NUM_VIEWS
    eye = jnp.eye(HEADS, dtype=jnp.float32)

    def blockdiag(w):                      # (hd, hd) -> (D, D) block-diagonal
        return jnp.kron(eye, w.astype(jnp.float32))

    pos = p["pos"][:S].astype(jnp.float32)                       # (S, D)
    return dict(
        pos_tiled=jnp.repeat(pos, chunk_c, axis=0),              # (chunk_c*S, D)
        w_qv=jnp.concatenate([blockdiag(p["Wq"].T),
                              blockdiag(p["Wv"].T)], axis=1),    # (D, 2D)
        w_kT=blockdiag(p["Wk"]),                                 # (D, D): K^T = w_kT @ xe^T
        wo=p["Wo"].T.astype(jnp.float32),                        # (D, D)
        bo=p["bo"].reshape(1, D),
        gamma=p["gamma"].reshape(1, D),
        beta=p["beta"].reshape(1, D),
        w1=p["W1"].T.astype(mlp_dtype),                          # (S*D, 1536) bf16
        b1=p["b1"].reshape(1, -1),
        w2=p["W2"].T.astype(mlp_dtype),                          # (1536, 384) bf16
        b2=p["b2"].reshape(1, -1),
        w3=p["W3"].T.astype(mlp_dtype),                          # (384, 64) bf16
        b3=p["b3"].reshape(1, -1),
        w4=p["W4"].reshape(1, -1).astype(jnp.float32),           # (1, 64) f32 row
        b4=p["b4"].reshape(1, 1),
    )


# ----------------------------------------------------------------------------
# Wrapper: one fused pallas_call over grid=(ceil(B / block_b),)
# ----------------------------------------------------------------------------
def scorer_forward(x, kp, *, block_b=16, chunk_c=8):
    B, S, D = x.shape
    assert D % HEADS == 0
    assert chunk_c >= 8 and (chunk_c & (chunk_c - 1)) == 0, "chunk_c: power of two >= 8"
    assert block_b % chunk_c == 0
    CS = chunk_c * S
    assert kp["pos_tiled"].shape == (CS, D), "prep_params chunk_c must match wrapper"

    n_blocks = pl.cdiv(B, block_b)
    b_pad = n_blocks * block_b
    if b_pad != B:
        x = jnp.concatenate([x, jnp.zeros((b_pad - B, S, D), x.dtype)], axis=0)

    # Single host-side relayout of x (no duplicated head-major stream):
    # row order = (block, chunk, position, sample-in-chunk), flattened to 2-D,
    # so each chunk is a contiguous position-major (chunk_c*S, D) slab.
    n_c = block_b // chunk_c
    x_flat = (x.reshape(n_blocks, n_c, chunk_c, S, D)
                .transpose(0, 1, 3, 2, 4)
                .reshape(b_pad * S, D))

    hd1 = kp["w1"].shape[1]
    hd2 = kp["w2"].shape[1]
    hd3 = kp["w3"].shape[1]

    flops = int(b_pad) * 2 * (S * D * 3 * D                 # q/k/v projections
                              + HEADS * S * CS * 2 * (D // HEADS)   # energies + context
                              + S * D * D                   # fc_out
                              + S * D * hd1 + hd1 * hd2 + hd2 * hd3 + hd3)  # MLP
    transcendentals = int(b_pad) * (HEADS * S * CS + HEADS * S + S)
    bytes_accessed = (int(x_flat.size) * 4
                      + sum(int(v.size) * v.dtype.itemsize for v in kp.values())
                      + int(b_pad) * 4)
    cost = pl.CostEstimate(flops=flops, transcendentals=transcendentals,
                           bytes_accessed=bytes_accessed)

    const2 = lambda b: (0, 0)

    out = pl.pallas_call(
        _scorer_kernel,
        out_shape=jax.ShapeDtypeStruct((n_blocks, 1, block_b), jnp.float32),
        grid=(n_blocks,),
        in_specs=[
            pl.BlockSpec((block_b * S, D), lambda b: (b, 0)),   # x (flattened block)
            pl.BlockSpec((CS, D), const2),                      # pos, tiled per chunk
            pl.BlockSpec((D, 2 * D), const2),                   # [Wq|Wv] block-diag
            pl.BlockSpec((D, D), const2),                       # blockdiag(Wk) (K^T form)
            pl.BlockSpec((D, D), const2),                       # Wo^T
            pl.BlockSpec((1, D), const2),                       # bo
            pl.BlockSpec((1, D), const2),                       # gamma
            pl.BlockSpec((1, D), const2),                       # beta
            pl.BlockSpec((S * D, hd1), const2),                 # W1^T (bf16)
            pl.BlockSpec((1, hd1), const2),                     # b1
            pl.BlockSpec((hd1, hd2), const2),                   # W2^T (bf16)
            pl.BlockSpec((1, hd2), const2),                     # b2
            pl.BlockSpec((hd2, hd3), const2),                   # W3^T (bf16)
            pl.BlockSpec((1, hd3), const2),                     # b3
            pl.BlockSpec((1, hd3), const2),                     # W4 row (f32)
            pl.BlockSpec((1, 1), const2),                       # b4
        ],
        out_specs=pl.BlockSpec((1, 1, block_b), lambda b: (b, 0, 0)),
        scratch_shapes=[pltpu.VMEM((block_b, S * D), jnp.float32)],
        compiler_params=pltpu.CompilerParams(
            dimension_semantics=("parallel",),
            vmem_limit_bytes=32 * 1024 * 1024),
        cost_estimate=cost,
    )(x_flat, kp["pos_tiled"], kp["w_qv"], kp["w_kT"], kp["wo"], kp["bo"],
      kp["gamma"], kp["beta"],
      kp["w1"], kp["b1"], kp["w2"], kp["b2"], kp["w3"], kp["b3"],
      kp["w4"], kp["b4"])
    return out.reshape(b_pad, 1)[:B]


# ----------------------------------------------------------------------------
# Pure-JAX reference (mirrors the PyTorch forward).  mlp_dtype=bfloat16 models
# the kernel's bf16-quantized MLP weights/operands for a tight comparison.
# ----------------------------------------------------------------------------
def scorer_ref(x, p, mlp_dtype=jnp.float32):
    B, S, D = x.shape
    H, hd = HEADS, D // HEADS
    xe = x + p["pos"][None, :S]
    xh = xe.reshape(B, S, H, hd)
    q = jnp.einsum("bshi,oi->bsho", xh, p["Wq"])
    k = jnp.einsum("bshi,oi->bsho", xh, p["Wk"])
    v = jnp.einsum("bshi,oi->bsho", xh, p["Wv"])
    energy = jnp.einsum("bqhd,bkhd->bhqk", q, k)
    attn = jax.nn.softmax(energy / (D ** 0.5), axis=3)
    out = jnp.einsum("bhql,blhd->bqhd", attn, v).reshape(B, S, D)
    out = out @ p["Wo"].T + p["bo"]
    res = xe + out
    mu = res.mean(-1, keepdims=True)
    var = ((res - mu) ** 2).mean(-1, keepdims=True)
    mv = ((res - mu) / jnp.sqrt(var + LN_EPS)) * p["gamma"] + p["beta"]
    h = mv.reshape(B, S * D)

    def lin(h, W, b):
        return jnp.dot(h.astype(mlp_dtype), W.T.astype(mlp_dtype),
                       preferred_element_type=jnp.float32) + b

    h = lin(h, p["W1"], p["b1"])
    h = lin(h, p["W2"], p["b2"])
    h = lin(h, p["W3"], p["b3"])
    return h @ p["W4"].T + p["b4"]


def init_params(key, D):
    """Deterministic parameter init (PyTorch-default-like uniform ranges)."""
    hd = D // HEADS
    ks = jax.random.split(key, 16)

    def lin(kw, kb, fan_out, fan_in, bias=True):
        bound = 1.0 / (fan_in ** 0.5)
        W = jax.random.uniform(kw, (fan_out, fan_in), jnp.float32, -bound, bound)
        b = (jax.random.uniform(kb, (fan_out,), jnp.float32, -bound, bound)
             if bias else None)
        return W, b

    p = {}
    p["pos"] = jax.random.normal(ks[0], (NUM_VIEWS, D), jnp.float32)  # nn.Embedding(12, D)
    p["Wq"], _ = lin(ks[1], ks[1], hd, hd, bias=False)
    p["Wk"], _ = lin(ks[2], ks[2], hd, hd, bias=False)
    p["Wv"], _ = lin(ks[3], ks[3], hd, hd, bias=False)
    p["Wo"], p["bo"] = lin(ks[4], ks[5], D, D)
    p["gamma"] = jnp.ones((D,), jnp.float32)
    p["beta"] = jnp.zeros((D,), jnp.float32)
    p["W1"], p["b1"] = lin(ks[6], ks[7], 1536, D * NUM_VIEWS)
    p["W2"], p["b2"] = lin(ks[8], ks[9], 384, 1536)
    p["W3"], p["b3"] = lin(ks[10], ks[11], 64, 384)
    p["W4"], p["b4"] = lin(ks[12], ks[13], 1, 64)
    return p


if __name__ == "__main__":
    # feature_dim=64 (divisible by 8 heads), 12 views; small batch that still
    # exercises padding (24 -> 32), two grid steps (even, good for v7x) and
    # two attention chunks per step.
    B, S, D = 24, NUM_VIEWS, 64
    BLOCK_B, CHUNK_C = 16, 8

    key = jax.random.PRNGKey(0)
    kx, kpk = jax.random.split(key)
    x = jax.random.normal(kx, (B, S, D), jnp.float32)
    params = init_params(kpk, D)
    kparams = prep_params(params, chunk_c=CHUNK_C)   # one-time layout + bf16 cast

    fwd = jax.jit(functools.partial(scorer_forward, block_b=BLOCK_B, chunk_c=CHUNK_C))
    score = jax.block_until_ready(fwd(x, kparams))

    # Reference with bf16-quantized MLP (matches the kernel's weight precision);
    # remaining differences: approx softmax reciprocal + accumulation order.
    ref = scorer_ref(x, params, mlp_dtype=jnp.bfloat16)
    assert score.shape == (B, 1), score.shape
    assert bool(jnp.all(jnp.isfinite(score))), score
    assert jnp.allclose(score, ref, rtol=1e-2, atol=1e-2), (score, ref)
    print("KERNEL_OK")
</pallas_src>

<mosaic_0001>
module attributes {stable_mosaic.version = 11 : i64} {
  func.func @_scorer_kernel(%arg0: i32, %arg1: memref<192x64xf32, #tpu.memory_space<vmem>>, %arg2: memref<96x64xf32, #tpu.memory_space<vmem>>, %arg3: memref<64x128xf32, #tpu.memory_space<vmem>>, %arg4: memref<64x64xf32, #tpu.memory_space<vmem>>, %arg5: memref<64x64xf32, #tpu.memory_space<vmem>>, %arg6: memref<1x64xf32, #tpu.memory_space<vmem>>, %arg7: memref<1x64xf32, #tpu.memory_space<vmem>>, %arg8: memref<1x64xf32, #tpu.memory_space<vmem>>, %arg9: memref<768x1536xbf16, #tpu.memory_space<vmem>>, %arg10: memref<1x1536xf32, #tpu.memory_space<vmem>>, %arg11: memref<1536x384xbf16, #tpu.memory_space<vmem>>, %arg12: memref<1x384xf32, #tpu.memory_space<vmem>>, %arg13: memref<384x64xbf16, #tpu.memory_space<vmem>>, %arg14: memref<1x64xf32, #tpu.memory_space<vmem>>, %arg15: memref<1x64xf32, #tpu.memory_space<vmem>>, %arg16: memref<1x1xf32, #tpu.memory_space<vmem>>, %arg17: memref<1x1x16xf32, #tpu.memory_space<vmem>>, %arg18: memref<16x768xf32, #tpu.memory_space<vmem>>) attributes {dimension_semantics = [#tpu.dimension_semantics<parallel>], iteration_bounds = array<i64: 2>, scalar_prefetch = 0 : i64, scratch_operands = 1 : i64, tpu.core_type = #tpu.core_type<tc>, window_params = [{transform_indices = @transform_0, window_bounds = array<i64: 192, 64>}, {pipeline_mode = #tpu.pipeline_mode<synchronous>, transform_indices = @transform_1, window_bounds = array<i64: 96, 64>}, {pipeline_mode = #tpu.pipeline_mode<synchronous>, transform_indices = @transform_2, window_bounds = array<i64: 64, 128>}, {pipeline_mode = #tpu.pipeline_mode<synchronous>, transform_indices = @transform_3, window_bounds = array<i64: 64, 64>}, {pipeline_mode = #tpu.pipeline_mode<synchronous>, transform_indices = @transform_4, window_bounds = array<i64: 64, 64>}, {pipeline_mode = #tpu.pipeline_mode<synchronous>, transform_indices = @transform_5, window_bounds = array<i64: 1, 64>}, {pipeline_mode = #tpu.pipeline_mode<synchronous>, transform_indices = @transform_6, window_bounds = array<i64: 1, 64>}, {pipeline_mode = #tpu.pipeline_mode<synchronous>, transform_indices = @transform_7, window_bounds = array<i64: 1, 64>}, {pipeline_mode = #tpu.pipeline_mode<synchronous>, transform_indices = @transform_8, window_bounds = array<i64: 768, 1536>}, {pipeline_mode = #tpu.pipeline_mode<synchronous>, transform_indices = @transform_9, window_bounds = array<i64: 1, 1536>}, {pipeline_mode = #tpu.pipeline_mode<synchronous>, transform_indices = @transform_10, window_bounds = array<i64: 1536, 384>}, {pipeline_mode = #tpu.pipeline_mode<synchronous>, transform_indices = @transform_11, window_bounds = array<i64: 1, 384>}, {pipeline_mode = #tpu.pipeline_mode<synchronous>, transform_indices = @transform_12, window_bounds = array<i64: 384, 64>}, {pipeline_mode = #tpu.pipeline_mode<synchronous>, transform_indices = @transform_13, window_bounds = array<i64: 1, 64>}, {pipeline_mode = #tpu.pipeline_mode<synchronous>, transform_indices = @transform_14, window_bounds = array<i64: 1, 64>}, {pipeline_mode = #tpu.pipeline_mode<synchronous>, transform_indices = @transform_15, window_bounds = array<i64: 1, 1>}, {transform_indices = @transform_16, window_bounds = array<i64: 1, 1, 16>}]} {
    %0 = tpu.iota {dimensions = array<i32: 0>} : vector<96x96xi32>
    %1 = tpu.iota {dimensions = array<i32: 1>} : vector<96x96xi32>
    %c7_i32 = arith.constant 7 : i32
    %2 = vector.broadcast %c7_i32 : i32 to vector<96x96xi32>
    %3 = arith.andi %0, %2 : vector<96x96xi32>
    %c7_i32_0 = arith.constant 7 : i32
    %4 = vector.broadcast %c7_i32_0 : i32 to vector<96x96xi32>
    %5 = arith.andi %1, %4 : vector<96x96xi32>
    %6 = arith.cmpi eq, %3, %5 : vector<96x96xi32>
    %cst = arith.constant 0.000000e+00 : f32
    %cst_1 = arith.constant -1.000000e+30 : f32
    %7 = vector.broadcast %cst : f32 to vector<96x96xf32>
    %8 = vector.broadcast %cst_1 : f32 to vector<96x96xf32>
    %9 = arith.select %6, %7, %8 : vector<96x96xi1>, vector<96x96xf32>
    %c0 = arith.constant 0 : index
    %c0_2 = arith.constant 0 : index
    %10 = vector.load %arg2[%c0, %c0_2] : memref<96x64xf32, #tpu.memory_space<vmem>>, vector<96x64xf32>
    %c0_3 = arith.constant 0 : index
    %c0_4 = arith.constant 0 : index
    %11 = vector.load %arg3[%c0_3, %c0_4] : memref<64x128xf32, #tpu.memory_space<vmem>>, vector<64x128xf32>
    %c0_5 = arith.constant 0 : index
    %c0_6 = arith.constant 0 : index
    %12 = vector.load %arg4[%c0_5, %c0_6] : memref<64x64xf32, #tpu.memory_space<vmem>>, vector<64x64xf32>
    %c0_7 = arith.constant 0 : index
    %c0_8 = arith.constant 0 : index
    %13 = vector.load %arg5[%c0_7, %c0_8] : memref<64x64xf32, #tpu.memory_space<vmem>>, vector<64x64xf32>
    %c0_9 = arith.constant 0 : index
    %c0_10 = arith.constant 0 : index
    %14 = vector.load %arg6[%c0_9, %c0_10] : memref<1x64xf32, #tpu.memory_space<vmem>>, vector<1x64xf32>
    %c0_11 = arith.constant 0 : index
    %c0_12 = arith.constant 0 : index
    %15 = vector.load %arg7[%c0_11, %c0_12] : memref<1x64xf32, #tpu.memory_space<vmem>>, vector<1x64xf32>
    %c0_13 = arith.constant 0 : index
    %c0_14 = arith.constant 0 : index
    %16 = vector.load %arg8[%c0_13, %c0_14] : memref<1x64xf32, #tpu.memory_space<vmem>>, vector<1x64xf32>
    %c0_i32 = arith.constant 0 : i32
    %c2_i32 = arith.constant 2 : i32
    %17 = arith.addi %c0_i32, %c2_i32 : i32
    %c1_i32 = arith.constant 1 : i32
    scf.for %arg19 = %c0_i32 to %17 step %c1_i32  : i32 {
      %c96_i32 = arith.constant 96 : i32
      %45 = arith.muli %arg19, %c96_i32 : i32
      %46 = tpu.assume_multiple %45, 96 : i32
      %47 = arith.index_cast %46 : i32 to index
      %c0_41 = arith.constant 0 : index
      %48 = vector.load %arg1[%47, %c0_41] : memref<192x64xf32, #tpu.memory_space<vmem>>, vector<96x64xf32>
      %49 = arith.addf %48, %10 : vector<96x64xf32>
      %cst_42 = arith.constant dense<0.000000e+00> : vector<96x128xf32>
      %50 = tpu.matmul %49, %11, %cst_42 {dimension_numbers = #tpu.dot_dimension_numbers<[1], [0], [0], [1], [0, 0, 1, 1], [], []>} : vector<96x64xf32>, vector<64x128xf32>, vector<96x128xf32> -> vector<96x128xf32>
      %51 = tpu.transpose %49, [1, 0] : vector<96x64xf32> -> vector<64x96xf32>
      %cst_43 = arith.constant dense<0.000000e+00> : vector<64x96xf32>
      %52 = tpu.matmul %12, %51, %cst_43 {dimension_numbers = #tpu.dot_dimension_numbers<[1], [0], [0], [1], [0, 0, 1, 1], [], []>} : vector<64x64xf32>, vector<64x96xf32>, vector<64x96xf32> -> vector<64x96xf32>
      %cst_44 = arith.constant 0.000000e+00 : f32
      %53 = vector.broadcast %cst_44 : f32 to vector<96x64xf32>
      %54 = vector.extract_strided_slice %50 {offsets = [0, 0], sizes = [96, 8], strides = [1, 1]} : vector<96x128xf32> to vector<96x8xf32>
      %55 = vector.extract_strided_slice %52 {offsets = [0, 0], sizes = [8, 96], strides = [1, 1]} : vector<64x96xf32> to vector<8x96xf32>
      %cst_45 = arith.constant dense<0.000000e+00> : vector<96x96xf32>
      %56 = tpu.matmul %54, %55, %cst_45 {dimension_numbers = #tpu.dot_dimension_numbers<[1], [0], [0], [1], [0, 0, 1, 1], [], []>} : vector<96x8xf32>, vector<8x96xf32>, vector<96x96xf32> -> vector<96x96xf32>
      %cst_46 = arith.constant 1.250000e-01 : f32
      %57 = vector.broadcast %cst_46 : f32 to vector<96x96xf32>
      %58 = arith.mulf %56, %57 : vector<96x96xf32>
      %59 = arith.addf %58, %9 : vector<96x96xf32>
      %cst_47 = arith.constant dense<0xFF800000> : vector<96xf32>
      %60 = vector.multi_reduction <maximumf>, %59, %cst_47 [1] : vector<96x96xf32> to vector<96xf32>
      %61 = vector.shape_cast %60 : vector<96xf32> to vector<96x1xf32>
      %62 = vector.broadcast %61 : vector<96x1xf32> to vector<96x96xf32>
      %63 = arith.subf %59, %62 : vector<96x96xf32>
      %64 = math.exp %63 : vector<96x96xf32>
      %cst_48 = arith.constant dense<0.000000e+00> : vector<96xf32>
      %65 = vector.multi_reduction <add>, %64, %cst_48 [1] : vector<96x96xf32> to vector<96xf32>
      %66 = vector.shape_cast %65 : vector<96xf32> to vector<96x1xf32>
      %67 = tpu.reciprocal %66 {approx = true} : vector<96x1xf32> -> vector<96x1xf32>
      %68 = vector.broadcast %67 : vector<96x1xf32> to vector<96x96xf32>
      %69 = arith.mulf %64, %68 : vector<96x96xf32>
      %70 = vector.extract_strided_slice %50 {offsets = [0, 64], sizes = [96, 8], strides = [1, 1]} : vector<96x128xf32> to vector<96x8xf32>
      %cst_49 = arith.constant dense<0.000000e+00> : vector<96x8xf32>
      %71 = tpu.matmul %69, %70, %cst_49 {dimension_numbers = #tpu.dot_dimension_numbers<[1], [0], [0], [1], [0, 0, 1, 1], [], []>} : vector<96x96xf32>, vector<96x8xf32>, vector<96x8xf32> -> vector<96x8xf32>
      %72 = vector.extract_strided_slice %13 {offsets = [0, 0], sizes = [8, 64], strides = [1, 1]} : vector<64x64xf32> to vector<8x64xf32>
      %cst_50 = arith.constant dense<0.000000e+00> : vector<96x64xf32>
      %73 = tpu.matmul %71, %72, %cst_50 {dimension_numbers = #tpu.dot_dimension_numbers<[1], [0], [0], [1], [0, 0, 1, 1], [], []>} : vector<96x8xf32>, vector<8x64xf32>, vector<96x64xf32> -> vector<96x64xf32>
      %74 = arith.addf %53, %73 : vector<96x64xf32>
      %75 = vector.extract_strided_slice %50 {offsets = [0, 8], sizes = [96, 8], strides = [1, 1]} : vector<96x128xf32> to vector<96x8xf32>
      %76 = vector.extract_strided_slice %52 {offsets = [8, 0], sizes = [8, 96], strides = [1, 1]} : vector<64x96xf32> to vector<8x96xf32>
      %cst_51 = arith.constant dense<0.000000e+00> : vector<96x96xf32>
      %77 = tpu.matmul %75, %76, %cst_51 {dimension_numbers = #tpu.dot_dimension_numbers<[1], [0], [0], [1], [0, 0, 1, 1], [], []>} : vector<96x8xf32>, vector<8x96xf32>, vector<96x96xf32> -> vector<96x96xf32>
      %cst_52 = arith.constant 1.250000e-01 : f32
      %78 = vector.broadcast %cst_52 : f32 to vector<96x96xf32>
      %79 = arith.mulf %77, %78 : vector<96x96xf32>
      %80 = arith.addf %79, %9 : vector<96x96xf32>
      %cst_53 = arith.constant dense<0xFF800000> : vector<96xf32>
      %81 = vector.multi_reduction <maximumf>, %80, %cst_53 [1] : vector<96x96xf32> to vector<96xf32>
      %82 = vector.shape_cast %81 : vector<96xf32> to vector<96x1xf32>
      %83 = vector.broadcast %82 : vector<96x1xf32> to vector<96x96xf32>
      %84 = arith.subf %80, %83 : vector<96x96xf32>
      %85 = math.exp %84 : vector<96x96xf32>
      %cst_54 = arith.constant dense<0.000000e+00> : vector<96xf32>
      %86 = vector.multi_reduction <add>, %85, %cst_54 [1] : vector<96x96xf32> to vector<96xf32>
      %87 = vector.shape_cast %86 : vector<96xf32> to vector<96x1xf32>
      %88 = tpu.reciprocal %87 {approx = true} : vector<96x1xf32> -> vector<96x1xf32>
      %89 = vector.broadcast %88 : vector<96x1xf32> to vector<96x96xf32>
      %90 = arith.mulf %85, %89 : vector<96x96xf32>
      %91 = vector.extract_strided_slice %50 {offsets = [0, 72], sizes = [96, 8], strides = [1, 1]} : vector<96x128xf32> to vector<96x8xf32>
      %cst_55 = arith.constant dense<0.000000e+00> : vector<96x8xf32>
      %92 = tpu.matmul %90, %91, %cst_55 {dimension_numbers = #tpu.dot_dimension_numbers<[1], [0], [0], [1], [0, 0, 1, 1], [], []>} : vector<96x96xf32>, vector<96x8xf32>, vector<96x8xf32> -> vector<96x8xf32>
      %93 = vector.extract_strided_slice %13 {offsets = [8, 0], sizes = [8, 64], strides = [1, 1]} : vector<64x64xf32> to vector<8x64xf32>
      %cst_56 = arith.constant dense<0.000000e+00> : vector<96x64xf32>
      %94 = tpu.matmul %92, %93, %cst_56 {dimension_numbers = #tpu.dot_dimension_numbers<[1], [0], [0], [1], [0, 0, 1, 1], [], []>} : vector<96x8xf32>, vector<8x64xf32>, vector<96x64xf32> -> vector<96x64xf32>
      %95 = arith.addf %74, %94 : vector<96x64xf32>
      %96 = vector.extract_strided_slice %50 {offsets = [0, 16], sizes = [96, 8], strides = [1, 1]} : vector<96x128xf32> to vector<96x8xf32>
      %97 = vector.extract_strided_slice %52 {offsets = [16, 0], sizes = [8, 96], strides = [1, 1]} : vector<64x96xf32> to vector<8x96xf32>
      %cst_57 = arith.constant dense<0.000000e+00> : vector<96x96xf32>
      %98 = tpu.matmul %96, %97, %cst_57 {dimension_numbers = #tpu.dot_dimension_numbers<[1], [0], [0], [1], [0, 0, 1, 1], [], []>} : vector<96x8xf32>, vector<8x96xf32>, vector<96x96xf32> -> vector<96x96xf32>
      %cst_58 = arith.constant 1.250000e-01 : f32
      %99 = vector.broadcast %cst_58 : f32 to vector<96x96xf32>
      %100 = arith.mulf %98, %99 : vector<96x96xf32>
      %101 = arith.addf %100, %9 : vector<96x96xf32>
      %cst_59 = arith.constant dense<0xFF800000> : vector<96xf32>
      %102 = vector.multi_reduction <maximumf>, %101, %cst_59 [1] : vector<96x96xf32> to vector<96xf32>
      %103 = vector.shape_cast %102 : vector<96xf32> to vector<96x1xf32>
      %104 = vector.broadcast %103 : vector<96x1xf32> to vector<96x96xf32>
      %105 = arith.subf %101, %104 : vector<96x96xf32>
      %106 = math.exp %105 : vector<96x96xf32>
      %cst_60 = arith.constant dense<0.000000e+00> : vector<96xf32>
      %107 = vector.multi_reduction <add>, %106, %cst_60 [1] : vector<96x96xf32> to vector<96xf32>
      %108 = vector.shape_cast %107 : vector<96xf32> to vector<96x1xf32>
      %109 = tpu.reciprocal %108 {approx = true} : vector<96x1xf32> -> vector<96x1xf32>
      %110 = vector.broadcast %109 : vector<96x1xf32> to vector<96x96xf32>
      %111 = arith.mulf %106, %110 : vector<96x96xf32>
      %112 = vector.extract_strided_slice %50 {offsets = [0, 80], sizes = [96, 8], strides = [1, 1]} : vector<96x128xf32> to vector<96x8xf32>
      %cst_61 = arith.constant dense<0.000000e+00> : vector<96x8xf32>
      %113 = tpu.matmul %111, %112, %cst_61 {dimension_numbers = #tpu.dot_dimension_numbers<[1], [0], [0], [1], [0, 0, 1, 1], [], []>} : vector<96x96xf32>, vector<96x8xf32>, vector<96x8xf32> -> vector<96x8xf32>
      %114 = vector.extract_strided_slice %13 {offsets = [16, 0], sizes = [8, 64], strides = [1, 1]} : vector<64x64xf32> to vector<8x64xf32>
      %cst_62 = arith.constant dense<0.000000e+00> : vector<96x64xf32>
      %115 = tpu.matmul %113, %114, %cst_62 {dimension_numbers = #tpu.dot_dimension_numbers<[1], [0], [0], [1], [0, 0, 1, 1], [], []>} : vector<96x8xf32>, vector<8x64xf32>, vector<96x64xf32> -> vector<96x64xf32>
      %116 = arith.addf %95, %115 : vector<96x64xf32>
      %117 = vector.extract_strided_slice %50 {offsets = [0, 24], sizes = [96, 8], strides = [1, 1]} : vector<96x128xf32> to vector<96x8xf32>
      %118 = vector.extract_strided_slice %52 {offsets = [24, 0], sizes = [8, 96], strides = [1, 1]} : vector<64x96xf32> to vector<8x96xf32>
      %cst_63 = arith.constant dense<0.000000e+00> : vector<96x96xf32>
      %119 = tpu.matmul %117, %118, %cst_63 {dimension_numbers = #tpu.dot_dimension_numbers<[1], [0], [0], [1], [0, 0, 1, 1], [], []>} : vector<96x8xf32>, vector<8x96xf32>, vector<96x96xf32> -> vector<96x96xf32>
      %cst_64 = arith.constant 1.250000e-01 : f32
      %120 = vector.broadcast %cst_64 : f32 to vector<96x96xf32>
      %121 = arith.mulf %119, %120 : vector<96x96xf32>
      %122 = arith.addf %121, %9 : vector<96x96xf32>
      %cst_65 = arith.constant dense<0xFF800000> : vector<96xf32>
      %123 = vector.multi_reduction <maximumf>, %122, %cst_65 [1] : vector<96x96xf32> to vector<96xf32>
      %124 = vector.shape_cast %123 : vector<96xf32> to vector<96x1xf32>
      %125 = vector.broadcast %124 : vector<96x1xf32> to vector<96x96xf32>
      %126 = arith.subf %122, %125 : vector<96x96xf32>
      %127 = math.exp %126 : vector<96x96xf32>
      %cst_66 = arith.constant dense<0.000000e+00> : vector<96xf32>
      %128 = vector.multi_reduction <add>, %127, %cst_66 [1] : vector<96x96xf32> to vector<96xf32>
      %129 = vector.shape_cast %128 : vector<96xf32> to vector<96x1xf32>
      %130 = tpu.reciprocal %129 {approx = true} : vector<96x1xf32> -> vector<96x1xf32>
      %131 = vector.broadcast %130 : vector<96x1xf32> to vector<96x96xf32>
      %132 = arith.mulf %127, %131 : vector<96x96xf32>
      %133 = vector.extract_strided_slice %50 {offsets = [0, 88], sizes = [96, 8], strides = [1, 1]} : vector<96x128xf32> to vector<96x8xf32>
      %cst_67 = arith.constant dense<0.000000e+00> : vector<96x8xf32>
      %134 = tpu.matmul %132, %133, %cst_67 {dimension_numbers = #tpu.dot_dimension_numbers<[1], [0], [0], [1], [0, 0, 1, 1], [], []>} : vector<96x96xf32>, vector<96x8xf32>, vector<96x8xf32> -> vector<96x8xf32>
      %135 = vector.extract_strided_slice %13 {offsets = [24, 0], sizes = [8, 64], strides = [1, 1]} : vector<64x64xf32> to vector<8x64xf32>
      %cst_68 = arith.constant dense<0.000000e+00> : vector<96x64xf32>
      %136 = tpu.matmul %134, %135, %cst_68 {dimension_numbers = #tpu.dot_dimension_numbers<[1], [0], [0], [1], [0, 0, 1, 1], [], []>} : vector<96x8xf32>, vector<8x64xf32>, vector<96x64xf32> -> vector<96x64xf32>
      %137 = arith.addf %116, %136 : vector<96x64xf32>
      %138 = vector.extract_strided_slice %50 {offsets = [0, 32], sizes = [96, 8], strides = [1, 1]} : vector<96x128xf32> to vector<96x8xf32>
      %139 = vector.extract_strided_slice %52 {offsets = [32, 0], sizes = [8, 96], strides = [1, 1]} : vector<64x96xf32> to vector<8x96xf32>
      %cst_69 = arith.constant dense<0.000000e+00> : vector<96x96xf32>
      %140 = tpu.matmul %138, %139, %cst_69 {dimension_numbers = #tpu.dot_dimension_numbers<[1], [0], [0], [1], [0, 0, 1, 1], [], []>} : vector<96x8xf32>, vector<8x96xf32>, vector<96x96xf32> -> vector<96x96xf32>
      %cst_70 = arith.constant 1.250000e-01 : f32
      %141 = vector.broadcast %cst_70 : f32 to vector<96x96xf32>
      %142 = arith.mulf %140, %141 : vector<96x96xf32>
      %143 = arith.addf %142, %9 : vector<96x96xf32>
      %cst_71 = arith.constant dense<0xFF800000> : vector<96xf32>
      %144 = vector.multi_reduction <maximumf>, %143, %cst_71 [1] : vector<96x96xf32> to vector<96xf32>
      %145 = vector.shape_cast %144 : vector<96xf32> to vector<96x1xf32>
      %146 = vector.broadcast %145 : vector<96x1xf32> to vector<96x96xf32>
      %147 = arith.subf %143, %146 : vector<96x96xf32>
      %148 = math.exp %147 : vector<96x96xf32>
      %cst_72 = arith.constant dense<0.000000e+00> : vector<96xf32>
      %149 = vector.multi_reduction <add>, %148, %cst_72 [1] : vector<96x96xf32> to vector<96xf32>
      %150 = vector.shape_cast %149 : vector<96xf32> to vector<96x1xf32>
      %151 = tpu.reciprocal %150 {approx = true} : vector<96x1xf32> -> vector<96x1xf32>
      %152 = vector.broadcast %151 : vector<96x1xf32> to vector<96x96xf32>
      %153 = arith.mulf %148, %152 : vector<96x96xf32>
      %154 = vector.extract_strided_slice %50 {offsets = [0, 96], sizes = [96, 8], strides = [1, 1]} : vector<96x128xf32> to vector<96x8xf32>
      %cst_73 = arith.constant dense<0.000000e+00> : vector<96x8xf32>
      %155 = tpu.matmul %153, %154, %cst_73 {dimension_numbers = #tpu.dot_dimension_numbers<[1], [0], [0], [1], [0, 0, 1, 1], [], []>} : vector<96x96xf32>, vector<96x8xf32>, vector<96x8xf32> -> vector<96x8xf32>
      %156 = vector.extract_strided_slice %13 {offsets = [32, 0], sizes = [8, 64], strides = [1, 1]} : vector<64x64xf32> to vector<8x64xf32>
      %cst_74 = arith.constant dense<0.000000e+00> : vector<96x64xf32>
      %157 = tpu.matmul %155, %156, %cst_74 {dimension_numbers = #tpu.dot_dimension_numbers<[1], [0], [0], [1], [0, 0, 1, 1], [], []>} : vector<96x8xf32>, vector<8x64xf32>, vector<96x64xf32> -> vector<96x64xf32>
      %158 = arith.addf %137, %157 : vector<96x64xf32>
      %159 = vector.extract_strided_slice %50 {offsets = [0, 40], sizes = [96, 8], strides = [1, 1]} : vector<96x128xf32> to vector<96x8xf32>
      %160 = vector.extract_strided_slice %52 {offsets = [40, 0], sizes = [8, 96], strides = [1, 1]} : vector<64x96xf32> to vector<8x96xf32>
      %cst_75 = arith.constant dense<0.000000e+00> : vector<96x96xf32>
      %161 = tpu.matmul %159, %160, %cst_75 {dimension_numbers = #tpu.dot_dimension_numbers<[1], [0], [0], [1], [0, 0, 1, 1], [], []>} : vector<96x8xf32>, vector<8x96xf32>, vector<96x96xf32> -> vector<96x96xf32>
      %cst_76 = arith.constant 1.250000e-01 : f32
      %162 = vector.broadcast %cst_76 : f32 to vector<96x96xf32>
      %163 = arith.mulf %161, %162 : vector<96x96xf32>
      %164 = arith.addf %163, %9 : vector<96x96xf32>
      %cst_77 = arith.constant dense<0xFF800000> : vector<96xf32>
      %165 = vector.multi_reduction <maximumf>, %164, %cst_77 [1] : vector<96x96xf32> to vector<96xf32>
      %166 = vector.shape_cast %165 : vector<96xf32> to vector<96x1xf32>
      %167 = vector.broadcast %166 : vector<96x1xf32> to vector<96x96xf32>
      %168 = arith.subf %164, %167 : vector<96x96xf32>
      %169 = math.exp %168 : vector<96x96xf32>
      %cst_78 = arith.constant dense<0.000000e+00> : vector<96xf32>
      %170 = vector.multi_reduction <add>, %169, %cst_78 [1] : vector<96x96xf32> to vector<96xf32>
      %171 = vector.shape_cast %170 : vector<96xf32> to vector<96x1xf32>
      %172 = tpu.reciprocal %171 {approx = true} : vector<96x1xf32> -> vector<96x1xf32>
      %173 = vector.broadcast %172 : vector<96x1xf32> to vector<96x96xf32>
      %174 = arith.mulf %169, %173 : vector<96x96xf32>
      %175 = vector.extract_strided_slice %50 {offsets = [0, 104], sizes = [96, 8], strides = [1, 1]} : vector<96x128xf32> to vector<96x8xf32>
      %cst_79 = arith.constant dense<0.000000e+00> : vector<96x8xf32>
      %176 = tpu.matmul %174, %175, %cst_79 {dimension_numbers = #tpu.dot_dimension_numbers<[1], [0], [0], [1], [0, 0, 1, 1], [], []>} : vector<96x96xf32>, vector<96x8xf32>, vector<96x8xf32> -> vector<96x8xf32>
      %177 = vector.extract_strided_slice %13 {offsets = [40, 0], sizes = [8, 64], strides = [1, 1]} : vector<64x64xf32> to vector<8x64xf32>
      %cst_80 = arith.constant dense<0.000000e+00> : vector<96x64xf32>
      %178 = tpu.matmul %176, %177, %cst_80 {dimension_numbers = #tpu.dot_dimension_numbers<[1], [0], [0], [1], [0, 0, 1, 1], [], []>} : vector<96x8xf32>, vector<8x64xf32>, vector<96x64xf32> -> vector<96x64xf32>
      %179 = arith.addf %158, %178 : vector<96x64xf32>
      %180 = vector.extract_strided_slice %50 {offsets = [0, 48], sizes = [96, 8], strides = [1, 1]} : vector<96x128xf32> to vector<96x8xf32>
      %181 = vector.extract_strided_slice %52 {offsets = [48, 0], sizes = [8, 96], strides = [1, 1]} : vector<64x96xf32> to vector<8x96xf32>
      %cst_81 = arith.constant dense<0.000000e+00> : vector<96x96xf32>
      %182 = tpu.matmul %180, %181, %cst_81 {dimension_numbers = #tpu.dot_dimension_numbers<[1], [0], [0], [1], [0, 0, 1, 1], [], []>} : vector<96x8xf32>, vector<8x96xf32>, vector<96x96xf32> -> vector<96x96xf32>
      %cst_82 = arith.constant 1.250000e-01 : f32
      %183 = vector.broadcast %cst_82 : f32 to vector<96x96xf32>
      %184 = arith.mulf %182, %183 : vector<96x96xf32>
      %185 = arith.addf %184, %9 : vector<96x96xf32>
      %cst_83 = arith.constant dense<0xFF800000> : vector<96xf32>
      %186 = vector.multi_reduction <maximumf>, %185, %cst_83 [1] : vector<96x96xf32> to vector<96xf32>
      %187 = vector.shape_cast %186 : vector<96xf32> to vector<96x1xf32>
      %188 = vector.broadcast %187 : vector<96x1xf32> to vector<96x96xf32>
      %189 = arith.subf %185, %188 : vector<96x96xf32>
      %190 = math.exp %189 : vector<96x96xf32>
      %cst_84 = arith.constant dense<0.000000e+00> : vector<96xf32>
      %191 = vector.multi_reduction <add>, %190, %cst_84 [1] : vector<96x96xf32> to vector<96xf32>
      %192 = vector.shape_cast %191 : vector<96xf32> to vector<96x1xf32>
      %193 = tpu.reciprocal %192 {approx = true} : vector<96x1xf32> -> vector<96x1xf32>
      %194 = vector.broadcast %193 : vector<96x1xf32> to vector<96x96xf32>
      %195 = arith.mulf %190, %194 : vector<96x96xf32>
      %196 = vector.extract_strided_slice %50 {offsets = [0, 112], sizes = [96, 8], strides = [1, 1]} : vector<96x128xf32> to vector<96x8xf32>
      %cst_85 = arith.constant dense<0.000000e+00> : vector<96x8xf32>
      %197 = tpu.matmul %195, %196, %cst_85 {dimension_numbers = #tpu.dot_dimension_numbers<[1], [0], [0], [1], [0, 0, 1, 1], [], []>} : vector<96x96xf32>, vector<96x8xf32>, vector<96x8xf32> -> vector<96x8xf32>
      %198 = vector.extract_strided_slice %13 {offsets = [48, 0], sizes = [8, 64], strides = [1, 1]} : vector<64x64xf32> to vector<8x64xf32>
      %cst_86 = arith.constant dense<0.000000e+00> : vector<96x64xf32>
      %199 = tpu.matmul %197, %198, %cst_86 {dimension_numbers = #tpu.dot_dimension_numbers<[1], [0], [0], [1], [0, 0, 1, 1], [], []>} : vector<96x8xf32>, vector<8x64xf32>, vector<96x64xf32> -> vector<96x64xf32>
      %200 = arith.addf %179, %199 : vector<96x64xf32>
      %201 = vector.extract_strided_slice %50 {offsets = [0, 56], sizes = [96, 8], strides = [1, 1]} : vector<96x128xf32> to vector<96x8xf32>
      %202 = vector.extract_strided_slice %52 {offsets = [56, 0], sizes = [8, 96], strides = [1, 1]} : vector<64x96xf32> to vector<8x96xf32>
      %cst_87 = arith.constant dense<0.000000e+00> : vector<96x96xf32>
      %203 = tpu.matmul %201, %202, %cst_87 {dimension_numbers = #tpu.dot_dimension_numbers<[1], [0], [0], [1], [0, 0, 1, 1], [], []>} : vector<96x8xf32>, vector<8x96xf32>, vector<96x96xf32> -> vector<96x96xf32>
      %cst_88 = arith.constant 1.250000e-01 : f32
      %204 = vector.broadcast %cst_88 : f32 to vector<96x96xf32>
      %205 = arith.mulf %203, %204 : vector<96x96xf32>
      %206 = arith.addf %205, %9 : vector<96x96xf32>
      %cst_89 = arith.constant dense<0xFF800000> : vector<96xf32>
      %207 = vector.multi_reduction <maximumf>, %206, %cst_89 [1] : vector<96x96xf32> to vector<96xf32>
      %208 = vector.shape_cast %207 : vector<96xf32> to vector<96x1xf32>
      %209 = vector.broadcast %208 : vector<96x1xf32> to vector<96x96xf32>
      %210 = arith.subf %206, %209 : vector<96x96xf32>
      %211 = math.exp %210 : vector<96x96xf32>
      %cst_90 = arith.constant dense<0.000000e+00> : vector<96xf32>
      %212 = vector.multi_reduction <add>, %211, %cst_90 [1] : vector<96x96xf32> to vector<96xf32>
      %213 = vector.shape_cast %212 : vector<96xf32> to vector<96x1xf32>
      %214 = tpu.reciprocal %213 {approx = true} : vector<96x1xf32> -> vector<96x1xf32>
      %215 = vector.broadcast %214 : vector<96x1xf32> to vector<96x96xf32>
      %216 = arith.mulf %211, %215 : vector<96x96xf32>
      %217 = vector.extract_strided_slice %50 {offsets = [0, 120], sizes = [96, 8], strides = [1, 1]} : vector<96x128xf32> to vector<96x8xf32>
      %cst_91 = arith.constant dense<0.000000e+00> : vector<96x8xf32>
      %218 = tpu.matmul %216, %217, %cst_91 {dimension_numbers = #tpu.dot_dimension_numbers<[1], [0], [0], [1], [0, 0, 1, 1], [], []>} : vector<96x96xf32>, vector<96x8xf32>, vector<96x8xf32> -> vector<96x8xf32>
      %219 = vector.extract_strided_slice %13 {offsets = [56, 0], sizes = [8, 64], strides = [1, 1]} : vector<64x64xf32> to vector<8x64xf32>
      %cst_92 = arith.constant dense<0.000000e+00> : vector<96x64xf32>
      %220 = tpu.matmul %218, %219, %cst_92 {dimension_numbers = #tpu.dot_dimension_numbers<[1], [0], [0], [1], [0, 0, 1, 1], [], []>} : vector<96x8xf32>, vector<8x64xf32>, vector<96x64xf32> -> vector<96x64xf32>
      %221 = arith.addf %200, %220 : vector<96x64xf32>
      %222 = vector.broadcast %14 : vector<1x64xf32> to vector<96x64xf32>
      %223 = arith.addf %221, %222 : vector<96x64xf32>
      %224 = arith.addf %49, %223 : vector<96x64xf32>
      %cst_93 = arith.constant dense<0.000000e+00> : vector<96xf32>
      %225 = vector.multi_reduction <add>, %224, %cst_93 [1] : vector<96x64xf32> to vector<96xf32>
      %226 = vector.shape_cast %225 : vector<96xf32> to vector<96x1xf32>
      %cst_94 = arith.constant 6.400000e+01 : f32
      %227 = vector.broadcast %cst_94 : f32 to vector<96x1xf32>
      %228 = arith.divf %226, %227 : vector<96x1xf32>
      %229 = vector.broadcast %228 : vector<96x1xf32> to vector<96x64xf32>
      %230 = arith.subf %224, %229 : vector<96x64xf32>
      %231 = arith.mulf %230, %230 : vector<96x64xf32>
      %cst_95 = arith.constant dense<0.000000e+00> : vector<96xf32>
      %232 = vector.multi_reduction <add>, %231, %cst_95 [1] : vector<96x64xf32> to vector<96xf32>
      %233 = vector.shape_cast %232 : vector<96xf32> to vector<96x1xf32>
      %cst_96 = arith.constant 6.400000e+01 : f32
      %234 = vector.broadcast %cst_96 : f32 to vector<96x1xf32>
      %235 = arith.divf %233, %234 : vector<96x1xf32>
      %236 = vector.broadcast %228 : vector<96x1xf32> to vector<96x64xf32>
      %237 = arith.subf %224, %236 : vector<96x64xf32>
      %cst_97 = arith.constant 9.99999996E-13 : f32
      %238 = vector.broadcast %cst_97 : f32 to vector<96x1xf32>
      %239 = arith.addf %235, %238 : vector<96x1xf32>
      %240 = math.rsqrt %239 : vector<96x1xf32>
      %241 = vector.broadcast %240 : vector<96x1xf32> to vector<96x64xf32>
      %242 = arith.mulf %237, %241 : vector<96x64xf32>
      %243 = vector.broadcast %15 : vector<1x64xf32> to vector<96x64xf32>
      %244 = arith.mulf %242, %243 : vector<96x64xf32>
      %245 = vector.broadcast %16 : vector<1x64xf32> to vector<96x64xf32>
      %246 = arith.addf %244, %245 : vector<96x64xf32>
      %247 = vector.extract_strided_slice %246 {offsets = [0, 0], sizes = [8, 64], strides = [1, 1]} : vector<96x64xf32> to vector<8x64xf32>
      %248 = vector.extract_strided_slice %246 {offsets = [8, 0], sizes = [8, 64], strides = [1, 1]} : vector<96x64xf32> to vector<8x64xf32>
      %249 = vector.extract_strided_slice %246 {offsets = [16, 0], sizes = [8, 64], strides = [1, 1]} : vector<96x64xf32> to vector<8x64xf32>
      %250 = vector.extract_strided_slice %246 {offsets = [24, 0], sizes = [8, 64], strides = [1, 1]} : vector<96x64xf32> to vector<8x64xf32>
      %251 = vector.extract_strided_slice %246 {offsets = [32, 0], sizes = [8, 64], strides = [1, 1]} : vector<96x64xf32> to vector<8x64xf32>
      %252 = vector.extract_strided_slice %246 {offsets = [40, 0], sizes = [8, 64], strides = [1, 1]} : vector<96x64xf32> to vector<8x64xf32>
      %253 = vector.extract_strided_slice %246 {offsets = [48, 0], sizes = [8, 64], strides = [1, 1]} : vector<96x64xf32> to vector<8x64xf32>
      %254 = vector.extract_strided_slice %246 {offsets = [56, 0], sizes = [8, 64], strides = [1, 1]} : vector<96x64xf32> to vector<8x64xf32>
      %255 = vector.extract_strided_slice %246 {offsets = [64, 0], sizes = [8, 64], strides = [1, 1]} : vector<96x64xf32> to vector<8x64xf32>
      %256 = vector.extract_strided_slice %246 {offsets = [72, 0], sizes = [8, 64], strides = [1, 1]} : vector<96x64xf32> to vector<8x64xf32>
      %257 = vector.extract_strided_slice %246 {offsets = [80, 0], sizes = [8, 64], strides = [1, 1]} : vector<96x64xf32> to vector<8x64xf32>
      %258 = vector.extract_strided_slice %246 {offsets = [88, 0], sizes = [8, 64], strides = [1, 1]} : vector<96x64xf32> to vector<8x64xf32>
      %259 = tpu.concatenate %247, %248, %249, %250, %251, %252, %253, %254, %255, %256, %257, %258 in 1 : vector<8x64xf32>, vector<8x64xf32>, vector<8x64xf32>, vector<8x64xf32>, vector<8x64xf32>, vector<8x64xf32>, vector<8x64xf32>, vector<8x64xf32>, vector<8x64xf32>, vector<8x64xf32>, vector<8x64xf32>, vector<8x64xf32> -> vector<8x768xf32>
      %c8_i32 = arith.constant 8 : i32
      %260 = arith.muli %arg19, %c8_i32 : i32
      %261 = tpu.assume_multiple %260, 8 : i32
      %262 = arith.index_cast %261 : i32 to index
      %c0_98 = arith.constant 0 : index
      %263 = vector.load %arg18[%262, %c0_98] : memref<16x768xf32, #tpu.memory_space<vmem>>, vector<8x768xf32>
      tpu.vector_store %arg18[%262, %c0_98], %259 {strides = array<i32>} : memref<16x768xf32, #tpu.memory_space<vmem>>, vector<8x768xf32>,
    }
    %c2_i32_15 = arith.constant 2 : i32
    %c0_16 = arith.constant 0 : index
    %c0_17 = arith.constant 0 : index
    %18 = vector.load %arg18[%c0_16, %c0_17] : memref<16x768xf32, #tpu.memory_space<vmem>>, vector<16x768xf32>
    %19 = arith.truncf %18 : vector<16x768xf32> to vector<16x768xbf16>
    %c0_18 = arith.constant 0 : index
    %c0_19 = arith.constant 0 : index
    %20 = vector.load %arg9[%c0_18, %c0_19] : memref<768x1536xbf16, #tpu.memory_space<vmem>>, vector<768x1536xbf16>
    %cst_20 = arith.constant dense<0.000000e+00> : vector<16x1536xf32>
    %21 = tpu.matmul %19, %20, %cst_20 {dimension_numbers = #tpu.dot_dimension_numbers<[1], [0], [0], [1], [0, 0, 1, 1], [], []>} : vector<16x768xbf16>, vector<768x1536xbf16>, vector<16x1536xf32> -> vector<16x1536xf32>
    %c0_21 = arith.constant 0 : index
    %c0_22 = arith.constant 0 : index
    %22 = vector.load %arg10[%c0_21, %c0_22] : memref<1x1536xf32, #tpu.memory_space<vmem>>, vector<1x1536xf32>
    %23 = vector.broadcast %22 : vector<1x1536xf32> to vector<16x1536xf32>
    %24 = arith.addf %21, %23 : vector<16x1536xf32>
    %25 = arith.truncf %24 : vector<16x1536xf32> to vector<16x1536xbf16>
    %c0_23 = arith.constant 0 : index
    %c0_24 = arith.constant 0 : index
    %26 = vector.load %arg11[%c0_23, %c0_24] : memref<1536x384xbf16, #tpu.memory_space<vmem>>, vector<1536x384xbf16>
    %cst_25 = arith.constant dense<0.000000e+00> : vector<16x384xf32>
    %27 = tpu.matmul %25, %26, %cst_25 {dimension_numbers = #tpu.dot_dimension_numbers<[1], [0], [0], [1], [0, 0, 1, 1], [], []>} : vector<16x1536xbf16>, vector<1536x384xbf16>, vector<16x384xf32> -> vector<16x384xf32>
    %c0_26 = arith.constant 0 : index
    %c0_27 = arith.constant 0 : index
    %28 = vector.load %arg12[%c0_26, %c0_27] : memref<1x384xf32, #tpu.memory_space<vmem>>, vector<1x384xf32>
    %29 = vector.broadcast %28 : vector<1x384xf32> to vector<16x384xf32>
    %30 = arith.addf %27, %29 : vector<16x384xf32>
    %31 = arith.truncf %30 : vector<16x384xf32> to vector<16x384xbf16>
    %c0_28 = arith.constant 0 : index
    %c0_29 = arith.constant 0 : index
    %32 = vector.load %arg13[%c0_28, %c0_29] : memref<384x64xbf16, #tpu.memory_space<vmem>>, vector<384x64xbf16>
    %cst_30 = arith.constant dense<0.000000e+00> : vector<16x64xf32>
    %33 = tpu.matmul %31, %32, %cst_30 {dimension_numbers = #tpu.dot_dimension_numbers<[1], [0], [0], [1], [0, 0, 1, 1], [], []>} : vector<16x384xbf16>, vector<384x64xbf16>, vector<16x64xf32> -> vector<16x64xf32>
    %c0_31 = arith.constant 0 : index
    %c0_32 = arith.constant 0 : index
    %34 = vector.load %arg14[%c0_31, %c0_32] : memref<1x64xf32, #tpu.memory_space<vmem>>, vector<1x64xf32>
    %35 = vector.broadcast %34 : vector<1x64xf32> to vector<16x64xf32>
    %36 = arith.addf %33, %35 : vector<16x64xf32>
    %c0_33 = arith.constant 0 : index
    %c0_34 = arith.constant 0 : index
    %37 = vector.load %arg15[%c0_33, %c0_34] : memref<1x64xf32, #tpu.memory_space<vmem>>, vector<1x64xf32>
    "tpu.trace_start"() <{level = 10 : i32, message = "no,bo->nb"}> : () -> ()
    %cst_35 = arith.constant dense<0.000000e+00> : vector<1x16xf32>
    %38 = tpu.matmul %37, %36, %cst_35 {dimension_numbers = #tpu.dot_dimension_numbers<[1], [1], [0], [0], [0, 0, 1, 0], [], []>} : vector<1x64xf32>, vector<16x64xf32>, vector<1x16xf32> -> vector<1x16xf32>
    "tpu.trace_stop"() : () -> ()
    %c0_36 = arith.constant 0 : index
    %c0_37 = arith.constant 0 : index
    %39 = vector.load %arg16[%c0_36, %c0_37] : memref<1x1xf32, #tpu.memory_space<vmem>>, vector<1x1xf32>
    %40 = vector.broadcast %39 : vector<1x1xf32> to vector<1x16xf32>
    %41 = arith.addf %38, %40 : vector<1x16xf32>
    %c0_38 = arith.constant 0 : index
    %c0_39 = arith.constant 0 : index
    %c0_40 = arith.constant 0 : index
    %42 = vector.load %arg17[%c0_38, %c0_39, %c0_40] : memref<1x1x16xf32, #tpu.memory_space<vmem>>, vector<1x1x16xf32>
    %43 = vector.shape_cast %42 : vector<1x1x16xf32> to vector<1x16xf32>
    %44 = vector.shape_cast %41 : vector<1x16xf32> to vector<1x1x16xf32>
    tpu.vector_store %arg17[%c0_38, %c0_39, %c0_40], %44 {strides = array<i32>} : memref<1x1x16xf32, #tpu.memory_space<vmem>>, vector<1x1x16xf32>,
    return
  }
  func.func @transform_0(%arg0: i32) -> (i32, i32) {
    %c0_i32 = arith.constant 0 : i32
    %c0_i32_0 = arith.constant 0 : i32
    return %arg0, %c0_i32 : i32, i32
  }
  func.func @transform_1(%arg0: i32) -> (i32, i32) {
    %c0_i32 = arith.constant 0 : i32
    %c0_i32_0 = arith.constant 0 : i32
    %c0_i32_1 = arith.constant 0 : i32
    return %c0_i32, %c0_i32_0 : i32, i32
  }
  func.func @transform_2(%arg0: i32) -> (i32, i32) {
    %c0_i32 = arith.constant 0 : i32
    %c0_i32_0 = arith.constant 0 : i32
    %c0_i32_1 = arith.constant 0 : i32
    return %c0_i32, %c0_i32_0 : i32, i32
  }
  func.func @transform_3(%arg0: i32) -> (i32, i32) {
    %c0_i32 = arith.constant 0 : i32
    %c0_i32_0 = arith.constant 0 : i32
    %c0_i32_1 = arith.constant 0 : i32
    return %c0_i32, %c0_i32_0 : i32, i32
  }
  func.func @transform_4(%arg0: i32) -> (i32, i32) {
    %c0_i32 = arith.constant 0 : i32
    %c0_i32_0 = arith.constant 0 : i32
    %c0_i32_1 = arith.constant 0 : i32
    return %c0_i32, %c0_i32_0 : i32, i32
  }
  func.func @transform_5(%arg0: i32) -> (i32, i32) {
    %c0_i32 = arith.constant 0 : i32
    %c0_i32_0 = arith.constant 0 : i32
    %c0_i32_1 = arith.constant 0 : i32
    return %c0_i32, %c0_i32_0 : i32, i32
  }
  func.func @transform_6(%arg0: i32) -> (i32, i32) {
    %c0_i32 = arith.constant 0 : i32
    %c0_i32_0 = arith.constant 0 : i32
    %c0_i32_1 = arith.constant 0 : i32
    return %c0_i32, %c0_i32_0 : i32, i32
  }
  func.func @transform_7(%arg0: i32) -> (i32, i32) {
    %c0_i32 = arith.constant 0 : i32
    %c0_i32_0 = arith.constant 0 : i32
    %c0_i32_1 = arith.constant 0 : i32
    return %c0_i32, %c0_i32_0 : i32, i32
  }
  func.func @transform_8(%arg0: i32) -> (i32, i32) {
    %c0_i32 = arith.constant 0 : i32
    %c0_i32_0 = arith.constant 0 : i32
    %c0_i32_1 = arith.constant 0 : i32
    return %c0_i32, %c0_i32_0 : i32, i32
  }
  func.func @transform_9(%arg0: i32) -> (i32, i32) {
    %c0_i32 = arith.constant 0 : i32
    %c0_i32_0 = arith.constant 0 : i32
    %c0_i32_1 = arith.constant 0 : i32
    return %c0_i32, %c0_i32_0 : i32, i32
  }
  func.func @transform_10(%arg0: i32) -> (i32, i32) {
    %c0_i32 = arith.constant 0 : i32
    %c0_i32_0 = arith.constant 0 : i32
    %c0_i32_1 = arith.constant 0 : i32
    return %c0_i32, %c0_i32_0 : i32, i32
  }
  func.func @transform_11(%arg0: i32) -> (i32, i32) {
    %c0_i32 = arith.constant 0 : i32
    %c0_i32_0 = arith.constant 0 : i32
    %c0_i32_1 = arith.constant 0 : i32
    return %c0_i32, %c0_i32_0 : i32, i32
  }
  func.func @transform_12(%arg0: i32) -> (i32, i32) {
    %c0_i32 = arith.constant 0 : i32
    %c0_i32_0 = arith.constant 0 : i32
    %c0_i32_1 = arith.constant 0 : i32
    return %c0_i32, %c0_i32_0 : i32, i32
  }
  func.func @transform_13(%arg0: i32) -> (i32, i32) {
    %c0_i32 = arith.constant 0 : i32
    %c0_i32_0 = arith.constant 0 : i32
    %c0_i32_1 = arith.constant 0 : i32
    return %c0_i32, %c0_i32_0 : i32, i32
  }
  func.func @transform_14(%arg0: i32) -> (i32, i32) {
    %c0_i32 = arith.constant 0 : i32
    %c0_i32_0 = arith.constant 0 : i32
    %c0_i32_1 = arith.constant 0 : i32
    return %c0_i32, %c0_i32_0 : i32, i32
  }
  func.func @transform_15(%arg0: i32) -> (i32, i32) {
    %c0_i32 = arith.constant 0 : i32
    %c0_i32_0 = arith.constant 0 : i32
    %c0_i32_1 = arith.constant 0 : i32
    return %c0_i32, %c0_i32_0 : i32, i32
  }
  func.func @transform_16(%arg0: i32) -> (i32, i32, i32) {
    %c0_i32 = arith.constant 0 : i32
    %c0_i32_0 = arith.constant 0 : i32
    %c0_i32_1 = arith.constant 0 : i32
    return %arg0, %c0_i32, %c0_i32_0 : i32, i32, i32
  }
}

</mosaic_0001>

<bundles_post_ra>
// kernel: scorer_forward.1
= control target key start
LH: loop header
LB: loop body
LE: loop exit
PB: predicated region body
PF: predicated region fallthrough
CT: control target
= control target key end

     0   :  { %s22933_s0 = inlined_call_operand.vmem [shape: f32[384,64], index: 0, kind: input, shape index: {}]   ;;  %s22934_s1 = inlined_call_operand.vmem [shape: f32[96,64], index: 1, kind: input, shape index: {}]   ;;  %s22935_s2 = inlined_call_operand.hbm [shape: f32[64,128], index: 2, kind: input, shape index: {}]   ;;  %s22936_s3 = inlined_call_operand.hbm [shape: f32[64,64], index: 3, kind: input, shape index: {}]   ;;  %s22937_s4 = inlined_call_operand.hbm [shape: f32[64,64], index: 4, kind: input, shape index: {}]   ;;  %s22938_s5 = inlined_call_operand.hbm [shape: f32[1,64], index: 5, kind: input, shape index: {}]   ;;  %s22939_s6 = inlined_call_operand.hbm [shape: f32[1,64], index: 6, kind: input, shape index: {}]   ;;  %s22940_s7 = inlined_call_operand.hbm [shape: f32[1,64], index: 7, kind: input, shape index: {}]   ;;  %s22941_s8 = inlined_call_operand.hbm [shape: bf16[768,1536], index: 8, kind: input, shape index: {}]   ;;  %s22942_s9 = inlined_call_operand.hbm [shape: f32[1,1536], index: 9, kind: input, shape index: {}]   ;;  %s22943_s10 = inlined_call_operand.hbm [shape: bf16[1536,384], index: 10, kind: input, shape index: {}]   ;;  %s22944_s11 = inlined_call_operand.hbm [shape: f32[1,384], index: 11, kind: input, shape index: {}]   ;;  %s22945_s12 = inlined_call_operand.vmem [shape: bf16[384,64], index: 12, kind: input, shape index: {}]   ;;  %s22946_s13 = inlined_call_operand.hbm [shape: f32[1,64], index: 13, kind: input, shape index: {}]   ;;  %s22947_s14 = inlined_call_operand.hbm [shape: f32[1,64], index: 14, kind: input, shape index: {}]   ;;  %s22948_s15 = inlined_call_operand.<no memory space> [shape: f32[1,1], index: 15, kind: input, shape index: {}]   ;;  %s22949_s16 = inlined_call_operand.vmem [shape: f32[2,1,16], index: 16, kind: output, shape index: {}]  }
   0x1   :  { %23021 = sst [smem:[#allocation121_spill]] %s22933_s0  ;;  %v21_v0 = vstv %s22948_s15 }
   0x2   :  { %23022 = sst [smem:[#allocation122_spill]] %s22934_s1  ;;  %22 = vst [vmem:[#allocation3] sm:$0x1] %v21_v0 }
   0x3   :  { %23023 = sst [smem:[#allocation123_spill]] %s22935_s2 }
   0x4   :  { %23024 = sst [smem:[#allocation124_spill]] %s22945_s12 }
   0x5   :  { %23025 = sst [smem:[#allocation125_spill]] %s22949_s16 }
   0x6   :  { %23 = vsyncpa [#allocation5], 0 }
   0x7   :  { %24 = vsyncpa [#allocation7], 0 }
   0x8   :  { %25 = vsyncpa [#allocation10], 0 }
   0x9   :  { %26 = vsyncpa [#allocation13], 0 }
   0xa   :  { %27 = vsyncpa [#allocation16], 0 }
   0xb   :  { %28 = vsyncpa [#allocation19], 0 }
   0xc   :  { %29 = vsyncpa [#allocation22], 0  ;;  %s19867_s23 = smov 0  }
   0xd LB: > { %23026 = sst [smem:[#allocation30_spill]] %s19735_s23  ;;  %s19873_s24 = sadd.s32 4294967295, %s19735_s23   ;;  %s19735_s23 = sphi %s19867_s23, %s35_s23  }
   0xe   : > { %p14238_p0 = scmp.ge.s32.totalorder %s19735_s23, 1  ;;  %p407_p1 = scmp.lt.s32.totalorder %s19735_s23, 3 }
   0xf   : > { %p22953_p2 = scmp.eq.s32.totalorder %s19873_s24, 0  ;;  %s19741_s25 = smov [#allocation6]  }
  0x10   : > { %p19878_p3 = pnand %p14238_p0, %p407_p1  ;;  %s435_s26 = sshll.u32 %s19741_s25, 4  ;;  %s19882_s26 = int_to_ptr.vmem [resolvable:$true] %s435_s26 }
  0x11   : > { %s19742_s27 = smov [#allocation9]   ;;  %s19743_s30 = smov [#allocation12]  }
  0x12   : > { %s23027_s15 = scalar_select %p19878_p3, 1, 0 }
  0x13   : > { %p17323_p4 = pneg %p19878_p3  ;;  %s462_s28 = sshll.u32 %s19742_s27, 4  ;;  %s19886_s28 = int_to_ptr.vmem [resolvable:$true] %s462_s28 }
  0x14   : > { %s484_s0 = sshll.u32 %s19743_s30, 4  ;;  %s19744_s17 = smov [#allocation15]   ;;  %s19894_s0 = int_to_ptr.vmem [resolvable:$true] %s484_s0 }
  0x15   : > { %p19890_p5 = pnand %p22953_p2, %p17323_p4  ;;  %s19896_s18 = sshll.u32 %s19744_s17, 4  ;;  %s509_s18 = int_to_ptr.vmem [resolvable:$true] %s19896_s18 }
  0x16   : > { %s19361_s21 = scalar_lea.hbm %s22936_s3, 1024 }
  0x17   : > { %p19362_p6 = scmp.ne.s32.totalorder %s22936_s3, %s19361_s21  ;;  %p19906_p7 = pneg %p19890_p5 }
  0x18   : > { %p19368_p10 = scmp.lt.u32.totalorder %s19361_s21, %s22936_s3 }
  0x19   : > { %p19364_p8 = pnand %p19906_p7, %p19362_p6 }
  0x1b   : > { %p19365_p9 = pneg %p19364_p8 }
  0x1d   : > { %p19370_p11 = pnand %p19368_p10, %p19365_p9 }
  0x1f   : > { %19373 = shalt.err (!%p19370_p11)
}
  0x20   : > { %s19374_s19 = scalar_lea.vmem %s19882_s26, 1024  ;;  %p19382_p1 = scmp.lt.s32.totalorder %s19882_s26, %s19882_s26 }
  0x21   : > { %p19375_p12 = scmp.ne.s32.totalorder %s19882_s26, %s19374_s19  ;;  %p19383_p4 = scmp.lt.s32.totalorder %s19374_s19, %s19374_s19 }
  0x23   : > { %p19377_p13 = pnand %p19375_p12, %p19906_p7  ;;  %p19384_p6 = por %p19383_p4, %p19382_p1 }
  0x25   : > { %p19378_p0 = pneg %p19377_p13 }
  0x27   : > { %p19385_p8 = pnand %p19384_p6, %p19378_p0 }
  0x29   : > { %19388 = shalt.err (!%p19385_p8)
}
  0x2a   : > { %s19745_s20 = smov 128   ;;  %s19746_s21 = smov 8  }
  0x2b   : > { %17329 = dma.hbm_to_vmem [thread:$0]  (!%p19890_p5), %s22936_s3, 1024, %s19882_s26, [#allocation7], %s19745_s20, %s19745_s20, %s19746_s21  }
  0x2c   : > { %s19389_s19 = scalar_lea.hbm %s22938_s5, 16 }
  0x2d   : > { %p19390_p9 = scmp.ne.s32.totalorder %s22938_s5, %s19389_s19  ;;  %p19396_p12 = scmp.lt.u32.totalorder %s19389_s19, %s22938_s5 }
  0x2f   : > { %p19392_p10 = pnand %p19390_p9, %p19906_p7 }
  0x31   : > { %p19393_p11 = pneg %p19392_p10 }
  0x33   : > { %p19398_p13 = pnand %p19396_p12, %p19393_p11 }
  0x35   : > { %19401 = shalt.err (!%p19398_p13)
}
  0x36   : > { %s19402_s26 = scalar_lea.vmem %s19886_s28, 16  ;;  %s19409_s12 = scalar_lea.vmem %s19886_s28, 32 }
  0x37   : > { %p19403_p0 = scmp.ne.s32.totalorder %s19886_s28, %s19402_s26  ;;  %p19410_p6 = scmp.lt.s32.totalorder %s19886_s28, %s19886_s28 }
  0x38   : > { %p19411_p8 = scmp.lt.s32.totalorder %s19409_s12, %s19402_s26 }
  0x39   : > { %p19405_p1 = pnand %p19403_p0, %p19906_p7 }
  0x3a   : > { %p19412_p9 = por %p19411_p8, %p19410_p6 }
  0x3b   : > { %p19406_p4 = pneg %p19405_p1 }
  0x3d   : > { %p19413_p10 = pnand %p19412_p9, %p19406_p4 }
  0x3f   : > { %19416 = shalt.err (!%p19413_p10)
}
  0x40   : > { %17335 = dma.hbm_to_vmem [thread:$0]  (!%p19890_p5), %s22938_s5, 16, %s19886_s28, [#allocation10]  }
  0x41   : > { %s19417_s25 = scalar_lea.hbm %s22940_s7, 16 }
  0x42   : > { %p19418_p11 = scmp.ne.s32.totalorder %s22940_s7, %s19417_s25  ;;  %p19424_p0 = scmp.lt.u32.totalorder %s19417_s25, %s22940_s7 }
  0x44   : > { %p19420_p12 = pnand %p19418_p11, %p19906_p7 }
  0x46   : > { %p19421_p13 = pneg %p19420_p12 }
  0x48   : > { %p19426_p1 = pnand %p19424_p0, %p19421_p13 }
  0x4a   : > { %19429 = shalt.err (!%p19426_p1)
}
  0x4b   : > { %s19430_s28 = scalar_lea.vmem %s19894_s0, 16  ;;  %s19437_s12 = scalar_lea.vmem %s19894_s0, 32 }
  0x4c   : > { %p19431_p4 = scmp.ne.s32.totalorder %s19894_s0, %s19430_s28  ;;  %p19438_p9 = scmp.lt.s32.totalorder %s19894_s0, %s19894_s0 }
  0x4d   : > { %p19439_p10 = scmp.lt.s32.totalorder %s19437_s12, %s19430_s28 }
  0x4e   : > { %p19433_p6 = pnand %p19431_p4, %p19906_p7 }
  0x4f   : > { %p19440_p11 = por %p19439_p10, %p19438_p9 }
  0x50   : > { %p19434_p8 = pneg %p19433_p6 }
  0x52   : > { %p19441_p12 = pnand %p19440_p11, %p19434_p8 }
  0x54   : > { %19444 = shalt.err (!%p19441_p12)
}
  0x55   : > { %17341 = dma.hbm_to_vmem [thread:$0]  (!%p19890_p5), %s22940_s7, 16, %s19894_s0, [#allocation13]  }
  0x56   : > { %s19445_s25 = scalar_lea.hbm %s22942_s9, 192 }
  0x57   : > { %p19446_p13 = scmp.ne.s32.totalorder %s22942_s9, %s19445_s25  ;;  %p19452_p4 = scmp.lt.u32.totalorder %s19445_s25, %s22942_s9 }
  0x59   : > { %p19448_p0 = pnand %p19446_p13, %p19906_p7 }
  0x5b   : > { %p19449_p1 = pneg %p19448_p0 }
  0x5d   : > { %p19454_p6 = pnand %p19452_p4, %p19449_p1 }
  0x5f   : > { %19457 = shalt.err (!%p19454_p6)
}
  0x60   : > { %s19458_s28 = scalar_lea.vmem %s509_s18, 192  ;;  %p19466_p11 = scmp.lt.s32.totalorder %s509_s18, %s509_s18 }
  0x61   : > { %p19459_p8 = scmp.ne.s32.totalorder %s509_s18, %s19458_s28  ;;  %p19467_p12 = scmp.lt.s32.totalorder %s19458_s28, %s19458_s28 }
  0x63   : > { %p19461_p9 = pnand %p19459_p8, %p19906_p7  ;;  %p19468_p2 = por %p19467_p12, %p19466_p11 }
  0x65   : > { %p19462_p10 = pneg %p19461_p9 }
  0x67   : > { %p19469_p3 = pnand %p19468_p2, %p19462_p10 }
  0x69   : > { %19472 = shalt.err (!%p19469_p3)
}
  0x6a   : > { %17347 = dma.hbm_to_vmem [thread:$0]  (!%p19890_p5), %s22942_s9, 192, %s509_s18, [#allocation16]  }
  0x6b   : > { %s19747_s1 = smov [#allocation18]   ;;  %s19748_s23 = smov [#allocation4]  }
  0x6c   : > { %s532_s16 = sshll.u32 %s19747_s1, 4  ;;  %s422_s22 = sshll.u32 %s19748_s23, 4  ;;  %s533_s16 = int_to_ptr.vmem [resolvable:$true] %s532_s16  ;;  %s423_s22 = int_to_ptr.vmem [resolvable:$true] %s422_s22 }
  0x6d   : > { %s19473_s17 = scalar_lea.hbm %s22944_s11, 48 }
  0x6e   : > { %p19474_p2 = scmp.ne.s32.totalorder %s22944_s11, %s19473_s17  ;;  %p19480_p0 = scmp.lt.u32.totalorder %s19473_s17, %s22944_s11 }
  0x70   : > { %p19476_p3 = pnand %p19474_p2, %p19906_p7 }
  0x72   : > { %p19477_p13 = pneg %p19476_p3 }
  0x74   : > { %p19482_p1 = pnand %p19480_p0, %p19477_p13 }
  0x76   : > { %19485 = shalt.err (!%p19482_p1)
}
  0x77   : > { %s19486_s18 = scalar_lea.vmem %s533_s16, 48  ;;  %s19493_s12 = scalar_lea.vmem %s533_s16, 64 }
  0x78   : > { %p19487_p4 = scmp.ne.s32.totalorder %s533_s16, %s19486_s18  ;;  %p19494_p9 = scmp.lt.s32.totalorder %s533_s16, %s533_s16 }
  0x79   : > { %p19495_p10 = scmp.lt.s32.totalorder %s19493_s12, %s19486_s18 }
  0x7a   : > { %p19489_p6 = pnand %p19487_p4, %p19906_p7 }
  0x7b   : > { %p19496_p11 = por %p19495_p10, %p19494_p9 }
  0x7c   : > { %p19490_p8 = pneg %p19489_p6 }
  0x7e   : > { %p19497_p12 = pnand %p19496_p11, %p19490_p8 }
  0x80   : > { %19500 = shalt.err (!%p19497_p12)
}
  0x81   : > { %17353 = dma.hbm_to_vmem [thread:$0]  (!%p19890_p5), %s22944_s11, 48, %s533_s16, [#allocation19]  }
  0x82   : > { %s23030_s2 = sld [smem:[#allocation123_spill]] }
  0x88   : > { %s19501_s17 = scalar_lea.hbm %s23030_s2, 1024 }
  0x89   : > { %p19502_p2 = scmp.ne.s32.totalorder %s23030_s2, %s19501_s17  ;;  %p19508_p0 = scmp.lt.u32.totalorder %s19501_s17, %s23030_s2 }
  0x8b   : > { %p19504_p3 = pnand %p19502_p2, %p19906_p7 }
  0x8d   : > { %p19505_p13 = pneg %p19504_p3 }
  0x8f   : > { %p19510_p1 = pnand %p19508_p0, %p19505_p13 }
  0x91   : > { %19513 = shalt.err (!%p19510_p1)
}
  0x92   : > { %s19514_s18 = scalar_lea.vmem %s423_s22, 1024  ;;  %p19522_p9 = scmp.lt.s32.totalorder %s423_s22, %s423_s22 }
  0x93   : > { %p19515_p4 = scmp.ne.s32.totalorder %s423_s22, %s19514_s18  ;;  %p19523_p10 = scmp.lt.s32.totalorder %s19514_s18, %s19514_s18 }
  0x95   : > { %p19517_p6 = pnand %p19515_p4, %p19906_p7  ;;  %p19524_p11 = por %p19523_p10, %p19522_p9 }
  0x97   : > { %p19518_p8 = pneg %p19517_p6 }
  0x99   : > { %p19525_p12 = pnand %p19524_p11, %p19518_p8 }
  0x9b   : > { %19528 = shalt.err (!%p19525_p12)
}
  0x9c   : > { %17326 = dma.hbm_to_vmem [thread:$0]  (!%p19890_p5), %s23030_s2, 1024, %s423_s22, [#allocation5], %s19745_s20, %s19745_s20, %s19746_s21  }
  0x9d   : > { %s19749_s1 = smov [#allocation8]   ;;  %s19750_s25 = smov [#allocation11]  }
  0x9e   : > { %s448_s23 = sshll.u32 %s19749_s1, 4  ;;  %s473_s30 = sshll.u32 %s19750_s25, 4  ;;  %s449_s23 = int_to_ptr.vmem [resolvable:$true] %s448_s23  ;;  %s474_s30 = int_to_ptr.vmem [resolvable:$true] %s473_s30 }
  0x9f   : > { %s19529_s26 = scalar_lea.hbm %s22937_s4, 1024 }
  0xa0   : > { %p19530_p2 = scmp.ne.s32.totalorder %s22937_s4, %s19529_s26  ;;  %p19536_p0 = scmp.lt.u32.totalorder %s19529_s26, %s22937_s4 }
  0xa2   : > { %p19532_p3 = pnand %p19530_p2, %p19906_p7 }
  0xa4   : > { %p19533_p13 = pneg %p19532_p3 }
  0xa6   : > { %p19538_p1 = pnand %p19536_p0, %p19533_p13 }
  0xa8   : > { %19541 = shalt.err (!%p19538_p1)
}
  0xa9   : > { %s19542_s22 = scalar_lea.vmem %s449_s23, 1024  ;;  %p19550_p9 = scmp.lt.s32.totalorder %s449_s23, %s449_s23 }
  0xaa   : > { %p19543_p4 = scmp.ne.s32.totalorder %s449_s23, %s19542_s22  ;;  %p19551_p10 = scmp.lt.s32.totalorder %s19542_s22, %s19542_s22 }
  0xac   : > { %p19545_p6 = pnand %p19543_p4, %p19906_p7  ;;  %p19552_p11 = por %p19551_p10, %p19550_p9 }
  0xae   : > { %p19546_p8 = pneg %p19545_p6 }
  0xb0   : > { %p19553_p12 = pnand %p19552_p11, %p19546_p8 }
  0xb2   : > { %19556 = shalt.err (!%p19553_p12)
}
  0xb3   : > { %17332 = dma.hbm_to_vmem [thread:$0]  (!%p19890_p5), %s22937_s4, 1024, %s449_s23, [#allocation7], %s19745_s20, %s19745_s20, %s19746_s21  }
  0xb4   : > { %s19557_s19 = scalar_lea.hbm %s22939_s6, 16 }
  0xb5   : > { %p19558_p2 = scmp.ne.s32.totalorder %s22939_s6, %s19557_s19  ;;  %p19564_p0 = scmp.lt.u32.totalorder %s19557_s19, %s22939_s6 }
  0xb7   : > { %p19560_p3 = pnand %p19558_p2, %p19906_p7 }
  0xb9   : > { %p19561_p13 = pneg %p19560_p3 }
  0xbb   : > { %p19566_p1 = pnand %p19564_p0, %p19561_p13 }
  0xbd   : > { %19569 = shalt.err (!%p19566_p1)
}
  0xbe   : > { %s19570_s16 = scalar_lea.vmem %s474_s30, 16  ;;  %s19577_s20 = scalar_lea.vmem %s474_s30, 32 }
  0xbf   : > { %p19571_p4 = scmp.ne.s32.totalorder %s474_s30, %s19570_s16  ;;  %p19578_p9 = scmp.lt.s32.totalorder %s474_s30, %s474_s30 }
  0xc0   : > { %p19579_p10 = scmp.lt.s32.totalorder %s19577_s20, %s19570_s16 }
  0xc1   : > { %p19573_p6 = pnand %p19571_p4, %p19906_p7 }
  0xc2   : > { %p19580_p11 = por %p19579_p10, %p19578_p9 }
  0xc3   : > { %p19574_p8 = pneg %p19573_p6 }
  0xc5   : > { %p19581_p12 = pnand %p19580_p11, %p19574_p8 }
  0xc7   : > { %19584 = shalt.err (!%p19581_p12)
}
  0xc8   : > { %17338 = dma.hbm_to_vmem [thread:$0]  (!%p19890_p5), %s22939_s6, 16, %s474_s30, [#allocation10]  }
  0xc9   : > { %s19751_s22 = smov [#allocation14]   ;;  %s19585_s17 = scalar_lea.hbm %s22941_s8, 73728 }
  0xca   : > { %s494_s12 = sshll.u32 %s19751_s22, 4  ;;  %p19586_p2 = scmp.ne.s32.totalorder %s22941_s8, %s19585_s17  ;;  %s495_s12 = int_to_ptr.vmem [resolvable:$true] %s494_s12 }
  0xcb   : > { %p19592_p0 = scmp.lt.u32.totalorder %s19585_s17, %s22941_s8 }
  0xcc   : > { %p19588_p3 = pnand %p19586_p2, %p19906_p7 }
  0xce   : > { %p19589_p13 = pneg %p19588_p3 }
  0xd0   : > { %p19594_p1 = pnand %p19592_p0, %p19589_p13 }
  0xd2   : > { %19597 = shalt.err (!%p19594_p1)
}
  0xd3   : > { %s19598_s30 = scalar_lea.vmem %s495_s12, 73728  ;;  %p19606_p9 = scmp.lt.s32.totalorder %s495_s12, %s495_s12 }
  0xd4   : > { %p19599_p4 = scmp.ne.s32.totalorder %s495_s12, %s19598_s30  ;;  %p19607_p10 = scmp.lt.s32.totalorder %s19598_s30, %s19598_s30 }
  0xd6   : > { %p19601_p6 = pnand %p19599_p4, %p19906_p7  ;;  %p19608_p11 = por %p19607_p10, %p19606_p9 }
  0xd8   : > { %p19602_p8 = pneg %p19601_p6 }
  0xda   : > { %p19609_p12 = pnand %p19608_p11, %p19602_p8 }
  0xdc   : > { %19612 = shalt.err (!%p19609_p12)
}
  0xdd   : > { %s19752_s18 = smov 768   ;;  %s19753_s16 = smov 48  }
  0xde   : > { %17344 = dma.hbm_to_vmem [thread:$0]  (!%p19890_p5), %s22941_s8, 73728, %s495_s12, [#allocation13], %s19752_s18, %s19752_s18, %s19753_s16  }
  0xdf   : > { %s19754_s23 = smov [#allocation17]   ;;  %s19613_s17 = scalar_lea.hbm %s22943_s10, 36864 }
  0xe0   : > { %s518_s22 = sshll.u32 %s19754_s23, 4  ;;  %p19614_p2 = scmp.ne.s32.totalorder %s22943_s10, %s19613_s17  ;;  %s519_s22 = int_to_ptr.vmem [resolvable:$true] %s518_s22 }
  0xe1   : > { %p19620_p0 = scmp.lt.u32.totalorder %s19613_s17, %s22943_s10 }
  0xe2   : > { %p19616_p3 = pnand %p19614_p2, %p19906_p7 }
  0xe4   : > { %p19617_p13 = pneg %p19616_p3 }
  0xe6   : > { %p19622_p1 = pnand %p19620_p0, %p19617_p13 }
  0xe8   : > { %19625 = shalt.err (!%p19622_p1)
}
  0xe9   : > { %s19626_s12 = scalar_lea.vmem %s519_s22, 36864  ;;  %p19634_p9 = scmp.lt.s32.totalorder %s519_s22, %s519_s22 }
  0xea   : > { %p19627_p4 = scmp.ne.s32.totalorder %s519_s22, %s19626_s12  ;;  %p19635_p10 = scmp.lt.s32.totalorder %s19626_s12, %s19626_s12 }
  0xec   : > { %p19629_p6 = pnand %p19627_p4, %p19906_p7  ;;  %p19636_p11 = por %p19635_p10, %p19634_p9 }
  0xee   : > { %p19630_p8 = pneg %p19629_p6 }
  0xf0   : > { %p19637_p12 = pnand %p19636_p11, %p19630_p8 }
  0xf2   : > { %19640 = shalt.err (!%p19637_p12)
}
  0xf3   : > { %s19755_s30 = smov 192   ;;  %s19756_s18 = smov 12  }
  0xf4   : > { %17350 = dma.hbm_to_vmem [thread:$0]  (!%p19890_p5), %s22943_s10, 36864, %s519_s22, [#allocation16], %s19755_s30, %s19755_s30, %s19756_s18  }
  0xf5   : > { %s19757_s21 = smov [#allocation20]   ;;  %s19758_s1 = smov [#allocation21]  }
  0xf6   : > { %s546_s23 = sshll.u32 %s19757_s21, 4  ;;  %s557_s25 = sshll.u32 %s19758_s1, 4  ;;  %s547_s23 = int_to_ptr.vmem [resolvable:$true] %s546_s23  ;;  %s558_s25 = int_to_ptr.vmem [resolvable:$true] %s557_s25 }
  0xf7   : > { %s19641_s26 = scalar_lea.hbm %s22946_s13, 16 }
  0xf8   : > { %p19642_p2 = scmp.ne.s32.totalorder %s22946_s13, %s19641_s26  ;;  %p19648_p0 = scmp.lt.u32.totalorder %s19641_s26, %s22946_s13 }
  0xfa   : > { %p19644_p3 = pnand %p19642_p2, %p19906_p7 }
  0xfc   : > { %p19645_p13 = pneg %p19644_p3 }
  0xfe   : > { %p19650_p1 = pnand %p19648_p0, %p19645_p13 }
 0x100   : > { %19653 = shalt.err (!%p19650_p1)
}
 0x101   : > { %s19654_s22 = scalar_lea.vmem %s547_s23, 16  ;;  %s19661_s30 = scalar_lea.vmem %s547_s23, 32 }
 0x102   : > { %p19655_p4 = scmp.ne.s32.totalorder %s547_s23, %s19654_s22  ;;  %p19662_p9 = scmp.lt.s32.totalorder %s547_s23, %s547_s23 }
 0x103   : > { %p19663_p10 = scmp.lt.s32.totalorder %s19661_s30, %s19654_s22 }
 0x104   : > { %p19657_p6 = pnand %p19655_p4, %p19906_p7 }
 0x105   : > { %p19664_p11 = por %p19663_p10, %p19662_p9 }
 0x106   : > { %p19658_p8 = pneg %p19657_p6 }
 0x108   : > { %p19665_p12 = pnand %p19664_p11, %p19658_p8 }
 0x10a   : > { %19668 = shalt.err (!%p19665_p12)
}
 0x10b   : > { %17356 = dma.hbm_to_vmem [thread:$0]  (!%p19890_p5), %s22946_s13, 16, %s547_s23, [#allocation19]  }
 0x10c   : > { %s19669_s21 = scalar_lea.hbm %s22947_s14, 16 }
 0x10d   : > { %p19670_p2 = scmp.ne.s32.totalorder %s22947_s14, %s19669_s21  ;;  %p19676_p0 = scmp.lt.u32.totalorder %s19669_s21, %s22947_s14 }
 0x10f   : > { %p19672_p3 = pnand %p19670_p2, %p19906_p7 }
 0x111   : > { %p19673_p13 = pneg %p19672_p3 }
 0x113   : > { %p19678_p1 = pnand %p19676_p0, %p19673_p13 }
 0x115   : > { %19681 = shalt.err (!%p19678_p1)
}
 0x116   : > { %s19682_s28 = scalar_lea.vmem %s558_s25, 16  ;;  %s19689_s23 = scalar_lea.vmem %s558_s25, 32 }
 0x117   : > { %p19683_p4 = scmp.ne.s32.totalorder %s558_s25, %s19682_s28  ;;  %p19690_p9 = scmp.lt.s32.totalorder %s558_s25, %s558_s25 }
 0x118   : > { %p19691_p10 = scmp.lt.s32.totalorder %s19689_s23, %s19682_s28 }
 0x119   : > { %p19685_p6 = pnand %p19683_p4, %p19906_p7 }
 0x11a   : > { %p19692_p11 = por %p19691_p10, %p19690_p9 }
 0x11b   : > { %p19686_p8 = pneg %p19685_p6 }
 0x11d   : > { %p19693_p12 = pnand %p19692_p11, %p19686_p8 }
 0x11f   : > { %19696 = shalt.err (!%p19693_p12)
}
 0x120   : > { %17359 = dma.hbm_to_vmem [thread:$0]  (!%p19890_p5), %s22947_s14, 16, %s558_s25, [#allocation22]  }
 0x121   : > { %p23031_p2 = scmp.ne.s32.totalorder %s23027_s15, 0 }
 0x123   : > { %582 = sbr.rel (%p23031_p2) target bundleno = 6386 (0x18f2), region = 84 }
 0x12a   : > { %p23032_p3 = scmp.eq.s32.totalorder %s19873_s24, 0 }
 0x12c   : > { %19706 = dma.done.wait (%p23032_p3), [#allocation5], 1024   ;;  %p23033_p7 = pmov %p23032_p3 }
 0x12d   : > { %p23034_p13 = pmov %p23032_p3 }
 0x12e   : > { %19708 = vsyncadd (%p23033_p7), [#allocation5], 4294966272 }
 0x12f   : > { %19710 = dma.done.wait (%p23034_p13), [#allocation7], 2048   ;;  %p23035_p0 = pmov %p23032_p3 }
 0x131   : > { %19712 = vsyncadd (%p23035_p0), [#allocation7], 4294965248  ;;  %p23036_p1 = pmov %p23035_p0 }
 0x132   : > { %p23037_p5 = pmov %p23035_p0 }
 0x133   : > { %19714 = dma.done.wait (%p23036_p1), [#allocation10], 32  }
 0x134   : > { %19716 = vsyncadd (%p23037_p5), [#allocation10], 4294967264  ;;  %p23038_p4 = pmov %p23035_p0 }
 0x135   : > { %p23039_p6 = pmov %p23035_p0 }
 0x136   : > { %19718 = dma.done.wait (%p23038_p4), [#allocation13], 73744  }
 0x137   : > { %19720 = vsyncadd (%p23039_p6), [#allocation13], 4294893552  ;;  %p23040_p8 = pmov %p23035_p0 }
 0x138   : > { %p23041_p9 = pmov %p23035_p0 }
 0x139   : > { %19722 = dma.done.wait (%p23040_p8), [#allocation16], 37056  }
 0x13a   : > { %19724 = vsyncadd (%p23041_p9), [#allocation16], 4294930240  ;;  %p23042_p10 = pmov %p23035_p0 }
 0x13b   : > { %p23043_p11 = pmov %p23035_p0 }
 0x13c   : > { %19726 = dma.done.wait (%p23042_p10), [#allocation19], 64  }
 0x13d   : > { %19728 = vsyncadd (%p23043_p11), [#allocation19], 4294967232  ;;  %p23044_p12 = pmov %p23035_p0 }
 0x13e   : > { %p23045_p2 = pmov %p23035_p0 }
 0x13f   : > { %19730 = dma.done.wait (%p23044_p12), [#allocation22], 16  }
 0x140   : > { %19732 = vsyncadd (%p23045_p2), [#allocation22], 4294967280  ;;  %s674_s15 = smul.u32 24, %s19873_s24  ;;  %p680_p3 = scmp.lt.s32.totalorder %s19873_s24, 1  ;;  %v684_v1 = vlaneseq  ;;  %v20297_v48 = vld [vmem:[#allocation4] sm:$0xff]  ;;  %v20299_v49 = vld [vmem:[#allocation4 + $0x8] sm:$0xff] }
 0x141   : > { %s23047_s25 = sld [smem:[#allocation125_spill]]  ;;  %s23048_s2 = sld [smem:[#allocation121_spill]]  ;;  %23078 = vst [vmem:[#allocation44_spill] sm:$0xff] %v20297_v48  ;;  %23079 = vst [vmem:[#allocation45_spill] sm:$0xff] %v20299_v49  ;;  %v20301_v50 = vld [vmem:[#allocation4 + $0x10] sm:$0xff]  ;;  %v20319_v55 = vld [vmem:[#allocation4 + $0x18] sm:$0xff] }
 0x142   : > { %p675_p7 = scmp.lt.s32.totalorder %s674_s15, 47  ;;  %v20179_v2 = vshrl.u32 %v684_v1, 7  ;;  %s23293_s24 = smov (!%p680_p3, %s19873_s24), 1  ;;  %v698_v3 = vand.u32 127, %v684_v1  ;;  %23080 = vst [vmem:[#allocation46_spill] sm:$0xff] %v20301_v50  ;;  %23089 = vst [vmem:[#allocation47_spill] sm:$0xff] %v20319_v55 }
 0x143   : > { %s23049_s17 = sld [smem:[#allocation122_spill]]  ;;  %v20321_v56 = vld [vmem:[#allocation4 + $0x20] sm:$0xff]  ;;  %v20323_v57 = vld [vmem:[#allocation4 + $0x28] sm:$0xff]  ;;  %v19759_v58 = vmov -1e+30   ;;  %v20341_v63 = vld [vmem:[#allocation4 + $0x30] sm:$0xff] }
 0x144   : > { %23046 = vst [vmem:[#allocation31_spill] sm:$0xff] %v20179_v2  ;;  %s23295_s15 = smov (!%p675_p7, %s674_s15), 47  ;;  %v686_v4 = vadd.s32 8, %v20179_v2  ;;  %v687_v5 = vadd.s32 16, %v20179_v2  ;;  %v688_v6 = vadd.s32 24, %v20179_v2  ;;  %v689_v7 = vadd.s32 32, %v20179_v2 }
 0x145   : > { %v690_v8 = vadd.s32 40, %v20179_v2  ;;  %v691_v9 = vadd.s32 48, %v20179_v2  ;;  %v692_v10 = vadd.s32 56, %v20179_v2  ;;  %v693_v11 = vadd.s32 64, %v20179_v2  ;;  %s14265_s30 = sshll.u32 %s23295_s15, 3  ;;  %23090 = vst [vmem:[#allocation48_spill] sm:$0xff] %v20321_v56 }
 0x146   : > { %v694_v12 = vadd.s32 72, %v20179_v2  ;;  %v695_v13 = vadd.s32 80, %v20179_v2  ;;  %v696_v14 = vadd.s32 88, %v20179_v2  ;;  %v699_v15 = vand.u32 7, %v20179_v2  ;;  %23091 = vst [vmem:[#allocation49_spill] sm:$0xff] %v20323_v57  ;;  %23096 = vst [vmem:[#allocation54_spill] sm:$0xff] %v20341_v63 }
 0x147   : > { %s682_s22 = scalar_lea.vmem %s23047_s25, %s23293_s24  ;;  %s20203_s20 = scalar_lea.vmem %s23048_s2, %s14265_s30  ;;  %v700_v16 = vand.u32 7, %v686_v4  ;;  %v701_v17 = vand.u32 7, %v687_v5  ;;  %v702_v18 = vand.u32 7, %v688_v6  ;;  %v703_v19 = vand.u32 7, %v689_v7  ;;  %v20343_v0 = vld [vmem:[#allocation4 + $0x38] sm:$0xff]  ;;  %v20361_v6 = vld [vmem:[#allocation6] sm:$0xff] }
 0x148   : > { %v704_v22 = vand.u32 7, %v690_v8  ;;  %v705_v23 = vand.u32 7, %v691_v9  ;;  %v706_v24 = vand.u32 7, %v692_v10  ;;  %v707_v25 = vand.u32 7, %v693_v11  ;;  %23097 = vst [vmem:[#allocation55_spill] sm:$0xff] %v20343_v0  ;;  %23100 = vst [vmem:[#allocation58_spill] sm:$0xff] %v20361_v6 }
 0x149   : > { %v20208_v20 = vld [vmem:[%s23049_s17] sm:$0xff]  ;;  %v20213_v21 = vld [vmem:[%s23049_s17 + $0x8] sm:$0xff]  ;;  %v20218_v26 = vld [vmem:[%s23049_s17 + $0x10] sm:$0xff]  ;;  %v708_v28 = vand.u32 7, %v694_v12  ;;  %v709_v29 = vand.u32 7, %v695_v13  ;;  %v710_v30 = vand.u32 7, %v696_v14 }
 0x14a   : > { %23050 = vst [vmem:[#allocation32_spill] sm:$0xff] %v20208_v20  ;;  %23051 = vst [vmem:[#allocation33_spill] sm:$0xff] %v20213_v21  ;;  %v20223_v27 = vld [vmem:[%s23049_s17 + $0x18] sm:$0xff]  ;;  %v711_v31 = vand.u32 7, %v698_v3  ;;  %v20228_v32 = vld [vmem:[%s23049_s17 + $0x20] sm:$0xff]  ;;  %s20415_s15 = smov 0  }
 0x14b   : > { %23052 = vst [vmem:[#allocation34_spill] sm:$0xff] %v20218_v26  ;;  %23053 = vst [vmem:[#allocation35_spill] sm:$0xff] %v20223_v27  ;;  %v20233_v33 = vld [vmem:[%s23049_s17 + $0x28] sm:$0xff]  ;;  %v20238_v34 = vld [vmem:[%s23049_s17 + $0x30] sm:$0xff] }
 0x14c   : > { %23054 = vst [vmem:[#allocation36_spill] sm:$0xff] %v20228_v32  ;;  %23055 = vst [vmem:[#allocation37_spill] sm:$0xff] %v20233_v33  ;;  %v20243_v35 = vld [vmem:[%s23049_s17 + $0x38] sm:$0xff]  ;;  %v20248_v36 = vld [vmem:[%s23049_s17 + $0x40] sm:$0xff]  ;;  %vm20250_vm0 = vcmp.eq.s32.totalorder %v699_v15, %v711_v31  ;;  %vm20254_vm1 = vcmp.eq.s32.totalorder %v700_v16, %v711_v31  ;;  %vm20258_vm2 = vcmp.eq.s32.totalorder %v701_v17, %v711_v31 }
 0x14d   : > { %23056 = vst [vmem:[#allocation38_spill] sm:$0xff] %v20238_v34  ;;  %23057 = vst [vmem:[#allocation39_spill] sm:$0xff] %v20243_v35  ;;  %vm20262_vm3 = vcmp.eq.s32.totalorder %v702_v18, %v711_v31  ;;  %v20269_v41 = vld [vmem:[%s23049_s17 + $0x48] sm:$0xff]  ;;  %v20274_v42 = vld [vmem:[%s23049_s17 + $0x50] sm:$0xff]  ;;  %vm20281_vm4 = vcmp.eq.s32.totalorder %v703_v19, %v711_v31  ;;  %vm20285_vm5 = vcmp.eq.s32.totalorder %v704_v22, %v711_v31  ;;  %v20327_v59 = vsel %vm20250_vm0, 0.0, %v19759_v58 }
 0x14e   : > { %23058 = vst [vmem:[#allocation40_spill] sm:$0xff] %v20248_v36  ;;  %23067 = vst [vmem:[#allocation41_spill] sm:$0xff] %v20269_v41  ;;  %v20279_v43 = vld [vmem:[%s23049_s17 + $0x58] sm:$0xff]  ;;  %vm20289_vm6 = vcmp.eq.s32.totalorder %v705_v23, %v711_v31  ;;  %vm20293_vm7 = vcmp.eq.s32.totalorder %v706_v24, %v711_v31  ;;  %vm20303_vm8 = vcmp.eq.s32.totalorder %v707_v25, %v711_v31  ;;  %v20331_v60 = vsel %vm20254_vm1, 0.0, %v19759_v58  ;;  %v20363_v7 = vld [vmem:[#allocation6 + $0x8] sm:$0xff] }
 0x14f   : > { %23068 = vst [vmem:[#allocation42_spill] sm:$0xff] %v20274_v42  ;;  %23069 = vst [vmem:[#allocation43_spill] sm:$0xff] %v20279_v43  ;;  %vm20307_vm9 = vcmp.eq.s32.totalorder %v708_v28, %v711_v31  ;;  %vm20311_vm10 = vcmp.eq.s32.totalorder %v709_v29, %v711_v31  ;;  %vm20315_vm11 = vcmp.eq.s32.totalorder %v710_v30, %v711_v31  ;;  %v20335_v61 = vsel %vm20258_vm2, 0.0, %v19759_v58  ;;  %v20381_v12 = vld [vmem:[#allocation6 + $0x10] sm:$0xff]  ;;  %v20383_v13 = vld [vmem:[#allocation6 + $0x18] sm:$0xff] }
 0x150   : > { %23092 = vst [vmem:[#allocation50_spill] sm:$0xff] %v20327_v59  ;;  %23093 = vst [vmem:[#allocation51_spill] sm:$0xff] %v20331_v60  ;;  %v20339_v62 = vsel %vm20262_vm3, 0.0, %v19759_v58  ;;  %v20347_v1 = vsel %vm20281_vm4, 0.0, %v19759_v58  ;;  %v20351_v3 = vsel %vm20285_vm5, 0.0, %v19759_v58  ;;  %v20355_v4 = vsel %vm20289_vm6, 0.0, %v19759_v58 }
 0x151   : > { %23094 = vst [vmem:[#allocation52_spill] sm:$0xff] %v20335_v61  ;;  %23095 = vst [vmem:[#allocation53_spill] sm:$0xff] %v20339_v62  ;;  %v20359_v5 = vsel %vm20293_vm7, 0.0, %v19759_v58  ;;  %v20367_v8 = vsel %vm20303_vm8, 0.0, %v19759_v58  ;;  %v20371_v9 = vsel %vm20307_vm9, 0.0, %v19759_v58  ;;  %v20375_v10 = vsel %vm20311_vm10, 0.0, %v19759_v58 }
 0x152   : > { %23098 = vst [vmem:[#allocation56_spill] sm:$0xff] %v20347_v1  ;;  %23099 = vst [vmem:[#allocation57_spill] sm:$0xff] %v20351_v3  ;;  %v20379_v11 = vsel %vm20315_vm11, 0.0, %v19759_v58  ;;  %v20385_v14 = vld [vmem:[#allocation6 + $0x20] sm:$0xff]  ;;  %v20387_v15 = vld [vmem:[#allocation6 + $0x28] sm:$0xff] }
 0x153   : > { %23101 = vst [vmem:[#allocation59_spill] sm:$0xff] %v20363_v7  ;;  %23102 = vst [vmem:[#allocation60_spill] sm:$0xff] %v20381_v12  ;;  %v20389_v16 = vld [vmem:[#allocation6 + $0x30] sm:$0xff]  ;;  %v20391_v17 = vld [vmem:[#allocation6 + $0x38] sm:$0xff] }
 0x154   : > { %23103 = vst [vmem:[#allocation61_spill] sm:$0xff] %v20383_v13  ;;  %23104 = vst [vmem:[#allocation62_spill] sm:$0xff] %v20385_v14  ;;  %v20393_v18 = vld [vmem:[#allocation8] sm:$0xff]  ;;  %v20395_v19 = vld [vmem:[#allocation8 + $0x8] sm:$0xff] }
 0x155   : > { %23105 = vst [vmem:[#allocation63_spill] sm:$0xff] %v20387_v15  ;;  %23106 = vst [vmem:[#allocation64_spill] sm:$0xff] %v20389_v16  ;;  %v20397_v22 = vld [vmem:[#allocation8 + $0x10] sm:$0xff]  ;;  %v20399_v23 = vld [vmem:[#allocation8 + $0x18] sm:$0xff] }
 0x156   : > { %23107 = vst [vmem:[#allocation65_spill] sm:$0xff] %v20391_v17  ;;  %23108 = vst [vmem:[#allocation66_spill] sm:$0xff] %v20393_v18  ;;  %v20401_v24 = vld [vmem:[#allocation8 + $0x20] sm:$0xff]  ;;  %v20403_v25 = vld [vmem:[#allocation8 + $0x28] sm:$0xff] }
 0x157   : > { %23109 = vst [vmem:[#allocation67_spill] sm:$0xff] %v20395_v19  ;;  %23110 = vst [vmem:[#allocation68_spill] sm:$0xff] %v20397_v22  ;;  %v20405_v28 = vld [vmem:[#allocation8 + $0x30] sm:$0xff]  ;;  %v20407_v29 = vld [vmem:[#allocation8 + $0x38] sm:$0xff] }
 0x158   : > { %23111 = vst [vmem:[#allocation69_spill] sm:$0xff] %v20399_v23  ;;  %23112 = vst [vmem:[#allocation70_spill] sm:$0xff] %v20401_v24  ;;  %v20409_v30 = vld [vmem:[#allocation9] ss:$0 sm:$0xff]  ;;  %v20411_v31 = vld [vmem:[#allocation11] ss:$0 sm:$0xff] }
 0x159   : > { %23113 = vst [vmem:[#allocation71_spill] sm:$0xff] %v20403_v25  ;;  %23114 = vst [vmem:[#allocation72_spill] sm:$0xff] %v20405_v28  ;;  %v20413_v37 = vld [vmem:[#allocation12] ss:$0 sm:$0xff] }
 0x15a   : > { %23115 = vst [vmem:[#allocation73_spill] sm:$0xff] %v20407_v29  ;;  %23116 = vst [vmem:[#allocation74_spill] sm:$0xff] %v20409_v30 }
 0x15b   : > { %23117 = vst [vmem:[#allocation75_spill] sm:$0xff] %v20411_v31  ;;  %23118 = vst [vmem:[#allocation76_spill] sm:$0xff] %v20413_v37 }
 0x15c LB: >> { %v23120_v60 = vld [vmem:[#allocation51_spill] sm:$0xff]  ;;  %v23121_v59 = vld [vmem:[#allocation50_spill] sm:$0xff]  ;;  %v23122_v61 = vld [vmem:[#allocation52_spill] sm:$0xff]  ;;  %vm807_vm12 = vcmask 523264   ;;  %s781_s29 = smul.u32 96, %s19739_s15  ;;  %v23139_v54 = vmov 0  ;;  %s19739_s15 = sphi %s20415_s15, %s780_s15  }
 0x15d   : >> { %v23123_v62 = vld [vmem:[#allocation53_spill] sm:$0xff]  ;;  %v23124_v1 = vld [vmem:[#allocation56_spill] sm:$0xff]  ;;  %v23128_v50 = vld [vmem:[#allocation46_spill] sm:$0xff]  ;;  %vm1098_vm14 = vcmask 64512   ;;  %s19760_s25 = smov 120   ;;  %s19761_s30 = smov 64  }
 0x15e   : >> { %v23119_v19 = vld [vmem:[#allocation67_spill] sm:$0xff]  ;;  %v23125_v3 = vld [vmem:[#allocation57_spill] sm:$0xff]  ;;  %v23126_v48 = vld [vmem:[#allocation44_spill] sm:$0xff]  ;;  %s20430_s27 = scalar_lea.vmem %s20203_s20, %s781_s29  ;;  %vm1284_vm15 = vcmask 785408   ;;  %s19762_s18 = smov 56  }
 0x15f   : >> { %v23127_v49 = vld [vmem:[#allocation45_spill] sm:$0xff]  ;;  %v23129_v55 = vld [vmem:[#allocation47_spill] sm:$0xff]  ;;  %v23130_v6 = vld [vmem:[#allocation58_spill] sm:$0xff]  ;;  %s19763_s16 = smov 112   ;;  %s19764_s2 = smov 48  }
 0x160   : >> { %v16845_v38 = vpack.c.bf16 %v23127_v49, %v23126_v48  ;;  %v16849_v39 = vpack.c.bf16 %v23129_v55, %v23128_v50  ;;  %16150 = vmatprep.mubr.msk.f32.mxu1 %vm807_vm12, %v23130_v6  ;;  %v23131_v56 = vld [vmem:[#allocation48_spill] sm:$0xff]  ;;  %v23132_v57 = vld [vmem:[#allocation49_spill] sm:$0xff]  ;;  %v786_v52 = vld [vmem:[%s20430_s27 + $0x18] sm:$0xff]  ;;  %s19765_s21 = smov 104   ;;  %s19766_s1 = smov 96  }
 0x161   : >> { %v16853_v40 = vpack.c.bf16 %v23132_v57, %v23131_v56  ;;  %v783_v44 = vld [vmem:[%s20430_s27] sm:$0xff]  ;;  %v784_v45 = vld [vmem:[%s20430_s27 + $0x8] sm:$0xff]  ;;  %v785_v46 = vld [vmem:[%s20430_s27 + $0x10] sm:$0xff]  ;;  %s19767_s19 = smov 32   ;;  %s19768_s26 = smov 88  }
 0x162   : >> { %16846 = vmatprep.subr.bf16.mxu0 %v16845_v38  ;;  %v23133_v20 = vld [vmem:[#allocation32_spill] sm:$0xff]  ;;  %v23135_v21 = vld [vmem:[#allocation33_spill] sm:$0xff]  ;;  %v23137_v26 = vld [vmem:[#allocation34_spill] sm:$0xff]  ;;  %s19769_s28 = smov 80   ;;  %s19770_s23 = smov 40  }
 0x163   : >> { %16848 = vmatpush3.bf16.msra.mxu0 %v16845_v38  ;;  %v20436_v47 = vadd.f32 %v783_v44, %v23133_v20  ;;  %v20439_v51 = vadd.f32 %v784_v45, %v23135_v21  ;;  %v20443_v53 = vadd.f32 %v785_v46, %v23137_v26  ;;  %vm20447_vm13 = vmpackc.low %vm807_vm12, %vm807_vm12  ;;  %v23142_v27 = vld [vmem:[#allocation35_spill] sm:$0xff]  ;;  %v23144_v63 = vld [vmem:[#allocation54_spill] sm:$0xff]  ;;  %s19771_s0 = smov 16   ;;  %s19772_s12 = smov 72  }
 0x164   : >> { %16850 = vmatprep.subr.bf16.mxu0 %v16849_v39  ;;  %v23140_v54 = vsel %vm20447_vm13, 4294967295, %v23139_v54  ;;  %v20452_v58 = vadd.f32 %v786_v52, %v23142_v27  ;;  %v23145_v0 = vld [vmem:[#allocation55_spill] sm:$0xff]  ;;  %v788_v46 = vld [vmem:[%s20430_s27 + $0x28] sm:$0xff]  ;;  %v23150_v34 = vld [vmem:[#allocation38_spill] sm:$0xff]  ;;  %s19773_s29 = smov 24  }
 0x165   : >> { %23134 = vst [vmem:[#allocation77_spill] sm:$0xff] %v20436_v47  ;;  %23136 = vst [vmem:[#allocation78_spill] sm:$0xff] %v20439_v51  ;;  %v16861_v38 = vpack.c.bf16 %v20439_v51, %v20436_v47  ;;  %v16857_v44 = vpack.c.bf16 %v23145_v0, %v23144_v63  ;;  %16108 = vmatprep.mubr.msk.f32.mxu0 %vm807_vm12, %v20436_v47  ;;  %v787_v45 = vld [vmem:[%s20430_s27 + $0x20] sm:$0xff]  ;;  %v23148_v33 = vld [vmem:[#allocation37_spill] sm:$0xff] }
 0x166   : >> { %23138 = vst [vmem:[#allocation79_spill] sm:$0xff] %v20443_v53  ;;  %23141 = vst [vmem:[#allocation80_spill] sm:$0xff] %v23140_v54  ;;  %v23146_v32 = vld [vmem:[#allocation36_spill] sm:$0xff]  ;;  %v20474_v0 = vadd.f32 %v788_v46, %v23148_v33  ;;  %v790_v20 = vld [vmem:[%s20430_s27 + $0x38] sm:$0xff] }
 0x167   : >> { %16852 = vmatpush3.bf16.msra.mxu0 %v16849_v39  ;;  %23143 = vst [vmem:[#allocation81_spill] sm:$0xff] %v20452_v58  ;;  %v16867_v39 = vpack.c.bf16 %v20452_v58, %v20443_v53  ;;  %16863 = vmatprep.subr.msk.bf16.mxu1 %vm20447_vm13, %v16861_v38  ;;  %v20471_v52 = vadd.f32 %v787_v45, %v23146_v32  ;;  %v23152_v35 = vld [vmem:[#allocation39_spill] sm:$0xff]  ;;  %v792_v46 = vld [vmem:[%s20430_s27 + $0x48] sm:$0xff]  ;;  %v793_v21 = vld [vmem:[%s20430_s27 + $0x50] sm:$0xff] }
 0x168   : >> { %16854 = vmatprep.subr.bf16.mxu0 %v16853_v40  ;;  %16866 = vmatpush3.bf16.xpose.msk.msra.mxu1 %vm20447_vm13, %v16861_v38  ;;  %23149 = vst [vmem:[#allocation83_spill] sm:$0xff] %v20474_v0  ;;  %v791_v45 = vld [vmem:[%s20430_s27 + $0x40] sm:$0xff]  ;;  %v23156_v41 = vld [vmem:[#allocation41_spill] sm:$0xff]  ;;  %v794_v26 = vld [vmem:[%s20430_s27 + $0x58] sm:$0xff] }
 0x169   : >> { %16869 = vmatprep.subr.msk.bf16.mxu1 %vm20447_vm13, %v16867_v39  ;;  %23147 = vst [vmem:[#allocation82_spill] sm:$0xff] %v20471_v52  ;;  %v16873_v6 = vpack.c.bf16 %v20474_v0, %v20471_v52  ;;  %v23154_v36 = vld [vmem:[#allocation40_spill] sm:$0xff]  ;;  %v23158_v42 = vld [vmem:[#allocation42_spill] sm:$0xff]  ;;  %v23160_v43 = vld [vmem:[#allocation43_spill] sm:$0xff] }
 0x16a   : >> { %v20525_v27 = vadd.f32 %v793_v21, %v23158_v42  ;;  %v23162_v7 = vld [vmem:[#allocation59_spill] sm:$0xff]  ;;  %v23163_v12 = vld [vmem:[#allocation60_spill] sm:$0xff]  ;;  %v23164_v13 = vld [vmem:[#allocation61_spill] sm:$0xff] }
 0x16b   : >> { %16856 = vmatpush3.bf16.msra.mxu0 %v16853_v40  ;;  %v789_v40 = vld [vmem:[%s20430_s27 + $0x30] sm:$0xff]  ;;  %v23166_v15 = vld [vmem:[#allocation63_spill] sm:$0xff]  ;;  %v23167_v16 = vld [vmem:[#allocation64_spill] sm:$0xff]  ;;  %s19774_s27 = smov 8  }
 0x16c   : >> { %16858 = vmatprep.subr.bf16.mxu0 %v16857_v44  ;;  %v20489_v38 = vadd.f32 %v789_v40, %v23150_v34  ;;  %v20514_v40 = vadd.f32 %v792_v46, %v23156_v41  ;;  %23159 = vst [vmem:[#allocation88_spill] sm:$0xff] %v20525_v27  ;;  %v23165_v14 = vld [vmem:[#allocation62_spill] sm:$0xff]  ;;  %v23168_v17 = vld [vmem:[#allocation65_spill] sm:$0xff] }
 0x16d   : >> { %v23177_v18 = vld [vmem:[#allocation66_spill] sm:$0xff] }
 0x16e   : >> { %23151 = vst [vmem:[#allocation84_spill] sm:$0xff] %v20489_v38  ;;  %23157 = vst [vmem:[#allocation87_spill] sm:$0xff] %v20514_v40 }
 0x16f   : >> { %16860 = vmatpush3.bf16.msra.mxu0 %v16857_v44  ;;  %v20492_v44 = vadd.f32 %v790_v20, %v23152_v35  ;;  %v20511_v20 = vadd.f32 %v791_v45, %v23154_v36  ;;  %v20536_v45 = vadd.f32 %v794_v26, %v23160_v43 }
 0x170   : >> { %16872 = vmatpush3.bf16.xpose.msk.msra.mxu1 %vm20447_vm13, %v16867_v39 }
 0x171   : >> { %16875 = vmatprep.subr.msk.bf16.mxu1 %vm20447_vm13, %v16873_v6  ;;  %23153 = vst [vmem:[#allocation85_spill] sm:$0xff] %v20492_v44  ;;  %v16879_v39 = vpack.c.bf16 %v20492_v44, %v20489_v38  ;;  %23155 = vst [vmem:[#allocation86_spill] sm:$0xff] %v20511_v20  ;;  %v16891_v21 = vpack.c.bf16 %v20536_v45, %v20525_v27 }
 0x172   : >> { %16109 = vmatmul.mubr.msk.f32.vlgmr.msra.gmra.mrb[0].mxu0 %vm807_vm12, %v20439_v51  ;;  %23161 = vst [vmem:[#allocation89_spill] sm:$0xff] %v20536_v45 }
 0x173   : >> { %16111 = vmatprep.mubr.msk.f32.mxu0 %vm807_vm12, %v20443_v53 }
 0x176   : >> { %16112 = vmatmul.mubr.msk.f32.gmra.mrb[2].mxu0 %vm807_vm12, %v20452_v58 }
 0x177   : >> { %16114 = vmatprep.mubr.msk.f32.mxu0 %vm807_vm12, %v20471_v52 }
 0x178   : >> { %16878 = vmatpush3.bf16.xpose.msk.msra.mxu1 %vm20447_vm13, %v16873_v6  ;;  %v16885_v6 = vpack.c.bf16 %v20514_v40, %v20511_v20 }
 0x179   : >> { %16881 = vmatprep.subr.msk.bf16.mxu1 %vm20447_vm13, %v16879_v39 }
 0x17a   : >> { %16115 = vmatmul.mubr.msk.f32.gmra.mrb[4].mxu0 %vm807_vm12, %v20474_v0 }
 0x17b   : >> { %16117 = vmatprep.mubr.msk.f32.mxu0 %vm807_vm12, %v20489_v38 }
 0x17e   : >> { %16118 = vmatmul.mubr.msk.f32.gmra.mrb[6].mxu0 %vm807_vm12, %v20492_v44 }
 0x17f   : >> { %16120 = vmatprep.mubr.msk.f32.mxu0 %vm807_vm12, %v20511_v20 }
 0x180   : >> { %16884 = vmatpush3.bf16.xpose.msk.msra.mxu1 %vm20447_vm13, %v16879_v39 }
 0x181   : >> { %16887 = vmatprep.subr.msk.bf16.mxu1 %vm20447_vm13, %v16885_v6 }
 0x182   : >> { %16121 = vmatmul.mubr.msk.f32.gmra.mrb[8].mxu0 %vm807_vm12, %v20514_v40 }
 0x183   : >> { %16123 = vmatprep.mubr.msk.f32.mxu0 %vm807_vm12, %v20525_v27 }
 0x186   : >> { %16124 = vmatmul.mubr.msk.f32.gmra.mrb[10].mxu0 %vm807_vm12, %v20536_v45 }
 0x188   : >> { %16890 = vmatpush3.bf16.xpose.msk.msra.mxu1 %vm20447_vm13, %v16885_v6 }
 0x189   : >> { %16893 = vmatprep.subr.msk.bf16.mxu1 %vm20447_vm13, %v16891_v21 }
 0x190   : >> { %16896 = vmatpush3.bf16.xpose.msk.msra.mxu1 %vm20447_vm13, %v16891_v21 }
 0x197   : >> { %16151 = vmatmul.mubr.msk.f32.vlgmr.msra.gmra.mrb[0].mxu1 %vm807_vm12, %v23162_v7 }
 0x198   : >> { %16153 = vmatprep.mubr.msk.f32.mxu1 %vm807_vm12, %v23163_v12 }
 0x19b   : >> { %16154 = vmatmul.mubr.msk.f32.gmra.mrb[2].mxu1 %vm807_vm12, %v23164_v13 }
 0x19c   : >> { %16156 = vmatprep.mubr.msk.f32.mxu1 %vm807_vm12, %v23165_v14 }
 0x19f   : >> { %16157 = vmatmul.mubr.msk.f32.gmra.mrb[4].mxu1 %vm807_vm12, %v23166_v15 }
 0x1a0   : >> { %16159 = vmatprep.mubr.msk.f32.mxu1 %vm807_vm12, %v23167_v16 }
 0x1a3   : >> { %16160 = vmatmul.mubr.msk.f32.gmra.mrb[6].mxu1 %vm807_vm12, %v23168_v17 }
 0x245   : >> { %v20562_v26 = vpop.f32.mrb[0].mxu0 }
 0x246   : >> { %v20564_v39 = vpop.f32.mrb[1].mxu0 }
 0x247   : >> { %1614 = vrot.lane.b32.xlu0 %v20564_v39, %s19760_s25  ;;  %16164 = vmatprep.mubr.msk.f32.mxu0 %vm1098_vm14, %v20564_v39  ;;  %v20572_v46 = vpack.i.bf16 %v20562_v26, %v20564_v39 }
 0x249   : >> { %23169 = vst [vmem:[#allocation90_spill] sm:$0xff] %v20572_v46  ;;  %v20574_v6 = vpop.f32.mrb[2].mxu0 }
 0x24a   : >> { %v20576_v21 = vpop.f32.mrb[3].mxu0 }
 0x24b   : >> { %1616 = vrot.lane.b32.xlu0 %v20562_v26, %s19760_s25  ;;  %1618 = vrot.lane.b32.xlu1 %v20576_v21, %s19760_s25  ;;  %v20584_v7 = vpack.i.bf16 %v20574_v6, %v20576_v21 }
 0x24d   : >> { %23170 = vst [vmem:[#allocation91_spill] sm:$0xff] %v20584_v7  ;;  %v20586_v12 = vpop.f32.mrb[4].mxu0 }
 0x24e   : >> { %v20588_v13 = vpop.f32.mrb[5].mxu0 }
 0x24f   : >> { %1620 = vrot.lane.b32.xlu1 %v20574_v6, %s19760_s25  ;;  %1622 = vrot.lane.b32.xlu0 %v20588_v13, %s19760_s25  ;;  %v20596_v14 = vpack.i.bf16 %v20586_v12, %v20588_v13 }
 0x251   : >> { %23171 = vst [vmem:[#allocation92_spill] sm:$0xff] %v20596_v14  ;;  %v20598_v15 = vpop.f32.mrb[6].mxu0 }
 0x252   : >> { %v20600_v16 = vpop.f32.mrb[7].mxu0 }
 0x253   : >> { %1624 = vrot.lane.b32.xlu1 %v20586_v12, %s19760_s25  ;;  %17444 = vrot.lane.b32.xlu0 %v20584_v7, %s19761_s30  ;;  %v20608_v17 = vpack.i.bf16 %v20598_v15, %v20600_v16 }
 0x255   : >> { %23172 = vst [vmem:[#allocation93_spill] sm:$0xff] %v20608_v17  ;;  %v20610_v32 = vpop.f32.mrb[8].mxu0 }
 0x256   : >> { %v20612_v33 = vpop.f32.mrb[9].mxu0 }
 0x257   : >> { %17439 = vrot.lane.b32.xlu1 %v20572_v46, %s19761_s30  ;;  %1626 = vrot.lane.b32.xlu0 %v20600_v16, %s19760_s25  ;;  %v20620_v34 = vpack.i.bf16 %v20610_v32, %v20612_v33 }
 0x259   : >> { %23173 = vst [vmem:[#allocation94_spill] sm:$0xff] %v20620_v34  ;;  %v20622_v35 = vpop.f32.mrb[10].mxu0 }
 0x25a   : >> { %23174 = vst [vmem:[#allocation95_spill] sm:$0xff] %v20622_v35  ;;  %v20624_v36 = vpop.f32.mrb[11].mxu0 }
 0x25b   : >> { %23175 = vst [vmem:[#allocation96_spill] sm:$0xff] %v20624_v36  ;;  %17449 = vrot.lane.b32.xlu1 %v20596_v14, %s19761_s30  ;;  %1630 = vrot.lane.b32.xlu0 %v20612_v33, %s19760_s25  ;;  %v20632_v41 = vpack.i.bf16 %v20622_v35, %v20624_v36 }
 0x25d   : >> { %23176 = vst [vmem:[#allocation97_spill] sm:$0xff] %v20632_v41 }
 0x25f   : >> { %1628 = vrot.lane.b32.xlu1 %v20598_v15, %s19760_s25  ;;  %17459 = vrot.lane.b32.xlu0 %v20620_v34, %s19761_s30 }
 0x263   : >> { %17454 = vrot.lane.b32.xlu1 %v20608_v17, %s19761_s30  ;;  %1634 = vrot.lane.b32.xlu0 %v20624_v36, %s19760_s25 }
 0x267   : >> { %1632 = vrot.lane.b32.xlu1 %v20610_v32, %s19760_s25 }
 0x26a   : >> { %v16152_v42 = vpop.f32.mrb[0].mxu1 }
 0x26b   : >> { %1636 = vrot.lane.b32.xlu1 %v20622_v35, %s19760_s25  ;;  %v1059_v43 = vpop.f32.mrb[1].mxu1  ;;  %16224 = vmatprep.subr.mxu1 %v16152_v42  ;;  %s14589_s25 = sshll.u32 %s19739_s15, 3  ;;  %s780_s15 = sadd.s32 1, %s19739_s15  }
 0x26c   : >> { %16162 = vmatprep.subr.mxu0 %v1059_v43  ;;  %16225 = vmatpush3.msra.mxu1 %v16152_v42  ;;  %p777_p13 = scmp.ge.s32.totalorder %s780_s15, 2  }
 0x26d   : >> { %16163 = vmatpush3.msra.mxu0 %v1059_v43  ;;  %17093 = vmatprep.subr.mxu1 %v23119_v19  ;;  %vm19776_vm0 = vmmov (%p777_p13), 0   ;;  %vm14061_vm1 = vcmask (%p777_p13), 122880  }
 0x26e   : >> { %16165 = vmatmul.mubr.msk.f32.vlgmr.msra.gmra.mrb[12].mxu0 %vm1098_vm14, %v20562_v26 }
 0x26f   : >> { %16167 = vmatprep.mubr.msk.f32.mxu0 %vm1098_vm14, %v20576_v21 }
 0x272   : >> { %16168 = vmatmul.mubr.msk.f32.gmra.mrb[14].mxu0 %vm1098_vm14, %v20574_v6 }
 0x273   : >> { %16170 = vmatprep.mubr.msk.f32.mxu0 %vm1098_vm14, %v20588_v13 }
 0x276   : >> { %16171 = vmatmul.mubr.msk.f32.gmra.mrb[16].mxu0 %vm1098_vm14, %v20586_v12 }
 0x277   : >> { %16173 = vmatprep.mubr.msk.f32.mxu0 %vm1098_vm14, %v20600_v16 }
 0x27a   : >> { %16174 = vmatmul.mubr.msk.f32.gmra.mrb[18].mxu0 %vm1098_vm14, %v20598_v15 }
 0x27b   : >> { %16176 = vmatprep.mubr.msk.f32.mxu0 %vm1098_vm14, %v20612_v33 }
 0x27e   : >> { %16177 = vmatmul.mubr.msk.f32.gmra.mrb[20].mxu0 %vm1098_vm14, %v20610_v32 }
 0x27f   : >> { %16179 = vmatprep.mubr.msk.f32.mxu0 %vm1098_vm14, %v20624_v36 }
 0x282   : >> { %16180 = vmatmul.mubr.msk.f32.gmra.mrb[22].mxu0 %vm1098_vm14, %v20622_v35 }
 0x2b9   : >> { %v1615_v42 = vpop.permute.xlu0 %1614 }
 0x2ba   : >> { %16226 = vmatprep.mubr.msk.f32.mxu1 %vm1098_vm14, %v1615_v42 }
 0x2bd   : >> { %v1617_v43 = vpop.permute.xlu0 %1616  ;;  %v1619_v48 = vpop.permute.xlu1 %1618 }
 0x2be   : >> { %16227 = vmatmul.mubr.msk.f32.vlgmr.msra.gmra.mrb[8].mxu1 %vm1098_vm14, %v1617_v43 }
 0x2bf   : >> { %16229 = vmatprep.mubr.msk.f32.mxu1 %vm1098_vm14, %v1619_v48  ;;  %17094 = vmatpush3.msra.mxu1 %v23119_v19 }
 0x2c0   : >> { %16306 = vmatprep.subr.mxu1 %v23177_v18 }
 0x2c1   : >> { %v1621_v49 = vpop.permute.xlu1 %1620  ;;  %v1623_v50 = vpop.permute.xlu0 %1622 }
 0x2c2   : >> { %16230 = vmatmul.mubr.msk.f32.gmra.mrb[10].mxu1 %vm1098_vm14, %v1621_v49 }
 0x2c3   : >> { %16232 = vmatprep.mubr.msk.f32.mxu1 %vm1098_vm14, %v1623_v50 }
 0x2c5   : >> { %v1625_v55 = vpop.permute.xlu1 %1624  ;;  %v17445_v56 = vpop.permute.xlu0 %17444 }
 0x2c6   : >> { %16233 = vmatmul.mubr.msk.f32.gmra.mrb[12].mxu1 %vm1098_vm14, %v1625_v55  ;;  %v17447_v63 = vunpack.i.h.bf16 %v17445_v56  ;;  %v17446_v43 = vunpack.i.l.bf16 %v17445_v56 }
 0x2c8   : >> { %v16901_v20 = vpack.c.bf16 %v17447_v63, %v17446_v43 }
 0x2c9   : >> { %v17440_v42 = vpop.permute.xlu1 %17439  ;;  %v1627_v57 = vpop.permute.xlu0 %1626 }
 0x2ca   : >> { %v17442_v54 = vunpack.i.h.bf16 %v17440_v42  ;;  %v17441_v48 = vunpack.i.l.bf16 %v17440_v42  ;;  %16235 = vmatprep.mubr.msk.f32.mxu1 %vm1098_vm14, %v1627_v57 }
 0x2cc   : >> { %v16897_v2 = vpack.c.bf16 %v17442_v54, %v17441_v48 }
 0x2cd   : >> { %v17450_v37 = vpop.permute.xlu1 %17449  ;;  %v1631_v31 = vpop.permute.xlu0 %1630 }
 0x2ce   : >> { %16898 = vmatprep.subr.bf16.mxu0 %v16897_v2  ;;  %v17452_v49 = vunpack.i.h.bf16 %v17450_v37  ;;  %v17451_v52 = vunpack.i.l.bf16 %v17450_v37 }
 0x2cf   : >> { %16900 = vmatpush3.bf16.msra.mxu0 %v16897_v2 }
 0x2d0   : >> { %16902 = vmatprep.subr.bf16.mxu0 %v16901_v20  ;;  %v16905_v50 = vpack.c.bf16 %v17452_v49, %v17451_v52 }
 0x2d1   : >> { %v1629_v47 = vpop.permute.xlu1 %1628  ;;  %v17460_v55 = vpop.permute.xlu0 %17459 }
 0x2d2   : >> { %16236 = vmatmul.mubr.msk.f32.gmra.mrb[14].mxu1 %vm1098_vm14, %v1629_v47  ;;  %v17462_v56 = vunpack.i.h.bf16 %v17460_v55  ;;  %v17461_v57 = vunpack.i.l.bf16 %v17460_v55 }
 0x2d3   : >> { %16904 = vmatpush3.bf16.msra.mxu0 %v16901_v20  ;;  %16238 = vmatprep.mubr.msk.f32.mxu1 %vm1098_vm14, %v1631_v31  ;;  %v20683_v31 = vpop.f32.mrb[2].mxu1 }
 0x2d4   : >> { %16906 = vmatprep.subr.bf16.mxu0 %v16905_v50  ;;  %v16913_v37 = vpack.c.bf16 %v17462_v56, %v17461_v57  ;;  %23178 = vst [vmem:[#allocation98_spill] sm:$0xff] %v20683_v31  ;;  %v20685_v52 = vpop.f32.mrb[3].mxu1 }
 0x2d5   : >> { %v17455_v54 = vpop.permute.xlu1 %17454  ;;  %v1635_v43 = vpop.permute.xlu0 %1634 }
 0x2d6   : >> { %v17457_v42 = vunpack.i.h.bf16 %v17455_v54  ;;  %v17456_v48 = vunpack.i.l.bf16 %v17455_v54  ;;  %v20687_v20 = vpop.f32.mrb[4].mxu1 }
 0x2d7   : >> { %16908 = vmatpush3.bf16.msra.mxu0 %v16905_v50  ;;  %23179 = vst [vmem:[#allocation99_spill] sm:$0xff] %v20687_v20  ;;  %v20689_v49 = vpop.f32.mrb[5].mxu1 }
 0x2d8   : >> { %v16909_v63 = vpack.c.bf16 %v17457_v42, %v17456_v48  ;;  %23180 = vst [vmem:[#allocation100_spill] sm:$0xff] %v20689_v49  ;;  %v20691_v50 = vpop.f32.mrb[6].mxu1 }
 0x2d9   : >> { %v1633_v2 = vpop.permute.xlu1 %1632  ;;  %23181 = vst [vmem:[#allocation101_spill] sm:$0xff] %v20691_v50  ;;  %v20693_v55 = vpop.f32.mrb[7].mxu1 }
 0x2da   : >> { %16910 = vmatprep.subr.bf16.mxu0 %v16909_v63  ;;  %16239 = vmatmul.mubr.msk.f32.gmra.mrb[16].mxu1 %vm1098_vm14, %v1633_v2  ;;  %23182 = vst [vmem:[#allocation102_spill] sm:$0xff] %v20693_v55 }
 0x2db   : >> { %16912 = vmatpush3.bf16.msra.mxu0 %v16909_v63  ;;  %16241 = vmatprep.mubr.msk.f32.mxu1 %vm1098_vm14, %v1635_v43 }
 0x2dc   : >> { %16914 = vmatprep.subr.bf16.mxu0 %v16913_v37 }
 0x2dd   : >> { %v1637_v47 = vpop.permute.xlu1 %1636 }
 0x2de   : >> { %16242 = vmatmul.mubr.msk.f32.gmra.mrb[18].mxu1 %vm1098_vm14, %v1637_v47 }
 0x2df   : >> { %16916 = vmatpush3.bf16.msra.mxu0 %v16913_v37 }
 0x341   : >> { %v16166_v56 = vpop.f32.mrb[12].mxu0 }
 0x342   : >> { %v1261_v57 = vmul.f32 0.125, %v16166_v56  ;;  %v1201_v54 = vpop.f32.mrb[13].mxu0 }
 0x343   : >> { %v1260_v42 = vmul.f32 0.125, %v1201_v54 }
 0x344   : >> { %v20696_v48 = vadd.f32 %v1261_v57, %v23120_v60 }
 0x345   : >> { %v20699_v63 = vadd.f32 %v1260_v42, %v23121_v59  ;;  %v16169_v43 = vpop.f32.mrb[14].mxu0 }
 0x346   : >> { %v1263_v37 = vmul.f32 0.125, %v16169_v43  ;;  %v1211_v2 = vpop.f32.mrb[15].mxu0  ;;  %v1288_v47 = vsel %vm1284_vm15, %v20696_v48, -inf }
 0x347   : >> { %v1262_v27 = vmul.f32 0.125, %v1211_v2  ;;  %1289 = vmax.xlane.f32.xlu1 %v1288_v47  ;;  %v1285_v56 = vsel %vm1284_vm15, %v20699_v63, -inf }
 0x348   : >> { %v20706_v54 = vadd.f32 %v1263_v37, %v23123_v62  ;;  %1286 = vmax.xlane.f32.xlu0 %v1285_v56 }
 0x349   : >> { %v16172_v57 = vpop.f32.mrb[16].mxu0  ;;  %v20711_v43 = vadd.f32 %v1262_v27, %v23122_v61 }
 0x34a   : >> { %v1265_v45 = vmul.f32 0.125, %v16172_v57  ;;  %v1221_v40 = vpop.f32.mrb[17].mxu0  ;;  %v1294_v42 = vsel %vm1284_vm15, %v20706_v54, -inf }
 0x34b   : >> { %v1264_v38 = vmul.f32 0.125, %v1221_v40  ;;  %v1291_v57 = vsel %vm1284_vm15, %v20711_v43, -inf }
 0x34c   : >> { %1295 = vmax.xlane.f32.xlu0 %v1294_v42  ;;  %v20714_v2 = vadd.f32 %v1265_v45, %v23125_v3 }
 0x34d   : >> { %v20717_v47 = vadd.f32 %v1264_v38, %v23124_v1  ;;  %v16175_v37 = vpop.f32.mrb[18].mxu0 }
 0x34e   : >> { %v1267_v44 = vmul.f32 0.125, %v16175_v37  ;;  %v1231_v56 = vpop.f32.mrb[19].mxu0  ;;  %v1300_v45 = vsel %vm1284_vm15, %v20714_v2, -inf }
 0x34f   : >> { %v1266_v0 = vmul.f32 0.125, %v1231_v56  ;;  %v1297_v53 = vsel %vm1284_vm15, %v20717_v47, -inf }
 0x350   : >> { %1292 = vmax.xlane.f32.xlu0 %v1291_v57  ;;  %1298 = vmax.xlane.f32.xlu1 %v1297_v53  ;;  %v20724_v27 = vadd.f32 %v1267_v44, %v20359_v5 }
 0x351   : >> { %v20727_v40 = vadd.f32 %v1266_v0, %v20355_v4  ;;  %v16178_v38 = vpop.f32.mrb[20].mxu0 }
 0x352   : >> { %v1269_v42 = vmul.f32 0.125, %v16178_v38  ;;  %v1241_v37 = vpop.f32.mrb[21].mxu0  ;;  %v1306_v57 = vsel %vm1284_vm15, %v20724_v27, -inf }
 0x353   : >> { %v1268_v56 = vmul.f32 0.125, %v1241_v37  ;;  %v1303_v58 = vsel %vm1284_vm15, %v20727_v40, -inf }
 0x354   : >> { %1301 = vmax.xlane.f32.xlu0 %v1300_v45  ;;  %1304 = vmax.xlane.f32.xlu1 %v1303_v58  ;;  %v20734_v53 = vadd.f32 %v1269_v42, %v20371_v9 }
 0x355   : >> { %v20737_v44 = vadd.f32 %v1268_v56, %v20367_v8  ;;  %v16181_v0 = vpop.f32.mrb[22].mxu0 }
 0x356   : >> { %v1271_v51 = vmul.f32 0.125, %v16181_v0  ;;  %v1251_v30 = vpop.f32.mrb[23].mxu0  ;;  %v1312_v42 = vsel %vm1284_vm15, %v20734_v53, -inf }
 0x357   : >> { %v1270_v38 = vmul.f32 0.125, %v1251_v30  ;;  %v1309_v37 = vsel %vm1284_vm15, %v20737_v44, -inf }
 0x358   : >> { %1307 = vmax.xlane.f32.xlu0 %v1306_v57  ;;  %1310 = vmax.xlane.f32.xlu1 %v1309_v37  ;;  %v20744_v58 = vadd.f32 %v1271_v51, %v20379_v11 }
 0x359   : >> { %v20747_v45 = vadd.f32 %v1270_v38, %v20375_v10 }
 0x35a   : >> { %v1318_v30 = vsel %vm1284_vm15, %v20744_v58, -inf }
 0x35b   : >> { %v1315_v56 = vsel %vm1284_vm15, %v20747_v45, -inf }
 0x35c   : >> { %1313 = vmax.xlane.f32.xlu0 %v1312_v42  ;;  %1316 = vmax.xlane.f32.xlu1 %v1315_v56 }
 0x360   : >> { %1319 = vmax.xlane.f32.xlu0 %v1318_v30 }
 0x391   : >> { %v16228_v0 = vpop.f32.mrb[8].mxu1 }
 0x392   : >> { %v1788_v57 = vmul.f32 0.125, %v16228_v0  ;;  %v1728_v37 = vpop.f32.mrb[9].mxu1 }
 0x393   : >> { %v1787_v51 = vmul.f32 0.125, %v1728_v37 }
 0x394   : >> { %v20756_v29 = vadd.f32 %v1788_v57, %v23120_v60 }
 0x395   : >> { %v20759_v38 = vadd.f32 %v1787_v51, %v23121_v59  ;;  %v16231_v28 = vpop.f32.mrb[10].mxu1 }
 0x396   : >> { %v1790_v25 = vmul.f32 0.125, %v16231_v28  ;;  %v1738_v50 = vpop.f32.mrb[11].mxu1  ;;  %v1814_v42 = vsel %vm1284_vm15, %v20756_v29, -inf }
 0x397   : >> { %v1789_v56 = vmul.f32 0.125, %v1738_v50  ;;  %1815 = vmax.xlane.f32.xlu0 %v1814_v42  ;;  %v1811_v30 = vsel %vm1284_vm15, %v20759_v38, -inf }
 0x398   : >> { %v20766_v0 = vadd.f32 %v1790_v25, %v23123_v62  ;;  %1812 = vmax.xlane.f32.xlu1 %v1811_v30 }
 0x399   : >> { %v20769_v57 = vadd.f32 %v1789_v56, %v23122_v61  ;;  %v16234_v37 = vpop.f32.mrb[12].mxu1 }
 0x39a   : >> { %v1792_v51 = vmul.f32 0.125, %v16234_v37  ;;  %v1748_v24 = vpop.f32.mrb[13].mxu1  ;;  %v1820_v28 = vsel %vm1284_vm15, %v20766_v0, -inf }
 0x39b   : >> { %v1791_v23 = vmul.f32 0.125, %v1748_v24  ;;  %1821 = vmax.xlane.f32.xlu0 %v1820_v28  ;;  %v1817_v50 = vsel %vm1284_vm15, %v20769_v57, -inf }
 0x39c   : >> { %v20776_v42 = vadd.f32 %v1792_v51, %v23125_v3  ;;  %1818 = vmax.xlane.f32.xlu1 %v1817_v50 }
 0x39d   : >> { %v20779_v25 = vadd.f32 %v1791_v23, %v23124_v1 }
 0x39e   : >> { %v1826_v56 = vsel %vm1284_vm15, %v20776_v42, -inf }
 0x39f   : >> { %1827 = vmax.xlane.f32.xlu0 %v1826_v56  ;;  %v1823_v30 = vsel %vm1284_vm15, %v20779_v25, -inf }
 0x3a0   : >> { %1824 = vmax.xlane.f32.xlu1 %v1823_v30 }
 0x3a5   : >> { %v20785_v24 = vpop.f32.mrb[14].mxu1 }
 0x3a6   : >> { %v20787_v37 = vpop.f32.mrb[15].mxu1 }
 0x3ad   : >> { %v20789_v28 = vpop.f32.mrb[16].mxu1 }
 0x3ae   : >> { %v20791_v51 = vpop.f32.mrb[17].mxu1 }
 0x3b1   : >> { %17464 = vrot.lane.b32.xlu1 %v20632_v41, %s19761_s30  ;;  %v20795_v23 = vpop.f32.mrb[18].mxu1 }
 0x3b2   : >> { %v20797_v50 = vpop.f32.mrb[19].mxu1 }
 0x3b5   : >> { %17469 = vrot.lane.b32.xlu0 %v20572_v46, %s19762_s18 }
 0x3d4   : >> { %v1290_v56 = vpop.xlane.xlu1 %1289 }
 0x3d5   : >> { %v1322_v30 = vsub.f32 %v20696_v48, %v1290_v56  ;;  %v1287_v55 = vpop.xlane.xlu0 %1286 }
 0x3d6   : >> { %v1321_v20 = vsub.f32 %v20699_v63, %v1287_v55 }
 0x3d7   : >> { %v1335_v49 = vmul.f32 1.442695, %v1322_v30 }
 0x3d8   : >> { %v1333_v31 = vmul.f32 1.442695, %v1321_v20 }
 0x3d9   : >> { %17678 = vpow2.f32 %v1335_v49  ;;  %v1296_v3 = vpop.xlane.xlu0 %1295 }
 0x3da   : >> { %17680 = vpow2.f32 %v1333_v31  ;;  %v1324_v1 = vsub.f32 %v20706_v54, %v1296_v3 }
 0x3dc   : >> { %v1339_v62 = vmul.f32 1.442695, %v1324_v1 }
 0x3dd   : >> { %v1293_v61 = vpop.xlane.xlu0 %1292  ;;  %v1299_v59 = vpop.xlane.xlu1 %1298 }
 0x3de   : >> { %17682 = vpow2.f32 %v1339_v62  ;;  %v1323_v60 = vsub.f32 %v20711_v43, %v1293_v61  ;;  %v1325_v46 = vsub.f32 %v20717_v47, %v1299_v59 }
 0x3e0   : >> { %v1337_v22 = vmul.f32 1.442695, %v1323_v60  ;;  %v1341_v48 = vmul.f32 1.442695, %v1325_v46 }
 0x3e1   : >> { %v1302_v56 = vpop.xlane.xlu0 %1301  ;;  %v1305_v18 = vpop.xlane.xlu1 %1304 }
 0x3e2   : >> { %17684 = vpow2.f32 %v1337_v22  ;;  %v1326_v20 = vsub.f32 %v20714_v2, %v1302_v56  ;;  %v1327_v3 = vsub.f32 %v20727_v40, %v1305_v18 }
 0x3e3   : >> { %v20807_v49 = vpop.eup %17678  ;;  %17686 = vpow2.f32 %v1341_v48 }
 0x3e4   : >> { %v20809_v31 = vpop.eup %17680  ;;  %v1343_v1 = vmul.f32 1.442695, %v1326_v20  ;;  %v1360_v61 = vsel %vm1284_vm15, %v20807_v49, 0.0  ;;  %v1345_v55 = vmul.f32 1.442695, %v1327_v3 }
 0x3e5   : >> { %v1308_v62 = vpop.xlane.xlu0 %1307  ;;  %v1311_v59 = vpop.xlane.xlu1 %1310  ;;  %1361 = vadd.xlane.f32.xlu0 %v1360_v61  ;;  %v1357_v60 = vsel %vm1284_vm15, %v20809_v31, 0.0 }
 0x3e6   : >> { %17688 = vpow2.f32 %v1343_v1  ;;  %v1328_v22 = vsub.f32 %v20724_v27, %v1308_v62  ;;  %1358 = vadd.xlane.f32.xlu1 %v1357_v60  ;;  %v1329_v54 = vsub.f32 %v20737_v44, %v1311_v59 }
 0x3e8   : >> { %v20817_v46 = vpop.eup %17682  ;;  %v1347_v63 = vmul.f32 1.442695, %v1328_v22  ;;  %v1349_v47 = vmul.f32 1.442695, %v1329_v54 }
 0x3e9   : >> { %v1317_v18 = vpop.xlane.xlu1 %1316  ;;  %v1366_v43 = vsel %vm1284_vm15, %v20817_v46, 0.0 }
 0x3ea   : >> { %17690 = vpow2.f32 %v1347_v63  ;;  %1367 = vadd.xlane.f32.xlu0 %v1366_v43  ;;  %v1331_v40 = vsub.f32 %v20747_v45, %v1317_v18 }
 0x3eb   : >> { %17692 = vpow2.f32 %v1345_v55  ;;  %v1314_v55 = vpop.xlane.xlu0 %1313 }
 0x3ec   : >> { %v20822_v2 = vpop.eup %17684  ;;  %17694 = vpow2.f32 %v1349_v47  ;;  %v1353_v56 = vmul.f32 1.442695, %v1331_v40  ;;  %v1330_v63 = vsub.f32 %v20734_v53, %v1314_v55 }
 0x3ed   : >> { %v20825_v27 = vpop.eup %17686  ;;  %v1363_v30 = vsel %vm1284_vm15, %v20822_v2, 0.0 }
 0x3ee   : >> { %1364 = vadd.xlane.f32.xlu0 %v1363_v30  ;;  %v1369_v44 = vsel %vm1284_vm15, %v20825_v27, 0.0  ;;  %17696 = vpow2.f32 %v1353_v56  ;;  %v1351_v18 = vmul.f32 1.442695, %v1330_v63 }
 0x3ef   : >> { %1370 = vadd.xlane.f32.xlu1 %v1369_v44  ;;  %v1320_v54 = vpop.xlane.xlu0 %1319 }
 0x3f0   : >> { %v20831_v48 = vpop.eup %17688  ;;  %v1332_v43 = vsub.f32 %v20744_v58, %v1320_v54  ;;  %17698 = vpow2.f32 %v1351_v18 }
 0x3f1   : >> { %v1372_v20 = vsel %vm1284_vm15, %v20831_v48, 0.0 }
 0x3f2   : >> { %1373 = vadd.xlane.f32.xlu0 %v1372_v20  ;;  %v1355_v47 = vmul.f32 1.442695, %v1332_v43 }
 0x3f4   : >> { %v20835_v1 = vpop.eup %17690  ;;  %17700 = vpow2.f32 %v1355_v47 }
 0x3f5   : >> { %v1378_v45 = vsel %vm1284_vm15, %v20835_v1, 0.0  ;;  %v20839_v3 = vpop.eup %17692 }
 0x3f6   : >> { %1379 = vadd.xlane.f32.xlu0 %v1378_v45  ;;  %v1375_v61 = vsel %vm1284_vm15, %v20839_v3, 0.0  ;;  %v20843_v62 = vpop.eup %17694 }
 0x3f7   : >> { %v1381_v59 = vsel %vm1284_vm15, %v20843_v62, 0.0 }
 0x3f8   : >> { %v20847_v60 = vpop.eup %17696 }
 0x3f9   : >> { %v1387_v22 = vsel %vm1284_vm15, %v20847_v60, 0.0 }
 0x3fa   : >> { %1376 = vadd.xlane.f32.xlu0 %v1375_v61  ;;  %v20855_v40 = vpop.eup %17698 }
 0x3fb   : >> { %v1384_v45 = vsel %vm1284_vm15, %v20855_v40, 0.0 }
 0x3fe   : >> { %1382 = vadd.xlane.f32.xlu0 %v1381_v59  ;;  %v20861_v61 = vpop.eup %17700 }
 0x400   : >> { %17474 = vrot.lane.b32.xlu1 %v20584_v7, %s19762_s18 }
 0x402   : >> { %1388 = vadd.xlane.f32.xlu0 %v1387_v22 }
 0x424   : >> { %v1816_v30 = vpop.xlane.xlu0 %1815  ;;  %1385 = vadd.xlane.f32.xlu1 %v1384_v45 }
 0x425   : >> { %v1848_v44 = vsub.f32 %v20756_v29, %v1816_v30  ;;  %v1813_v56 = vpop.xlane.xlu1 %1812  ;;  %v1390_v29 = vsel %vm1284_vm15, %v20861_v61, 0.0 }
 0x426   : >> { %v1847_v20 = vsub.f32 %v20759_v38, %v1813_v56 }
 0x427   : >> { %v1861_v53 = vmul.f32 1.442695, %v1848_v44 }
 0x428   : >> { %v1859_v59 = vmul.f32 1.442695, %v1847_v20  ;;  %v1822_v58 = vpop.xlane.xlu0 %1821  ;;  %1391 = vadd.xlane.f32.xlu1 %v1390_v29 }
 0x429   : >> { %17702 = vpow2.f32 %v1861_v53  ;;  %v1850_v22 = vsub.f32 %v20766_v0, %v1822_v58  ;;  %v1819_v55 = vpop.xlane.xlu1 %1818 }
 0x42a   : >> { %17704 = vpow2.f32 %v1859_v59  ;;  %v1849_v63 = vsub.f32 %v20769_v57, %v1819_v55 }
 0x42b   : >> { %v1865_v38 = vmul.f32 1.442695, %v1850_v22 }
 0x42c   : >> { %v1863_v54 = vmul.f32 1.442695, %v1849_v63  ;;  %v1828_v18 = vpop.xlane.xlu0 %1827 }
 0x42d   : >> { %17706 = vpow2.f32 %v1865_v38  ;;  %v1852_v43 = vsub.f32 %v20776_v42, %v1828_v18  ;;  %v1825_v47 = vpop.xlane.xlu1 %1824  ;;  %v1794_v38 = vmul.f32 0.125, %v20785_v24  ;;  %v1796_v24 = vmul.f32 0.125, %v20789_v28 }
 0x42e   : >> { %17708 = vpow2.f32 %v1863_v54 }
 0x42f   : >> { %v1869_v30 = vmul.f32 1.442695, %v1852_v43 }
 0x430   : >> { %v17470_v44 = vpop.permute.xlu0 %17469 }
 0x431   : >> { %17710 = vpow2.f32 %v1869_v30  ;;  %v17465_v0 = vpop.permute.xlu1 %17464  ;;  %v17472_v56 = vunpack.i.h.bf16 %v17470_v44  ;;  %v17471_v20 = vunpack.i.l.bf16 %v17470_v44  ;;  %v20888_v30 = vadd.f32 %v1794_v38, %v20359_v5 }
 0x432   : >> { %v17467_v45 = vunpack.i.h.bf16 %v17465_v0  ;;  %v17466_v57 = vunpack.i.l.bf16 %v17465_v0  ;;  %v1795_v44 = vmul.f32 0.125, %v20791_v51 }
 0x433   : >> { %v20868_v53 = vpop.eup %17702  ;;  %v16921_v55 = vpack.c.bf16 %v17472_v56, %v17471_v20  ;;  %v1832_v20 = vsel %vm1284_vm15, %v20888_v30, -inf }
 0x434   : >> { %v20870_v59 = vpop.eup %17704  ;;  %v1886_v58 = vsel %vm1284_vm15, %v20868_v53, 0.0  ;;  %v16917_v22 = vpack.c.bf16 %v17467_v45, %v17466_v57  ;;  %v20895_v56 = vadd.f32 %v1795_v44, %v20367_v8  ;;  %v20900_v45 = vadd.f32 %v1796_v24, %v20371_v9 }
 0x435   : >> { %1887 = vadd.xlane.f32.xlu1 %v1886_v58  ;;  %v1883_v42 = vsel %vm1284_vm15, %v20870_v59, 0.0  ;;  %v1797_v57 = vmul.f32 0.125, %v20797_v50  ;;  %v1798_v58 = vmul.f32 0.125, %v20795_v23  ;;  %v1851_v50 = vsub.f32 %v20779_v25, %v1825_v47 }
 0x436   : >> { %1884 = vadd.xlane.f32.xlu0 %v1883_v42  ;;  %16918 = vmatprep.subr.bf16.mxu0 %v16917_v22  ;;  %v1835_v51 = vsel %vm1284_vm15, %v20895_v56, -inf }
 0x437   : >> { %v20876_v63 = vpop.eup %17706  ;;  %16920 = vmatpush3.bf16.msra.mxu0 %v16917_v22  ;;  %v20907_v28 = vadd.f32 %v1797_v57, %v20375_v10  ;;  %v1838_v22 = vsel %vm1284_vm15, %v20900_v45, -inf  ;;  %v20912_v42 = vadd.f32 %v1798_v58, %v20379_v11 }
 0x438   : >> { %v20878_v29 = vpop.eup %17708  ;;  %16922 = vmatprep.subr.bf16.mxu0 %v16921_v55  ;;  %v1892_v54 = vsel %vm1284_vm15, %v20876_v63, 0.0 }
 0x439   : >> { %1893 = vadd.xlane.f32.xlu1 %v1892_v54  ;;  %v1889_v18 = vsel %vm1284_vm15, %v20878_v29, 0.0  ;;  %v1841_v38 = vsel %vm1284_vm15, %v20907_v28, -inf  ;;  %v1844_v23 = vsel %vm1284_vm15, %v20912_v42, -inf  ;;  %v1867_v54 = vmul.f32 1.442695, %v1851_v50 }
 0x43a   : >> { %1890 = vadd.xlane.f32.xlu0 %v1889_v18 }
 0x43b   : >> { %v20885_v43 = vpop.eup %17710  ;;  %17712 = vpow2.f32 %v1867_v54 }
 0x43c   : >> { %v1898_v0 = vsel %vm1284_vm15, %v20885_v43, 0.0 }
 0x43d   : >> { %1899 = vadd.xlane.f32.xlu1 %v1898_v0 }
 0x441   : >> { %1833 = vmax.xlane.f32.xlu1 %v1832_v20 }
 0x445   : >> { %1836 = vmax.xlane.f32.xlu1 %v1835_v51  ;;  %v20925_v18 = vpop.eup %17712 }
 0x446   : >> { %v1895_v24 = vsel %vm1284_vm15, %v20925_v18, 0.0 }
 0x449   : >> { %1839 = vmax.xlane.f32.xlu1 %v1838_v22 }
 0x44d   : >> { %1842 = vmax.xlane.f32.xlu1 %v1841_v38 }
 0x450   : >> { %17479 = vrot.lane.b32.xlu0 %v20596_v14, %s19762_s18 }
 0x451   : >> { %1845 = vmax.xlane.f32.xlu1 %v1844_v23 }
 0x454   : >> { %17484 = vrot.lane.b32.xlu0 %v20608_v17, %s19762_s18 }
 0x458   : >> { %17489 = vrot.lane.b32.xlu0 %v20620_v34, %s19762_s18 }
 0x472   : >> { %v1362_v44 = vpop.xlane.xlu0 %1361 }
 0x473   : >> { %17714 = vrcp.f32 %v1362_v44  ;;  %v1359_v0 = vpop.xlane.xlu1 %1358 }
 0x474   : >> { %17716 = vrcp.f32 %v1359_v0 }
 0x477   : >> { %1896 = vadd.xlane.f32.xlu0 %v1895_v24  ;;  %v1368_v20 = vpop.xlane.xlu0 %1367 }
 0x478   : >> { %17718 = vrcp.f32 %v1368_v20 }
 0x47b   : >> { %v1365_v57 = vpop.xlane.xlu0 %1364 }
 0x47c   : >> { %17720 = vrcp.f32 %v1365_v57  ;;  %v1371_v51 = vpop.xlane.xlu1 %1370 }
 0x47d   : >> { %v17715_v58 = vpop.eup %17714  ;;  %17722 = vrcp.f32 %v1371_v51 }
 0x47e   : >> { %v17717_v25 = vpop.eup %17716  ;;  %v1406_v38 = vmul.f32 %v17715_v58, %v20807_v49 }
 0x47f   : >> { %v1374_v47 = vpop.xlane.xlu0 %1373  ;;  %v1405_v22 = vmul.f32 %v17717_v25, %v20809_v31 }
 0x480   : >> { %17724 = vrcp.f32 %v1374_v47  ;;  %v17475_v23 = vpop.permute.xlu1 %17474 }
 0x481   : >> { %v17477_v50 = vunpack.i.h.bf16 %v17475_v23  ;;  %v17476_v54 = vunpack.i.l.bf16 %v17475_v23  ;;  %16206 = vmatprep.mubr.msk.f32.mxu0 %vm1284_vm15, %v1405_v22 }
 0x482   : >> { %16207 = vmatmul.mubr.msk.f32.vlgmr.msra.gmra.mrb[24].mxu0 %vm1284_vm15, %v1406_v38  ;;  %v17719_v24 = vpop.eup %17718 }
 0x483   : >> { %16924 = vmatpush3.bf16.msra.mxu0 %v16921_v55  ;;  %v1380_v44 = vpop.xlane.xlu0 %1379  ;;  %v16925_v0 = vpack.c.bf16 %v17477_v50, %v17476_v54  ;;  %v1408_v51 = vmul.f32 %v17719_v24, %v20817_v46 }
 0x484   : >> { %17726 = vrcp.f32 %v1380_v44 }
 0x485   : >> { %16926 = vmatprep.subr.bf16.mxu0 %v16925_v0 }
 0x486   : >> { %v17721_v20 = vpop.eup %17720 }
 0x487   : >> { %v17723_v57 = vpop.eup %17722  ;;  %16928 = vmatpush3.bf16.msra.mxu0 %v16925_v0  ;;  %v1377_v31 = vpop.xlane.xlu0 %1376  ;;  %v1407_v49 = vmul.f32 %v17721_v20, %v20822_v2 }
 0x488   : >> { %17728 = vrcp.f32 %v1377_v31  ;;  %v1409_v58 = vmul.f32 %v17723_v57, %v20825_v27 }
 0x489   : >> { %16209 = vmatprep.mubr.msk.f32.mxu0 %vm1284_vm15, %v1407_v49 }
 0x48a   : >> { %v17725_v25 = vpop.eup %17724  ;;  %16210 = vmatmul.mubr.msk.f32.gmra.mrb[26].mxu0 %vm1284_vm15, %v1408_v51 }
 0x48b   : >> { %v1383_v55 = vpop.xlane.xlu0 %1382  ;;  %16212 = vmatprep.mubr.msk.f32.mxu0 %vm1284_vm15, %v1409_v58  ;;  %v1410_v47 = vmul.f32 %v17725_v25, %v20831_v48  ;;  %v1793_v48 = vmul.f32 0.125, %v20787_v37 }
 0x48c   : >> { %17730 = vrcp.f32 %v1383_v55 }
 0x48d   : >> { %17494 = vrot.lane.b32.xlu0 %v20632_v41, %s19762_s18  ;;  %v20951_v50 = vadd.f32 %v1793_v48, %v20355_v4 }
 0x48e   : >> { %16213 = vmatmul.mubr.msk.f32.gmra.mrb[28].mxu0 %vm1284_vm15, %v1410_v47  ;;  %v17727_v2 = vpop.eup %17726 }
 0x48f   : >> { %v1412_v27 = vmul.f32 %v17727_v2, %v20835_v1  ;;  %v1829_v54 = vsel %vm1284_vm15, %v20951_v50, -inf }
 0x492   : >> { %v17729_v46 = vpop.eup %17728 }
 0x493   : >> { %v1411_v22 = vmul.f32 %v17729_v46, %v20839_v3  ;;  %v1389_v3 = vpop.xlane.xlu0 %1388 }
 0x494   : >> { %17732 = vrcp.f32 %v1389_v3 }
 0x495   : >> { %16215 = vmatprep.mubr.msk.f32.mxu0 %vm1284_vm15, %v1411_v22 }
 0x496   : >> { %v17731_v38 = vpop.eup %17730  ;;  %16216 = vmatmul.mubr.msk.f32.gmra.mrb[30].mxu0 %vm1284_vm15, %v1412_v27 }
 0x497   : >> { %v1413_v23 = vmul.f32 %v17731_v38, %v20843_v62 }
 0x499   : >> { %16218 = vmatprep.mubr.msk.f32.mxu0 %vm1284_vm15, %v1413_v23 }
 0x49e   : >> { %v17733_v0 = vpop.eup %17732 }
 0x49f   : >> { %v1415_v20 = vmul.f32 %v17733_v0, %v20847_v60 }
 0x4ac   : >> { %1830 = vmax.xlane.f32.xlu0 %v1829_v54 }
 0x4b1   : >> { %v1386_v1 = vpop.xlane.xlu1 %1385 }
 0x4b2   : >> { %17734 = vrcp.f32 %v1386_v1 }
 0x4b5   : >> { %v1392_v44 = vpop.xlane.xlu1 %1391 }
 0x4b6   : >> { %17736 = vrcp.f32 %v1392_v44 }
 0x4bc   : >> { %v17735_v24 = vpop.eup %17734 }
 0x4bd   : >> { %v1414_v62 = vmul.f32 %v17735_v24, %v20855_v40 }
 0x4bf   : >> { %16219 = vmatmul.mubr.msk.f32.gmra.mrb[32].mxu0 %vm1284_vm15, %v1414_v62 }
 0x4c0   : >> { %v17737_v57 = vpop.eup %17736  ;;  %16221 = vmatprep.mubr.msk.f32.mxu0 %vm1284_vm15, %v1415_v20 }
 0x4c1   : >> { %v1416_v49 = vmul.f32 %v17737_v57, %v20861_v61 }
 0x4c2   : >> { %v1888_v37 = vpop.xlane.xlu1 %1887 }
 0x4c3   : >> { %v1885_v31 = vpop.xlane.xlu0 %1884  ;;  %16222 = vmatmul.mubr.msk.f32.gmra.mrb[34].mxu0 %vm1284_vm15, %v1416_v49 }
 0x4c4   : >> { %17738 = vrcp.f32 %v1885_v31 }
 0x4c6   : >> { %v1894_v51 = vpop.xlane.xlu1 %1893 }
 0x4c7   : >> { %v1891_v58 = vpop.xlane.xlu0 %1890 }
 0x4ca   : >> { %v1900_v25 = vpop.xlane.xlu1 %1899 }
 0x4cb   : >> { %v17480_v55 = vpop.permute.xlu0 %17479 }
 0x4cc   : >> { %v17482_v47 = vunpack.i.h.bf16 %v17480_v55  ;;  %v17481_v40 = vunpack.i.l.bf16 %v17480_v55 }
 0x4ce   : >> { %v17739_v2 = vpop.eup %17738  ;;  %v1834_v60 = vpop.xlane.xlu1 %1833  ;;  %v16929_v46 = vpack.c.bf16 %v17482_v47, %v17481_v40 }
 0x4cf   : >> { %v1854_v22 = vsub.f32 %v20888_v30, %v1834_v60  ;;  %v17485_v27 = vpop.permute.xlu0 %17484  ;;  %v1931_v38 = vmul.f32 %v17739_v2, %v20870_v59 }
 0x4d0   : >> { %v17487_v23 = vunpack.i.h.bf16 %v17485_v27  ;;  %v17486_v48 = vunpack.i.l.bf16 %v17485_v27  ;;  %16930 = vmatprep.subr.bf16.mxu0 %v16929_v46 }
 0x4d1   : >> { %v1873_v61 = vmul.f32 1.442695, %v1854_v22  ;;  %16932 = vmatpush3.bf16.msra.mxu0 %v16929_v46  ;;  %16268 = vmatprep.mubr.msk.f32.mxu0 %vm1284_vm15, %v1931_v38 }
 0x4d2   : >> { %v20964_v54 = vpop.xlane.xlu1 %1836  ;;  %v16933_v3 = vpack.c.bf16 %v17487_v23, %v17486_v48 }
 0x4d3   : >> { %17740 = vpow2.f32 %v1873_v61  ;;  %v17490_v1 = vpop.permute.xlu0 %17489 }
 0x4d4   : >> { %v17492_v44 = vunpack.i.h.bf16 %v17490_v1  ;;  %v17491_v0 = vunpack.i.l.bf16 %v17490_v1  ;;  %16934 = vmatprep.subr.bf16.mxu0 %v16933_v3  ;;  %v1855_v1 = vsub.f32 %v20895_v56, %v20964_v54 }
 0x4d5   : >> { %16936 = vmatpush3.bf16.msra.mxu0 %v16933_v3 }
 0x4d6   : >> { %v1840_v30 = vpop.xlane.xlu1 %1839  ;;  %v16937_v24 = vpack.c.bf16 %v17492_v44, %v17491_v0  ;;  %v1875_v0 = vmul.f32 1.442695, %v1855_v1 }
 0x4d7   : >> { %v1856_v59 = vsub.f32 %v20900_v45, %v1840_v30 }
 0x4d8   : >> { %16938 = vmatprep.subr.bf16.mxu0 %v16937_v24 }
 0x4d9   : >> { %v1877_v62 = vmul.f32 1.442695, %v1856_v59  ;;  %16940 = vmatpush3.bf16.msra.mxu0 %v16937_v24 }
 0x4da   : >> { %v1843_v20 = vpop.xlane.xlu1 %1842 }
 0x4db   : >> { %17742 = vpow2.f32 %v1877_v62 }
 0x4dd   : >> { %v20967_v57 = vpop.eup %17740 }
 0x4de   : >> { %v1846_v31 = vpop.xlane.xlu1 %1845  ;;  %v1904_v49 = vsel %vm1284_vm15, %v20967_v57, 0.0 }
 0x4df   : >> { %v1858_v55 = vsub.f32 %v20912_v42, %v1846_v31  ;;  %1905 = vadd.xlane.f32.xlu1 %v1904_v49 }
 0x4e1   : >> { %v1881_v47 = vmul.f32 1.442695, %v1858_v55 }
 0x4e3   : >> { %17744 = vpow2.f32 %v1881_v47 }
 0x4e4   : >> { %17746 = vrcp.f32 %v1888_v37 }
 0x4e5   : >> { %v20972_v40 = vpop.eup %17742  ;;  %17748 = vrcp.f32 %v1891_v58 }
 0x4e6   : >> { %v1910_v45 = vsel %vm1284_vm15, %v20972_v40, 0.0  ;;  %17750 = vrcp.f32 %v1894_v51 }
 0x4e7   : >> { %1911 = vadd.xlane.f32.xlu0 %v1910_v45 }
 0x4ed   : >> { %v20976_v2 = vpop.eup %17744 }
 0x4ee   : >> { %v1916_v60 = vsel %vm1284_vm15, %v20976_v2, 0.0  ;;  %v17747_v23 = vpop.eup %17746 }
 0x4ef   : >> { %1917 = vadd.xlane.f32.xlu0 %v1916_v60  ;;  %v17749_v48 = vpop.eup %17748  ;;  %v1932_v37 = vmul.f32 %v17747_v23, %v20868_v53 }
 0x4f0   : >> { %v17751_v51 = vpop.eup %17750  ;;  %v1933_v58 = vmul.f32 %v17749_v48, %v20878_v29 }
 0x504   : >> { %v1897_v46 = vpop.xlane.xlu0 %1896 }
 0x505   : >> { %2464 = vrot.lane.b32.xlu0 %v20562_v26, %s19763_s16  ;;  %17752 = vrcp.f32 %v1897_v46 }
 0x506   : >> { %17754 = vrcp.f32 %v1900_v25  ;;  %v1934_v25 = vmul.f32 %v17751_v51, %v20876_v63 }
 0x508   : >> { %v17495_v42 = vpop.permute.xlu0 %17494 }
 0x509   : >> { %v17497_v22 = vunpack.i.h.bf16 %v17495_v42  ;;  %v17496_v27 = vunpack.i.l.bf16 %v17495_v42  ;;  %2470 = vrot.lane.b32.xlu0 %v20588_v13, %s19763_s16 }
 0x50b   : >> { %v16941_v38 = vpack.c.bf16 %v17497_v22, %v17496_v27 }
 0x50d   : >> { %2474 = vrot.lane.b32.xlu0 %v20600_v16, %s19763_s16  ;;  %16942 = vmatprep.subr.bf16.mxu0 %v16941_v38 }
 0x50e   : >> { %16944 = vmatpush3.bf16.msra.mxu0 %v16941_v38 }
 0x50f   : >> { %16286 = vmatprep.subr.mxu0 %v23119_v19  ;;  %v17753_v61 = vpop.eup %17752 }
 0x510   : >> { %v17755_v53 = vpop.eup %17754  ;;  %v1935_v3 = vmul.f32 %v17753_v61, %v20925_v18  ;;  %v1857_v18 = vsub.f32 %v20907_v28, %v1843_v20 }
 0x511   : >> { %2478 = vrot.lane.b32.xlu0 %v20612_v33, %s19763_s16  ;;  %16269 = vmatmul.mubr.msk.f32.vlgmr.msra.gmra.mrb[36].mxu0 %vm1284_vm15, %v1932_v37  ;;  %v1936_v29 = vmul.f32 %v17755_v53, %v20885_v43 }
 0x512   : >> { %16271 = vmatprep.mubr.msk.f32.mxu0 %vm1284_vm15, %v1933_v58  ;;  %16287 = vmatpush3.msra.mxu0 %v23119_v19  ;;  %v1879_v24 = vmul.f32 1.442695, %v1857_v18 }
 0x513   : >> { %16326 = vmatprep.subr.mxu0 %v20685_v52 }
 0x515   : >> { %2482 = vrot.lane.b32.xlu0 %v20624_v36, %s19763_s16  ;;  %16272 = vmatmul.mubr.msk.f32.gmra.mrb[38].mxu0 %vm1284_vm15, %v1934_v25 }
 0x516   : >> { %16274 = vmatprep.mubr.msk.f32.mxu0 %vm1284_vm15, %v1935_v3 }
 0x519   : >> { %16275 = vmatmul.mubr.msk.f32.gmra.mrb[40].mxu0 %vm1284_vm15, %v1936_v29 }
 0x539   : >> { %v1831_v44 = vpop.xlane.xlu0 %1830 }
 0x53a   : >> { %v1853_v63 = vsub.f32 %v20951_v50, %v1831_v44 }
 0x53c   : >> { %v1871_v30 = vmul.f32 1.442695, %v1853_v63 }
 0x53e   : >> { %17756 = vpow2.f32 %v1871_v30 }
 0x53f   : >> { %17758 = vpow2.f32 %v1875_v0 }
 0x540   : >> { %17760 = vpow2.f32 %v1879_v24 }
 0x548   : >> { %v17757_v59 = vpop.eup %17756 }
 0x549   : >> { %v1901_v62 = vsel %vm1284_vm15, %v17757_v59, 0.0  ;;  %v17759_v43 = vpop.eup %17758 }
 0x54a   : >> { %1902 = vadd.xlane.f32.xlu1 %v1901_v62  ;;  %v1907_v31 = vsel %vm1284_vm15, %v17759_v43, 0.0  ;;  %v17761_v49 = vpop.eup %17760 }
 0x54b   : >> { %v1913_v56 = vsel %vm1284_vm15, %v17761_v49, 0.0 }
 0x54e   : >> { %1908 = vadd.xlane.f32.xlu1 %v1907_v31 }
 0x552   : >> { %1914 = vadd.xlane.f32.xlu1 %v1913_v56 }
 0x555   : >> { %v21010_v50 = vpop.f32.mrb[24].mxu0 }
 0x556   : >> { %v21012_v28 = vpop.f32.mrb[25].mxu0 }
 0x55d   : >> { %v21014_v54 = vpop.f32.mrb[26].mxu0 }
 0x55e   : >> { %v21016_v20 = vpop.f32.mrb[27].mxu0 }
 0x561   : >> { %v21020_v55 = vpop.f32.mrb[28].mxu0 }
 0x562   : >> { %v21022_v47 = vpop.f32.mrb[29].mxu0 }
 0x563   : >> { %2462 = vrot.lane.b32.xlu1 %v20564_v39, %s19763_s16 }
 0x567   : >> { %2466 = vrot.lane.b32.xlu1 %v20576_v21, %s19763_s16 }
 0x569   : >> { %v21028_v45 = vpop.f32.mrb[30].mxu0 }
 0x56a   : >> { %v21030_v60 = vpop.f32.mrb[31].mxu0 }
 0x56b   : >> { %2468 = vrot.lane.b32.xlu1 %v20574_v6, %s19763_s16 }
 0x56c   : >> { %v1906_v38 = vpop.xlane.xlu1 %1905 }
 0x56d   : >> { %17762 = vrcp.f32 %v1906_v38 }
 0x56f   : >> { %2472 = vrot.lane.b32.xlu1 %v20586_v12, %s19763_s16 }
 0x573   : >> { %2476 = vrot.lane.b32.xlu1 %v20598_v15, %s19763_s16 }
 0x574   : >> { %v1912_v48 = vpop.xlane.xlu0 %1911 }
 0x577   : >> { %2480 = vrot.lane.b32.xlu1 %v20610_v32, %s19763_s16  ;;  %v17763_v61 = vpop.eup %17762 }
 0x578   : >> { %v1938_v29 = vmul.f32 %v17763_v61, %v20967_v57 }
 0x57b   : >> { %2484 = vrot.lane.b32.xlu1 %v20622_v35, %s19763_s16 }
 0x57c   : >> { %v1918_v51 = vpop.xlane.xlu0 %1917 }
 0x592   : >> { %v21040_v46 = vpop.f32.mrb[32].mxu0 }
 0x593   : >> { %v21042_v42 = vpop.f32.mrb[33].mxu0 }
 0x596   : >> { %v21044_v22 = vpop.f32.mrb[34].mxu0 }
 0x597   : >> { %v21046_v27 = vpop.f32.mrb[35].mxu0 }
 0x5d7   : >> { %v1903_v23 = vpop.xlane.xlu1 %1902 }
 0x5d8   : >> { %17764 = vrcp.f32 %v1903_v23 }
 0x5d9   : >> { %17766 = vrcp.f32 %v1912_v48 }
 0x5db   : >> { %v1909_v37 = vpop.xlane.xlu1 %1908 }
 0x5dc   : >> { %17768 = vrcp.f32 %v1909_v37 }
 0x5dd   : >> { %17770 = vrcp.f32 %v1918_v51 }
 0x5df   : >> { %v1915_v58 = vpop.xlane.xlu1 %1914 }
 0x5e0   : >> { %17772 = vrcp.f32 %v1915_v58 }
 0x5e2   : >> { %v17765_v25 = vpop.eup %17764 }
 0x5e3   : >> { %v1937_v53 = vmul.f32 %v17765_v25, %v17757_v59  ;;  %v17767_v1 = vpop.eup %17766  ;;  %v2463_v38 = vpop.permute.xlu1 %2462 }
 0x5e4   : >> { %v16270_v3 = vpop.f32.mrb[36].mxu0  ;;  %v1940_v30 = vmul.f32 %v17767_v1, %v20972_v40  ;;  %v23183_v1 = vld [vmem:[#allocation66_spill] sm:$0xff] }
 0x5e5   : >> { %v2081_v44 = vpop.f32.mrb[37].mxu0  ;;  %16277 = vmatprep.mubr.msk.f32.mxu0 %vm1284_vm15, %v1937_v53 }
 0x5e6   : >> { %v17769_v63 = vpop.eup %17768  ;;  %16278 = vmatmul.mubr.msk.f32.gmra.mrb[42].mxu0 %vm1284_vm15, %v1938_v29 }
 0x5e7   : >> { %v1939_v0 = vmul.f32 %v17769_v63, %v17759_v43  ;;  %v17771_v24 = vpop.eup %17770  ;;  %v2467_v40 = vpop.permute.xlu1 %2466  ;;  %v23184_v63 = vld [vmem:[#allocation68_spill] sm:$0xff] }
 0x5e8   : >> { %v16273_v18 = vpop.f32.mrb[38].mxu0  ;;  %v1942_v56 = vmul.f32 %v17771_v24, %v20976_v2  ;;  %v2465_v43 = vpop.permute.xlu0 %2464 }
 0x5e9   : >> { %v2091_v62 = vpop.f32.mrb[39].mxu0  ;;  %16280 = vmatprep.mubr.msk.f32.mxu0 %vm1284_vm15, %v1939_v0 }
 0x5ea   : >> { %v17773_v31 = vpop.eup %17772  ;;  %16281 = vmatmul.mubr.msk.f32.gmra.mrb[44].mxu0 %vm1284_vm15, %v1940_v30 }
 0x5eb   : >> { %v1941_v59 = vmul.f32 %v17773_v31, %v17761_v49  ;;  %v2469_v2 = vpop.permute.xlu1 %2468 }
 0x5ec   : >> { %v16276_v57 = vpop.f32.mrb[40].mxu0  ;;  %v2471_v49 = vpop.permute.xlu0 %2470 }
 0x5ed   : >> { %v2101_v23 = vpop.f32.mrb[41].mxu0  ;;  %16283 = vmatprep.mubr.msk.f32.mxu0 %vm1284_vm15, %v1941_v59 }
 0x5ee   : >> { %16284 = vmatmul.mubr.msk.f32.gmra.mrb[46].mxu0 %vm1284_vm15, %v1942_v56 }
 0x5ef   : >> { %16288 = vmatprep.mubr.msk.f32.mxu0 %vm1098_vm14, %v2081_v44  ;;  %v2473_v48 = vpop.permute.xlu1 %2472 }
 0x5f0   : >> { %v2475_v37 = vpop.permute.xlu0 %2474 }
 0x5f2   : >> { %16289 = vmatmul.mubr.msk.f32.vlgmr.msra.gmra.mrb[48].mxu0 %vm1098_vm14, %v16270_v3 }
 0x5f3   : >> { %16327 = vmatpush3.msra.mxu0 %v20685_v52  ;;  %16291 = vmatprep.mubr.msk.f32.mxu0 %vm1098_vm14, %v2091_v62  ;;  %v2477_v52 = vpop.permute.xlu1 %2476 }
 0x5f4   : >> { %v2479_v51 = vpop.permute.xlu0 %2478 }
 0x5f6   : >> { %16292 = vmatmul.mubr.msk.f32.gmra.mrb[50].mxu0 %vm1098_vm14, %v16273_v18 }
 0x5f7   : >> { %16294 = vmatprep.mubr.msk.f32.mxu0 %vm1098_vm14, %v2101_v23  ;;  %v2481_v58 = vpop.permute.xlu1 %2480 }
 0x5f8   : >> { %v2483_v61 = vpop.permute.xlu0 %2482 }
 0x5fa   : >> { %16295 = vmatmul.mubr.msk.f32.gmra.mrb[52].mxu0 %vm1098_vm14, %v16276_v57 }
 0x5fb   : >> { %16328 = vmatprep.mubr.msk.f32.mxu0 %vm1098_vm14, %v2463_v38  ;;  %v2485_v25 = vpop.permute.xlu1 %2484  ;;  %v23191_v38 = vld [vmem:[#allocation51_spill] sm:$0xff] }
 0x5fe   : >> { %16329 = vmatmul.mubr.msk.f32.vlgmr.msra.gmra.mrb[54].mxu0 %vm1098_vm14, %v2465_v43 }
 0x5ff   : >> { %16331 = vmatprep.mubr.msk.f32.mxu0 %vm1098_vm14, %v2467_v40 }
 0x602   : >> { %16332 = vmatmul.mubr.msk.f32.gmra.mrb[56].mxu0 %vm1098_vm14, %v2469_v2 }
 0x603   : >> { %16334 = vmatprep.mubr.msk.f32.mxu0 %vm1098_vm14, %v2471_v49 }
 0x606   : >> { %16335 = vmatmul.mubr.msk.f32.gmra.mrb[58].mxu0 %vm1098_vm14, %v2473_v48 }
 0x607   : >> { %16337 = vmatprep.mubr.msk.f32.mxu0 %vm1098_vm14, %v2475_v37 }
 0x60a   : >> { %16338 = vmatmul.mubr.msk.f32.gmra.mrb[60].mxu0 %vm1098_vm14, %v2477_v52  ;;  %v23194_v52 = vld [vmem:[#allocation53_spill] sm:$0xff] }
 0x60b   : >> { %16340 = vmatprep.mubr.msk.f32.mxu0 %vm1098_vm14, %v2479_v51 }
 0x60e   : >> { %16341 = vmatmul.mubr.msk.f32.gmra.mrb[62].mxu0 %vm1098_vm14, %v2481_v58 }
 0x60f   : >> { %16343 = vmatprep.mubr.msk.f32.mxu0 %vm1098_vm14, %v2483_v61 }
 0x612   : >> { %16344 = vmatmul.mubr.msk.f32.gmra.mrb[64].mxu0 %vm1098_vm14, %v2485_v25 }
 0x6b9   : >> { %v16279_v53 = vpop.f32.mrb[42].mxu0 }
 0x6ba   : >> { %v2111_v3 = vpop.f32.mrb[43].mxu0 }
 0x6bb   : >> { %16297 = vmatprep.mubr.msk.f32.mxu1 %vm1098_vm14, %v2111_v3 }
 0x6bc   : >> { %16298 = vmatmul.mubr.msk.f32.vlgmr.msra.gmra.mrb[20].mxu1 %vm1098_vm14, %v16279_v53 }
 0x6bd   : >> { %v16282_v29 = vpop.f32.mrb[44].mxu0  ;;  %16307 = vmatpush3.msra.mxu1 %v23183_v1 }
 0x6be   : >> { %v2121_v44 = vpop.f32.mrb[45].mxu0  ;;  %16388 = vmatprep.subr.mxu1 %v23184_v63 }
 0x6bf   : >> { %16300 = vmatprep.mubr.msk.f32.mxu1 %vm1098_vm14, %v2121_v44 }
 0x6c0   : >> { %16301 = vmatmul.mubr.msk.f32.gmra.mrb[22].mxu1 %vm1098_vm14, %v16282_v29 }
 0x6c1   : >> { %v16285_v0 = vpop.f32.mrb[46].mxu0 }
 0x6c2   : >> { %v2131_v18 = vpop.f32.mrb[47].mxu0 }
 0x6c3   : >> { %16303 = vmatprep.mubr.msk.f32.mxu1 %vm1098_vm14, %v2131_v18 }
 0x6c4   : >> { %16304 = vmatmul.mubr.msk.f32.gmra.mrb[24].mxu1 %vm1098_vm14, %v16285_v0 }
 0x6c5   : >> { %v21084_v30 = vpop.f32.mrb[48].mxu0  ;;  %16308 = vmatprep.mubr.msk.f32.mxu1 %vm1098_vm14, %v21012_v28 }
 0x6c6   : >> { %23185 = vst [vmem:[#allocation103_spill] sm:$0xff] %v21084_v30  ;;  %v21088_v24 = vpop.f32.mrb[49].mxu0 }
 0x6c7   : >> { %23186 = vst [vmem:[#allocation104_spill] sm:$0xff] %v21088_v24 }
 0x6c8   : >> { %16309 = vmatmul.mubr.msk.f32.vlgmr.msra.gmra.mrb[26].mxu1 %vm1098_vm14, %v21010_v50 }
 0x6c9   : >> { %v21092_v62 = vpop.f32.mrb[50].mxu0  ;;  %16311 = vmatprep.mubr.msk.f32.mxu1 %vm1098_vm14, %v21016_v20  ;;  %16389 = vmatpush3.msra.mxu1 %v23184_v63 }
 0x6ca   : >> { %23187 = vst [vmem:[#allocation105_spill] sm:$0xff] %v21092_v62  ;;  %v21097_v31 = vpop.f32.mrb[51].mxu0 }
 0x6cb   : >> { %23188 = vst [vmem:[#allocation106_spill] sm:$0xff] %v21097_v31 }
 0x6cc   : >> { %16312 = vmatmul.mubr.msk.f32.gmra.mrb[28].mxu1 %vm1098_vm14, %v21014_v54  ;;  %v23192_v54 = vld [vmem:[#allocation50_spill] sm:$0xff] }
 0x6cd   : >> { %v21101_v59 = vpop.f32.mrb[52].mxu0  ;;  %16314 = vmatprep.mubr.msk.f32.mxu1 %vm1098_vm14, %v21022_v47 }
 0x6ce   : >> { %23189 = vst [vmem:[#allocation107_spill] sm:$0xff] %v21101_v59  ;;  %v21105_v28 = vpop.f32.mrb[53].mxu0 }
 0x6cf   : >> { %23190 = vst [vmem:[#allocation108_spill] sm:$0xff] %v21105_v28 }
 0x6d0   : >> { %16315 = vmatmul.mubr.msk.f32.gmra.mrb[30].mxu1 %vm1098_vm14, %v21020_v55 }
 0x6d1   : >> { %16317 = vmatprep.mubr.msk.f32.mxu1 %vm1098_vm14, %v21030_v60  ;;  %v16330_v50 = vpop.f32.mrb[54].mxu0 }
 0x6d2   : >> { %v2636_v20 = vmul.f32 0.125, %v16330_v50  ;;  %v2576_v57 = vpop.f32.mrb[55].mxu0 }
 0x6d3   : >> { %v2635_v56 = vmul.f32 0.125, %v2576_v57 }
 0x6d4   : >> { %v21112_v23 = vadd.f32 %v2636_v20, %v23191_v38  ;;  %16318 = vmatmul.mubr.msk.f32.gmra.mrb[20].mxu1 %vm1098_vm14, %v21028_v45  ;;  %v23193_v45 = vld [vmem:[#allocation52_spill] sm:$0xff] }
 0x6d5   : >> { %v21117_v47 = vadd.f32 %v2635_v56, %v23192_v54  ;;  %16320 = vmatprep.mubr.msk.f32.mxu1 %vm1098_vm14, %v21042_v42  ;;  %v16333_v55 = vpop.f32.mrb[56].mxu0 }
 0x6d6   : >> { %v2586_v40 = vpop.f32.mrb[57].mxu0  ;;  %v2662_v60 = vsel %vm1284_vm15, %v21112_v23, -inf  ;;  %v2638_v43 = vmul.f32 0.125, %v16333_v55 }
 0x6d7   : >> { %v2637_v2 = vmul.f32 0.125, %v2586_v40  ;;  %2663 = vmax.xlane.f32.xlu1 %v2662_v60  ;;  %v2659_v49 = vsel %vm1284_vm15, %v21117_v47, -inf }
 0x6d8   : >> { %16321 = vmatmul.mubr.msk.f32.gmra.mrb[22].mxu1 %vm1098_vm14, %v21040_v46  ;;  %2660 = vmax.xlane.f32.xlu0 %v2659_v49  ;;  %v21133_v51 = vadd.f32 %v2638_v43, %v23194_v52  ;;  %v23195_v46 = vld [vmem:[#allocation56_spill] sm:$0xff] }
 0x6d9   : >> { %v21128_v48 = vadd.f32 %v2637_v2, %v23193_v45  ;;  %16323 = vmatprep.mubr.msk.f32.mxu1 %vm1098_vm14, %v21046_v27  ;;  %v16336_v42 = vpop.f32.mrb[58].mxu0  ;;  %v23196_v27 = vld [vmem:[#allocation57_spill] sm:$0xff] }
 0x6da   : >> { %v2596_v37 = vpop.f32.mrb[59].mxu0  ;;  %v2640_v58 = vmul.f32 0.125, %v16336_v42  ;;  %v2668_v18 = vsel %vm1284_vm15, %v21133_v51, -inf }
 0x6db   : >> { %v2639_v61 = vmul.f32 0.125, %v2596_v37  ;;  %v2665_v25 = vsel %vm1284_vm15, %v21128_v48, -inf }
 0x6dc   : >> { %16324 = vmatmul.mubr.msk.f32.gmra.mrb[24].mxu1 %vm1098_vm14, %v21044_v22  ;;  %2666 = vmax.xlane.f32.xlu0 %v2665_v25  ;;  %v21141_v44 = vadd.f32 %v2640_v58, %v23196_v27 }
 0x6dd   : >> { %v2651_v53 = vadd.f32 %v2639_v61, %v23195_v46  ;;  %v16339_v3 = vpop.f32.mrb[60].mxu0 }
 0x6de   : >> { %v2642_v29 = vmul.f32 0.125, %v16339_v3  ;;  %v2606_v1 = vpop.f32.mrb[61].mxu0  ;;  %v2674_v60 = vsel %vm1284_vm15, %v21141_v44, -inf }
 0x6df   : >> { %v2641_v0 = vmul.f32 0.125, %v2606_v1  ;;  %v2671_v50 = vsel %vm1284_vm15, %v2651_v53, -inf }
 0x6e0   : >> { %2669 = vmax.xlane.f32.xlu0 %v2668_v18  ;;  %2672 = vmax.xlane.f32.xlu1 %v2671_v50  ;;  %v21150_v57 = vadd.f32 %v2642_v29, %v20359_v5 }
 0x6e1   : >> { %v21147_v20 = vadd.f32 %v2641_v0, %v20355_v4  ;;  %v16342_v22 = vpop.f32.mrb[62].mxu0 }
 0x6e2   : >> { %v2616_v56 = vpop.f32.mrb[63].mxu0  ;;  %v2644_v55 = vmul.f32 0.125, %v16342_v22  ;;  %v2680_v37 = vsel %vm1284_vm15, %v21150_v57, -inf  ;;  %v23197_v22 = vld [vmem:[#allocation90_spill] sm:$0xff] }
 0x6e3   : >> { %v2643_v40 = vmul.f32 0.125, %v2616_v56  ;;  %v2677_v43 = vsel %vm1284_vm15, %v21147_v20, -inf }
 0x6e4   : >> { %2675 = vmax.xlane.f32.xlu0 %v2674_v60  ;;  %2678 = vmax.xlane.f32.xlu1 %v2677_v43  ;;  %v21162_v58 = vadd.f32 %v2644_v55, %v20371_v9 }
 0x6e5   : >> { %v21157_v2 = vadd.f32 %v2643_v40, %v20367_v8  ;;  %v16345_v49 = vpop.f32.mrb[64].mxu0 }
 0x6e6   : >> { %v2626_v42 = vpop.f32.mrb[65].mxu0  ;;  %v2646_v61 = vmul.f32 0.125, %v16345_v49  ;;  %v2686_v0 = vsel %vm1284_vm15, %v21162_v58, -inf }
 0x6e7   : >> { %v2645_v25 = vmul.f32 0.125, %v2626_v42  ;;  %v2683_v3 = vsel %vm1284_vm15, %v21157_v2, -inf }
 0x6e8   : >> { %2681 = vmax.xlane.f32.xlu0 %v2680_v37  ;;  %2684 = vmax.xlane.f32.xlu1 %v2683_v3  ;;  %v21170_v1 = vadd.f32 %v2646_v61, %v20379_v11 }
 0x6e9   : >> { %v21167_v29 = vadd.f32 %v2645_v25, %v20375_v10 }
 0x6ea   : >> { %v2692_v50 = vsel %vm1284_vm15, %v21170_v1, -inf }
 0x6eb   : >> { %v2689_v18 = vsel %vm1284_vm15, %v21167_v29, -inf }
 0x6ec   : >> { %2687 = vmax.xlane.f32.xlu0 %v2686_v0  ;;  %2690 = vmax.xlane.f32.xlu1 %v2689_v18 }
 0x6f0   : >> { %2693 = vmax.xlane.f32.xlu0 %v2692_v50 }
 0x6fd   : >> { %17499 = vrot.lane.b32.xlu1 %v23197_v22, %s19764_s2 }
 0x701   : >> { %17509 = vrot.lane.b32.xlu1 %v20596_v14, %s19764_s2 }
 0x705   : >> { %17514 = vrot.lane.b32.xlu1 %v20608_v17, %s19764_s2 }
 0x706   : >> { %17504 = vrot.lane.b32.xlu0 %v20584_v7, %s19764_s2 }
 0x709   : >> { %17524 = vrot.lane.b32.xlu1 %v20632_v41, %s19764_s2 }
 0x70a   : >> { %17519 = vrot.lane.b32.xlu0 %v20620_v34, %s19764_s2  ;;  %s23288_s2 = sld [smem:[#allocation124_spill]] (%p777_p13) }
 0x764   : >> { %v2664_v56 = vpop.xlane.xlu1 %2663 }
 0x765   : >> { %v2696_v55 = vsub.f32 %v21112_v23, %v2664_v56  ;;  %v2661_v40 = vpop.xlane.xlu0 %2660 }
 0x766   : >> { %v2695_v60 = vsub.f32 %v21117_v47, %v2661_v40 }
 0x767   : >> { %v2709_v43 = vmul.f32 1.442695, %v2696_v55 }
 0x768   : >> { %v2707_v49 = vmul.f32 1.442695, %v2695_v60 }
 0x769   : >> { %17774 = vpow2.f32 %v2709_v43  ;;  %v2667_v42 = vpop.xlane.xlu0 %2666 }
 0x76a   : >> { %17776 = vpow2.f32 %v2707_v49  ;;  %v2697_v37 = vsub.f32 %v21128_v48, %v2667_v42 }
 0x76c   : >> { %v2711_v18 = vmul.f32 1.442695, %v2697_v37 }
 0x76d   : >> { %v2670_v61 = vpop.xlane.xlu0 %2669  ;;  %v2673_v25 = vpop.xlane.xlu1 %2672 }
 0x76e   : >> { %v2698_v3 = vsub.f32 %v21133_v51, %v2670_v61  ;;  %v2699_v0 = vsub.f32 %v2651_v53, %v2673_v25 }
 0x770   : >> { %v2713_v50 = vmul.f32 1.442695, %v2698_v3  ;;  %v2715_v19 = vmul.f32 1.442695, %v2699_v0 }
 0x771   : >> { %v2676_v63 = vpop.xlane.xlu0 %2675  ;;  %v2679_v23 = vpop.xlane.xlu1 %2678 }
 0x772   : >> { %17778 = vpow2.f32 %v2713_v50  ;;  %v2700_v47 = vsub.f32 %v21141_v44, %v2676_v63  ;;  %v2701_v63 = vsub.f32 %v21147_v20, %v2679_v23 }
 0x773   : >> { %v21189_v56 = vpop.eup %17774  ;;  %17780 = vpow2.f32 %v2715_v19 }
 0x774   : >> { %v21191_v55 = vpop.eup %17776  ;;  %17782 = vpow2.f32 %v2711_v18  ;;  %v2717_v48 = vmul.f32 1.442695, %v2700_v47  ;;  %v2734_v40 = vsel %vm1284_vm15, %v21189_v56, 0.0  ;;  %v2719_v37 = vmul.f32 1.442695, %v2701_v63 }
 0x775   : >> { %v2682_v51 = vpop.xlane.xlu0 %2681  ;;  %v2685_v53 = vpop.xlane.xlu1 %2684  ;;  %2735 = vadd.xlane.f32.xlu0 %v2734_v40  ;;  %v2731_v60 = vsel %vm1284_vm15, %v21191_v55, 0.0 }
 0x776   : >> { %v2702_v43 = vsub.f32 %v21150_v57, %v2682_v51  ;;  %2732 = vadd.xlane.f32.xlu1 %v2731_v60  ;;  %17784 = vpow2.f32 %v2717_v48  ;;  %v2703_v25 = vsub.f32 %v21157_v2, %v2685_v53 }
 0x778   : >> { %v2721_v19 = vmul.f32 1.442695, %v2702_v43  ;;  %v2723_v48 = vmul.f32 1.442695, %v2703_v25 }
 0x779   : >> { %v2688_v44 = vpop.xlane.xlu0 %2687  ;;  %v2691_v49 = vpop.xlane.xlu1 %2690 }
 0x77a   : >> { %v2704_v42 = vsub.f32 %v21162_v58, %v2688_v44  ;;  %17786 = vpow2.f32 %v2721_v19  ;;  %v2705_v40 = vsub.f32 %v21167_v29, %v2691_v49 }
 0x77c   : >> { %v21200_v61 = vpop.eup %17778  ;;  %v2725_v3 = vmul.f32 1.442695, %v2704_v42  ;;  %v2727_v29 = vmul.f32 1.442695, %v2705_v40 }
 0x77d   : >> { %v21203_v0 = vpop.eup %17780  ;;  %v2694_v18 = vpop.xlane.xlu0 %2693  ;;  %v2740_v20 = vsel %vm1284_vm15, %v21200_v61, 0.0 }
 0x77e   : >> { %v17500_v57 = vpop.permute.xlu1 %17499  ;;  %v21207_v50 = vpop.eup %17782  ;;  %17788 = vpow2.f32 %v2725_v3  ;;  %v2706_v23 = vsub.f32 %v21170_v1, %v2694_v18  ;;  %2741 = vadd.xlane.f32.xlu0 %v2740_v20  ;;  %v2743_v2 = vsel %vm1284_vm15, %v21203_v0, 0.0 }
 0x77f   : >> { %v17502_v58 = vunpack.i.h.bf16 %v17500_v57  ;;  %v17501_v47 = vunpack.i.l.bf16 %v17500_v57  ;;  %17790 = vpow2.f32 %v2719_v37  ;;  %2744 = vadd.xlane.f32.xlu1 %v2743_v2  ;;  %v2737_v63 = vsel %vm1284_vm15, %v21207_v50, 0.0 }
 0x780   : >> { %v2729_v51 = vmul.f32 1.442695, %v2706_v23  ;;  %v21215_v19 = vpop.eup %17784 }
 0x781   : >> { %v16945_v53 = vpack.c.bf16 %v17502_v58, %v17501_v47  ;;  %v17505_v60 = vpop.permute.xlu0 %17504  ;;  %v2746_v3 = vsel %vm1284_vm15, %v21215_v19, 0.0 }
 0x782   : >> { %v17510_v43 = vpop.permute.xlu1 %17509  ;;  %17792 = vpow2.f32 %v2729_v51  ;;  %v17507_v1 = vunpack.i.h.bf16 %v17505_v60  ;;  %v17506_v44 = vunpack.i.l.bf16 %v17505_v60  ;;  %2738 = vadd.xlane.f32.xlu0 %v2737_v63 }
 0x783   : >> { %v17512_v42 = vunpack.i.h.bf16 %v17510_v43  ;;  %16946 = vmatprep.subr.bf16.mxu0 %v16945_v53  ;;  %v17511_v37 = vunpack.i.l.bf16 %v17510_v43  ;;  %17794 = vpow2.f32 %v2723_v48 }
 0x784   : >> { %16948 = vmatpush3.bf16.msra.mxu0 %v16945_v53  ;;  %v16949_v49 = vpack.c.bf16 %v17507_v1, %v17506_v44  ;;  %v21219_v18 = vpop.eup %17786  ;;  %17796 = vpow2.f32 %v2727_v29 }
 0x785   : >> { %v16953_v23 = vpack.c.bf16 %v17512_v42, %v17511_v37  ;;  %v17520_v58 = vpop.permute.xlu0 %17519  ;;  %v2752_v48 = vsel %vm1284_vm15, %v21219_v18, 0.0 }
 0x786   : >> { %v17515_v25 = vpop.permute.xlu1 %17514  ;;  %2747 = vadd.xlane.f32.xlu0 %v2746_v3  ;;  %16950 = vmatprep.subr.bf16.mxu0 %v16949_v49  ;;  %v17522_v51 = vunpack.i.h.bf16 %v17520_v58  ;;  %v17521_v53 = vunpack.i.l.bf16 %v17520_v58 }
 0x787   : >> { %v17517_v57 = vunpack.i.h.bf16 %v17515_v25  ;;  %v17516_v20 = vunpack.i.l.bf16 %v17515_v25 }
 0x788   : >> { %16952 = vmatpush3.bf16.msra.mxu0 %v16949_v49  ;;  %v21221_v47 = vpop.eup %17788  ;;  %v16961_v49 = vpack.c.bf16 %v17522_v51, %v17521_v53 }
 0x789   : >> { %16954 = vmatprep.subr.bf16.mxu0 %v16953_v23  ;;  %v21223_v2 = vpop.eup %17790  ;;  %v2758_v40 = vsel %vm1284_vm15, %v21221_v47, 0.0  ;;  %v16957_v60 = vpack.c.bf16 %v17517_v57, %v17516_v20 }
 0x78a   : >> { %2753 = vadd.xlane.f32.xlu0 %v2752_v48  ;;  %2759 = vadd.xlane.f32.xlu1 %v2758_v40  ;;  %v17525_v43 = vpop.permute.xlu1 %17524  ;;  %v2749_v1 = vsel %vm1284_vm15, %v21223_v2, 0.0 }
 0x78b   : >> { %v17527_v37 = vunpack.i.h.bf16 %v17525_v43  ;;  %v17526_v29 = vunpack.i.l.bf16 %v17525_v43 }
 0x78c   : >> { %16956 = vmatpush3.bf16.msra.mxu0 %v16953_v23  ;;  %v21229_v63 = vpop.eup %17792  ;;  %v23198_v23 = vld [vmem:[#allocation98_spill] sm:$0xff] }
 0x78d   : >> { %16958 = vmatprep.subr.bf16.mxu0 %v16957_v60  ;;  %v2764_v44 = vsel %vm1284_vm15, %v21229_v63, 0.0  ;;  %v21235_v42 = vpop.eup %17794  ;;  %v16965_v57 = vpack.c.bf16 %v17527_v37, %v17526_v29  ;;  %v23199_v29 = vld [vmem:[#allocation100_spill] sm:$0xff] }
 0x78e   : >> { %2750 = vadd.xlane.f32.xlu0 %v2749_v1  ;;  %2765 = vadd.xlane.f32.xlu1 %v2764_v44  ;;  %v2755_v25 = vsel %vm1284_vm15, %v21235_v42, 0.0  ;;  %v21239_v3 = vpop.eup %17796 }
 0x78f   : >> { %v2761_v20 = vsel %vm1284_vm15, %v21239_v3, 0.0 }
 0x790   : >> { %16960 = vmatpush3.bf16.msra.mxu0 %v16957_v60 }
 0x791   : >> { %16962 = vmatprep.subr.bf16.mxu0 %v16961_v49 }
 0x792   : >> { %2756 = vadd.xlane.f32.xlu0 %v2755_v25 }
 0x794   : >> { %16964 = vmatpush3.bf16.msra.mxu0 %v16961_v49 }
 0x795   : >> { %16966 = vmatprep.subr.bf16.mxu0 %v16965_v57 }
 0x796   : >> { %2762 = vadd.xlane.f32.xlu0 %v2761_v20 }
 0x798   : >> { %16968 = vmatpush3.bf16.msra.mxu0 %v16965_v57 }
 0x799   : >> { %16408 = vmatprep.subr.mxu0 %v23198_v23 }
 0x79f   : >> { %3163 = vrot.lane.b32.xlu1 %v20562_v26, %s19765_s21 }
 0x7a3   : >> { %3165 = vrot.lane.b32.xlu1 %v20576_v21, %s19765_s21 }
 0x7a7   : >> { %3167 = vrot.lane.b32.xlu1 %v20574_v6, %s19765_s21 }
 0x7ab   : >> { %3169 = vrot.lane.b32.xlu1 %v20588_v13, %s19765_s21 }
 0x7ac   : >> { %3161 = vrot.lane.b32.xlu0 %v20564_v39, %s19765_s21 }
 0x7af   : >> { %3171 = vrot.lane.b32.xlu1 %v20586_v12, %s19765_s21 }
 0x7b0   : >> { %3173 = vrot.lane.b32.xlu0 %v20600_v16, %s19765_s21 }
 0x7b3   : >> { %3175 = vrot.lane.b32.xlu1 %v20598_v15, %s19765_s21 }
 0x7b4   : >> { %3177 = vrot.lane.b32.xlu0 %v20612_v33, %s19765_s21 }
 0x7b7   : >> { %3179 = vrot.lane.b32.xlu1 %v20610_v32, %s19765_s21 }
 0x7b8   : >> { %3181 = vrot.lane.b32.xlu0 %v20624_v36, %s19765_s21 }
 0x7bb   : >> { %3183 = vrot.lane.b32.xlu1 %v20622_v35, %s19765_s21 }
 0x7bc   : >> { %3860 = vrot.lane.b32.xlu0 %v20564_v39, %s19766_s1 }
 0x7bf   : >> { %3862 = vrot.lane.b32.xlu1 %v20562_v26, %s19766_s1 }
 0x7c0   : >> { %3864 = vrot.lane.b32.xlu0 %v20576_v21, %s19766_s1 }
 0x7c3   : >> { %3866 = vrot.lane.b32.xlu1 %v20574_v6, %s19766_s1 }
 0x7c4   : >> { %3868 = vrot.lane.b32.xlu0 %v20588_v13, %s19766_s1 }
 0x7c7   : >> { %3870 = vrot.lane.b32.xlu1 %v20586_v12, %s19766_s1 }
 0x7c8   : >> { %3872 = vrot.lane.b32.xlu0 %v20600_v16, %s19766_s1 }
 0x7cb   : >> { %3874 = vrot.lane.b32.xlu1 %v20598_v15, %s19766_s1 }
 0x7cc   : >> { %3876 = vrot.lane.b32.xlu0 %v20612_v33, %s19766_s1 }
 0x7cf   : >> { %3878 = vrot.lane.b32.xlu1 %v20610_v32, %s19766_s1 }
 0x7d0   : >> { %3880 = vrot.lane.b32.xlu0 %v20624_v36, %s19766_s1 }
 0x7d3   : >> { %3882 = vrot.lane.b32.xlu1 %v20622_v35, %s19766_s1 }
 0x7d4   : >> { %17534 = vrot.lane.b32.xlu0 %v20584_v7, %s19767_s19 }
 0x7d7   : >> { %17529 = vrot.lane.b32.xlu1 %v23197_v22, %s19767_s19 }
 0x7d8   : >> { %17549 = vrot.lane.b32.xlu0 %v20620_v34, %s19767_s19 }
 0x7db   : >> { %17539 = vrot.lane.b32.xlu1 %v20596_v14, %s19767_s19 }
 0x7dc   : >> { %4559 = vrot.lane.b32.xlu0 %v20564_v39, %s19768_s26 }
 0x7df   : >> { %17544 = vrot.lane.b32.xlu1 %v20608_v17, %s19767_s19 }
 0x7e3   : >> { %17554 = vrot.lane.b32.xlu1 %v20632_v41, %s19767_s19 }
 0x7e7   : >> { %4561 = vrot.lane.b32.xlu1 %v20562_v26, %s19768_s26 }
 0x7eb   : >> { %4563 = vrot.lane.b32.xlu1 %v20576_v21, %s19768_s26 }
 0x7ef   : >> { %4565 = vrot.lane.b32.xlu1 %v20574_v6, %s19768_s26 }
 0x7f3   : >> { %4567 = vrot.lane.b32.xlu1 %v20588_v13, %s19768_s26 }
 0x802   : >> { %v2736_v58 = vpop.xlane.xlu0 %2735 }
 0x803   : >> { %17798 = vrcp.f32 %v2736_v58  ;;  %v2733_v48 = vpop.xlane.xlu1 %2732 }
 0x804   : >> { %17800 = vrcp.f32 %v2733_v48 }
 0x80b   : >> { %v2742_v40 = vpop.xlane.xlu0 %2741 }
 0x80c   : >> { %v2745_v53 = vpop.xlane.xlu1 %2744  ;;  %17802 = vrcp.f32 %v2742_v40 }
 0x80d   : >> { %v17799_v51 = vpop.eup %17798  ;;  %17804 = vrcp.f32 %v2745_v53 }
 0x80e   : >> { %v17801_v60 = vpop.eup %17800  ;;  %v2780_v44 = vmul.f32 %v17799_v51, %v21189_v56 }
 0x80f   : >> { %v2739_v43 = vpop.xlane.xlu0 %2738  ;;  %v2779_v1 = vmul.f32 %v17801_v60, %v21191_v55 }
 0x810   : >> { %17806 = vrcp.f32 %v2739_v43 }
 0x811   : >> { %16370 = vmatprep.mubr.msk.f32.mxu0 %vm1284_vm15, %v2779_v1 }
 0x812   : >> { %16371 = vmatmul.mubr.msk.f32.vlgmr.msra.gmra.mrb[66].mxu0 %vm1284_vm15, %v2780_v44 }
 0x813   : >> { %16409 = vmatpush3.msra.mxu0 %v23198_v23  ;;  %v2748_v37 = vpop.xlane.xlu0 %2747 }
 0x814   : >> { %17808 = vrcp.f32 %v2748_v37  ;;  %16490 = vmatprep.subr.mxu0 %v23199_v29 }
 0x816   : >> { %v17803_v57 = vpop.eup %17802 }
 0x817   : >> { %v2754_v49 = vpop.xlane.xlu0 %2753  ;;  %v2760_v25 = vpop.xlane.xlu1 %2759  ;;  %v2782_v40 = vmul.f32 %v17803_v57, %v21200_v61 }
 0x818   : >> { %v17805_v20 = vpop.eup %17804  ;;  %17810 = vrcp.f32 %v2754_v49 }
 0x819   : >> { %v2783_v23 = vmul.f32 %v17805_v20, %v21203_v0 }
 0x81a   : >> { %v17807_v58 = vpop.eup %17806 }
 0x81b   : >> { %v2751_v55 = vpop.xlane.xlu0 %2750  ;;  %v2766_v48 = vpop.xlane.xlu1 %2765  ;;  %v2781_v56 = vmul.f32 %v17807_v58, %v21207_v50 }
 0x81c   : >> { %17812 = vrcp.f32 %v2751_v55 }
 0x81d   : >> { %16373 = vmatprep.mubr.msk.f32.mxu0 %vm1284_vm15, %v2781_v56  ;;  %17814 = vrcp.f32 %v2760_v25 }
 0x81e   : >> { %v17809_v51 = vpop.eup %17808  ;;  %16374 = vmatmul.mubr.msk.f32.gmra.mrb[68].mxu0 %vm1284_vm15, %v2782_v40 }
 0x81f   : >> { %v2757_v53 = vpop.xlane.xlu0 %2756  ;;  %v3164_v60 = vpop.permute.xlu1 %3163  ;;  %16376 = vmatprep.mubr.msk.f32.mxu0 %vm1284_vm15, %v2783_v23  ;;  %v2784_v43 = vmul.f32 %v17809_v51, %v21215_v19 }
 0x820   : >> { %17816 = vrcp.f32 %v2757_v53 }
 0x821   : >> { %17818 = vrcp.f32 %v2766_v48 }
 0x822   : >> { %16377 = vmatmul.mubr.msk.f32.gmra.mrb[70].mxu0 %vm1284_vm15, %v2784_v43  ;;  %v17811_v1 = vpop.eup %17810 }
 0x823   : >> { %v2763_v50 = vpop.xlane.xlu0 %2762  ;;  %v3166_v61 = vpop.permute.xlu1 %3165  ;;  %v2786_v25 = vmul.f32 %v17811_v1, %v21219_v18 }
 0x824   : >> { %17820 = vrcp.f32 %v2763_v50 }
 0x826   : >> { %v17813_v44 = vpop.eup %17812 }
 0x827   : >> { %v3162_v0 = vpop.permute.xlu0 %3161  ;;  %v3168_v37 = vpop.permute.xlu1 %3167  ;;  %v2785_v49 = vmul.f32 %v17813_v44, %v21223_v2 }
 0x828   : >> { %v17815_v57 = vpop.eup %17814 }
 0x829   : >> { %16379 = vmatprep.mubr.msk.f32.mxu0 %vm1284_vm15, %v2785_v49  ;;  %v2788_v48 = vmul.f32 %v17815_v57, %v21221_v47 }
 0x82a   : >> { %v17817_v20 = vpop.eup %17816  ;;  %16380 = vmatmul.mubr.msk.f32.gmra.mrb[72].mxu0 %vm1284_vm15, %v2786_v25 }
 0x82b   : >> { %v3174_v19 = vpop.permute.xlu0 %3173  ;;  %v3170_v58 = vpop.permute.xlu1 %3169  ;;  %v2787_v55 = vmul.f32 %v17817_v20, %v21235_v42 }
 0x82c   : >> { %v17819_v56 = vpop.eup %17818 }
 0x82d   : >> { %16382 = vmatprep.mubr.msk.f32.mxu0 %vm1284_vm15, %v2787_v55  ;;  %v2790_v51 = vmul.f32 %v17819_v56, %v21229_v63 }
 0x82e   : >> { %v17821_v40 = vpop.eup %17820  ;;  %16383 = vmatmul.mubr.msk.f32.gmra.mrb[74].mxu0 %vm1284_vm15, %v2788_v48 }
 0x82f   : >> { %v3178_v2 = vpop.permute.xlu0 %3177  ;;  %v3172_v18 = vpop.permute.xlu1 %3171  ;;  %v2789_v23 = vmul.f32 %v17821_v40, %v21239_v3 }
 0x831   : >> { %16385 = vmatprep.mubr.msk.f32.mxu0 %vm1284_vm15, %v2789_v23 }
 0x832   : >> { %16386 = vmatmul.mubr.msk.f32.gmra.mrb[76].mxu0 %vm1284_vm15, %v2790_v51 }
 0x833   : >> { %v3182_v53 = vpop.permute.xlu0 %3181  ;;  %v3176_v42 = vpop.permute.xlu1 %3175  ;;  %16410 = vmatprep.mubr.msk.f32.mxu0 %vm1098_vm14, %v3162_v0 }
 0x836   : >> { %16411 = vmatmul.mubr.msk.f32.vlgmr.msra.gmra.mrb[78].mxu0 %vm1098_vm14, %v3164_v60 }
 0x837   : >> { %16491 = vmatpush3.msra.mxu0 %v23199_v29  ;;  %v3861_v47 = vpop.permute.xlu0 %3860  ;;  %v3180_v43 = vpop.permute.xlu1 %3179  ;;  %16413 = vmatprep.mubr.msk.f32.mxu0 %vm1098_vm14, %v3166_v61 }
 0x83a   : >> { %16414 = vmatmul.mubr.msk.f32.gmra.mrb[80].mxu0 %vm1098_vm14, %v3168_v37 }
 0x83b   : >> { %v3865_v3 = vpop.permute.xlu0 %3864  ;;  %v3184_v63 = vpop.permute.xlu1 %3183  ;;  %16416 = vmatprep.mubr.msk.f32.mxu0 %vm1098_vm14, %v3170_v58 }
 0x83e   : >> { %16417 = vmatmul.mubr.msk.f32.gmra.mrb[82].mxu0 %vm1098_vm14, %v3172_v18 }
 0x83f   : >> { %v3869_v50 = vpop.permute.xlu0 %3868  ;;  %v3863_v1 = vpop.permute.xlu1 %3862  ;;  %16419 = vmatprep.mubr.msk.f32.mxu0 %vm1098_vm14, %v3174_v19 }
 0x842   : >> { %16420 = vmatmul.mubr.msk.f32.gmra.mrb[84].mxu0 %vm1098_vm14, %v3176_v42 }
 0x843   : >> { %v3873_v60 = vpop.permute.xlu0 %3872  ;;  %v3867_v29 = vpop.permute.xlu1 %3866  ;;  %16422 = vmatprep.mubr.msk.f32.mxu0 %vm1098_vm14, %v3178_v2 }
 0x846   : >> { %16423 = vmatmul.mubr.msk.f32.gmra.mrb[86].mxu0 %vm1098_vm14, %v3180_v43 }
 0x847   : >> { %v3871_v61 = vpop.permute.xlu1 %3870  ;;  %16425 = vmatprep.mubr.msk.f32.mxu0 %vm1098_vm14, %v3182_v53  ;;  %v3877_v44 = vpop.permute.xlu0 %3876 }
 0x84a   : >> { %16426 = vmatmul.mubr.msk.f32.gmra.mrb[88].mxu0 %vm1098_vm14, %v3184_v63 }
 0x84b   : >> { %v3875_v0 = vpop.permute.xlu1 %3874  ;;  %16492 = vmatprep.mubr.msk.f32.mxu0 %vm1098_vm14, %v3861_v47  ;;  %v3881_v37 = vpop.permute.xlu0 %3880 }
 0x84e   : >> { %16493 = vmatmul.mubr.msk.f32.vlgmr.msra.gmra.mrb[90].mxu0 %vm1098_vm14, %v3863_v1 }
 0x84f   : >> { %v3879_v49 = vpop.permute.xlu1 %3878  ;;  %16495 = vmatprep.mubr.msk.f32.mxu0 %vm1098_vm14, %v3865_v3  ;;  %v17535_v57 = vpop.permute.xlu0 %17534 }
 0x850   : >> { %v17537_v19 = vunpack.i.h.bf16 %v17535_v57  ;;  %v17536_v58 = vunpack.i.l.bf16 %v17535_v57 }
 0x852   : >> { %16496 = vmatmul.mubr.msk.f32.gmra.mrb[92].mxu0 %vm1098_vm14, %v3867_v29  ;;  %v16997_v23 = vpack.c.bf16 %v17537_v19, %v17536_v58 }
 0x853   : >> { %v3883_v25 = vpop.permute.xlu1 %3882  ;;  %16498 = vmatprep.mubr.msk.f32.mxu0 %vm1098_vm14, %v3869_v50  ;;  %v17550_v43 = vpop.permute.xlu0 %17549 }
 0x854   : >> { %v17552_v3 = vunpack.i.h.bf16 %v17550_v43  ;;  %v17551_v63 = vunpack.i.l.bf16 %v17550_v43 }
 0x856   : >> { %16499 = vmatmul.mubr.msk.f32.gmra.mrb[94].mxu0 %vm1098_vm14, %v3871_v61  ;;  %v17009_v61 = vpack.c.bf16 %v17552_v3, %v17551_v63 }
 0x857   : >> { %v17530_v20 = vpop.permute.xlu1 %17529  ;;  %16501 = vmatprep.mubr.msk.f32.mxu0 %vm1098_vm14, %v3873_v60 }
 0x858   : >> { %v17532_v55 = vunpack.i.h.bf16 %v17530_v20  ;;  %v17531_v48 = vunpack.i.l.bf16 %v17530_v20 }
 0x85a   : >> { %16502 = vmatmul.mubr.msk.f32.gmra.mrb[96].mxu0 %vm1098_vm14, %v3875_v0  ;;  %v16993_v56 = vpack.c.bf16 %v17532_v55, %v17531_v48  ;;  %v23200_v0 = vld [vmem:[#allocation99_spill] sm:$0xff] }
 0x85b   : >> { %v17540_v40 = vpop.permute.xlu1 %17539  ;;  %16504 = vmatprep.mubr.msk.f32.mxu0 %vm1098_vm14, %v3877_v44 }
 0x85c   : >> { %v17542_v2 = vunpack.i.h.bf16 %v17540_v40  ;;  %v17541_v18 = vunpack.i.l.bf16 %v17540_v40  ;;  %16994 = vmatprep.subr.bf16.mxu0 %v16993_v56 }
 0x85d   : >> { %16996 = vmatpush3.bf16.msra.mxu0 %v16993_v56 }
 0x85e   : >> { %16505 = vmatmul.mubr.msk.f32.gmra.mrb[98].mxu0 %vm1098_vm14, %v3879_v49  ;;  %16998 = vmatprep.subr.bf16.mxu0 %v16997_v23  ;;  %v17001_v47 = vpack.c.bf16 %v17542_v2, %v17541_v18 }
 0x85f   : >> { %v17545_v51 = vpop.permute.xlu1 %17544  ;;  %16507 = vmatprep.mubr.msk.f32.mxu0 %vm1098_vm14, %v3881_v37 }
 0x860   : >> { %v17547_v53 = vunpack.i.h.bf16 %v17545_v51  ;;  %v17546_v42 = vunpack.i.l.bf16 %v17545_v51 }
 0x861   : >> { %17000 = vmatpush3.bf16.msra.mxu0 %v16997_v23 }
 0x862   : >> { %16508 = vmatmul.mubr.msk.f32.gmra.mrb[100].mxu0 %vm1098_vm14, %v3883_v25  ;;  %17002 = vmatprep.subr.bf16.mxu0 %v17001_v47  ;;  %v17005_v50 = vpack.c.bf16 %v17547_v53, %v17546_v42 }
 0x863   : >> { %v17555_v1 = vpop.permute.xlu1 %17554 }
 0x864   : >> { %v17557_v60 = vunpack.i.h.bf16 %v17555_v1  ;;  %v17556_v29 = vunpack.i.l.bf16 %v17555_v1 }
 0x865   : >> { %17004 = vmatpush3.bf16.msra.mxu0 %v17001_v47 }
 0x866   : >> { %17006 = vmatprep.subr.bf16.mxu0 %v17005_v50  ;;  %v17013_v44 = vpack.c.bf16 %v17557_v60, %v17556_v29 }
 0x869   : >> { %17008 = vmatpush3.bf16.msra.mxu0 %v17005_v50 }
 0x86a   : >> { %17010 = vmatprep.subr.bf16.mxu0 %v17009_v61 }
 0x86d   : >> { %17012 = vmatpush3.bf16.msra.mxu0 %v17009_v61 }
 0x86e   : >> { %17014 = vmatprep.subr.bf16.mxu0 %v17013_v44 }
 0x871   : >> { %17016 = vmatpush3.bf16.msra.mxu0 %v17013_v44 }
 0x872   : >> { %16572 = vmatprep.subr.mxu0 %v23200_v0 }
 0x8e5   : >> { %v16372_v37 = vpop.f32.mrb[66].mxu0 }
 0x8e6   : >> { %v2929_v49 = vpop.f32.mrb[67].mxu0 }
 0x8e7   : >> { %16390 = vmatprep.mubr.msk.f32.mxu1 %vm1098_vm14, %v2929_v49 }
 0x8e8   : >> { %16391 = vmatmul.mubr.msk.f32.vlgmr.msra.gmra.mrb[26].mxu1 %vm1098_vm14, %v16372_v37 }
 0x8f1   : >> { %v16375_v25 = vpop.f32.mrb[68].mxu0 }
 0x8f2   : >> { %v2939_v57 = vpop.f32.mrb[69].mxu0 }
 0x8f3   : >> { %16393 = vmatprep.mubr.msk.f32.mxu1 %vm1098_vm14, %v2939_v57 }
 0x8f4   : >> { %16394 = vmatmul.mubr.msk.f32.gmra.mrb[28].mxu1 %vm1098_vm14, %v16375_v25 }
 0x8f5   : >> { %v16378_v20 = vpop.f32.mrb[70].mxu0 }
 0x8f6   : >> { %v2949_v19 = vpop.f32.mrb[71].mxu0 }
 0x8f7   : >> { %16396 = vmatprep.mubr.msk.f32.mxu1 %vm1098_vm14, %v2949_v19 }
 0x8f8   : >> { %16397 = vmatmul.mubr.msk.f32.gmra.mrb[30].mxu1 %vm1098_vm14, %v16378_v20 }
 0x8fd   : >> { %v16381_v58 = vpop.f32.mrb[72].mxu0 }
 0x8fe   : >> { %v2959_v55 = vpop.f32.mrb[73].mxu0 }
 0x8ff   : >> { %16399 = vmatprep.mubr.msk.f32.mxu1 %vm1098_vm14, %v2959_v55 }
 0x900   : >> { %16400 = vmatmul.mubr.msk.f32.gmra.mrb[20].mxu1 %vm1098_vm14, %v16381_v58 }
 0x901   : >> { %v16384_v48 = vpop.f32.mrb[74].mxu0 }
 0x902   : >> { %v2969_v56 = vpop.f32.mrb[75].mxu0 }
 0x903   : >> { %16402 = vmatprep.mubr.msk.f32.mxu1 %vm1098_vm14, %v2969_v56 }
 0x904   : >> { %16403 = vmatmul.mubr.msk.f32.gmra.mrb[22].mxu1 %vm1098_vm14, %v16384_v48 }
 0x905   : >> { %v16387_v40 = vpop.f32.mrb[76].mxu0 }
 0x906   : >> { %v2979_v2 = vpop.f32.mrb[77].mxu0 }
 0x907   : >> { %16405 = vmatprep.mubr.msk.f32.mxu1 %vm1098_vm14, %v2979_v2 }
 0x908   : >> { %16406 = vmatmul.mubr.msk.f32.gmra.mrb[24].mxu1 %vm1098_vm14, %v16387_v40 }
 0x909   : >> { %v21348_v18 = vpop.f32.mrb[78].mxu0 }
 0x90a   : >> { %v21350_v23 = vpop.f32.mrb[79].mxu0 }
 0x90d   : >> { %v21352_v51 = vpop.f32.mrb[80].mxu0 }
 0x90e   : >> { %v21354_v53 = vpop.f32.mrb[81].mxu0 }
 0x911   : >> { %v21356_v42 = vpop.f32.mrb[82].mxu0 }
 0x912   : >> { %v21358_v47 = vpop.f32.mrb[83].mxu0 }
 0x915   : >> { %v21360_v43 = vpop.f32.mrb[84].mxu0 }
 0x916   : >> { %v21362_v3 = vpop.f32.mrb[85].mxu0 }
 0x919   : >> { %v21364_v63 = vpop.f32.mrb[86].mxu0 }
 0x91a   : >> { %v21366_v50 = vpop.f32.mrb[87].mxu0 }
 0x91d   : >> { %v21368_v1 = vpop.f32.mrb[88].mxu0 }
 0x91e   : >> { %v21370_v60 = vpop.f32.mrb[89].mxu0 }
 0x921   : >> { %v16494_v29 = vpop.f32.mrb[90].mxu0 }
 0x922   : >> { %v4034_v61 = vmul.f32 0.125, %v16494_v29  ;;  %v3974_v44 = vpop.f32.mrb[91].mxu0 }
 0x923   : >> { %v4033_v37 = vmul.f32 0.125, %v3974_v44 }
 0x924   : >> { %v21373_v49 = vadd.f32 %v4034_v61, %v23191_v38 }
 0x925   : >> { %v21376_v25 = vadd.f32 %v4033_v37, %v23192_v54  ;;  %v16497_v57 = vpop.f32.mrb[92].mxu0 }
 0x926   : >> { %v4036_v20 = vmul.f32 0.125, %v16497_v57  ;;  %v3984_v19 = vpop.f32.mrb[93].mxu0  ;;  %v4060_v58 = vsel %vm1284_vm15, %v21373_v49, -inf }
 0x927   : >> { %v4035_v55 = vmul.f32 0.125, %v3984_v19  ;;  %4061 = vmax.xlane.f32.xlu1 %v4060_v58  ;;  %v4057_v48 = vsel %vm1284_vm15, %v21376_v25, -inf }
 0x928   : >> { %v21383_v56 = vadd.f32 %v4036_v20, %v23194_v52  ;;  %4058 = vmax.xlane.f32.xlu0 %v4057_v48 }
 0x929   : >> { %v16500_v40 = vpop.f32.mrb[94].mxu0  ;;  %v21388_v61 = vadd.f32 %v4035_v55, %v23193_v45 }
 0x92a   : >> { %v3994_v2 = vpop.f32.mrb[95].mxu0  ;;  %v4066_v29 = vsel %vm1284_vm15, %v21383_v56, -inf  ;;  %v4038_v62 = vmul.f32 0.125, %v16500_v40 }
 0x92b   : >> { %v4063_v57 = vsel %vm1284_vm15, %v21388_v61, -inf  ;;  %v4037_v48 = vmul.f32 0.125, %v3994_v2 }
 0x92c   : >> { %4067 = vmax.xlane.f32.xlu0 %v4066_v29 }
 0x92d   : >> { %v16503_v44 = vpop.f32.mrb[96].mxu0  ;;  %v21397_v55 = vadd.f32 %v4037_v48, %v23195_v46  ;;  %v21410_v48 = vadd.f32 %v4038_v62, %v23196_v27 }
 0x92e   : >> { %v4004_v37 = vpop.f32.mrb[97].mxu0 }
 0x92f   : >> { %v4039_v29 = vmul.f32 0.125, %v4004_v37  ;;  %v4040_v37 = vmul.f32 0.125, %v16503_v44 }
 0x930   : >> { %4064 = vmax.xlane.f32.xlu0 %v4063_v57  ;;  %v4069_v57 = vsel %vm1284_vm15, %v21397_v55, -inf }
 0x931   : >> { %v16506_v19 = vpop.f32.mrb[98].mxu0  ;;  %v21400_v59 = vadd.f32 %v4039_v29, %v20355_v4  ;;  %v21418_v40 = vadd.f32 %v4040_v37, %v20359_v5 }
 0x932   : >> { %v4014_v58 = vpop.f32.mrb[99].mxu0 }
 0x933   : >> { %v4041_v31 = vmul.f32 0.125, %v4014_v58  ;;  %v4075_v2 = vsel %vm1284_vm15, %v21400_v59, -inf }
 0x935   : >> { %v16509_v20 = vpop.f32.mrb[100].mxu0  ;;  %v21405_v24 = vadd.f32 %v4041_v31, %v20367_v8  ;;  %v4042_v31 = vmul.f32 0.125, %v16506_v19 }
 0x936   : >> { %v4024_v28 = vpop.f32.mrb[101].mxu0 }
 0x937   : >> { %v4043_v30 = vmul.f32 0.125, %v4024_v28  ;;  %v4081_v58 = vsel %vm1284_vm15, %v21405_v24, -inf  ;;  %v4072_v28 = vsel %vm1284_vm15, %v21410_v48, -inf  ;;  %v21425_v44 = vadd.f32 %v4042_v31, %v20371_v9 }
 0x938   : >> { %4569 = vrot.lane.b32.xlu1 %v20586_v12, %s19768_s26 }
 0x939   : >> { %v21413_v29 = vadd.f32 %v4043_v30, %v20375_v10  ;;  %v4044_v30 = vmul.f32 0.125, %v16509_v20  ;;  %v4084_v19 = vsel %vm1284_vm15, %v21425_v44, -inf  ;;  %v21446_v20 = vpop.permute.xlu1 %4561 }
 0x93a   : >> { %23201 = vst [vmem:[#allocation98_spill] sm:$0xff] %v21446_v20 }
 0x93b   : >> { %v4087_v62 = vsel %vm1284_vm15, %v21413_v29, -inf }
 0x946   : >> { %4571 = vrot.lane.b32.xlu0 %v20600_v16, %s19768_s26 }
 0x95c   : >> { %4070 = vmax.xlane.f32.xlu1 %v4069_v57  ;;  %v4078_v57 = vsel %vm1284_vm15, %v21418_v40, -inf }
 0x960   : >> { %4076 = vmax.xlane.f32.xlu1 %v4075_v2  ;;  %v21430_v2 = vadd.f32 %v4044_v30, %v20379_v11 }
 0x962   : >> { %v4090_v37 = vsel %vm1284_vm15, %v21430_v2, -inf }
 0x964   : >> { %4082 = vmax.xlane.f32.xlu1 %v4081_v58  ;;  %v21448_v58 = vpop.permute.xlu1 %4563 }
 0x965   : >> { %4073 = vmax.xlane.f32.xlu0 %v4072_v28  ;;  %23202 = vst [vmem:[#allocation100_spill] sm:$0xff] %v21448_v58 }
 0x968   : >> { %4088 = vmax.xlane.f32.xlu1 %v4087_v62  ;;  %v21450_v31 = vpop.permute.xlu1 %4565  ;;  %v21454_v62 = vpop.permute.xlu0 %4559 }
 0x969   : >> { %4079 = vmax.xlane.f32.xlu0 %v4078_v57  ;;  %23203 = vst [vmem:[#allocation99_spill] sm:$0xff] %v21450_v31 }
 0x96c   : >> { %v21452_v28 = vpop.permute.xlu1 %4567 }
 0x96d   : >> { %4085 = vmax.xlane.f32.xlu0 %v4084_v19  ;;  %23204 = vst [vmem:[#allocation109_spill] sm:$0xff] %v21452_v28 }
 0x971   : >> { %4091 = vmax.xlane.f32.xlu0 %v4090_v37 }
 0x979   : >> { %4573 = vrot.lane.b32.xlu1 %v20598_v15, %s19768_s26 }
 0x97d   : >> { %4577 = vrot.lane.b32.xlu1 %v20610_v32, %s19768_s26 }
 0x981   : >> { %4581 = vrot.lane.b32.xlu1 %v20622_v35, %s19768_s26 }
 0x987   : >> { %4575 = vrot.lane.b32.xlu0 %v20612_v33, %s19768_s26 }
 0x98b   : >> { %4579 = vrot.lane.b32.xlu0 %v20624_v36, %s19768_s26 }
 0x9b4   : >> { %v4062_v30 = vpop.xlane.xlu1 %4061 }
 0x9b5   : >> { %v4094_v57 = vsub.f32 %v21373_v49, %v4062_v30  ;;  %v4059_v19 = vpop.xlane.xlu0 %4058 }
 0x9b6   : >> { %v4093_v37 = vsub.f32 %v21376_v25, %v4059_v19 }
 0x9b7   : >> { %v4107_v41 = vmul.f32 1.442695, %v4094_v57 }
 0x9b8   : >> { %v4105_v34 = vmul.f32 1.442695, %v4093_v37 }
 0x9b9   : >> { %17822 = vpow2.f32 %v4107_v41  ;;  %v4068_v17 = vpop.xlane.xlu0 %4067 }
 0x9ba   : >> { %17824 = vpow2.f32 %v4105_v34  ;;  %v4096_v14 = vsub.f32 %v21383_v56, %v4068_v17 }
 0x9bc   : >> { %v4111_v7 = vmul.f32 1.442695, %v4096_v14 }
 0x9bd   : >> { %v4065_v22 = vpop.xlane.xlu0 %4064 }
 0x9be   : >> { %17826 = vpow2.f32 %v4111_v7  ;;  %v4095_v28 = vsub.f32 %v21388_v61, %v4065_v22  ;;  %v21476_v22 = vpop.permute.xlu1 %4569 }
 0x9bf   : >> { %23205 = vst [vmem:[#allocation110_spill] sm:$0xff] %v21476_v22 }
 0x9c0   : >> { %v4109_v31 = vmul.f32 1.442695, %v4095_v28 }
 0x9c1   : >> { %v21479_v28 = vpop.permute.xlu0 %4571 }
 0x9c2   : >> { %17828 = vpow2.f32 %v4109_v31  ;;  %23206 = vst [vmem:[#allocation111_spill] sm:$0xff] %v21479_v28 }
 0x9c3   : >> { %v21460_v58 = vpop.eup %17822 }
 0x9c4   : >> { %v21462_v49 = vpop.eup %17824  ;;  %v4132_v25 = vsel %vm1284_vm15, %v21460_v58, 0.0 }
 0x9c5   : >> { %4133 = vadd.xlane.f32.xlu0 %v4132_v25  ;;  %v4129_v34 = vsel %vm1284_vm15, %v21462_v49, 0.0 }
 0x9c6   : >> { %4130 = vadd.xlane.f32.xlu1 %v4129_v34 }
 0x9c8   : >> { %v21468_v41 = vpop.eup %17826 }
 0x9c9   : >> { %v4138_v7 = vsel %vm1284_vm15, %v21468_v41, 0.0 }
 0x9ca   : >> { %4139 = vadd.xlane.f32.xlu0 %v4138_v7 }
 0x9cc   : >> { %v21472_v14 = vpop.eup %17828 }
 0x9cd   : >> { %v4135_v17 = vsel %vm1284_vm15, %v21472_v14, 0.0 }
 0x9ce   : >> { %4136 = vadd.xlane.f32.xlu0 %v4135_v17 }
 0x9e9   : >> { %v4071_v56 = vpop.xlane.xlu1 %4070 }
 0x9ea   : >> { %v4097_v61 = vsub.f32 %v21397_v55, %v4071_v56 }
 0x9ec   : >> { %v4113_v31 = vmul.f32 1.442695, %v4097_v61 }
 0x9ed   : >> { %v4077_v30 = vpop.xlane.xlu1 %4076 }
 0x9ee   : >> { %17830 = vpow2.f32 %v4113_v31  ;;  %v4099_v25 = vsub.f32 %v21400_v59, %v4077_v30 }
 0x9f0   : >> { %v4117_v20 = vmul.f32 1.442695, %v4099_v25 }
 0x9f1   : >> { %v4083_v37 = vpop.xlane.xlu1 %4082 }
 0x9f2   : >> { %v4074_v57 = vpop.xlane.xlu0 %4073  ;;  %v4101_v55 = vsub.f32 %v21405_v24, %v4083_v37 }
 0x9f3   : >> { %v4098_v19 = vsub.f32 %v21410_v48, %v4074_v57 }
 0x9f4   : >> { %v4121_v48 = vmul.f32 1.442695, %v4101_v55 }
 0x9f5   : >> { %v4115_v34 = vmul.f32 1.442695, %v4098_v19  ;;  %v4089_v31 = vpop.xlane.xlu1 %4088 }
 0x9f6   : >> { %v4080_v7 = vpop.xlane.xlu0 %4079  ;;  %v4103_v30 = vsub.f32 %v21413_v29, %v4089_v31 }
 0x9f7   : >> { %17832 = vpow2.f32 %v4115_v34  ;;  %v4100_v17 = vsub.f32 %v21418_v40, %v4080_v7 }
 0x9f8   : >> { %v21484_v22 = vpop.eup %17830  ;;  %v4125_v37 = vmul.f32 1.442695, %v4103_v30 }
 0x9f9   : >> { %v4119_v56 = vmul.f32 1.442695, %v4100_v17  ;;  %v4141_v61 = vsel %vm1284_vm15, %v21484_v22, 0.0 }
 0x9fa   : >> { %v4086_v28 = vpop.xlane.xlu0 %4085  ;;  %4142 = vadd.xlane.f32.xlu1 %v4141_v61 }
 0x9fb   : >> { %17834 = vpow2.f32 %v4119_v56  ;;  %v4102_v59 = vsub.f32 %v21425_v44, %v4086_v28 }
 0x9fc   : >> { %17836 = vpow2.f32 %v4117_v20 }
 0x9fd   : >> { %v4123_v40 = vmul.f32 1.442695, %v4102_v59 }
 0x9fe   : >> { %v4092_v57 = vpop.xlane.xlu0 %4091 }
 0x9ff   : >> { %17838 = vpow2.f32 %v4123_v40  ;;  %v4104_v19 = vsub.f32 %v21430_v2, %v4092_v57 }
 0xa00   : >> { %17840 = vpow2.f32 %v4121_v48  ;;  %v21532_v48 = vpop.permute.xlu1 %4573 }
 0xa01   : >> { %v21492_v24 = vpop.eup %17832  ;;  %v4127_v25 = vmul.f32 1.442695, %v4104_v19  ;;  %v3335_v19 = vmul.f32 0.125, %v21348_v18 }
 0xa02   : >> { %v4144_v34 = vsel %vm1284_vm15, %v21492_v24, 0.0  ;;  %v21534_v30 = vpop.permute.xlu0 %4575 }
 0xa03   : >> { %17842 = vpow2.f32 %v4127_v25  ;;  %4145 = vadd.xlane.f32.xlu0 %v4144_v34  ;;  %v3334_v25 = vmul.f32 0.125, %v21350_v23 }
 0xa04   : >> { %17844 = vpow2.f32 %v4125_v37  ;;  %v21536_v40 = vpop.permute.xlu1 %4577 }
 0xa05   : >> { %v21496_v44 = vpop.eup %17834 }
 0xa06   : >> { %v4150_v29 = vsel %vm1284_vm15, %v21496_v44, 0.0  ;;  %v21500_v20 = vpop.eup %17836  ;;  %v21538_v57 = vpop.permute.xlu0 %4579 }
 0xa07   : >> { %4151 = vadd.xlane.f32.xlu0 %v4150_v29  ;;  %v4147_v28 = vsel %vm1284_vm15, %v21500_v20, 0.0  ;;  %v21545_v29 = vadd.f32 %v3335_v19, %v23191_v38 }
 0xa08   : >> { %v21541_v37 = vpop.permute.xlu1 %4581 }
 0xa09   : >> { %v21502_v2 = vpop.eup %17838  ;;  %v3361_v19 = vsel %vm1284_vm15, %v21545_v29, -inf }
 0xa0a   : >> { %v4156_v7 = vsel %vm1284_vm15, %v21502_v2, 0.0  ;;  %v21508_v17 = vpop.eup %17840 }
 0xa0b   : >> { %4148 = vadd.xlane.f32.xlu0 %v4147_v28  ;;  %4157 = vadd.xlane.f32.xlu1 %v4156_v7  ;;  %v4153_v56 = vsel %vm1284_vm15, %v21508_v17, 0.0  ;;  %v3338_v28 = vmul.f32 0.125, %v21358_v47 }
 0xa0d   : >> { %v21510_v55 = vpop.eup %17842  ;;  %v21553_v18 = vadd.f32 %v3338_v28, %v23195_v46 }
 0xa0e   : >> { %v4162_v61 = vsel %vm1284_vm15, %v21510_v55, 0.0  ;;  %v21516_v31 = vpop.eup %17844 }
 0xa0f   : >> { %4154 = vadd.xlane.f32.xlu0 %v4153_v56  ;;  %4163 = vadd.xlane.f32.xlu1 %v4162_v61  ;;  %v4159_v59 = vsel %vm1284_vm15, %v21516_v31, 0.0  ;;  %v21549_v56 = vadd.f32 %v3334_v25, %v23192_v54  ;;  %v3336_v61 = vmul.f32 0.125, %v21354_v53  ;;  %v3342_v53 = vmul.f32 0.125, %v21366_v50 }
 0xa10   : >> { %v3344_v50 = vmul.f32 0.125, %v21370_v60 }
 0xa11   : >> { %v21559_v47 = vadd.f32 %v3336_v61, %v23193_v45 }
 0xa12   : >> { %v21587_v60 = vadd.f32 %v3344_v50, %v20375_v10 }
 0xa13   : >> { %4160 = vadd.xlane.f32.xlu0 %v4159_v59  ;;  %v3340_v59 = vmul.f32 0.125, %v21362_v3  ;;  %v3370_v3 = vsel %vm1284_vm15, %v21553_v18, -inf }
 0xa15   : >> { %v21564_v25 = vadd.f32 %v3340_v59, %v20355_v4  ;;  %v21573_v59 = vadd.f32 %v3342_v53, %v20367_v8 }
 0xa20   : >> { %5260 = vrot.lane.b32.xlu1 %v20562_v26, %s19769_s28 }
 0xa24   : >> { %5264 = vrot.lane.b32.xlu1 %v20574_v6, %s19769_s28 }
 0xa28   : >> { %5268 = vrot.lane.b32.xlu1 %v20586_v12, %s19769_s28 }
 0xa29   : >> { %5258 = vrot.lane.b32.xlu0 %v20564_v39, %s19769_s28 }
 0xa2c   : >> { %5272 = vrot.lane.b32.xlu1 %v20598_v15, %s19769_s28 }
 0xa2d   : >> { %5262 = vrot.lane.b32.xlu0 %v20576_v21, %s19769_s28 }
 0xa30   : >> { %5276 = vrot.lane.b32.xlu1 %v20610_v32, %s19769_s28 }
 0xa31   : >> { %5266 = vrot.lane.b32.xlu0 %v20588_v13, %s19769_s28 }
 0xa34   : >> { %5280 = vrot.lane.b32.xlu1 %v20622_v35, %s19769_s28  ;;  %v3364_v35 = vsel %vm1284_vm15, %v21559_v47, -inf }
 0xa35   : >> { %5270 = vrot.lane.b32.xlu0 %v20600_v16, %s19769_s28 }
 0xa39   : >> { %5274 = vrot.lane.b32.xlu0 %v20612_v33, %s19769_s28 }
 0xa3d   : >> { %5278 = vrot.lane.b32.xlu0 %v20624_v36, %s19769_s28 }
 0xa52   : >> { %v4134_v34 = vpop.xlane.xlu0 %4133 }
 0xa53   : >> { %17846 = vrcp.f32 %v4134_v34  ;;  %v4131_v7 = vpop.xlane.xlu1 %4130  ;;  %v3358_v34 = vsel %vm1284_vm15, %v21549_v56, -inf }
 0xa54   : >> { %17848 = vrcp.f32 %v4131_v7  ;;  %v3337_v7 = vmul.f32 0.125, %v21352_v51 }
 0xa56   : >> { %v21580_v51 = vadd.f32 %v3337_v7, %v23194_v52 }
 0xa57   : >> { %v4140_v23 = vpop.xlane.xlu0 %4139 }
 0xa58   : >> { %3362 = vmax.xlane.f32.xlu1 %v3361_v19  ;;  %17850 = vrcp.f32 %v4140_v23  ;;  %v3376_v23 = vsel %vm1284_vm15, %v21564_v25, -inf }
 0xa5b   : >> { %v4137_v28 = vpop.xlane.xlu0 %4136 }
 0xa5c   : >> { %17852 = vrcp.f32 %v4137_v28  ;;  %3371 = vmax.xlane.f32.xlu1 %v3370_v3  ;;  %3359 = vmax.xlane.f32.xlu0 %v3358_v34  ;;  %v3339_v34 = vmul.f32 0.125, %v21356_v42  ;;  %v3341_v42 = vmul.f32 0.125, %v21360_v43 }
 0xa5d   : >> { %v17847_v61 = vpop.eup %17846 }
 0xa5e   : >> { %v17849_v19 = vpop.eup %17848  ;;  %v4178_v28 = vmul.f32 %v17847_v61, %v21460_v58  ;;  %v21593_v53 = vadd.f32 %v3339_v34, %v23196_v27  ;;  %v23207_v58 = vld [vmem:[#allocation102_spill] sm:$0xff]  ;;  %v21603_v61 = vadd.f32 %v3341_v42, %v20359_v5 }
 0xa5f   : >> { %v4177_v36 = vmul.f32 %v17849_v19, %v21462_v49  ;;  %v3382_v49 = vsel %vm1284_vm15, %v21573_v59, -inf  ;;  %v3343_v19 = vmul.f32 0.125, %v21364_v63 }
 0xa60   : >> { %3377 = vmax.xlane.f32.xlu1 %v3376_v23  ;;  %3365 = vmax.xlane.f32.xlu0 %v3364_v35  ;;  %v3367_v35 = vsel %vm1284_vm15, %v21580_v51, -inf  ;;  %v3373_v43 = vsel %vm1284_vm15, %v21593_v53, -inf  ;;  %v3379_v34 = vsel %vm1284_vm15, %v21603_v61, -inf }
 0xa61   : >> { %16534 = vmatprep.mubr.msk.f32.mxu0 %vm1284_vm15, %v4177_v36  ;;  %v21612_v23 = vadd.f32 %v3343_v19, %v20371_v9 }
 0xa62   : >> { %16535 = vmatmul.mubr.msk.f32.vlgmr.msra.gmra.mrb[102].mxu0 %vm1284_vm15, %v4178_v28  ;;  %v17851_v36 = vpop.eup %17850 }
 0xa63   : >> { %16573 = vmatpush3.msra.mxu0 %v23200_v0  ;;  %v3388_v0 = vsel %vm1284_vm15, %v21587_v60, -inf  ;;  %v4180_v50 = vmul.f32 %v17851_v36, %v21468_v41  ;;  %v3385_v41 = vsel %vm1284_vm15, %v21612_v23, -inf }
 0xa64   : >> { %16654 = vmatprep.subr.mxu0 %v23207_v58  ;;  %3383 = vmax.xlane.f32.xlu1 %v3382_v49 }
 0xa65   : >> { %3368 = vmax.xlane.f32.xlu0 %v3367_v35 }
 0xa66   : >> { %v17853_v3 = vpop.eup %17852 }
 0xa67   : >> { %v4179_v7 = vmul.f32 %v17853_v3, %v21472_v14  ;;  %v3345_v14 = vmul.f32 0.125, %v21368_v1 }
 0xa68   : >> { %3389 = vmax.xlane.f32.xlu1 %v3388_v0 }
 0xa69   : >> { %3374 = vmax.xlane.f32.xlu0 %v3373_v43  ;;  %16537 = vmatprep.mubr.msk.f32.mxu0 %vm1284_vm15, %v4179_v7  ;;  %v21618_v63 = vadd.f32 %v3345_v14, %v20379_v11 }
 0xa6a   : >> { %16538 = vmatmul.mubr.msk.f32.gmra.mrb[104].mxu0 %vm1284_vm15, %v4180_v50 }
 0xa6b   : >> { %v3391_v28 = vsel %vm1284_vm15, %v21618_v63, -inf }
 0xa6d   : >> { %3380 = vmax.xlane.f32.xlu0 %v3379_v34 }
 0xa71   : >> { %3386 = vmax.xlane.f32.xlu0 %v3385_v41 }
 0xa75   : >> { %3392 = vmax.xlane.f32.xlu0 %v3391_v28 }
 0xa87   : >> { %v4143_v49 = vpop.xlane.xlu1 %4142 }
 0xa88   : >> { %17854 = vrcp.f32 %v4143_v49 }
 0xa90   : >> { %v4146_v42 = vpop.xlane.xlu0 %4145 }
 0xa91   : >> { %17856 = vrcp.f32 %v4146_v42 }
 0xa92   : >> { %v17855_v1 = vpop.eup %17854 }
 0xa93   : >> { %v4181_v35 = vmul.f32 %v17855_v1, %v21484_v22 }
 0xa94   : >> { %v4152_v36 = vpop.xlane.xlu0 %4151 }
 0xa95   : >> { %16540 = vmatprep.mubr.msk.f32.mxu0 %vm1284_vm15, %v4181_v35  ;;  %17858 = vrcp.f32 %v4152_v36 }
 0xa98   : >> { %v4149_v3 = vpop.xlane.xlu0 %4148  ;;  %v4158_v0 = vpop.xlane.xlu1 %4157 }
 0xa99   : >> { %17860 = vrcp.f32 %v4149_v3  ;;  %v23210_v3 = vld [vmem:[#allocation99_spill] sm:$0xff] }
 0xa9a   : >> { %17862 = vrcp.f32 %v4158_v0  ;;  %v23213_v0 = vld [vmem:[#allocation111_spill] sm:$0xff] }
 0xa9b   : >> { %v17857_v7 = vpop.eup %17856 }
 0xa9c   : >> { %v4155_v19 = vpop.xlane.xlu0 %4154  ;;  %v4182_v43 = vmul.f32 %v17857_v7, %v21492_v24  ;;  %v4164_v50 = vpop.xlane.xlu1 %4163 }
 0xa9d   : >> { %17864 = vrcp.f32 %v4155_v19 }
 0xa9e   : >> { %16541 = vmatmul.mubr.msk.f32.gmra.mrb[106].mxu0 %vm1284_vm15, %v4182_v43  ;;  %17866 = vrcp.f32 %v4164_v50 }
 0xa9f   : >> { %v17859_v22 = vpop.eup %17858 }
 0xaa0   : >> { %v4161_v14 = vpop.xlane.xlu0 %4160  ;;  %v4184_v28 = vmul.f32 %v17859_v22, %v21496_v44 }
 0xaa1   : >> { %17868 = vrcp.f32 %v4161_v14 }
 0xaa3   : >> { %v17861_v34 = vpop.eup %17860 }
 0xaa4   : >> { %v4183_v41 = vmul.f32 %v17861_v34, %v21500_v20  ;;  %v17863_v49 = vpop.eup %17862 }
 0xaa5   : >> { %v4186_v1 = vmul.f32 %v17863_v49, %v21502_v2  ;;  %v23209_v2 = vld [vmem:[#allocation100_spill] sm:$0xff] }
 0xaa6   : >> { %16543 = vmatprep.mubr.msk.f32.mxu0 %vm1284_vm15, %v4183_v41 }
 0xaa7   : >> { %v17865_v42 = vpop.eup %17864  ;;  %16544 = vmatmul.mubr.msk.f32.gmra.mrb[108].mxu0 %vm1284_vm15, %v4184_v28 }
 0xaa8   : >> { %v4185_v24 = vmul.f32 %v17865_v42, %v21508_v17  ;;  %v17867_v35 = vpop.eup %17866  ;;  %v23208_v17 = vld [vmem:[#allocation98_spill] sm:$0xff] }
 0xaa9   : >> { %v4188_v44 = vmul.f32 %v17867_v35, %v21510_v55  ;;  %v23212_v55 = vld [vmem:[#allocation110_spill] sm:$0xff] }
 0xaaa   : >> { %16546 = vmatprep.mubr.msk.f32.mxu0 %vm1284_vm15, %v4185_v24 }
 0xaab   : >> { %v17869_v36 = vpop.eup %17868  ;;  %16547 = vmatmul.mubr.msk.f32.gmra.mrb[110].mxu0 %vm1284_vm15, %v4186_v1 }
 0xaac   : >> { %v4187_v20 = vmul.f32 %v17869_v36, %v21516_v31  ;;  %v23211_v31 = vld [vmem:[#allocation109_spill] sm:$0xff] }
 0xaae   : >> { %16549 = vmatprep.mubr.msk.f32.mxu0 %vm1284_vm15, %v4187_v20 }
 0xaaf   : >> { %16550 = vmatmul.mubr.msk.f32.gmra.mrb[112].mxu0 %vm1284_vm15, %v4188_v44 }
 0xab0   : >> { %16574 = vmatprep.mubr.msk.f32.mxu0 %vm1098_vm14, %v21454_v62  ;;  %v5259_v62 = vpop.permute.xlu0 %5258 }
 0xab3   : >> { %16575 = vmatmul.mubr.msk.f32.vlgmr.msra.gmra.mrb[114].mxu0 %vm1098_vm14, %v23208_v17 }
 0xab4   : >> { %16655 = vmatpush3.msra.mxu0 %v23207_v58  ;;  %16577 = vmatprep.mubr.msk.f32.mxu0 %vm1098_vm14, %v23209_v2  ;;  %v5261_v58 = vpop.permute.xlu1 %5260  ;;  %v5263_v7 = vpop.permute.xlu0 %5262 }
 0xab7   : >> { %16578 = vmatmul.mubr.msk.f32.gmra.mrb[116].mxu0 %vm1098_vm14, %v23210_v3 }
 0xab8   : >> { %16580 = vmatprep.mubr.msk.f32.mxu0 %vm1098_vm14, %v23211_v31  ;;  %v5265_v19 = vpop.permute.xlu1 %5264  ;;  %v5267_v43 = vpop.permute.xlu0 %5266 }
 0xabb   : >> { %16581 = vmatmul.mubr.msk.f32.gmra.mrb[118].mxu0 %vm1098_vm14, %v23212_v55  ;;  %v23214_v55 = vld [vmem:[#allocation90_spill] sm:$0xff] }
 0xabc   : >> { %16583 = vmatprep.mubr.msk.f32.mxu0 %vm1098_vm14, %v23213_v0 }
 0xabf   : >> { %16584 = vmatmul.mubr.msk.f32.gmra.mrb[120].mxu0 %vm1098_vm14, %v21532_v48  ;;  %v5269_v48 = vpop.permute.xlu1 %5268 }
 0xac0   : >> { %16586 = vmatprep.mubr.msk.f32.mxu0 %vm1098_vm14, %v21534_v30  ;;  %v5271_v30 = vpop.permute.xlu0 %5270 }
 0xac3   : >> { %16587 = vmatmul.mubr.msk.f32.gmra.mrb[122].mxu0 %vm1098_vm14, %v21536_v40  ;;  %v5273_v40 = vpop.permute.xlu1 %5272 }
 0xac4   : >> { %16589 = vmatprep.mubr.msk.f32.mxu0 %vm1098_vm14, %v21538_v57  ;;  %v5275_v57 = vpop.permute.xlu0 %5274 }
 0xac7   : >> { %16590 = vmatmul.mubr.msk.f32.gmra.mrb[124].mxu0 %vm1098_vm14, %v21541_v37  ;;  %v5277_v37 = vpop.permute.xlu1 %5276 }
 0xac8   : >> { %16656 = vmatprep.mubr.msk.f32.mxu0 %vm1098_vm14, %v5259_v62  ;;  %v5279_v50 = vpop.permute.xlu0 %5278 }
 0xacb   : >> { %16657 = vmatmul.mubr.msk.f32.vlgmr.msra.gmra.mrb[126].mxu0 %vm1098_vm14, %v5261_v58  ;;  %v5281_v14 = vpop.permute.xlu1 %5280  ;;  %v23215_v58 = vld [vmem:[#allocation91_spill] sm:$0xff] }
 0xacc   : >> { %16659 = vmatprep.mubr.msk.f32.mxu0 %vm1098_vm14, %v5263_v7 }
 0xacf   : >> { %16660 = vmatmul.mubr.msk.f32.gmra.mrb[128].mxu0 %vm1098_vm14, %v5265_v19 }
 0xad0   : >> { %16662 = vmatprep.mubr.msk.f32.mxu0 %vm1098_vm14, %v5267_v43 }
 0xad3   : >> { %16663 = vmatmul.mubr.msk.f32.gmra.mrb[130].mxu0 %vm1098_vm14, %v5269_v48 }
 0xad4   : >> { %16665 = vmatprep.mubr.msk.f32.mxu0 %vm1098_vm14, %v5271_v30 }
 0xad7   : >> { %16666 = vmatmul.mubr.msk.f32.gmra.mrb[132].mxu0 %vm1098_vm14, %v5273_v40 }
 0xad8   : >> { %16668 = vmatprep.mubr.msk.f32.mxu0 %vm1098_vm14, %v5275_v57 }
 0xadb   : >> { %16669 = vmatmul.mubr.msk.f32.gmra.mrb[134].mxu0 %vm1098_vm14, %v5277_v37 }
 0xadc   : >> { %16671 = vmatprep.mubr.msk.f32.mxu0 %vm1098_vm14, %v5279_v50 }
 0xadf   : >> { %16672 = vmatmul.mubr.msk.f32.gmra.mrb[136].mxu0 %vm1098_vm14, %v5281_v14 }
 0xae5   : >> { %v3363_v22 = vpop.xlane.xlu1 %3362 }
 0xae6   : >> { %v3395_v34 = vsub.f32 %v21545_v29, %v3363_v22 }
 0xae8   : >> { %v3408_v41 = vmul.f32 1.442695, %v3395_v34 }
 0xae9   : >> { %v3360_v28 = vpop.xlane.xlu0 %3359  ;;  %v3372_v0 = vpop.xlane.xlu1 %3371 }
 0xaea   : >> { %17870 = vpow2.f32 %v3408_v41  ;;  %v3394_v49 = vsub.f32 %v21549_v56, %v3360_v28  ;;  %v3398_v62 = vsub.f32 %v21553_v18, %v3372_v0 }
 0xaec   : >> { %v3406_v42 = vmul.f32 1.442695, %v3394_v49  ;;  %v3414_v7 = vmul.f32 1.442695, %v3398_v62 }
 0xaed   : >> { %v3366_v24 = vpop.xlane.xlu0 %3365  ;;  %v3378_v48 = vpop.xlane.xlu1 %3377 }
 0xaee   : >> { %17872 = vpow2.f32 %v3406_v42  ;;  %v3396_v1 = vsub.f32 %v21559_v47, %v3366_v24  ;;  %v3400_v30 = vsub.f32 %v21564_v25, %v3378_v48 }
 0xaf0   : >> { %v3410_v35 = vmul.f32 1.442695, %v3396_v1  ;;  %v3418_v37 = vmul.f32 1.442695, %v3400_v30 }
 0xaf1   : >> { %v3384_v18 = vpop.xlane.xlu1 %3383 }
 0xaf2   : >> { %17874 = vpow2.f32 %v3410_v35  ;;  %v3369_v36 = vpop.xlane.xlu0 %3368  ;;  %v3402_v22 = vsub.f32 %v21573_v59, %v3384_v18 }
 0xaf3   : >> { %v3397_v20 = vsub.f32 %v21580_v51, %v3369_v36 }
 0xaf4   : >> { %v21681_v44 = vpop.eup %17870 }
 0xaf5   : >> { %v3412_v17 = vmul.f32 1.442695, %v3397_v20  ;;  %v3433_v29 = vsel %vm1284_vm15, %v21681_v44, 0.0  ;;  %v3390_v48 = vpop.xlane.xlu1 %3389 }
 0xaf6   : >> { %3434 = vadd.xlane.f32.xlu0 %v3433_v29  ;;  %v3375_v19 = vpop.xlane.xlu0 %3374  ;;  %v3404_v30 = vsub.f32 %v21587_v60, %v3390_v48 }
 0xaf7   : >> { %17876 = vpow2.f32 %v3412_v17  ;;  %v3399_v43 = vsub.f32 %v21593_v53, %v3375_v19  ;;  %v3422_v53 = vmul.f32 1.442695, %v3402_v22  ;;  %v23220_v17 = vld [vmem:[#allocation92_spill] sm:$0xff] }
 0xaf8   : >> { %v21685_v2 = vpop.eup %17872  ;;  %17878 = vpow2.f32 %v3414_v7 }
 0xaf9   : >> { %v3430_v56 = vsel %vm1284_vm15, %v21685_v2, 0.0  ;;  %v3416_v40 = vmul.f32 1.442695, %v3399_v43  ;;  %v23222_v43 = vld [vmem:[#allocation94_spill] sm:$0xff] }
 0xafa   : >> { %3431 = vadd.xlane.f32.xlu1 %v3430_v56  ;;  %v3381_v57 = vpop.xlane.xlu0 %3380  ;;  %v23221_v56 = vld [vmem:[#allocation93_spill] sm:$0xff] }
 0xafb   : >> { %17880 = vpow2.f32 %v3416_v40  ;;  %v3401_v50 = vsub.f32 %v21603_v61, %v3381_v57  ;;  %v3426_v57 = vmul.f32 1.442695, %v3404_v30 }
 0xafc   : >> { %v21689_v47 = vpop.eup %17874  ;;  %17882 = vpow2.f32 %v3418_v37 }
 0xafd   : >> { %v3436_v3 = vsel %vm1284_vm15, %v21689_v47, 0.0  ;;  %v3420_v34 = vmul.f32 1.442695, %v3401_v50 }
 0xafe   : >> { %3437 = vadd.xlane.f32.xlu0 %v3436_v3  ;;  %v3387_v3 = vpop.xlane.xlu0 %3386 }
 0xaff   : >> { %17884 = vpow2.f32 %v3420_v34 }
 0xb00   : >> { %17886 = vpow2.f32 %v3422_v53  ;;  %v23227_v53 = vld [vmem:[#allocation97_spill] sm:$0xff] }
 0xb01   : >> { %v21693_v51 = vpop.eup %17876 }
 0xb02   : >> { %v3439_v31 = vsel %vm1284_vm15, %v21693_v51, 0.0  ;;  %v21705_v14 = vpop.eup %17878  ;;  %v3393_v0 = vpop.xlane.xlu0 %3392 }
 0xb03   : >> { %3440 = vadd.xlane.f32.xlu0 %v3439_v31  ;;  %v3442_v41 = vsel %vm1284_vm15, %v21705_v14, 0.0  ;;  %v3403_v31 = vsub.f32 %v21612_v23, %v3387_v3  ;;  %v3405_v7 = vsub.f32 %v21618_v63, %v3393_v0 }
 0xb05   : >> { %v21710_v25 = vpop.eup %17880  ;;  %v3424_v62 = vmul.f32 1.442695, %v3403_v31  ;;  %v3428_v19 = vmul.f32 1.442695, %v3405_v7 }
 0xb06   : >> { %v3445_v61 = vsel %vm1284_vm15, %v21710_v25, 0.0  ;;  %v21718_v42 = vpop.eup %17882 }
 0xb07   : >> { %v3448_v59 = vsel %vm1284_vm15, %v21718_v42, 0.0  ;;  %17888 = vpow2.f32 %v3424_v62 }
 0xb08   : >> { %17890 = vpow2.f32 %v3428_v19 }
 0xb09   : >> { %v21722_v24 = vpop.eup %17884  ;;  %17892 = vpow2.f32 %v3426_v57 }
 0xb0a   : >> { %v3451_v36 = vsel %vm1284_vm15, %v21722_v24, 0.0  ;;  %v21730_v20 = vpop.eup %17886 }
 0xb0b   : >> { %17559 = vrot.lane.b32.xlu1 %v23214_v55, %s19770_s23  ;;  %v3454_v29 = vsel %vm1284_vm15, %v21730_v20, 0.0 }
 0xb11   : >> { %v21743_v40 = vpop.eup %17888 }
 0xb12   : >> { %v3457_v37 = vsel %vm1284_vm15, %v21743_v40, 0.0  ;;  %v21747_v23 = vpop.eup %17890 }
 0xb13   : >> { %v3463_v63 = vsel %vm1284_vm15, %v21747_v23, 0.0  ;;  %v21755_v22 = vpop.eup %17892 }
 0xb14   : >> { %v3460_v60 = vsel %vm1284_vm15, %v21755_v22, 0.0 }
 0xb19   : >> { %17564 = vrot.lane.b32.xlu0 %v23215_v58, %s19770_s23 }
 0xb2f   : >> { %3443 = vadd.xlane.f32.xlu1 %v3442_v41 }
 0xb35   : >> { %v21712_v28 = vpop.f32.mrb[102].mxu0 }
 0xb36   : >> { %23216 = vst [vmem:[#allocation102_spill] sm:$0xff] %v21712_v28  ;;  %v21714_v49 = vpop.f32.mrb[103].mxu0 }
 0xb37   : >> { %23217 = vst [vmem:[#allocation98_spill] sm:$0xff] %v21714_v49 }
 0xb38   : >> { %3446 = vadd.xlane.f32.xlu0 %v3445_v61 }
 0xb3c   : >> { %3449 = vadd.xlane.f32.xlu0 %v3448_v59 }
 0xb3d   : >> { %v21724_v1 = vpop.f32.mrb[104].mxu0 }
 0xb3e   : >> { %23218 = vst [vmem:[#allocation100_spill] sm:$0xff] %v21724_v1  ;;  %v21726_v35 = vpop.f32.mrb[105].mxu0 }
 0xb3f   : >> { %23219 = vst [vmem:[#allocation99_spill] sm:$0xff] %v21726_v35 }
 0xb40   : >> { %3452 = vadd.xlane.f32.xlu0 %v3451_v36  ;;  %17569 = vrot.lane.b32.xlu1 %v23220_v17, %s19770_s23 }
 0xb44   : >> { %3455 = vadd.xlane.f32.xlu0 %v3454_v29  ;;  %17574 = vrot.lane.b32.xlu1 %v23221_v56, %s19770_s23 }
 0xb5a   : >> { %17579 = vrot.lane.b32.xlu0 %v23222_v43, %s19770_s23 }
 0xb68   : >> { %3458 = vadd.xlane.f32.xlu1 %v3457_v37 }
 0xb6c   : >> { %3464 = vadd.xlane.f32.xlu1 %v3463_v63 }
 0xb71   : >> { %v21751_v50 = vpop.f32.mrb[106].mxu0 }
 0xb72   : >> { %23223 = vst [vmem:[#allocation109_spill] sm:$0xff] %v21751_v50  ;;  %v21753_v18 = vpop.f32.mrb[107].mxu0 }
 0xb73   : >> { %23224 = vst [vmem:[#allocation110_spill] sm:$0xff] %v21753_v18 }
 0xb79   : >> { %3461 = vadd.xlane.f32.xlu0 %v3460_v60 }
 0xb7a   : >> { %v21759_v34 = vpop.f32.mrb[108].mxu0 }
 0xb7b   : >> { %23225 = vst [vmem:[#allocation111_spill] sm:$0xff] %v21759_v34  ;;  %v21761_v41 = vpop.f32.mrb[109].mxu0 }
 0xb7c   : >> { %23226 = vst [vmem:[#allocation112_spill] sm:$0xff] %v21761_v41 }
 0xb7d   : >> { %17584 = vrot.lane.b32.xlu1 %v23227_v53, %s19770_s23 }
 0xb7e   : >> { %v21765_v61 = vpop.f32.mrb[110].mxu0 }
 0xb7f   : >> { %23228 = vst [vmem:[#allocation113_spill] sm:$0xff] %v21765_v61  ;;  %v21767_v59 = vpop.f32.mrb[111].mxu0 }
 0xb80   : >> { %23229 = vst [vmem:[#allocation114_spill] sm:$0xff] %v21767_v59 }
 0xb81   : >> { %17594 = vrot.lane.b32.xlu1 %v23215_v58, %s19771_s0 }
 0xb82   : >> { %v21771_v36 = vpop.f32.mrb[112].mxu0 }
 0xb83   : >> { %23230 = vst [vmem:[#allocation115_spill] sm:$0xff] %v21771_v36  ;;  %v21773_v29 = vpop.f32.mrb[113].mxu0  ;;  %v21777_v3 = vpop.xlane.xlu0 %3434 }
 0xb84   : >> { %23231 = vst [vmem:[#allocation116_spill] sm:$0xff] %v21773_v29 }
 0xb85   : >> { %17604 = vrot.lane.b32.xlu1 %v23221_v56, %s19771_s0 }
 0xb86   : >> { %v16576_v31 = vpop.f32.mrb[114].mxu0 }
 0xb87   : >> { %v21779_v0 = vpop.f32.mrb[115].mxu0  ;;  %v3432_v62 = vpop.xlane.xlu1 %3431  ;;  %v4733_v59 = vmul.f32 0.125, %v16576_v31 }
 0xb88   : >> { %17894 = vrcp.f32 %v3432_v62 }
 0xb89   : >> { %17614 = vrot.lane.b32.xlu1 %v23227_v53, %s19771_s0  ;;  %17896 = vrcp.f32 %v21777_v3 }
 0xb8a   : >> { %v21783_v7 = vpop.f32.mrb[116].mxu0 }
 0xb8b   : >> { %v21785_v19 = vpop.f32.mrb[117].mxu0  ;;  %v21787_v48 = vpop.xlane.xlu0 %3437 }
 0xb8c   : >> { %v17560_v30 = vpop.permute.xlu1 %17559  ;;  %17898 = vrcp.f32 %v21787_v48 }
 0xb8d   : >> { %v17562_v57 = vunpack.i.h.bf16 %v17560_v30  ;;  %v17561_v37 = vunpack.i.l.bf16 %v17560_v30  ;;  %5957 = vrot.lane.b32.xlu1 %v20564_v39, %s19772_s12 }
 0xb8e   : >> { %v21791_v63 = vpop.f32.mrb[118].mxu0 }
 0xb8f   : >> { %17589 = vrot.lane.b32.xlu0 %v23214_v55, %s19771_s0  ;;  %v21795_v60 = vpop.f32.mrb[119].mxu0  ;;  %v16969_v62 = vpack.c.bf16 %v17562_v57, %v17561_v37 }
 0xb90   : >> { %v21797_v53 = vpop.xlane.xlu0 %3440 }
 0xb91   : >> { %16970 = vmatprep.subr.bf16.mxu1 %v16969_v62  ;;  %5959 = vrot.lane.b32.xlu1 %v20562_v26, %s19772_s12  ;;  %17900 = vrcp.f32 %v21797_v53  ;;  %v23236_v53 = vld [vmem:[#allocation69_spill] sm:$0xff] }
 0xb92   : >> { %v17895_v56 = vpop.eup %17894  ;;  %16972 = vmatpush3.bf16.msra.mxu1 %v16969_v62  ;;  %v21801_v30 = vpop.f32.mrb[120].mxu0 }
 0xb93   : >> { %23232 = vst [vmem:[#allocation117_spill] sm:$0xff] %v21801_v30  ;;  %17599 = vrot.lane.b32.xlu0 %v23220_v17, %s19771_s0  ;;  %v21805_v39 = vpop.f32.mrb[121].mxu0  ;;  %v3478_v36 = vmul.f32 %v17895_v56, %v21685_v2 }
 0xb94   : >> { %v17565_v29 = vpop.permute.xlu0 %17564 }
 0xb95   : >> { %v17567_v61 = vunpack.i.h.bf16 %v17565_v29  ;;  %v17566_v57 = vunpack.i.l.bf16 %v17565_v29  ;;  %5961 = vrot.lane.b32.xlu1 %v20576_v21, %s19772_s12  ;;  %16452 = vmatprep.mubr.msk.f32.mxu1 %vm1284_vm15, %v3478_v36 }
 0xb96   : >> { %v21811_v26 = vpop.f32.mrb[122].mxu0 }
 0xb97   : >> { %23233 = vst [vmem:[#allocation118_spill] sm:$0xff] %v21811_v26  ;;  %17609 = vrot.lane.b32.xlu0 %v23222_v43, %s19771_s0  ;;  %v21815_v37 = vpop.f32.mrb[123].mxu0  ;;  %v16973_v62 = vpack.c.bf16 %v17567_v61, %v17566_v57 }
 0xb99   : >> { %16974 = vmatprep.subr.bf16.mxu1 %v16973_v62  ;;  %5963 = vrot.lane.b32.xlu1 %v20574_v6, %s19772_s12 }
 0xb9a   : >> { %16976 = vmatpush3.bf16.msra.mxu1 %v16973_v62  ;;  %v21819_v2 = vpop.f32.mrb[124].mxu0 }
 0xb9b   : >> { %23234 = vst [vmem:[#allocation119_spill] sm:$0xff] %v21819_v2  ;;  %5965 = vrot.lane.b32.xlu0 %v20588_v13, %s19772_s12  ;;  %v21823_v21 = vpop.f32.mrb[125].mxu0 }
 0xb9d   : >> { %5967 = vrot.lane.b32.xlu1 %v20586_v12, %s19772_s12  ;;  %v21834_v12 = vadd.f32 %v4733_v59, %v23191_v38  ;;  %v4732_v59 = vmul.f32 0.125, %v21779_v0 }
 0xb9e   : >> { %v16658_v56 = vpop.f32.mrb[126].mxu0 }
 0xb9f   : >> { %v5372_v36 = vpop.f32.mrb[127].mxu0  ;;  %23235 = vst [vmem:[#allocation120_spill] sm:$0xff] %v21834_v12  ;;  %v5432_v2 = vmul.f32 0.125, %v16658_v56 }
 0xba0   : >> { %v5431_v56 = vmul.f32 0.125, %v5372_v36 }
 0xba1   : >> { %5969 = vrot.lane.b32.xlu1 %v20600_v16, %s19772_s12 }
 0xba2   : >> { %v16661_v61 = vpop.f32.mrb[128].mxu0 }
 0xba3   : >> { %v5382_v29 = vpop.f32.mrb[129].mxu0  ;;  %v5434_v50 = vmul.f32 0.125, %v16661_v61 }
 0xba4   : >> { %v5433_v16 = vmul.f32 0.125, %v5382_v29 }
 0xba5   : >> { %5971 = vrot.lane.b32.xlu1 %v20598_v15, %s19772_s12  ;;  %v21837_v18 = vadd.f32 %v5434_v50, %v23194_v52  ;;  %v4759_v15 = vsel %vm1284_vm15, %v21834_v12, -inf }
 0xba6   : >> { %v16664_v6 = vpop.f32.mrb[130].mxu0  ;;  %v21842_v1 = vadd.f32 %v5433_v16, %v23193_v45 }
 0xba7   : >> { %v5392_v57 = vpop.f32.mrb[131].mxu0  ;;  %v5464_v28 = vsel %vm1284_vm15, %v21837_v18, -inf }
 0xba8   : >> { %v5435_v31 = vmul.f32 0.125, %v5392_v57  ;;  %v5461_v50 = vsel %vm1284_vm15, %v21842_v1, -inf  ;;  %v21855_v57 = vadd.f32 %v4732_v59, %v23192_v54 }
 0xbaa   : >> { %v16667_v62 = vpop.f32.mrb[132].mxu0  ;;  %v21852_v29 = vadd.f32 %v5435_v31, %v23195_v46  ;;  %v21865_v31 = vadd.f32 %v5432_v2, %v23191_v38 }
 0xbab   : >> { %v5402_v43 = vpop.f32.mrb[133].mxu0 }
 0xbac   : >> { %v5437_v26 = vmul.f32 0.125, %v5402_v43  ;;  %v4756_v43 = vsel %vm1284_vm15, %v21855_v57, -inf  ;;  %v5458_v2 = vsel %vm1284_vm15, %v21865_v31, -inf }
 0xbae   : >> { %v16670_v13 = vpop.f32.mrb[134].mxu0  ;;  %v21870_v59 = vadd.f32 %v5437_v26, %v20355_v4 }
 0xbaf   : >> { %v5412_v17 = vpop.f32.mrb[135].mxu0 }
 0xbb0   : >> { %v5439_v26 = vmul.f32 0.125, %v5412_v17 }
 0xbb2   : >> { %v16673_v34 = vpop.f32.mrb[136].mxu0 }
 0xbb3   : >> { %v21831_v41 = vpop.f32.mrb[137].mxu0 }
 0xbba   : >> { %4760 = vmax.xlane.f32.xlu0 %v4759_v15  ;;  %v5438_v15 = vmul.f32 0.125, %v16667_v62  ;;  %v5467_v62 = vsel %vm1284_vm15, %v21852_v29, -inf }
 0xbbc   : >> { %v21844_v35 = vpop.xlane.xlu1 %3443  ;;  %v21858_v0 = vadd.f32 %v5438_v15, %v20359_v5 }
 0xbbd   : >> { %17902 = vrcp.f32 %v21844_v35 }
 0xbbe   : >> { %5465 = vmax.xlane.f32.xlu0 %v5464_v28  ;;  %v5476_v15 = vsel %vm1284_vm15, %v21858_v0, -inf }
 0xbc0   : >> { %v17570_v61 = vpop.permute.xlu1 %17569 }
 0xbc1   : >> { %v17572_v49 = vunpack.i.h.bf16 %v17570_v61  ;;  %v17571_v16 = vunpack.i.l.bf16 %v17570_v61  ;;  %v5440_v61 = vmul.f32 0.125, %v16670_v13 }
 0xbc2   : >> { %5462 = vmax.xlane.f32.xlu0 %v5461_v50 }
 0xbc3   : >> { %v16977_v58 = vpack.c.bf16 %v17572_v49, %v17571_v16  ;;  %v21880_v36 = vadd.f32 %v5440_v61, %v20371_v9  ;;  %v5441_v61 = vmul.f32 0.125, %v21831_v41 }
 0xbc4   : >> { %v17575_v28 = vpop.permute.xlu1 %17574 }
 0xbc5   : >> { %v21860_v30 = vpop.xlane.xlu0 %3446  ;;  %v17577_v12 = vunpack.i.h.bf16 %v17575_v28  ;;  %v17576_v55 = vunpack.i.l.bf16 %v17575_v28  ;;  %16978 = vmatprep.subr.bf16.mxu1 %v16977_v58  ;;  %v5482_v17 = vsel %vm1284_vm15, %v21880_v36, -inf }
 0xbc6   : >> { %5468 = vmax.xlane.f32.xlu0 %v5467_v62  ;;  %16980 = vmatpush3.bf16.msra.mxu1 %v16977_v58  ;;  %v5436_v58 = vmul.f32 0.125, %v16664_v6  ;;  %v21890_v6 = vadd.f32 %v5439_v26, %v20367_v8  ;;  %v5442_v62 = vmul.f32 0.125, %v16673_v34  ;;  %17904 = vrcp.f32 %v21860_v30 }
 0xbc7   : >> { %v16981_v49 = vpack.c.bf16 %v17577_v12, %v17576_v55  ;;  %v21875_v55 = vadd.f32 %v5431_v56, %v23192_v54  ;;  %v5473_v12 = vsel %vm1284_vm15, %v21870_v59, -inf }
 0xbc8   : >> { %v21885_v16 = vadd.f32 %v5436_v58, %v23196_v27  ;;  %v5479_v58 = vsel %vm1284_vm15, %v21890_v6, -inf }
 0xbc9   : >> { %v3450_v50 = vpop.xlane.xlu0 %3449  ;;  %4757 = vmax.xlane.f32.xlu1 %v4756_v43  ;;  %16982 = vmatprep.subr.bf16.mxu1 %v16981_v49  ;;  %v5455_v28 = vsel %vm1284_vm15, %v21875_v55, -inf  ;;  %v21897_v43 = vadd.f32 %v5442_v62, %v20379_v11 }
 0xbca   : >> { %5477 = vmax.xlane.f32.xlu0 %v5476_v15  ;;  %16984 = vmatpush3.bf16.msra.mxu1 %v16981_v49  ;;  %v5470_v56 = vsel %vm1284_vm15, %v21885_v16, -inf  ;;  %17906 = vrcp.f32 %v3450_v50 }
 0xbcd   : >> { %v3453_v13 = vpop.xlane.xlu0 %3452  ;;  %5459 = vmax.xlane.f32.xlu1 %v5458_v2 }
 0xbce   : >> { %5474 = vmax.xlane.f32.xlu0 %v5473_v12  ;;  %v21903_v12 = vadd.f32 %v5441_v61, %v20375_v10  ;;  %17908 = vrcp.f32 %v3453_v13  ;;  %v23237_v13 = vld [vmem:[#allocation70_spill] sm:$0xff] }
 0xbd0   : >> { %v5485_v41 = vsel %vm1284_vm15, %v21903_v12, -inf }
 0xbd1   : >> { %v3456_v49 = vpop.xlane.xlu0 %3455  ;;  %5456 = vmax.xlane.f32.xlu1 %v5455_v28  ;;  %v5488_v28 = vsel %vm1284_vm15, %v21897_v43, -inf }
 0xbd2   : >> { %5483 = vmax.xlane.f32.xlu0 %v5482_v17  ;;  %17910 = vrcp.f32 %v3456_v49 }
 0xbd5   : >> { %v17580_v15 = vpop.permute.xlu0 %17579  ;;  %5471 = vmax.xlane.f32.xlu1 %v5470_v56 }
 0xbd6   : >> { %v17582_v34 = vunpack.i.h.bf16 %v17580_v15  ;;  %v17581_v2 = vunpack.i.l.bf16 %v17580_v15  ;;  %5480 = vmax.xlane.f32.xlu0 %v5479_v58  ;;  %v17897_v58 = vpop.eup %17896 }
 0xbd7   : >> { %v3479_v3 = vmul.f32 %v17897_v58, %v21681_v44 }
 0xbd8   : >> { %v16985_v26 = vpack.c.bf16 %v17582_v34, %v17581_v2  ;;  %v17899_v34 = vpop.eup %17898 }
 0xbd9   : >> { %v17901_v35 = vpop.eup %17900  ;;  %v3480_v30 = vmul.f32 %v17899_v34, %v21689_v47 }
 0xbda   : >> { %5489 = vmax.xlane.f32.xlu0 %v5488_v28  ;;  %16986 = vmatprep.subr.bf16.mxu1 %v16985_v26  ;;  %v17903_v50 = vpop.eup %17902  ;;  %v3481_v44 = vmul.f32 %v17901_v35, %v21693_v51 }
 0xbdb   : >> { %16988 = vmatpush3.bf16.msra.mxu1 %v16985_v26  ;;  %v17905_v49 = vpop.eup %17904  ;;  %v3482_v47 = vmul.f32 %v17903_v50, %v21705_v14 }
 0xbdc   : >> { %v17907_v28 = vpop.eup %17906 }
 0xbdd   : >> { %v17909_v58 = vpop.eup %17908  ;;  %v3484_v14 = vmul.f32 %v17907_v28, %v21718_v42 }
 0xbde   : >> { %5486 = vmax.xlane.f32.xlu0 %v5485_v41  ;;  %v4735_v41 = vmul.f32 0.125, %v21783_v7  ;;  %v17911_v34 = vpop.eup %17910 }
 0xbdf   : >> { %v3486_v42 = vmul.f32 %v17911_v34, %v21730_v20 }
 0xbe0   : >> { %v21939_v7 = vadd.f32 %v4735_v41, %v23194_v52 }
 0xbe6   : >> { %5973 = vrot.lane.b32.xlu1 %v20612_v33, %s19772_s12 }
 0xbf4   : >> { %5975 = vrot.lane.b32.xlu0 %v20610_v32, %s19772_s12  ;;  %v4734_v32 = vmul.f32 0.125, %v21785_v19 }
 0xbf5   : >> { %v3459_v62 = vpop.xlane.xlu1 %3458 }
 0xbf6   : >> { %v21922_v48 = vadd.f32 %v4734_v32, %v23193_v45  ;;  %17912 = vrcp.f32 %v3459_v62 }
 0xbf8   : >> { %v4762_v26 = vsel %vm1284_vm15, %v21922_v48, -inf }
 0xbf9   : >> { %v3465_v17 = vpop.xlane.xlu1 %3464 }
 0xbfd   : >> { %v17585_v56 = vpop.permute.xlu1 %17584 }
 0xbfe   : >> { %v17587_v61 = vunpack.i.h.bf16 %v17585_v56  ;;  %v17586_v15 = vunpack.i.l.bf16 %v17585_v56 }
 0xc00   : >> { %v16989_v33 = vpack.c.bf16 %v17587_v61, %v17586_v15 }
 0xc01   : >> { %v17595_v19 = vpop.permute.xlu1 %17594 }
 0xc02   : >> { %16990 = vmatprep.subr.bf16.mxu1 %v16989_v33  ;;  %v17597_v56 = vunpack.i.h.bf16 %v17595_v19  ;;  %v17596_v61 = vunpack.i.l.bf16 %v17595_v19 }
 0xc03   : >> { %16992 = vmatpush3.bf16.msra.mxu1 %v16989_v33  ;;  %v3483_v33 = vmul.f32 %v17905_v49, %v21710_v25  ;;  %v3485_v25 = vmul.f32 %v17909_v58, %v21722_v24 }
 0xc04   : >> { %16470 = vmatprep.subr.mxu1 %v23236_v53 }
 0xc05   : >> { %v17605_v50 = vpop.permute.xlu1 %17604 }
 0xc06   : >> { %v3462_v2 = vpop.xlane.xlu0 %3461  ;;  %16453 = vmatmul.mubr.msk.f32.vlgmr.msra.gmra.mrb[32].mxu1 %vm1284_vm15, %v3479_v3  ;;  %v17607_v49 = vunpack.i.h.bf16 %v17605_v50 }
 0xc07   : >> { %16455 = vmatprep.mubr.msk.f32.mxu1 %vm1284_vm15, %v3480_v30  ;;  %16471 = vmatpush3.msra.mxu1 %v23236_v53  ;;  %17914 = vrcp.f32 %v3462_v2  ;;  %v17045_v30 = vpack.c.bf16 %v17597_v56, %v17596_v61  ;;  %v17913_v2 = vpop.eup %17912  ;;  %v18115_v53 = vld [vmem:[#allocation14 + $0x180] ss:$48 sps:$4 sm:$0xff] (%p777_p13)  }
 0xc08   : >> { %16552 = vmatprep.subr.mxu1 %v23237_v13  ;;  %17916 = vrcp.f32 %v3465_v17  ;;  %v3487_v24 = vmul.f32 %v17913_v2, %v21743_v40  ;;  %v23238_v40 = vld [vmem:[#allocation96_spill] sm:$0xff] }
 0xc0a   : >> { %v17590_v62 = vpop.permute.xlu0 %17589  ;;  %4763 = vmax.xlane.f32.xlu1 %v4762_v26  ;;  %16456 = vmatmul.mubr.msk.f32.gmra.mrb[34].mxu1 %vm1284_vm15, %v3481_v44  ;;  %v4765_v44 = vsel %vm1284_vm15, %v21939_v7, -inf  ;;  %v17606_v26 = vunpack.i.l.bf16 %v17605_v50 }
 0xc0b   : >> { %v17592_v15 = vunpack.i.h.bf16 %v17590_v62  ;;  %v17591_v51 = vunpack.i.l.bf16 %v17590_v62  ;;  %16458 = vmatprep.mubr.msk.f32.mxu1 %vm1284_vm15, %v3482_v47 }
 0xc0c   : >> { %v17053_v61 = vpack.c.bf16 %v17607_v49, %v17606_v26 }
 0xc0d   : >> { %v17041_v32 = vpack.c.bf16 %v17592_v15, %v17591_v51  ;;  %v17615_v15 = vpop.permute.xlu1 %17614 }
 0xc0e   : >> { %v17600_v17 = vpop.permute.xlu0 %17599  ;;  %16459 = vmatmul.mubr.msk.f32.gmra.mrb[36].mxu1 %vm1284_vm15, %v3483_v33  ;;  %v17617_v33 = vunpack.i.h.bf16 %v17615_v15  ;;  %v17616_v58 = vunpack.i.l.bf16 %v17615_v15 }
 0xc0f   : >> { %v17602_v3 = vunpack.i.h.bf16 %v17600_v17  ;;  %v17601_v35 = vunpack.i.l.bf16 %v17600_v17  ;;  %17042 = vmatprep.subr.bf16.mxu0 %v17041_v32  ;;  %16461 = vmatprep.mubr.msk.f32.mxu1 %vm1284_vm15, %v3484_v14  ;;  %v23239_v14 = vld [vmem:[#allocation101_spill] sm:$0xff] }
 0xc10   : >> { %17044 = vmatpush3.bf16.msra.mxu0 %v17041_v32  ;;  %v17061_v32 = vpack.c.bf16 %v17617_v33, %v17616_v58 }
 0xc11   : >> { %17046 = vmatprep.subr.bf16.mxu0 %v17045_v30  ;;  %v17915_v19 = vpop.eup %17914  ;;  %v17049_v47 = vpack.c.bf16 %v17602_v3, %v17601_v35  ;;  %v21958_v34 = vpop.permute.xlu1 %5957 }
 0xc12   : >> { %16462 = vmatmul.mubr.msk.f32.gmra.mrb[38].mxu1 %vm1284_vm15, %v3485_v25  ;;  %v17917_v28 = vpop.eup %17916  ;;  %v17610_v41 = vpop.permute.xlu0 %17609  ;;  %v3488_v20 = vmul.f32 %v17915_v19, %v21755_v22 }
 0xc13   : >> { %4766 = vmax.xlane.f32.xlu0 %v4765_v44  ;;  %16464 = vmatprep.mubr.msk.f32.mxu1 %vm1284_vm15, %v3486_v42  ;;  %v17612_v62 = vunpack.i.h.bf16 %v17610_v41  ;;  %v17611_v56 = vunpack.i.l.bf16 %v17610_v41  ;;  %v3489_v51 = vmul.f32 %v17917_v28, %v21747_v23 }
 0xc14   : >> { %17048 = vmatpush3.bf16.msra.mxu0 %v17045_v30 }
 0xc15   : >> { %17050 = vmatprep.subr.bf16.mxu0 %v17049_v47  ;;  %v17057_v22 = vpack.c.bf16 %v17612_v62, %v17611_v56  ;;  %v21960_v23 = vpop.permute.xlu1 %5959 }
 0xc16   : >> { %16465 = vmatmul.mubr.msk.f32.gmra.mrb[40].mxu1 %vm1284_vm15, %v3487_v24  ;;  %v21966_v35 = vpop.permute.xlu0 %5965 }
 0xc17   : >> { %16467 = vmatprep.mubr.msk.f32.mxu1 %vm1284_vm15, %v3488_v20 }
 0xc18   : >> { %17052 = vmatpush3.bf16.msra.mxu0 %v17049_v47 }
 0xc19   : >> { %17054 = vmatprep.subr.bf16.mxu0 %v17053_v61  ;;  %v21962_v17 = vpop.permute.xlu1 %5961 }
 0xc1a   : >> { %16468 = vmatmul.mubr.msk.f32.gmra.mrb[42].mxu1 %vm1284_vm15, %v3489_v51 }
 0xc1b   : >> { %5977 = vrot.lane.b32.xlu1 %v23238_v40, %s19772_s12 }
 0xc1c   : >> { %17056 = vmatpush3.bf16.msra.mxu0 %v17053_v61 }
 0xc1d   : >> { %17058 = vmatprep.subr.bf16.mxu0 %v17057_v22  ;;  %v21964_v3 = vpop.permute.xlu1 %5963 }
 0xc20   : >> { %17060 = vmatpush3.bf16.msra.mxu0 %v17057_v22 }
 0xc21   : >> { %17062 = vmatprep.subr.bf16.mxu0 %v17061_v32  ;;  %v21968_v30 = vpop.permute.xlu1 %5967 }
 0xc24   : >> { %17064 = vmatpush3.bf16.msra.mxu0 %v17061_v32 }
 0xc25   : >> { %16736 = vmatprep.subr.mxu0 %v23239_v14  ;;  %v21972_v2 = vpop.permute.xlu1 %5969 }
 0xc29   : >> { %v21976_v26 = vpop.permute.xlu1 %5971 }
 0xc47   : >> { %v21970_v50 = vpop.xlane.xlu0 %4760 }
 0xc4b   : >> { %v5466_v25 = vpop.xlane.xlu0 %5465 }
 0xc4c   : >> { %v5494_v42 = vsub.f32 %v21837_v18, %v5466_v25 }
 0xc4e   : >> { %v5509_v19 = vmul.f32 1.442695, %v5494_v42 }
 0xc4f   : >> { %v5463_v44 = vpop.xlane.xlu0 %5462 }
 0xc50   : >> { %17918 = vpow2.f32 %v5509_v19  ;;  %v5493_v49 = vsub.f32 %v21842_v1, %v5463_v44 }
 0xc52   : >> { %v5507_v47 = vmul.f32 1.442695, %v5493_v49 }
 0xc53   : >> { %v5469_v28 = vpop.xlane.xlu0 %5468 }
 0xc54   : >> { %17920 = vpow2.f32 %v5507_v47  ;;  %v5495_v1 = vsub.f32 %v21852_v29, %v5469_v28 }
 0xc56   : >> { %v21978_v41 = vpop.xlane.xlu1 %4757 }
 0xc57   : >> { %v5478_v24 = vpop.xlane.xlu0 %5477 }
 0xc58   : >> { %v5498_v32 = vsub.f32 %v21858_v0, %v5478_v24 }
 0xc5a   : >> { %v21980_v20 = vpop.eup %17918  ;;  %v5460_v62 = vpop.xlane.xlu1 %5459  ;;  %v5517_v44 = vmul.f32 1.442695, %v5498_v32 }
 0xc5b   : >> { %v5475_v56 = vpop.xlane.xlu0 %5474  ;;  %v5492_v61 = vsub.f32 %v21865_v31, %v5460_v62  ;;  %v5536_v18 = vsel %vm1284_vm15, %v21980_v20, 0.0  ;;  %v5511_v31 = vmul.f32 1.442695, %v5495_v1 }
 0xc5c   : >> { %5537 = vadd.xlane.f32.xlu1 %v5536_v18  ;;  %v5497_v49 = vsub.f32 %v21870_v59, %v5475_v56 }
 0xc5d   : >> { %v5505_v15 = vmul.f32 1.442695, %v5492_v61 }
 0xc5e   : >> { %v21986_v51 = vpop.eup %17920  ;;  %v5457_v33 = vpop.xlane.xlu1 %5456  ;;  %v5515_v0 = vmul.f32 1.442695, %v5497_v49 }
 0xc5f   : >> { %17922 = vpow2.f32 %v5505_v15  ;;  %v5484_v58 = vpop.xlane.xlu0 %5483  ;;  %v5491_v40 = vsub.f32 %v21875_v55, %v5457_v33  ;;  %v5533_v22 = vsel %vm1284_vm15, %v21986_v51, 0.0 }
 0xc60   : >> { %5534 = vadd.xlane.f32.xlu1 %v5533_v22  ;;  %v5500_v18 = vsub.f32 %v21880_v36, %v5484_v58 }
 0xc61   : >> { %v5503_v25 = vmul.f32 1.442695, %v5491_v40 }
 0xc62   : >> { %v5472_v42 = vpop.xlane.xlu1 %5471  ;;  %v5521_v56 = vmul.f32 1.442695, %v5500_v18 }
 0xc63   : >> { %17924 = vpow2.f32 %v5503_v25  ;;  %v5481_v19 = vpop.xlane.xlu0 %5480  ;;  %v5496_v29 = vsub.f32 %v21885_v16, %v5472_v42 }
 0xc64   : >> { %v5499_v47 = vsub.f32 %v21890_v6, %v5481_v19  ;;  %17926 = vpow2.f32 %v5511_v31 }
 0xc65   : >> { %v5513_v55 = vmul.f32 1.442695, %v5496_v29  ;;  %v4736_v29 = vmul.f32 0.125, %v21795_v60  ;;  %v4792_v60 = vsub.f32 %v21855_v57, %v21978_v41  ;;  %v4742_v57 = vmul.f32 0.125, %v21823_v21 }
 0xc66   : >> { %v5519_v28 = vmul.f32 1.442695, %v5499_v47 }
 0xc67   : >> { %17928 = vpow2.f32 %v5513_v55  ;;  %v5490_v62 = vpop.xlane.xlu0 %5489 }
 0xc68   : >> { %17930 = vpow2.f32 %v5517_v44  ;;  %v5502_v24 = vsub.f32 %v21897_v43, %v5490_v62  ;;  %v4738_v62 = vmul.f32 0.125, %v21805_v39 }
 0xc69   : >> { %v21996_v61 = vpop.eup %17922  ;;  %17932 = vpow2.f32 %v5519_v28  ;;  %v22034_v28 = vadd.f32 %v4736_v29, %v23195_v46  ;;  %v23242_v29 = vld [vmem:[#allocation120_spill] sm:$0xff] }
 0xc6a   : >> { %v5525_v16 = vmul.f32 1.442695, %v5502_v24  ;;  %v5530_v59 = vsel %vm1284_vm15, %v21996_v61, 0.0  ;;  %17934 = vpow2.f32 %v5515_v0  ;;  %v22042_v0 = vadd.f32 %v4738_v62, %v20355_v4 }
 0xc6b   : >> { %5531 = vadd.xlane.f32.xlu0 %v5530_v59  ;;  %v5487_v32 = vpop.xlane.xlu0 %5486  ;;  %v4740_v24 = vmul.f32 0.125, %v21815_v37  ;;  %v4768_v18 = vsel %vm1284_vm15, %v22034_v28, -inf  ;;  %v22058_v37 = vadd.f32 %v4742_v57, %v20375_v10 }
 0xc6c   : >> { %17936 = vpow2.f32 %v5525_v16  ;;  %v5501_v19 = vsub.f32 %v21903_v12, %v5487_v32  ;;  %v4804_v16 = vmul.f32 1.442695, %v4792_v60  ;;  %v4774_v59 = vsel %vm1284_vm15, %v22042_v0, -inf }
 0xc6d   : >> { %v22001_v6 = vpop.eup %17924  ;;  %17938 = vpow2.f32 %v5521_v56  ;;  %v22048_v39 = vadd.f32 %v4740_v24, %v20367_v8 }
 0xc6e   : >> { %v5527_v1 = vsel %vm1284_vm15, %v22001_v6, 0.0  ;;  %v22005_v15 = vpop.eup %17926  ;;  %v5523_v55 = vmul.f32 1.442695, %v5501_v19  ;;  %v23241_v19 = vld [vmem:[#allocation90_spill] sm:$0xff] }
 0xc6f   : >> { %5528 = vadd.xlane.f32.xlu0 %v5527_v1  ;;  %v5539_v33 = vsel %vm1284_vm15, %v22005_v15, 0.0  ;;  %v4780_v41 = vsel %vm1284_vm15, %v22048_v39, -inf }
 0xc70   : >> { %17940 = vpow2.f32 %v5523_v55  ;;  %v23243_v55 = vld [vmem:[#allocation117_spill] sm:$0xff] }
 0xc71   : >> { %v22007_v43 = vpop.eup %17928  ;;  %17942 = vpow2.f32 %v4804_v16  ;;  %v4739_v62 = vmul.f32 0.125, %v23243_v55  ;;  %v23244_v16 = vld [vmem:[#allocation118_spill] sm:$0xff] }
 0xc72   : >> { %v22009_v36 = vpop.eup %17930  ;;  %v5542_v58 = vsel %vm1284_vm15, %v22007_v43, 0.0 }
 0xc73   : >> { %v22015_v40 = vpop.eup %17932  ;;  %5540 = vadd.xlane.f32.xlu0 %v5539_v33  ;;  %5543 = vadd.xlane.f32.xlu1 %v5542_v58  ;;  %v5548_v25 = vsel %vm1284_vm15, %v22009_v36, 0.0  ;;  %v23240_v33 = vld [vmem:[#allocation95_spill] sm:$0xff]  ;;  %v4786_v58 = vsel %vm1284_vm15, %v22058_v37, -inf }
 0xc74   : >> { %v22017_v22 = vpop.eup %17934  ;;  %v5551_v31 = vsel %vm1284_vm15, %v22015_v40, 0.0 }
 0xc75   : >> { %v5545_v49 = vsel %vm1284_vm15, %v22017_v22, 0.0 }
 0xc76   : >> { %v22023_v42 = vpop.eup %17936 }
 0xc77   : >> { %5552 = vadd.xlane.f32.xlu0 %v5551_v31  ;;  %5549 = vadd.xlane.f32.xlu1 %v5548_v25  ;;  %v5560_v44 = vsel %vm1284_vm15, %v22023_v42, 0.0  ;;  %v22031_v47 = vpop.eup %17938  ;;  %v4737_v31 = vmul.f32 0.125, %v21791_v63  ;;  %v22071_v25 = vpop.permute.xlu1 %5973 }
 0xc78   : >> { %v5554_v12 = vsel %vm1284_vm15, %v22031_v47, 0.0 }
 0xc7a   : >> { %v22055_v56 = vpop.eup %17940 }
 0xc7b   : >> { %5561 = vadd.xlane.f32.xlu0 %v5560_v44  ;;  %5546 = vadd.xlane.f32.xlu1 %v5545_v49  ;;  %v5557_v1 = vsel %vm1284_vm15, %v22055_v56, 0.0  ;;  %v22066_v21 = vpop.eup %17942  ;;  %v4793_v44 = vsub.f32 %v23242_v29, %v21970_v50  ;;  %v22078_v49 = vadd.f32 %v4737_v31, %v23196_v27 }
 0xc7c   : >> { %v4828_v32 = vsel %vm1284_vm15, %v22066_v21, 0.0 }
 0xc7d   : >> { %v4806_v24 = vmul.f32 1.442695, %v4793_v44  ;;  %v4771_v50 = vsel %vm1284_vm15, %v22078_v49, -inf }
 0xc7f   : >> { %5555 = vadd.xlane.f32.xlu1 %v5554_v12  ;;  %v22081_v12 = vpop.permute.xlu0 %5975  ;;  %17944 = vpow2.f32 %v4806_v24 }
 0xc83   : >> { %4769 = vmax.xlane.f32.xlu1 %v4768_v18  ;;  %v22085_v18 = vadd.f32 %v4739_v62, %v20359_v5 }
 0xc87   : >> { %4775 = vmax.xlane.f32.xlu1 %v4774_v59  ;;  %v4741_v59 = vmul.f32 0.125, %v23244_v16 }
 0xc89   : >> { %v22104_v55 = vpop.eup %17944 }
 0xc8a   : >> { %v4831_v62 = vsel %vm1284_vm15, %v22104_v55, 0.0 }
 0xc8b   : >> { %4781 = vmax.xlane.f32.xlu1 %v4780_v41 }
 0xc8f   : >> { %5558 = vadd.xlane.f32.xlu1 %v5557_v1 }
 0xc91   : >> { %5979 = vrot.lane.b32.xlu0 %v23240_v33, %s19772_s12  ;;  %v22092_v33 = vadd.f32 %v4741_v59, %v20371_v9 }
 0xc93   : >> { %4787 = vmax.xlane.f32.xlu1 %v4786_v58  ;;  %v23245_v58 = vld [vmem:[#allocation119_spill] sm:$0xff]  ;;  %v4783_v44 = vsel %vm1284_vm15, %v22092_v33, -inf }
 0xc97   : >> { %4829 = vadd.xlane.f32.xlu1 %v4828_v32  ;;  %v4764_v60 = vpop.xlane.xlu1 %4763  ;;  %v4743_v32 = vmul.f32 0.125, %v23245_v58 }
 0xc98   : >> { %v4794_v63 = vsub.f32 %v21922_v48, %v4764_v60  ;;  %v4777_v48 = vsel %vm1284_vm15, %v22085_v18, -inf }
 0xc99   : >> { %v22098_v29 = vadd.f32 %v4743_v32, %v20379_v11 }
 0xc9a   : >> { %v4808_v41 = vmul.f32 1.442695, %v4794_v63 }
 0xc9c   : >> { %17946 = vpow2.f32 %v4808_v41  ;;  %v23246_v41 = vld [vmem:[#allocation91_spill] sm:$0xff] }
 0xca0   : >> { %v4767_v57 = vpop.xlane.xlu0 %4766 }
 0xca1   : >> { %v4795_v1 = vsub.f32 %v21939_v7, %v4767_v57  ;;  %v4789_v7 = vsel %vm1284_vm15, %v22098_v29, -inf }
 0xca3   : >> { %v4810_v31 = vmul.f32 1.442695, %v4795_v1 }
 0xca5   : >> { %17948 = vpow2.f32 %v4810_v31 }
 0xca6   : >> { %v22108_v60 = vpop.eup %17946 }
 0xca7   : >> { %v4834_v24 = vsel %vm1284_vm15, %v22108_v60, 0.0 }
 0xca8   : >> { %17619 = vrot.lane.b32.xlu1 %v23241_v19, %s19773_s29 }
 0xcaf   : >> { %v22112_v63 = vpop.eup %17948 }
 0xcb0   : >> { %4772 = vmax.xlane.f32.xlu0 %v4771_v50  ;;  %v4837_v16 = vsel %vm1284_vm15, %v22112_v63, 0.0 }
 0xcb4   : >> { %4778 = vmax.xlane.f32.xlu0 %v4777_v48 }
 0xcb8   : >> { %4784 = vmax.xlane.f32.xlu0 %v4783_v44 }
 0xcbc   : >> { %4790 = vmax.xlane.f32.xlu0 %v4789_v7 }
 0xcc0   : >> { %4832 = vadd.xlane.f32.xlu0 %v4831_v62 }
 0xcc4   : >> { %4835 = vadd.xlane.f32.xlu0 %v4834_v24  ;;  %v22129_v24 = vpop.permute.xlu1 %5977 }
 0xcc8   : >> { %4838 = vadd.xlane.f32.xlu0 %v4837_v16 }
 0xcd9   : >> { %v16454_v59 = vpop.f32.mrb[32].mxu1 }
 0xcda   : >> { %v3628_v57 = vpop.f32.mrb[33].mxu1 }
 0xcdb   : >> { %16472 = vmatprep.mubr.msk.f32.mxu1 %vm1098_vm14, %v3628_v57 }
 0xcdc   : >> { %16473 = vmatmul.mubr.msk.f32.vlgmr.msra.gmra.mrb[26].mxu1 %vm1098_vm14, %v16454_v59  ;;  %v23247_v59 = vld [vmem:[#allocation98_spill] sm:$0xff] }
 0xcdd   : >> { %v16457_v50 = vpop.f32.mrb[34].mxu1  ;;  %16553 = vmatpush3.msra.mxu1 %v23237_v13  ;;  %v23258_v13 = vld [vmem:[#allocation115_spill] sm:$0xff] }
 0xcde   : >> { %17624 = vrot.lane.b32.xlu0 %v23246_v41, %s19773_s29  ;;  %v3638_v1 = vpop.f32.mrb[35].mxu1 }
 0xcdf   : >> { %16475 = vmatprep.mubr.msk.f32.mxu1 %vm1098_vm14, %v3638_v1  ;;  %v23249_v1 = vld [vmem:[#allocation99_spill] sm:$0xff] }
 0xce0   : >> { %16476 = vmatmul.mubr.msk.f32.gmra.mrb[28].mxu1 %vm1098_vm14, %v16457_v50  ;;  %v23248_v50 = vld [vmem:[#allocation102_spill] sm:$0xff] }
 0xce1   : >> { %v16460_v58 = vpop.f32.mrb[36].mxu1 }
 0xce2   : >> { %v3648_v32 = vpop.f32.mrb[37].mxu1 }
 0xce3   : >> { %16478 = vmatprep.mubr.msk.f32.mxu1 %vm1098_vm14, %v3648_v32 }
 0xce4   : >> { %16479 = vmatmul.mubr.msk.f32.gmra.mrb[30].mxu1 %vm1098_vm14, %v16460_v58 }
 0xce5   : >> { %v16463_v48 = vpop.f32.mrb[38].mxu1 }
 0xce6   : >> { %v3658_v31 = vpop.f32.mrb[39].mxu1 }
 0xce7   : >> { %16481 = vmatprep.mubr.msk.f32.mxu1 %vm1098_vm14, %v3658_v31  ;;  %v23251_v31 = vld [vmem:[#allocation110_spill] sm:$0xff] }
 0xce8   : >> { %16482 = vmatmul.mubr.msk.f32.gmra.mrb[20].mxu1 %vm1098_vm14, %v16463_v48  ;;  %v23250_v48 = vld [vmem:[#allocation100_spill] sm:$0xff] }
 0xce9   : >> { %v16466_v44 = vpop.f32.mrb[40].mxu1  ;;  %v5538_v57 = vpop.xlane.xlu1 %5537 }
 0xcea   : >> { %v3668_v7 = vpop.f32.mrb[41].mxu1 }
 0xceb   : >> { %16484 = vmatprep.mubr.msk.f32.mxu1 %vm1098_vm14, %v3668_v7  ;;  %v23252_v7 = vld [vmem:[#allocation109_spill] sm:$0xff] }
 0xcec   : >> { %16485 = vmatmul.mubr.msk.f32.gmra.mrb[22].mxu1 %vm1098_vm14, %v16466_v44 }
 0xced   : >> { %v16469_v62 = vpop.f32.mrb[42].mxu1  ;;  %v5535_v58 = vpop.xlane.xlu1 %5534 }
 0xcee   : >> { %v3678_v16 = vpop.f32.mrb[43].mxu1  ;;  %17950 = vrcp.f32 %v5535_v58 }
 0xcef   : >> { %16487 = vmatprep.mubr.msk.f32.mxu1 %vm1098_vm14, %v3678_v16 }
 0xcf0   : >> { %16488 = vmatmul.mubr.msk.f32.gmra.mrb[24].mxu1 %vm1098_vm14, %v16469_v62  ;;  %v23253_v62 = vld [vmem:[#allocation112_spill] sm:$0xff] }
 0xcf1   : >> { %16554 = vmatprep.mubr.msk.f32.mxu1 %vm1098_vm14, %v23247_v59 }
 0xcf4   : >> { %16555 = vmatmul.mubr.msk.f32.vlgmr.msra.gmra.mrb[26].mxu1 %vm1098_vm14, %v23248_v50  ;;  %v23254_v50 = vld [vmem:[#allocation111_spill] sm:$0xff] }
 0xcf5   : >> { %16557 = vmatprep.mubr.msk.f32.mxu1 %vm1098_vm14, %v23249_v1  ;;  %v23255_v1 = vld [vmem:[#allocation114_spill] sm:$0xff] }
 0xcf8   : >> { %v5532_v32 = vpop.xlane.xlu0 %5531  ;;  %16558 = vmatmul.mubr.msk.f32.gmra.mrb[28].mxu1 %vm1098_vm14, %v23250_v48  ;;  %v17951_v48 = vpop.eup %17950 }
 0xcf9   : >> { %16560 = vmatprep.mubr.msk.f32.mxu1 %vm1098_vm14, %v23251_v31  ;;  %17952 = vrcp.f32 %v5532_v32  ;;  %v23256_v32 = vld [vmem:[#allocation113_spill] sm:$0xff] }
 0xcfc   : >> { %v5529_v44 = vpop.xlane.xlu0 %5528  ;;  %16561 = vmatmul.mubr.msk.f32.gmra.mrb[30].mxu1 %vm1098_vm14, %v23252_v7 }
 0xcfd   : >> { %17954 = vrcp.f32 %v5529_v44  ;;  %16563 = vmatprep.mubr.msk.f32.mxu1 %vm1098_vm14, %v23253_v62  ;;  %v23257_v44 = vld [vmem:[#allocation116_spill] sm:$0xff] }
 0xcfe   : >> { %17956 = vrcp.f32 %v5538_v57 }
 0xd00   : >> { %v5541_v16 = vpop.xlane.xlu0 %5540  ;;  %v5544_v59 = vpop.xlane.xlu1 %5543  ;;  %16564 = vmatmul.mubr.msk.f32.gmra.mrb[20].mxu1 %vm1098_vm14, %v23254_v50 }
 0xd01   : >> { %17958 = vrcp.f32 %v5541_v16  ;;  %16566 = vmatprep.mubr.msk.f32.mxu1 %vm1098_vm14, %v23255_v1  ;;  %v5577_v1 = vmul.f32 %v17951_v48, %v21986_v51 }
 0xd02   : >> { %17960 = vrcp.f32 %v5544_v59 }
 0xd03   : >> { %v17953_v57 = vpop.eup %17952 }
 0xd04   : >> { %v5550_v58 = vpop.xlane.xlu1 %5549  ;;  %16567 = vmatmul.mubr.msk.f32.gmra.mrb[22].mxu1 %vm1098_vm14, %v23256_v32  ;;  %v5553_v31 = vpop.xlane.xlu0 %5552  ;;  %v5576_v59 = vmul.f32 %v17953_v57, %v21996_v61 }
 0xd05   : >> { %16569 = vmatprep.mubr.msk.f32.mxu1 %vm1098_vm14, %v23257_v44  ;;  %17962 = vrcp.f32 %v5553_v31 }
 0xd06   : >> { %17964 = vrcp.f32 %v5550_v58 }
 0xd07   : >> { %v17955_v7 = vpop.eup %17954 }
 0xd08   : >> { %v5547_v62 = vpop.xlane.xlu1 %5546  ;;  %16570 = vmatmul.mubr.msk.f32.gmra.mrb[24].mxu1 %vm1098_vm14, %v23258_v13  ;;  %v5575_v16 = vmul.f32 %v17955_v7, %v22001_v6  ;;  %v17957_v50 = vpop.eup %17956 }
 0xd09   : >> { %17966 = vrcp.f32 %v5547_v62  ;;  %v5578_v13 = vmul.f32 %v17957_v50, %v21980_v20  ;;  %v5562_v50 = vpop.xlane.xlu0 %5561 }
 0xd0a   : >> { %16698 = vmatprep.mubr.msk.f32.mxu0 %vm1284_vm15, %v5575_v16 }
 0xd0b   : >> { %v17959_v32 = vpop.eup %17958  ;;  %16699 = vmatmul.mubr.msk.f32.vlgmr.msra.gmra.mrb[138].mxu0 %vm1284_vm15, %v5576_v59 }
 0xd0c   : >> { %16737 = vmatpush3.msra.mxu0 %v23239_v14  ;;  %v5556_v31 = vpop.xlane.xlu1 %5555  ;;  %16701 = vmatprep.mubr.msk.f32.mxu0 %vm1284_vm15, %v5577_v1  ;;  %v17961_v6 = vpop.eup %17960  ;;  %v5579_v61 = vmul.f32 %v17959_v32, %v22005_v15 }
 0xd0d   : >> { %17968 = vrcp.f32 %v5556_v31  ;;  %v5580_v48 = vmul.f32 %v17961_v6, %v22007_v43 }
 0xd0f   : >> { %16702 = vmatmul.mubr.msk.f32.gmra.mrb[140].mxu0 %vm1284_vm15, %v5578_v13  ;;  %v17963_v44 = vpop.eup %17962 }
 0xd10   : >> { %v4770_v58 = vpop.xlane.xlu1 %4769  ;;  %16704 = vmatprep.mubr.msk.f32.mxu0 %vm1284_vm15, %v5579_v61  ;;  %v17965_v14 = vpop.eup %17964  ;;  %v5583_v59 = vmul.f32 %v17963_v44, %v22015_v40 }
 0xd11   : >> { %v4796_v51 = vsub.f32 %v22034_v28, %v4770_v58  ;;  %v5582_v15 = vmul.f32 %v17965_v14, %v22009_v36 }
 0xd13   : >> { %v4812_v57 = vmul.f32 1.442695, %v4796_v51  ;;  %16705 = vmatmul.mubr.msk.f32.gmra.mrb[142].mxu0 %vm1284_vm15, %v5580_v48  ;;  %v17967_v7 = vpop.eup %17966 }
 0xd14   : >> { %v4776_v62 = vpop.xlane.xlu1 %4775  ;;  %v5581_v20 = vmul.f32 %v17967_v7, %v22017_v22 }
 0xd15   : >> { %17970 = vpow2.f32 %v4812_v57 }
 0xd16   : >> { %16707 = vmatprep.mubr.msk.f32.mxu0 %vm1284_vm15, %v5581_v20  ;;  %17972 = vrcp.f32 %v5562_v50 }
 0xd17   : >> { %v17969_v16 = vpop.eup %17968  ;;  %16708 = vmatmul.mubr.msk.f32.gmra.mrb[144].mxu0 %vm1284_vm15, %v5582_v15 }
 0xd18   : >> { %v4782_v43 = vpop.xlane.xlu1 %4781  ;;  %v5584_v28 = vmul.f32 %v17969_v16, %v22031_v47  ;;  %16710 = vmatprep.mubr.msk.f32.mxu0 %vm1284_vm15, %v5583_v59 }
 0xd1b   : >> { %16711 = vmatmul.mubr.msk.f32.gmra.mrb[146].mxu0 %vm1284_vm15, %v5584_v28 }
 0xd1c   : >> { %v5559_v1 = vpop.xlane.xlu1 %5558 }
 0xd1d   : >> { %17974 = vrcp.f32 %v5559_v1 }
 0xd1f   : >> { %v22179_v22 = vpop.eup %17970 }
 0xd20   : >> { %v22181_v36 = vpop.xlane.xlu1 %4787  ;;  %v4840_v40 = vsel %vm1284_vm15, %v22179_v22, 0.0  ;;  %v17973_v31 = vpop.eup %17972 }
 0xd21   : >> { %4841 = vadd.xlane.f32.xlu1 %v4840_v40  ;;  %v5586_v51 = vmul.f32 %v17973_v31, %v22023_v42  ;;  %v23259_v42 = vld [vmem:[#allocation92_spill] sm:$0xff] }
 0xd24   : >> { %v4830_v32 = vpop.xlane.xlu1 %4829 }
 0xd25   : >> { %17976 = vrcp.f32 %v4830_v32 }
 0xd27   : >> { %v17975_v47 = vpop.eup %17974 }
 0xd28   : >> { %v17620_v13 = vpop.permute.xlu1 %17619  ;;  %v5585_v58 = vmul.f32 %v17975_v47, %v22055_v56 }
 0xd29   : >> { %v17622_v6 = vunpack.i.h.bf16 %v17620_v13  ;;  %v17621_v61 = vunpack.i.l.bf16 %v17620_v13 }
 0xd2a   : >> { %16713 = vmatprep.mubr.msk.f32.mxu0 %vm1284_vm15, %v5585_v58  ;;  %v23261_v58 = vld [vmem:[#allocation97_spill] sm:$0xff] }
 0xd2b   : >> { %v17017_v48 = vpack.c.bf16 %v17622_v6, %v17621_v61  ;;  %16714 = vmatmul.mubr.msk.f32.gmra.mrb[148].mxu0 %vm1284_vm15, %v5586_v51  ;;  %v23262_v51 = vld [vmem:[#allocation94_spill] sm:$0xff] }
 0xd2c   : >> { %16738 = vmatprep.mubr.msk.f32.mxu0 %vm1098_vm14, %v21958_v34  ;;  %v23260_v34 = vld [vmem:[#allocation93_spill] sm:$0xff] }
 0xd2d   : >> { %17018 = vmatprep.subr.bf16.mxu1 %v17017_v48 }
 0xd2e   : >> { %17020 = vmatpush3.bf16.msra.mxu1 %v17017_v48  ;;  %v4802_v48 = vsub.f32 %v22058_v37, %v22181_v36 }
 0xd2f   : >> { %v17977_v44 = vpop.eup %17976  ;;  %16739 = vmatmul.mubr.msk.f32.vlgmr.msra.gmra.mrb[150].mxu0 %vm1098_vm14, %v21960_v23  ;;  %v5980_v23 = vpop.permute.xlu0 %5979 }
 0xd30   : >> { %16741 = vmatprep.mubr.msk.f32.mxu0 %vm1098_vm14, %v21962_v17  ;;  %v4876_v56 = vmul.f32 %v17977_v44, %v22066_v21  ;;  %v4798_v17 = vsub.f32 %v22042_v0, %v4776_v62  ;;  %v4824_v44 = vmul.f32 1.442695, %v4802_v48 }
 0xd32   : >> { %17629 = vrot.lane.b32.xlu1 %v23259_v42, %s19773_s29  ;;  %16616 = vmatprep.mubr.msk.f32.mxu1 %vm1284_vm15, %v4876_v56  ;;  %v4816_v21 = vmul.f32 1.442695, %v4798_v17 }
 0xd33   : >> { %16742 = vmatmul.mubr.msk.f32.gmra.mrb[152].mxu0 %vm1098_vm14, %v21964_v3 }
 0xd34   : >> { %16744 = vmatprep.mubr.msk.f32.mxu0 %vm1098_vm14, %v21966_v35 }
 0xd36   : >> { %17634 = vrot.lane.b32.xlu1 %v23260_v34, %s19773_s29 }
 0xd37   : >> { %16745 = vmatmul.mubr.msk.f32.gmra.mrb[154].mxu0 %vm1098_vm14, %v21968_v30 }
 0xd38   : >> { %16747 = vmatprep.mubr.msk.f32.mxu0 %vm1098_vm14, %v21972_v2 }
 0xd3b   : >> { %16748 = vmatmul.mubr.msk.f32.gmra.mrb[156].mxu0 %vm1098_vm14, %v21976_v26  ;;  %v4800_v26 = vsub.f32 %v22048_v39, %v4782_v43 }
 0xd3c   : >> { %16750 = vmatprep.mubr.msk.f32.mxu0 %vm1098_vm14, %v22071_v25 }
 0xd3d   : >> { %v4773_v3 = vpop.xlane.xlu0 %4772  ;;  %v4820_v57 = vmul.f32 1.442695, %v4800_v26 }
 0xd3e   : >> { %v4797_v35 = vsub.f32 %v22078_v49, %v4773_v3 }
 0xd3f   : >> { %16751 = vmatmul.mubr.msk.f32.gmra.mrb[158].mxu0 %vm1098_vm14, %v22081_v12 }
 0xd40   : >> { %v4814_v14 = vmul.f32 1.442695, %v4797_v35  ;;  %16753 = vmatprep.mubr.msk.f32.mxu0 %vm1098_vm14, %v22129_v24 }
 0xd41   : >> { %v4779_v30 = vpop.xlane.xlu0 %4778 }
 0xd42   : >> { %17978 = vpow2.f32 %v4814_v14  ;;  %v4799_v2 = vsub.f32 %v22085_v18, %v4779_v30 }
 0xd43   : >> { %17980 = vpow2.f32 %v4816_v21  ;;  %16754 = vmatmul.mubr.msk.f32.gmra.mrb[160].mxu0 %vm1098_vm14, %v5980_v23 }
 0xd44   : >> { %v4818_v0 = vmul.f32 1.442695, %v4799_v2 }
 0xd45   : >> { %v4785_v25 = vpop.xlane.xlu0 %4784 }
 0xd46   : >> { %v4801_v49 = vsub.f32 %v22092_v33, %v4785_v25  ;;  %17982 = vpow2.f32 %v4818_v0 }
 0xd47   : >> { %17984 = vpow2.f32 %v4820_v57 }
 0xd48   : >> { %v4822_v7 = vmul.f32 1.442695, %v4801_v49 }
 0xd49   : >> { %v4791_v12 = vpop.xlane.xlu0 %4790 }
 0xd4a   : >> { %v4803_v62 = vsub.f32 %v22098_v29, %v4791_v12  ;;  %17986 = vpow2.f32 %v4822_v7 }
 0xd4c   : >> { %v22224_v24 = vpop.eup %17978  ;;  %v4826_v18 = vmul.f32 1.442695, %v4803_v62 }
 0xd4d   : >> { %v4833_v20 = vpop.xlane.xlu0 %4832  ;;  %v4843_v39 = vsel %vm1284_vm15, %v22224_v24, 0.0  ;;  %v22228_v15 = vpop.eup %17980 }
 0xd4e   : >> { %4844 = vadd.xlane.f32.xlu0 %v4843_v39  ;;  %17988 = vpow2.f32 %v4826_v18  ;;  %v4846_v16 = vsel %vm1284_vm15, %v22228_v15, 0.0 }
 0xd4f   : >> { %17990 = vpow2.f32 %v4824_v44 }
 0xd50   : >> { %v22232_v59 = vpop.eup %17982  ;;  %17992 = vrcp.f32 %v4833_v20 }
 0xd51   : >> { %v4836_v33 = vpop.xlane.xlu0 %4835  ;;  %v22234_v29 = vpop.eup %17984  ;;  %v4849_v28 = vsel %vm1284_vm15, %v22232_v59, 0.0 }
 0xd52   : >> { %4847 = vadd.xlane.f32.xlu0 %v4846_v16  ;;  %v4852_v32 = vsel %vm1284_vm15, %v22234_v29, 0.0  ;;  %17994 = vrcp.f32 %v4836_v33 }
 0xd54   : >> { %v22238_v50 = vpop.eup %17986 }
 0xd55   : >> { %v4839_v43 = vpop.xlane.xlu0 %4838  ;;  %v4855_v40 = vsel %vm1284_vm15, %v22238_v50, 0.0 }
 0xd56   : >> { %4850 = vadd.xlane.f32.xlu0 %v4849_v28  ;;  %17996 = vrcp.f32 %v4839_v43 }
 0xd58   : >> { %v22244_v31 = vpop.eup %17988 }
 0xd59   : >> { %v17625_v1 = vpop.permute.xlu0 %17624  ;;  %v4861_v61 = vsel %vm1284_vm15, %v22244_v31, 0.0  ;;  %v22256_v56 = vpop.eup %17990 }
 0xd5a   : >> { %v17627_v47 = vunpack.i.h.bf16 %v17625_v1  ;;  %v17626_v13 = vunpack.i.l.bf16 %v17625_v1  ;;  %4856 = vadd.xlane.f32.xlu1 %v4855_v40  ;;  %4853 = vadd.xlane.f32.xlu0 %v4852_v32  ;;  %v4858_v23 = vsel %vm1284_vm15, %v22256_v56, 0.0  ;;  %v17993_v44 = vpop.eup %17992 }
 0xd5b   : >> { %v4877_v43 = vmul.f32 %v17993_v44, %v22104_v55 }
 0xd5c   : >> { %v17021_v6 = vpack.c.bf16 %v17627_v47, %v17626_v13 }
 0xd5e   : >> { %4862 = vadd.xlane.f32.xlu1 %v4861_v61  ;;  %17022 = vmatprep.subr.bf16.mxu1 %v17021_v6 }
 0xd5f   : >> { %17024 = vmatpush3.bf16.msra.mxu1 %v17021_v6 }
 0xd6f   : >> { %17644 = vrot.lane.b32.xlu1 %v23261_v58, %s19773_s29 }
 0xd70   : >> { %17639 = vrot.lane.b32.xlu0 %v23262_v51, %s19773_s29 }
 0xd73   : >> { %17654 = vrot.lane.b32.xlu1 %v23246_v41, %s19774_s27 }
 0xd8f   : >> { %4859 = vadd.xlane.f32.xlu0 %v4858_v23  ;;  %v17995_v23 = vpop.eup %17994 }
 0xda5   : >> { %17649 = vrot.lane.b32.xlu0 %v23241_v19, %s19774_s27 }
 0xdae   : >> { %v4842_v17 = vpop.xlane.xlu1 %4841 }
 0xdaf   : >> { %17998 = vrcp.f32 %v4842_v17  ;;  %v23263_v17 = vld [vmem:[#allocation71_spill] sm:$0xff] }
 0xdb2   : >> { %v17630_v3 = vpop.permute.xlu1 %17629 }
 0xdb3   : >> { %v17632_v35 = vunpack.i.h.bf16 %v17630_v3  ;;  %v17631_v21 = vunpack.i.l.bf16 %v17630_v3  ;;  %v17997_v3 = vpop.eup %17996 }
 0xdb5   : >> { %v17025_v14 = vpack.c.bf16 %v17632_v35, %v17631_v21  ;;  %v4878_v35 = vmul.f32 %v17995_v23, %v22108_v60 }
 0xdb6   : >> { %v17635_v41 = vpop.permute.xlu1 %17634 }
 0xdb7   : >> { %v17637_v30 = vunpack.i.h.bf16 %v17635_v41  ;;  %v17636_v2 = vunpack.i.l.bf16 %v17635_v41  ;;  %17026 = vmatprep.subr.bf16.mxu1 %v17025_v14  ;;  %v23264_v41 = vld [vmem:[#allocation72_spill] sm:$0xff] }
 0xdb8   : >> { %17028 = vmatpush3.bf16.msra.mxu1 %v17025_v14  ;;  %v4879_v14 = vmul.f32 %v17997_v3, %v22112_v63 }
 0xdb9   : >> { %v17029_v37 = vpack.c.bf16 %v17637_v30, %v17636_v2  ;;  %v17999_v21 = vpop.eup %17998 }
 0xdba   : >> { %v4880_v55 = vmul.f32 %v17999_v21, %v22179_v22 }
 0xdbb   : >> { %17030 = vmatprep.subr.bf16.mxu1 %v17029_v37 }
 0xdbc   : >> { %17032 = vmatpush3.bf16.msra.mxu1 %v17029_v37 }
 0xddb   : >> { %v4845_v36 = vpop.xlane.xlu0 %4844 }
 0xddc   : >> { %18000 = vrcp.f32 %v4845_v36 }
 0xdde   : >> { %v22262_v26 = vpop.f32.mrb[138].mxu0 }
 0xddf   : >> { %v4848_v0 = vpop.xlane.xlu0 %4847  ;;  %v22264_v25 = vpop.f32.mrb[139].mxu0 }
 0xde0   : >> { %18002 = vrcp.f32 %v4848_v0 }
 0xde2   : >> { %v22266_v19 = vpop.f32.mrb[140].mxu0 }
 0xde3   : >> { %v4851_v49 = vpop.xlane.xlu0 %4850  ;;  %v22268_v57 = vpop.f32.mrb[141].mxu0 }
 0xde4   : >> { %18004 = vrcp.f32 %v4851_v49 }
 0xde6   : >> { %v22270_v7 = vpop.f32.mrb[142].mxu0  ;;  %v18001_v30 = vpop.eup %18000 }
 0xde7   : >> { %v4854_v12 = vpop.xlane.xlu0 %4853  ;;  %v4857_v62 = vpop.xlane.xlu1 %4856  ;;  %v4881_v37 = vmul.f32 %v18001_v30, %v22224_v24 }
 0xde8   : >> { %v22272_v18 = vpop.f32.mrb[143].mxu0  ;;  %18006 = vrcp.f32 %v4854_v12 }
 0xde9   : >> { %18008 = vrcp.f32 %v4857_v62 }
 0xdea   : >> { %v22274_v39 = vpop.f32.mrb[144].mxu0  ;;  %v18003_v2 = vpop.eup %18002 }
 0xdeb   : >> { %v17640_v16 = vpop.permute.xlu0 %17639  ;;  %v22276_v40 = vpop.xlane.xlu1 %4862  ;;  %v4882_v49 = vmul.f32 %v18003_v2, %v22228_v15 }
 0xdec   : >> { %v17642_v28 = vunpack.i.h.bf16 %v17640_v16  ;;  %v17641_v1 = vunpack.i.l.bf16 %v17640_v16  ;;  %v22278_v32 = vpop.f32.mrb[145].mxu0  ;;  %18010 = vrcp.f32 %v22276_v40 }
 0xdee   : >> { %v17033_v47 = vpack.c.bf16 %v17642_v28, %v17641_v1  ;;  %v22280_v13 = vpop.f32.mrb[146].mxu0  ;;  %v18005_v36 = vpop.eup %18004 }
 0xdef   : >> { %v17645_v6 = vpop.permute.xlu1 %17644  ;;  %v22282_v61 = vpop.f32.mrb[147].mxu0  ;;  %v4883_v12 = vmul.f32 %v18005_v36, %v22232_v59 }
 0xdf0   : >> { %17034 = vmatprep.subr.bf16.mxu1 %v17033_v47  ;;  %v17647_v20 = vunpack.i.h.bf16 %v17645_v6  ;;  %v17646_v33 = vunpack.i.l.bf16 %v17645_v6 }
 0xdf1   : >> { %17036 = vmatpush3.bf16.msra.mxu1 %v17033_v47 }
 0xdf2   : >> { %v17037_v48 = vpack.c.bf16 %v17647_v20, %v17646_v33  ;;  %v18007_v63 = vpop.eup %18006 }
 0xdf3   : >> { %v18009_v62 = vpop.eup %18008  ;;  %v4884_v1 = vmul.f32 %v18007_v63, %v22234_v29 }
 0xdf4   : >> { %17038 = vmatprep.subr.bf16.mxu1 %v17037_v48  ;;  %v4885_v20 = vmul.f32 %v18009_v62, %v22238_v50 }
 0xdf5   : >> { %17040 = vmatpush3.bf16.msra.mxu1 %v17037_v48 }
 0xdf6   : >> { %16634 = vmatprep.subr.mxu1 %v23263_v17 }
 0xdf8   : >> { %16617 = vmatmul.mubr.msk.f32.vlgmr.msra.gmra.mrb[44].mxu1 %vm1284_vm15, %v4877_v43 }
 0xdf9   : >> { %16619 = vmatprep.mubr.msk.f32.mxu1 %vm1284_vm15, %v4878_v35  ;;  %16635 = vmatpush3.msra.mxu1 %v23263_v17  ;;  %v18116_v17 = vld [vmem:[#allocation14 + $0x780] ss:$48 sps:$4 sm:$0xff] (%p777_p13)  }
 0xdfa   : >> { %16716 = vmatprep.subr.mxu1 %v23264_v41 }
 0xdfc   : >> { %16620 = vmatmul.mubr.msk.f32.gmra.mrb[46].mxu1 %vm1284_vm15, %v4879_v14 }
 0xdfd   : >> { %16622 = vmatprep.mubr.msk.f32.mxu1 %vm1284_vm15, %v4880_v55 }
 0xdfe   : >> { %v22295_v60 = vpop.f32.mrb[148].mxu0 }
 0xdff   : >> { %v22298_v0 = vpop.f32.mrb[149].mxu0 }
 0xe00   : >> { %16623 = vmatmul.mubr.msk.f32.gmra.mrb[48].mxu1 %vm1284_vm15, %v4881_v37 }
 0xe01   : >> { %16625 = vmatprep.mubr.msk.f32.mxu1 %vm1284_vm15, %v4882_v49 }
 0xe02   : >> { %v16740_v22 = vpop.f32.mrb[150].mxu0 }
 0xe03   : >> { %v6131_v16 = vmul.f32 0.125, %v16740_v22  ;;  %v6071_v28 = vpop.f32.mrb[151].mxu0 }
 0xe04   : >> { %v6130_v47 = vmul.f32 0.125, %v6071_v28  ;;  %16626 = vmatmul.mubr.msk.f32.gmra.mrb[50].mxu1 %vm1284_vm15, %v4883_v12 }
 0xe05   : >> { %v22307_v24 = vadd.f32 %v6131_v16, %v23191_v38  ;;  %16628 = vmatprep.mubr.msk.f32.mxu1 %vm1284_vm15, %v4884_v1 }
 0xe06   : >> { %v22311_v15 = vadd.f32 %v6130_v47, %v23192_v54  ;;  %v16743_v6 = vpop.f32.mrb[152].mxu0 }
 0xe07   : >> { %v6133_v59 = vmul.f32 0.125, %v16743_v6  ;;  %v6081_v33 = vpop.f32.mrb[153].mxu0  ;;  %v6157_v48 = vsel %vm1284_vm15, %v22307_v24, -inf }
 0xe08   : >> { %v6132_v29 = vmul.f32 0.125, %v6081_v33  ;;  %6158 = vmax.xlane.f32.xlu1 %v6157_v48  ;;  %16629 = vmatmul.mubr.msk.f32.gmra.mrb[52].mxu1 %vm1284_vm15, %v4885_v20  ;;  %v6154_v38 = vsel %vm1284_vm15, %v22311_v15, -inf }
 0xe09   : >> { %v22320_v44 = vadd.f32 %v6133_v59, %v23194_v52  ;;  %6155 = vmax.xlane.f32.xlu0 %v6154_v38  ;;  %v18011_v38 = vpop.eup %18010 }
 0xe0a   : >> { %v16746_v54 = vpop.f32.mrb[154].mxu0  ;;  %v22325_v43 = vadd.f32 %v6132_v29, %v23193_v45 }
 0xe0b   : >> { %v6091_v23 = vpop.f32.mrb[155].mxu0  ;;  %v6163_v50 = vsel %vm1284_vm15, %v22320_v44, -inf  ;;  %v6135_v3 = vmul.f32 0.125, %v16746_v54 }
 0xe0c   : >> { %v6134_v30 = vmul.f32 0.125, %v6091_v23  ;;  %v6160_v52 = vsel %vm1284_vm15, %v22325_v43, -inf }
 0xe0d   : >> { %6164 = vmax.xlane.f32.xlu0 %v6163_v50  ;;  %v22328_v14 = vadd.f32 %v6135_v3, %v23196_v27 }
 0xe0e   : >> { %v16749_v35 = vpop.f32.mrb[156].mxu0  ;;  %v22333_v37 = vadd.f32 %v6134_v30, %v23195_v46 }
 0xe0f   : >> { %v6101_v21 = vpop.f32.mrb[157].mxu0  ;;  %v6137_v36 = vmul.f32 0.125, %v16749_v35  ;;  %v6169_v45 = vsel %vm1284_vm15, %v22328_v14, -inf  ;;  %v4887_v35 = vmul.f32 %v18011_v38, %v22244_v31 }
 0xe10   : >> { %v6136_v12 = vmul.f32 0.125, %v6101_v21  ;;  %v6166_v62 = vsel %vm1284_vm15, %v22333_v37, -inf }
 0xe11   : >> { %6161 = vmax.xlane.f32.xlu0 %v6160_v52  ;;  %v22338_v27 = vadd.f32 %v6137_v36, %v20359_v5  ;;  %v18107_v5 = vld [vmem:[#allocation14 + $0x724] ss:$48 sps:$4 sm:$0xff] (%p777_p13)  }
 0xe12   : >> { %v16752_v55 = vpop.f32.mrb[158].mxu0  ;;  %v22349_v1 = vadd.f32 %v6136_v12, %v20355_v4  ;;  %v18105_v4 = vld [vmem:[#allocation14 + $0x124] ss:$48 sps:$4 sm:$0xff] (%p777_p13)  }
 0xe13   : >> { %v6111_v2 = vpop.f32.mrb[159].mxu0  ;;  %v6139_v47 = vmul.f32 0.125, %v16752_v55  ;;  %v6175_v6 = vsel %vm1284_vm15, %v22338_v27, -inf }
 0xe14   : >> { %v6138_v59 = vmul.f32 0.125, %v6111_v2  ;;  %v6172_v40 = vsel %vm1284_vm15, %v22349_v1, -inf }
 0xe15   : >> { %6170 = vmax.xlane.f32.xlu0 %v6169_v45  ;;  %v22354_v20 = vadd.f32 %v6139_v47, %v20371_v9  ;;  %v18110_v9 = vld [vmem:[#allocation14 + $0x720] ss:$48 sps:$4 sm:$0xff] (%p777_p13)  }
 0xe16   : >> { %v16755_v49 = vpop.f32.mrb[160].mxu0  ;;  %v22359_v33 = vadd.f32 %v6138_v59, %v20367_v8  ;;  %v18109_v8 = vld [vmem:[#allocation14 + $0x120] ss:$48 sps:$4 sm:$0xff] (%p777_p13)  }
 0xe17   : >> { %v6141_v63 = vmul.f32 0.125, %v16755_v49  ;;  %v6121_v22 = vpop.f32.mrb[161].mxu0  ;;  %v6181_v29 = vsel %vm1284_vm15, %v22354_v20, -inf }
 0xe18   : >> { %v6140_v48 = vmul.f32 0.125, %v6121_v22  ;;  %v6178_v3 = vsel %vm1284_vm15, %v22359_v33, -inf }
 0xe19   : >> { %v22343_v16 = vadd.f32 %v6141_v63, %v20379_v11  ;;  %6167 = vmax.xlane.f32.xlu0 %v6166_v62  ;;  %v18113_v11 = vld [vmem:[#allocation14 + $0x784] ss:$48 sps:$4 sm:$0xff] (%p777_p13)  }
 0xe1a   : >> { %v22365_v50 = vadd.f32 %v6140_v48, %v20375_v10  ;;  %v18111_v10 = vld [vmem:[#allocation14 + $0x184] ss:$48 sps:$4 sm:$0xff] (%p777_p13)  }
 0xe1b   : >> { %v6187_v28 = vsel %vm1284_vm15, %v22343_v16, -inf }
 0xe1c   : >> { %v4860_v46 = vpop.xlane.xlu0 %4859  ;;  %6188 = vmax.xlane.f32.xlu1 %v6187_v28  ;;  %v6184_v21 = vsel %vm1284_vm15, %v22365_v50, -inf }
 0xe1d   : >> { %18012 = vrcp.f32 %v4860_v46  ;;  %6176 = vmax.xlane.f32.xlu0 %v6175_v6 }
 0xe20   : >> { %v22380_v30 = vpop.permute.xlu0 %17649 }
 0xe21   : >> { %6173 = vmax.xlane.f32.xlu0 %v6172_v40 }
 0xe25   : >> { %6182 = vmax.xlane.f32.xlu0 %v6181_v29 }
 0xe27   : >> { %v18013_v54 = vpop.eup %18012 }
 0xe28   : >> { %v4886_v23 = vmul.f32 %v18013_v54, %v22256_v56  ;;  %v22378_v56 = vpop.permute.xlu1 %17654 }
 0xe29   : >> { %6179 = vmax.xlane.f32.xlu0 %v6178_v3 }
 0xe2a   : >> { %16631 = vmatprep.mubr.msk.f32.mxu1 %vm1284_vm15, %v4886_v23 }
 0xe2b   : >> { %16632 = vmatmul.mubr.msk.f32.gmra.mrb[54].mxu1 %vm1284_vm15, %v4887_v35 }
 0xe2d   : >> { %17664 = vrot.lane.b32.xlu1 %v23260_v34, %s19774_s27  ;;  %6185 = vmax.xlane.f32.xlu0 %v6184_v21 }
 0xe43   : >> { %17659 = vrot.lane.b32.xlu0 %v23259_v42, %s19774_s27 }
 0xe95   : >> { %v6159_v31 = vpop.xlane.xlu1 %6158 }
 0xe96   : >> { %v6191_v52 = vsub.f32 %v22307_v24, %v6159_v31  ;;  %v6156_v55 = vpop.xlane.xlu0 %6155 }
 0xe97   : >> { %v6190_v2 = vsub.f32 %v22311_v15, %v6156_v55 }
 0xe98   : >> { %v6204_v36 = vmul.f32 1.442695, %v6191_v52 }
 0xe99   : >> { %v6202_v45 = vmul.f32 1.442695, %v6190_v2 }
 0xe9a   : >> { %18014 = vpow2.f32 %v6204_v36  ;;  %v6165_v49 = vpop.xlane.xlu0 %6164 }
 0xe9b   : >> { %18016 = vpow2.f32 %v6202_v45  ;;  %v6193_v34 = vsub.f32 %v22320_v44, %v6165_v49 }
 0xe9d   : >> { %v6208_v63 = vmul.f32 1.442695, %v6193_v34 }
 0xe9e   : >> { %v6162_v22 = vpop.xlane.xlu0 %6161 }
 0xe9f   : >> { %18018 = vpow2.f32 %v6208_v63  ;;  %v6192_v42 = vsub.f32 %v22325_v43, %v6162_v22 }
 0xea1   : >> { %v6206_v12 = vmul.f32 1.442695, %v6192_v42 }
 0xea2   : >> { %v6171_v62 = vpop.xlane.xlu0 %6170 }
 0xea3   : >> { %18020 = vpow2.f32 %v6206_v12  ;;  %v6195_v24 = vsub.f32 %v22328_v14, %v6171_v62 }
 0xea4   : >> { %v22387_v46 = vpop.eup %18014 }
 0xea5   : >> { %v22389_v15 = vpop.eup %18016  ;;  %v6212_v28 = vmul.f32 1.442695, %v6195_v24  ;;  %v6229_v47 = vsel %vm1284_vm15, %v22387_v46, 0.0 }
 0xea6   : >> { %v6168_v6 = vpop.xlane.xlu0 %6167  ;;  %6230 = vadd.xlane.f32.xlu1 %v6229_v47  ;;  %v6226_v44 = vsel %vm1284_vm15, %v22389_v15, 0.0 }
 0xea7   : >> { %18022 = vpow2.f32 %v6212_v28  ;;  %v6194_v43 = vsub.f32 %v22333_v37, %v6168_v6  ;;  %6227 = vadd.xlane.f32.xlu0 %v6226_v44  ;;  %v17652_v6 = vunpack.i.h.bf16 %v22380_v30  ;;  %v17651_v44 = vunpack.i.l.bf16 %v22380_v30 }
 0xea9   : >> { %v22396_v59 = vpop.eup %18018  ;;  %v6210_v14 = vmul.f32 1.442695, %v6194_v43 }
 0xeaa   : >> { %v6177_v40 = vpop.xlane.xlu0 %6176  ;;  %v6235_v48 = vsel %vm1284_vm15, %v22396_v59, 0.0 }
 0xeab   : >> { %18024 = vpow2.f32 %v6210_v14  ;;  %v6197_v29 = vsub.f32 %v22338_v27, %v6177_v40  ;;  %6236 = vadd.xlane.f32.xlu1 %v6235_v48  ;;  %v17065_v48 = vpack.c.bf16 %v17652_v6, %v17651_v44 }
 0xead   : >> { %v22401_v38 = vpop.eup %18020  ;;  %v6216_v54 = vmul.f32 1.442695, %v6197_v29 }
 0xeae   : >> { %v6174_v23 = vpop.xlane.xlu0 %6173  ;;  %v6232_v3 = vsel %vm1284_vm15, %v22401_v38, 0.0 }
 0xeaf   : >> { %18026 = vpow2.f32 %v6216_v54  ;;  %v6196_v37 = vsub.f32 %v22349_v1, %v6174_v23  ;;  %6233 = vadd.xlane.f32.xlu1 %v6232_v3 }
 0xeb1   : >> { %v22406_v35 = vpop.eup %18022  ;;  %v6214_v21 = vmul.f32 1.442695, %v6196_v37 }
 0xeb2   : >> { %v6183_v31 = vpop.xlane.xlu0 %6182  ;;  %v6241_v52 = vsel %vm1284_vm15, %v22406_v35, 0.0 }
 0xeb3   : >> { %18028 = vpow2.f32 %v6214_v21  ;;  %v6199_v27 = vsub.f32 %v22354_v20, %v6183_v31  ;;  %6242 = vadd.xlane.f32.xlu1 %v6241_v52  ;;  %v6189_v52 = vpop.xlane.xlu1 %6188 }
 0xeb5   : >> { %v22411_v55 = vpop.eup %18024  ;;  %v6220_v2 = vmul.f32 1.442695, %v6199_v27  ;;  %v6201_v27 = vsub.f32 %v22343_v16, %v6189_v52 }
 0xeb6   : >> { %v6180_v36 = vpop.xlane.xlu0 %6179  ;;  %v6238_v45 = vsel %vm1284_vm15, %v22411_v55, 0.0 }
 0xeb7   : >> { %18030 = vpow2.f32 %v6220_v2  ;;  %v6198_v1 = vsub.f32 %v22359_v33, %v6180_v36  ;;  %6239 = vadd.xlane.f32.xlu0 %v6238_v45  ;;  %v6224_v2 = vmul.f32 1.442695, %v6201_v27 }
 0xeb9   : >> { %v22416_v49 = vpop.eup %18026  ;;  %v6218_v34 = vmul.f32 1.442695, %v6198_v1 }
 0xeba   : >> { %v6186_v63 = vpop.xlane.xlu0 %6185  ;;  %v6247_v22 = vsel %vm1284_vm15, %v22416_v49, 0.0 }
 0xebb   : >> { %18032 = vpow2.f32 %v6218_v34  ;;  %v6200_v20 = vsub.f32 %v22365_v50, %v6186_v63  ;;  %6248 = vadd.xlane.f32.xlu1 %v6247_v22  ;;  %v17656_v34 = vunpack.i.l.bf16 %v22378_v56 }
 0xebd   : >> { %v22421_v42 = vpop.eup %18028  ;;  %v6222_v12 = vmul.f32 1.442695, %v6200_v20 }
 0xebe   : >> { %v6244_v62 = vsel %vm1284_vm15, %v22421_v42, 0.0  ;;  %v17660_v63 = vpop.permute.xlu0 %17659 }
 0xebf   : >> { %18034 = vpow2.f32 %v6222_v12  ;;  %6245 = vadd.xlane.f32.xlu1 %v6244_v62  ;;  %v17662_v22 = vunpack.i.h.bf16 %v17660_v63  ;;  %v17661_v20 = vunpack.i.l.bf16 %v17660_v63  ;;  %v17665_v12 = vpop.permute.xlu1 %17664 }
 0xec0   : >> { %18036 = vpow2.f32 %v6224_v2  ;;  %v17667_v62 = vunpack.i.h.bf16 %v17665_v12 }
 0xec1   : >> { %v22425_v33 = vpop.eup %18030 }
 0xec2   : >> { %v6253_v24 = vsel %vm1284_vm15, %v22425_v33, 0.0 }
 0xec3   : >> { %6254 = vadd.xlane.f32.xlu1 %v6253_v24  ;;  %v17073_v24 = vpack.c.bf16 %v17662_v22, %v17661_v20 }
 0xec5   : >> { %v22429_v28 = vpop.eup %18032 }
 0xec6   : >> { %v6250_v50 = vsel %vm1284_vm15, %v22429_v28, 0.0 }
 0xec7   : >> { %6251 = vadd.xlane.f32.xlu0 %v6250_v50 }
 0xec9   : >> { %v22433_v47 = vpop.eup %18034 }
 0xeca   : >> { %v6256_v43 = vsel %vm1284_vm15, %v22433_v47, 0.0  ;;  %v22455_v36 = vpop.eup %18036 }
 0xecb   : >> { %6257 = vadd.xlane.f32.xlu1 %v6256_v43  ;;  %v16618_v14 = vpop.f32.mrb[44].mxu1  ;;  %v6259_v45 = vsel %vm1284_vm15, %v22455_v36, 0.0 }
 0xecc   : >> { %v5026_v40 = vpop.f32.mrb[45].mxu1 }
 0xecd   : >> { %16636 = vmatprep.mubr.msk.f32.mxu1 %vm1098_vm14, %v5026_v40 }
 0xece   : >> { %16637 = vmatmul.mubr.msk.f32.vlgmr.msra.gmra.mrb[26].mxu1 %vm1098_vm14, %v16618_v14 }
 0xecf   : >> { %16717 = vmatpush3.msra.mxu1 %v23264_v41  ;;  %v16621_v29 = vpop.f32.mrb[46].mxu1  ;;  %v18117_v41 = vld [vmem:[#allocation14 + $0x1e4] ss:$48 sps:$4 sm:$0xff] (%p777_p13)  }
 0xed0   : >> { %17066 = vmatprep.subr.bf16.mxu1 %v17065_v48  ;;  %v5036_v54 = vpop.f32.mrb[47].mxu1 }
 0xed1   : >> { %16639 = vmatprep.mubr.msk.f32.mxu1 %vm1098_vm14, %v5036_v54 }
 0xed2   : >> { %16640 = vmatmul.mubr.msk.f32.gmra.mrb[28].mxu1 %vm1098_vm14, %v16621_v29 }
 0xed3   : >> { %v16624_v30 = vpop.f32.mrb[48].mxu1 }
 0xed4   : >> { %v5046_v23 = vpop.f32.mrb[49].mxu1 }
 0xed5   : >> { %16642 = vmatprep.mubr.msk.f32.mxu1 %vm1098_vm14, %v5046_v23 }
 0xed6   : >> { %16643 = vmatmul.mubr.msk.f32.gmra.mrb[30].mxu1 %vm1098_vm14, %v16624_v30 }
 0xed7   : >> { %v16627_v3 = vpop.f32.mrb[50].mxu1 }
 0xed8   : >> { %v5056_v37 = vpop.f32.mrb[51].mxu1 }
 0xed9   : >> { %16645 = vmatprep.mubr.msk.f32.mxu1 %vm1098_vm14, %v5056_v37  ;;  %v23265_v37 = vld [vmem:[#allocation73_spill] sm:$0xff] }
 0xeda   : >> { %16646 = vmatmul.mubr.msk.f32.gmra.mrb[20].mxu1 %vm1098_vm14, %v16627_v3 }
 0xedb   : >> { %v16630_v21 = vpop.f32.mrb[52].mxu1 }
 0xedc   : >> { %17674 = vrot.lane.b32.xlu1 %v23261_v58, %s19774_s27  ;;  %v5066_v31 = vpop.f32.mrb[53].mxu1 }
 0xedd   : >> { %17669 = vrot.lane.b32.xlu0 %v23262_v51, %s19774_s27  ;;  %16648 = vmatprep.mubr.msk.f32.mxu1 %vm1098_vm14, %v5066_v31  ;;  %v17657_v51 = vunpack.i.h.bf16 %v22378_v56  ;;  %v17666_v56 = vunpack.i.l.bf16 %v17665_v12 }
 0xede   : >> { %16649 = vmatmul.mubr.msk.f32.gmra.mrb[22].mxu1 %vm1098_vm14, %v16630_v21 }
 0xedf   : >> { %v17069_v16 = vpack.c.bf16 %v17657_v51, %v17656_v34 }
 0xefc   : >> { %6260 = vadd.xlane.f32.xlu0 %v6259_v45 }
 0xefe   : >> { %v16633_v58 = vpop.f32.mrb[54].mxu1 }
 0xeff   : >> { %v5076_v1 = vpop.f32.mrb[55].mxu1 }
 0xf00   : >> { %16651 = vmatprep.mubr.msk.f32.mxu1 %vm1098_vm14, %v5076_v1 }
 0xf01   : >> { %16652 = vmatmul.mubr.msk.f32.gmra.mrb[24].mxu1 %vm1098_vm14, %v16633_v58 }
 0xf02   : >> { %16718 = vmatprep.mubr.msk.f32.mxu1 %vm1098_vm14, %v22264_v25  ;;  %v17077_v25 = vpack.c.bf16 %v17667_v62, %v17666_v56 }
 0xf05   : >> { %16719 = vmatmul.mubr.msk.f32.vlgmr.msra.gmra.mrb[26].mxu1 %vm1098_vm14, %v22262_v26 }
 0xf06   : >> { %17068 = vmatpush3.bf16.msra.mxu1 %v17065_v48  ;;  %16721 = vmatprep.mubr.msk.f32.mxu1 %vm1098_vm14, %v22268_v57 }
 0xf07   : >> { %17070 = vmatprep.subr.bf16.mxu1 %v17069_v16 }
 0xf09   : >> { %16722 = vmatmul.mubr.msk.f32.gmra.mrb[28].mxu1 %vm1098_vm14, %v22266_v19 }
 0xf0a   : >> { %17072 = vmatpush3.bf16.msra.mxu1 %v17069_v16  ;;  %16724 = vmatprep.mubr.msk.f32.mxu1 %vm1098_vm14, %v22272_v18 }
 0xf0b   : >> { %17074 = vmatprep.subr.bf16.mxu1 %v17073_v24 }
 0xf0d   : >> { %16725 = vmatmul.mubr.msk.f32.gmra.mrb[30].mxu1 %vm1098_vm14, %v22270_v7 }
 0xf0e   : >> { %17076 = vmatpush3.bf16.msra.mxu1 %v17073_v24  ;;  %16727 = vmatprep.mubr.msk.f32.mxu1 %vm1098_vm14, %v22278_v32 }
 0xf0f   : >> { %17078 = vmatprep.subr.bf16.mxu1 %v17077_v25 }
 0xf11   : >> { %16728 = vmatmul.mubr.msk.f32.gmra.mrb[20].mxu1 %vm1098_vm14, %v22274_v39 }
 0xf12   : >> { %17080 = vmatpush3.bf16.msra.mxu1 %v17077_v25  ;;  %16730 = vmatprep.mubr.msk.f32.mxu1 %vm1098_vm14, %v22282_v61 }
 0xf15   : >> { %16731 = vmatmul.mubr.msk.f32.gmra.mrb[22].mxu1 %vm1098_vm14, %v22280_v13 }
 0xf16   : >> { %16733 = vmatprep.mubr.msk.f32.mxu1 %vm1098_vm14, %v22298_v0 }
 0xf19   : >> { %16734 = vmatmul.mubr.msk.f32.gmra.mrb[24].mxu1 %vm1098_vm14, %v22295_v60 }
 0xf33   : >> { %v6231_v26 = vpop.xlane.xlu1 %6230 }
 0xf34   : >> { %v6228_v19 = vpop.xlane.xlu0 %6227 }
 0xf35   : >> { %18038 = vrcp.f32 %v6228_v19 }
 0xf36   : >> { %18040 = vrcp.f32 %v6231_v26 }
 0xf38   : >> { %v6237_v57 = vpop.xlane.xlu1 %6236 }
 0xf3c   : >> { %v6234_v7 = vpop.xlane.xlu1 %6233 }
 0xf3d   : >> { %18042 = vrcp.f32 %v6234_v7  ;;  %v23266_v7 = vld [vmem:[#allocation103_spill] sm:$0xff] }
 0xf3e   : >> { %18044 = vrcp.f32 %v6237_v57 }
 0xf3f   : >> { %v18039_v18 = vpop.eup %18038 }
 0xf40   : >> { %v6274_v39 = vmul.f32 %v18039_v18, %v22389_v15  ;;  %v6243_v32 = vpop.xlane.xlu1 %6242  ;;  %v18041_v30 = vpop.eup %18040 }
 0xf41   : >> { %v6275_v3 = vmul.f32 %v18041_v30, %v22387_v46 }
 0xf42   : >> { %16780 = vmatprep.mubr.msk.f32.mxu1 %vm1284_vm15, %v6274_v39 }
 0xf44   : >> { %v6240_v13 = vpop.xlane.xlu0 %6239 }
 0xf45   : >> { %18046 = vrcp.f32 %v6240_v13 }
 0xf46   : >> { %18048 = vrcp.f32 %v6243_v32  ;;  %v23267_v32 = vld [vmem:[#allocation104_spill] sm:$0xff] }
 0xf47   : >> { %v18043_v23 = vpop.eup %18042 }
 0xf48   : >> { %v6249_v61 = vpop.xlane.xlu1 %6248  ;;  %v18045_v21 = vpop.eup %18044  ;;  %v6276_v31 = vmul.f32 %v18043_v23, %v22401_v38  ;;  %v23272_v23 = vld [vmem:[#allocation81_spill] sm:$0xff] }
 0xf49   : >> { %v6277_v27 = vmul.f32 %v18045_v21, %v22396_v59  ;;  %v23273_v21 = vld [vmem:[#allocation107_spill] sm:$0xff] }
 0xf4c   : >> { %v6246_v50 = vpop.xlane.xlu1 %6245 }
 0xf4d   : >> { %18050 = vrcp.f32 %v6246_v50  ;;  %v23268_v50 = vld [vmem:[#allocation74_spill] sm:$0xff] }
 0xf4e   : >> { %18052 = vrcp.f32 %v6249_v61 }
 0xf4f   : >> { %v18047_v52 = vpop.eup %18046 }
 0xf50   : >> { %v6255_v6 = vpop.xlane.xlu1 %6254  ;;  %v18049_v2 = vpop.eup %18048  ;;  %v6278_v46 = vmul.f32 %v18047_v52, %v22411_v55 }
 0xf51   : >> { %v6279_v38 = vmul.f32 %v18049_v2, %v22406_v35 }
 0xf54   : >> { %v6252_v44 = vpop.xlane.xlu0 %6251 }
 0xf55   : >> { %18054 = vrcp.f32 %v6252_v44  ;;  %v23269_v44 = vld [vmem:[#allocation78_spill] sm:$0xff] }
 0xf56   : >> { %18056 = vrcp.f32 %v6255_v6 }
 0xf57   : >> { %v18051_v45 = vpop.eup %18050 }
 0xf58   : >> { %v6258_v0 = vpop.xlane.xlu1 %6257  ;;  %v17670_v60 = vpop.permute.xlu0 %17669  ;;  %v6280_v1 = vmul.f32 %v18051_v45, %v22421_v42 }
 0xf59   : >> { %v17672_v43 = vunpack.i.h.bf16 %v17670_v60  ;;  %v17671_v14 = vunpack.i.l.bf16 %v17670_v60  ;;  %18058 = vrcp.f32 %v6258_v0  ;;  %v18053_v58 = vpop.eup %18052  ;;  %v23270_v60 = vld [vmem:[#allocation105_spill] sm:$0xff] }
 0xf5a   : >> { %v6281_v59 = vmul.f32 %v18053_v58, %v22416_v49 }
 0xf5b   : >> { %v17081_v40 = vpack.c.bf16 %v17672_v43, %v17671_v14 }
 0xf5c   : >> { %v17675_v48 = vpop.permute.xlu1 %17674 }
 0xf5d   : >> { %v17677_v29 = vunpack.i.h.bf16 %v17675_v48  ;;  %v17676_v15 = vunpack.i.l.bf16 %v17675_v48  ;;  %17082 = vmatprep.subr.bf16.mxu1 %v17081_v40 }
 0xf5e   : >> { %17084 = vmatpush3.bf16.msra.mxu1 %v17081_v40  ;;  %v23271_v40 = vld [vmem:[#allocation106_spill] sm:$0xff] }
 0xf5f   : >> { %v17085_v54 = vpack.c.bf16 %v17677_v29, %v17676_v15  ;;  %v18055_v51 = vpop.eup %18054 }
 0xf60   : >> { %v18057_v34 = vpop.eup %18056  ;;  %v6282_v55 = vmul.f32 %v18055_v51, %v22429_v28 }
 0xf61   : >> { %17086 = vmatprep.subr.bf16.mxu1 %v17085_v54  ;;  %v6283_v35 = vmul.f32 %v18057_v34, %v22425_v33 }
 0xf62   : >> { %17088 = vmatpush3.bf16.msra.mxu1 %v17085_v54 }
 0xf63   : >> { %16798 = vmatprep.subr.mxu1 %v23265_v37  ;;  %v18059_v63 = vpop.eup %18058 }
 0xf64   : >> { %v6284_v16 = vmul.f32 %v18059_v63, %v22433_v47 }
 0xf65   : >> { %16781 = vmatmul.mubr.msk.f32.vlgmr.msra.gmra.mrb[56].mxu1 %vm1284_vm15, %v6275_v3 }
 0xf66   : >> { %16783 = vmatprep.mubr.msk.f32.mxu1 %vm1284_vm15, %v6276_v31  ;;  %16799 = vmatpush3.msra.mxu1 %v23265_v37  ;;  %v18119_v37 = vld [vmem:[#allocation14 + $0x7e4] ss:$48 sps:$4 sm:$0xff] (%p777_p13)  }
 0xf69   : >> { %16784 = vmatmul.mubr.msk.f32.gmra.mrb[58].mxu1 %vm1284_vm15, %v6277_v27  ;;  %v23274_v27 = vld [vmem:[#allocation79_spill] sm:$0xff] }
 0xf6a   : >> { %16786 = vmatprep.mubr.msk.f32.mxu1 %vm1284_vm15, %v6278_v46  ;;  %v23275_v46 = vld [vmem:[#allocation108_spill] sm:$0xff] }
 0xf6d   : >> { %16787 = vmatmul.mubr.msk.f32.gmra.mrb[60].mxu1 %vm1284_vm15, %v6279_v38 }
 0xf6e   : >> { %16789 = vmatprep.mubr.msk.f32.mxu1 %vm1284_vm15, %v6280_v1 }
 0xf71   : >> { %16790 = vmatmul.mubr.msk.f32.gmra.mrb[62].mxu1 %vm1284_vm15, %v6281_v59  ;;  %v23276_v59 = vld [vmem:[#allocation83_spill] sm:$0xff] }
 0xf72   : >> { %16792 = vmatprep.mubr.msk.f32.mxu1 %vm1284_vm15, %v6282_v55 }
 0xf75   : >> { %16793 = vmatmul.mubr.msk.f32.gmra.mrb[64].mxu1 %vm1284_vm15, %v6283_v35 }
 0xf76   : >> { %16795 = vmatprep.mubr.msk.f32.mxu1 %vm1284_vm15, %v6284_v16  ;;  %v23277_v16 = vld [vmem:[#allocation85_spill] sm:$0xff] }
 0xf89   : >> { %v6261_v42 = vpop.xlane.xlu0 %6260 }
 0xf8a   : >> { %18060 = vrcp.f32 %v6261_v42 }
 0xf94   : >> { %v18061_v22 = vpop.eup %18060 }
 0xf95   : >> { %v6285_v49 = vmul.f32 %v18061_v22, %v22455_v36 }
 0xf97   : >> { %16796 = vmatmul.mubr.msk.f32.gmra.mrb[66].mxu1 %vm1284_vm15, %v6285_v49  ;;  %v23278_v49 = vld [vmem:[#allocation84_spill] sm:$0xff] }
0x1038   : >> { %v16782_v28 = vpop.f32.mrb[56].mxu1 }
0x1039   : >> { %v6424_v20 = vpop.f32.mrb[57].mxu1 }
0x103a   : >> { %16800 = vmatprep.mubr.msk.f32.mxu1 %vm1098_vm14, %v6424_v20 }
0x103b   : >> { %16801 = vmatmul.mubr.msk.f32.vlgmr.msra.gmra.mrb[26].mxu1 %vm1098_vm14, %v16782_v28 }
0x103c   : >> { %v16785_v33 = vpop.f32.mrb[58].mxu1 }
0x103d   : >> { %v6434_v12 = vpop.f32.mrb[59].mxu1 }
0x103e   : >> { %16803 = vmatprep.mubr.msk.f32.mxu1 %vm1098_vm14, %v6434_v12 }
0x103f   : >> { %16804 = vmatmul.mubr.msk.f32.gmra.mrb[28].mxu1 %vm1098_vm14, %v16785_v33 }
0x1040   : >> { %v16788_v47 = vpop.f32.mrb[60].mxu1 }
0x1041   : >> { %v6444_v62 = vpop.f32.mrb[61].mxu1 }
0x1042   : >> { %16806 = vmatprep.mubr.msk.f32.mxu1 %vm1098_vm14, %v6444_v62  ;;  %v23279_v62 = vld [vmem:[#allocation87_spill] sm:$0xff] }
0x1043   : >> { %16807 = vmatmul.mubr.msk.f32.gmra.mrb[30].mxu1 %vm1098_vm14, %v16788_v47 }
0x1044   : >> { %v16791_v36 = vpop.f32.mrb[62].mxu1 }
0x1045   : >> { %v6454_v56 = vpop.f32.mrb[63].mxu1 }
0x1046   : >> { %16809 = vmatprep.mubr.msk.f32.mxu1 %vm1098_vm14, %v6454_v56 }
0x1047   : >> { %16810 = vmatmul.mubr.msk.f32.gmra.mrb[20].mxu1 %vm1098_vm14, %v16791_v36 }
0x1048   : >> { %v16794_v24 = vpop.f32.mrb[64].mxu1 }
0x1049   : >> { %v6464_v25 = vpop.f32.mrb[65].mxu1 }
0x104a   : >> { %16812 = vmatprep.mubr.msk.f32.mxu1 %vm1098_vm14, %v6464_v25 }
0x104b   : >> { %16813 = vmatmul.mubr.msk.f32.gmra.mrb[22].mxu1 %vm1098_vm14, %v16794_v24 }
0x106a   : >> { %v16797_v26 = vpop.f32.mrb[66].mxu1 }
0x106b   : >> { %v6474_v19 = vpop.f32.mrb[67].mxu1 }
0x106c   : >> { %16815 = vmatprep.mubr.msk.f32.mxu1 %vm1098_vm14, %v6474_v19 }
0x106d   : >> { %16816 = vmatmul.mubr.msk.f32.gmra.mrb[24].mxu1 %vm1098_vm14, %v16797_v26 }
0x110e   : >> { %v16802_v57 = vpop.f32.mrb[26].mxu1 }
0x110f   : >> { %v17095_v18 = vadd.f32 %v16802_v57, %v23266_v7  ;;  %v6585_v39 = vpop.f32.mrb[27].mxu1 }
0x1110   : >> { %v17096_v61 = vadd.f32 %v6585_v39, %v23267_v32  ;;  %v23281_v32 = vld [vmem:[#allocation88_spill] sm:$0xff] }
0x1111   : >> { %v6663_v13 = vadd.f32 %v17095_v18, %v23268_v50  ;;  %v23280_v18 = vld [vmem:[#allocation89_spill] sm:$0xff] }
0x1112   : >> { %v16805_v6 = vpop.f32.mrb[28].mxu1  ;;  %v6662_v26 = vadd.f32 %v17096_v61, %v23268_v50 }
0x1113   : >> { %v6675_v0 = vadd.f32 %v6663_v13, %v23269_v44  ;;  %v17097_v43 = vadd.f32 %v16805_v6, %v23270_v60  ;;  %v6595_v14 = vpop.f32.mrb[29].mxu1  ;;  %v23282_v6 = vld [vmem:[#allocation77_spill] sm:$0xff] }
0x1114   : >> { %v17098_v48 = vadd.f32 %v6595_v14, %v23271_v40  ;;  %v6674_v44 = vadd.f32 %v6662_v26, %v23282_v6  ;;  %v23283_v14 = vld [vmem:[#allocation82_spill] sm:$0xff] }
0x1115   : >> { %v6665_v29 = vadd.f32 %v17097_v43, %v23268_v50  ;;  %v6689_v15 = vsel %vm807_vm12, %v6675_v0, 0.0 }
0x1116   : >> { %v6664_v54 = vadd.f32 %v17098_v48, %v23268_v50  ;;  %6690 = vadd.xlane.f32.xlu1 %v6689_v15  ;;  %v16808_v30 = vpop.f32.mrb[30].mxu1  ;;  %v23284_v15 = vld [vmem:[#allocation86_spill] sm:$0xff] }
0x1117   : >> { %v6677_v3 = vadd.f32 %v6665_v29, %v23272_v23  ;;  %v17099_v31 = vadd.f32 %v16808_v30, %v23273_v21  ;;  %v6605_v52 = vpop.f32.mrb[31].mxu1  ;;  %v6686_v29 = vsel %vm807_vm12, %v6674_v44, 0.0 }
0x1118   : >> { %v22537_v2 = vadd.f32 %v6664_v54, %v23274_v27  ;;  %v17100_v45 = vadd.f32 %v6605_v52, %v23275_v46 }
0x1119   : >> { %v6667_v38 = vadd.f32 %v17099_v31, %v23268_v50  ;;  %v6695_v58 = vsel %vm807_vm12, %v6677_v3, 0.0 }
0x111a   : >> { %6696 = vadd.xlane.f32.xlu0 %v6695_v58  ;;  %v16811_v1 = vpop.f32.mrb[20].mxu1  ;;  %v6692_v51 = vsel %vm807_vm12, %v22537_v2, 0.0  ;;  %v6666_v60 = vadd.f32 %v17100_v45, %v23268_v50 }
0x111b   : >> { %v6679_v34 = vadd.f32 %v6667_v38, %v23276_v59  ;;  %v6669_v55 = vadd.f32 %v16811_v1, %v23268_v50  ;;  %6693 = vadd.xlane.f32.xlu1 %v6692_v51  ;;  %v6615_v63 = vpop.f32.mrb[21].mxu1 }
0x111c   : >> { %v6668_v35 = vadd.f32 %v23268_v50, %v6615_v63  ;;  %v6678_v40 = vadd.f32 %v6666_v60, %v23283_v14 }
0x111d   : >> { %v6681_v42 = vadd.f32 %v6669_v55, %v23277_v16  ;;  %v6701_v22 = vsel %vm807_vm12, %v6679_v34, 0.0 }
0x111e   : >> { %v22550_v28 = vadd.f32 %v6668_v35, %v23278_v49  ;;  %6702 = vadd.xlane.f32.xlu0 %v6701_v22  ;;  %v16814_v20 = vpop.f32.mrb[22].mxu1  ;;  %v6698_v30 = vsel %vm807_vm12, %v6678_v40, 0.0 }
0x111f   : >> { %v6671_v33 = vadd.f32 %v16814_v20, %v23268_v50  ;;  %v6625_v12 = vpop.f32.mrb[23].mxu1  ;;  %v6707_v56 = vsel %vm807_vm12, %v6681_v42, 0.0 }
0x1120   : >> { %v6704_v47 = vsel %vm807_vm12, %v22550_v28, 0.0  ;;  %v6670_v48 = vadd.f32 %v23268_v50, %v6625_v12 }
0x1121   : >> { %v6683_v36 = vadd.f32 %v6671_v33, %v23279_v62  ;;  %6705 = vadd.xlane.f32.xlu1 %v6704_v47 }
0x1122   : >> { %6708 = vadd.xlane.f32.xlu0 %v6707_v56  ;;  %v22574_v54 = vadd.f32 %v6670_v48, %v23284_v15 }
0x1123   : >> { %v6713_v24 = vsel %vm807_vm12, %v6683_v36, 0.0 }
0x1124   : >> { %v6710_v23 = vsel %vm807_vm12, %v22574_v54, 0.0 }
0x1126   : >> { %6714 = vadd.xlane.f32.xlu0 %v6713_v24 }
0x1140   : >> { %v16817_v25 = vpop.f32.mrb[24].mxu1 }
0x1141   : >> { %v6673_v19 = vadd.f32 %v16817_v25, %v23268_v50  ;;  %v6635_v57 = vpop.f32.mrb[25].mxu1 }
0x1142   : >> { %v6672_v7 = vadd.f32 %v23268_v50, %v6635_v57  ;;  %v18121_v50 = vld [vmem:[#allocation14 + $0x1e0] ss:$48 sps:$4 sm:$0xff] (%p777_p13)  }
0x1143   : >> { %v6685_v39 = vadd.f32 %v6673_v19, %v23280_v18 }
0x1144   : >> { %v22563_v13 = vadd.f32 %v6672_v7, %v23281_v32 }
0x1145   : >> { %v6719_v43 = vsel %vm807_vm12, %v6685_v39, 0.0 }
0x1146   : >> { %6720 = vadd.xlane.f32.xlu0 %v6719_v43  ;;  %v6716_v61 = vsel %vm807_vm12, %v22563_v13, 0.0 }
0x1147   : >> { %6717 = vadd.xlane.f32.xlu1 %v6716_v61 }
0x114a   : >> { %6687 = vadd.xlane.f32.xlu0 %v6686_v29 }
0x114e   : >> { %6699 = vadd.xlane.f32.xlu0 %v6698_v30 }
0x1152   : >> { %6711 = vadd.xlane.f32.xlu0 %v6710_v23 }
0x11a3   : >> { %v6691_v21 = vpop.xlane.xlu1 %6690 }
0x11a4   : >> { %v6724_v31 = vmul.f32 0.015625, %v6691_v21 }
0x11a6   : >> { %v22579_v52 = vsub.f32 %v6675_v0, %v6724_v31 }
0x11a7   : >> { %v6697_v27 = vpop.xlane.xlu0 %6696 }
0x11a8   : >> { %v6726_v46 = vmul.f32 0.015625, %v6697_v27  ;;  %v6748_v45 = vmul.f32 %v22579_v52, %v22579_v52 }
0x11aa   : >> { %v22583_v38 = vsub.f32 %v6677_v3, %v6726_v46  ;;  %v6762_v58 = vsel %vm807_vm12, %v6748_v45, 0.0 }
0x11ab   : >> { %v6703_v1 = vpop.xlane.xlu0 %6702  ;;  %6763 = vadd.xlane.f32.xlu0 %v6762_v58 }
0x11ac   : >> { %v6728_v51 = vmul.f32 0.015625, %v6703_v1  ;;  %v6750_v59 = vmul.f32 %v22583_v38, %v22583_v38 }
0x11ae   : >> { %v22588_v55 = vsub.f32 %v6679_v34, %v6728_v51  ;;  %v6768_v0 = vsel %vm807_vm12, %v6750_v59, 0.0 }
0x11af   : >> { %v6709_v63 = vpop.xlane.xlu0 %6708  ;;  %6769 = vadd.xlane.f32.xlu1 %v6768_v0 }
0x11b0   : >> { %v6730_v35 = vmul.f32 0.015625, %v6709_v63  ;;  %v6752_v16 = vmul.f32 %v22588_v55, %v22588_v55 }
0x11b2   : >> { %v22593_v3 = vsub.f32 %v6681_v42, %v6730_v35  ;;  %v6774_v22 = vsel %vm807_vm12, %v6752_v16, 0.0  ;;  %v6694_v42 = vpop.xlane.xlu1 %6693 }
0x11b3   : >> { %v6715_v49 = vpop.xlane.xlu0 %6714  ;;  %6775 = vadd.xlane.f32.xlu0 %v6774_v22  ;;  %v6725_v56 = vmul.f32 0.015625, %v6694_v42 }
0x11b4   : >> { %v6732_v20 = vmul.f32 0.015625, %v6715_v49  ;;  %v6754_v33 = vmul.f32 %v22593_v3, %v22593_v3 }
0x11b5   : >> { %v22605_v19 = vsub.f32 %v22537_v2, %v6725_v56 }
0x11b6   : >> { %v22598_v34 = vsub.f32 %v6683_v36, %v6732_v20  ;;  %v6780_v12 = vsel %vm807_vm12, %v6754_v33, 0.0  ;;  %v6706_v24 = vpop.xlane.xlu1 %6705 }
0x11b7   : >> { %6781 = vadd.xlane.f32.xlu1 %v6780_v12  ;;  %v6729_v57 = vmul.f32 0.015625, %v6706_v24  ;;  %v6749_v60 = vmul.f32 %v22605_v19, %v22605_v19 }
0x11b8   : >> { %v6756_v47 = vmul.f32 %v22598_v34, %v22598_v34 }
0x11b9   : >> { %v22614_v43 = vsub.f32 %v22550_v28, %v6729_v57  ;;  %v6765_v15 = vsel %vm807_vm12, %v6749_v60, 0.0 }
0x11ba   : >> { %v6786_v62 = vsel %vm807_vm12, %v6756_v47, 0.0 }
0x11bb   : >> { %6787 = vadd.xlane.f32.xlu0 %v6786_v62 }
0x11d3   : >> { %v6721_v25 = vpop.xlane.xlu0 %6720 }
0x11d4   : >> { %v6734_v26 = vmul.f32 0.015625, %v6721_v25  ;;  %v6718_v7 = vpop.xlane.xlu1 %6717  ;;  %v23285_v25 = vld [vmem:[#allocation75_spill] sm:$0xff] }
0x11d5   : >> { %v6733_v61 = vmul.f32 0.015625, %v6718_v7 }
0x11d6   : >> { %v22607_v36 = vsub.f32 %v6685_v39, %v6734_v26 }
0x11d7   : >> { %v6688_v18 = vpop.xlane.xlu0 %6687  ;;  %v22623_v30 = vsub.f32 %v22563_v13, %v6733_v61 }
0x11d8   : >> { %v6723_v32 = vmul.f32 0.015625, %v6688_v18  ;;  %v6758_v6 = vmul.f32 %v22607_v36, %v22607_v36  ;;  %v23286_v18 = vld [vmem:[#allocation76_spill] sm:$0xff] }
0x11d9   : >> { %v6757_v45 = vmul.f32 %v22623_v30, %v22623_v30 }
0x11da   : >> { %v22616_v14 = vsub.f32 %v6674_v44, %v6723_v32  ;;  %v6792_v2 = vsel %vm807_vm12, %v6758_v6, 0.0  ;;  %v6753_v44 = vmul.f32 %v22614_v43, %v22614_v43 }
0x11db   : >> { %v6700_v48 = vpop.xlane.xlu0 %6699  ;;  %6793 = vadd.xlane.f32.xlu1 %v6792_v2  ;;  %v6789_v51 = vsel %vm807_vm12, %v6757_v45, 0.0 }
0x11dc   : >> { %v6727_v39 = vmul.f32 0.015625, %v6700_v48  ;;  %v6747_v29 = vmul.f32 %v22616_v14, %v22616_v14 }
0x11de   : >> { %v22625_v23 = vsub.f32 %v6678_v40, %v6727_v39  ;;  %v6759_v28 = vsel %vm807_vm12, %v6747_v29, 0.0  ;;  %v6777_v40 = vsel %vm807_vm12, %v6753_v44, 0.0 }
0x11df   : >> { %6760 = vadd.xlane.f32.xlu0 %v6759_v28  ;;  %v6712_v21 = vpop.xlane.xlu0 %6711  ;;  %6766 = vadd.xlane.f32.xlu1 %v6765_v15 }
0x11e0   : >> { %v6731_v31 = vmul.f32 0.015625, %v6712_v21  ;;  %v6751_v27 = vmul.f32 %v22625_v23, %v22625_v23 }
0x11e2   : >> { %v22633_v46 = vsub.f32 %v22574_v54, %v6731_v31  ;;  %v6771_v13 = vsel %vm807_vm12, %v6751_v27, 0.0 }
0x11e3   : >> { %6772 = vadd.xlane.f32.xlu0 %v6771_v13  ;;  %6778 = vadd.xlane.f32.xlu1 %v6777_v40 }
0x11e4   : >> { %v6755_v58 = vmul.f32 %v22633_v46, %v22633_v46 }
0x11e6   : >> { %v6783_v1 = vsel %vm807_vm12, %v6755_v58, 0.0 }
0x11e7   : >> { %6784 = vadd.xlane.f32.xlu0 %v6783_v1  ;;  %6790 = vadd.xlane.f32.xlu1 %v6789_v51 }
0x1238   : >> { %v6764_v54 = vpop.xlane.xlu0 %6763 }
0x1239   : >> { %v6796_v59 = vmul.f32 0.015625, %v6764_v54 }
0x123b   : >> { %v6808_v0 = vadd.f32 1e-12, %v6796_v59 }
0x123c   : >> { %v6770_v63 = vpop.xlane.xlu1 %6769 }
0x123d   : >> { %18062 = vrsqrt.f32 %v6808_v0  ;;  %v6798_v35 = vmul.f32 0.015625, %v6770_v63 }
0x123f   : >> { %v6810_v16 = vadd.f32 1e-12, %v6798_v35 }
0x1240   : >> { %v6776_v22 = vpop.xlane.xlu0 %6775 }
0x1241   : >> { %18064 = vrsqrt.f32 %v6810_v16  ;;  %v6800_v49 = vmul.f32 0.015625, %v6776_v22 }
0x1243   : >> { %v6812_v20 = vadd.f32 1e-12, %v6800_v49 }
0x1244   : >> { %v6782_v33 = vpop.xlane.xlu1 %6781 }
0x1245   : >> { %18066 = vrsqrt.f32 %v6812_v20  ;;  %v6802_v12 = vmul.f32 0.015625, %v6782_v33 }
0x1247   : >> { %v18063_v47 = vpop.eup %18062  ;;  %v6814_v62 = vadd.f32 1e-12, %v6802_v12 }
0x1248   : >> { %v6788_v42 = vpop.xlane.xlu0 %6787  ;;  %v6832_v56 = vmul.f32 %v18063_v47, %v22579_v52 }
0x1249   : >> { %18068 = vrsqrt.f32 %v6814_v62  ;;  %v6804_v24 = vmul.f32 0.015625, %v6788_v42 }
0x124a   : >> { %v6850_v26 = vmul.f32 %v23285_v25, %v6832_v56 }
0x124b   : >> { %v18065_v57 = vpop.eup %18064  ;;  %v6816_v7 = vadd.f32 1e-12, %v6804_v24 }
0x124c   : >> { %v6868_v32 = vadd.f32 %v23286_v18, %v6850_v26  ;;  %v6834_v6 = vmul.f32 %v18065_v57, %v22583_v38 }
0x124d   : >> { %18070 = vrsqrt.f32 %v6816_v7 }
0x124e   : >> { %6880 = vrot.lane.b32.xlu0 %v6868_v32, %s19761_s30  ;;  %v6852_v60 = vmul.f32 %v23285_v25, %v6834_v6 }
0x124f   : >> { %v18067_v61 = vpop.eup %18066 }
0x1250   : >> { %v6870_v2 = vadd.f32 %v23286_v18, %v6852_v60  ;;  %v6836_v52 = vmul.f32 %v18067_v61, %v22588_v55 }
0x1252   : >> { %6884 = vrot.lane.b32.xlu1 %v6870_v2, %s19761_s30  ;;  %v6854_v48 = vmul.f32 %v23285_v25, %v6836_v52 }
0x1253   : >> { %v18069_v39 = vpop.eup %18068 }
0x1254   : >> { %v6872_v29 = vadd.f32 %v23286_v18, %v6854_v48  ;;  %v6838_v15 = vmul.f32 %v18069_v39, %v22593_v3 }
0x1256   : >> { %6888 = vrot.lane.b32.xlu1 %v6872_v29, %s19761_s30  ;;  %v6856_v38 = vmul.f32 %v23285_v25, %v6838_v15 }
0x1257   : >> { %v18071_v28 = vpop.eup %18070 }
0x1258   : >> { %v6874_v44 = vadd.f32 %v23286_v18, %v6856_v38  ;;  %v6840_v21 = vmul.f32 %v18071_v28, %v22598_v34 }
0x125a   : >> { %6892 = vrot.lane.b32.xlu0 %v6874_v44, %s19761_s30  ;;  %v6858_v55 = vmul.f32 %v23285_v25, %v6840_v21 }
0x125c   : >> { %v6876_v31 = vadd.f32 %v23286_v18, %v6858_v55 }
0x125e   : >> { %6896 = vrot.lane.b32.xlu1 %v6876_v31, %s19761_s30 }
0x1268   : >> { %v6794_v27 = vpop.xlane.xlu1 %6793 }
0x1269   : >> { %v6806_v13 = vmul.f32 0.015625, %v6794_v27 }
0x126b   : >> { %v6818_v3 = vadd.f32 1e-12, %v6806_v13 }
0x126c   : >> { %v6761_v34 = vpop.xlane.xlu0 %6760  ;;  %v6767_v54 = vpop.xlane.xlu1 %6766 }
0x126d   : >> { %18072 = vrsqrt.f32 %v6818_v3  ;;  %v6795_v51 = vmul.f32 0.015625, %v6761_v34  ;;  %v6797_v0 = vmul.f32 0.015625, %v6767_v54 }
0x126f   : >> { %v6807_v59 = vadd.f32 1e-12, %v6795_v51  ;;  %v6809_v35 = vadd.f32 1e-12, %v6797_v0  ;;  %v18087_v0 = vld [vmem:[#allocation14 + $0x4] ss:$48 sps:$4 sm:$0xff] (%p777_p13)  }
0x1270   : >> { %v6773_v63 = vpop.xlane.xlu0 %6772  ;;  %v6779_v22 = vpop.xlane.xlu1 %6778  ;;  %10459 = vmatprep.subr.bf16.mxu1 (%p777_p13), %v18087_v0  ;;  %v18175_v0 = vld [vmem:[#allocation14 + $0x540] ss:$48 sps:$4 sm:$0xff] (%p777_p13)  }
0x1271   : >> { %18074 = vrsqrt.f32 %v6807_v59  ;;  %v6799_v16 = vmul.f32 0.015625, %v6773_v63  ;;  %v18089_v63 = vld [vmem:[#allocation14 + $0x604] ss:$48 sps:$4 sm:$0xff] (%p777_p13)  }
0x1272   : >> { %18076 = vrsqrt.f32 %v6809_v35  ;;  %v18091_v35 = vld [vmem:[#allocation14] ss:$48 sps:$4 sm:$0xff] (%p777_p13)   ;;  %10502 = vmatprep.subr.bf16.mxu0 (%p777_p13), %v18089_v63 }
0x1273   : >> { %v6811_v49 = vadd.f32 1e-12, %v6799_v16  ;;  %v18092_v16 = vld [vmem:[#allocation14 + $0x600] ss:$48 sps:$4 sm:$0xff] (%p777_p13)   ;;  %10460 = vmatpush1.bf16.msra.mxu1 (%p777_p13), %v18091_v35  ;;  %v18177_v35 = vld [vmem:[#allocation14 + $0x5a4] ss:$48 sps:$4 sm:$0xff] (%p777_p13)  }
0x1274   : >> { %v6785_v20 = vpop.xlane.xlu0 %6784  ;;  %v6791_v61 = vpop.xlane.xlu1 %6790  ;;  %10503 = vmatpush1.bf16.msra.mxu0 (%p777_p13), %v18092_v16  ;;  %v18176_v63 = vld [vmem:[#allocation14 + $0xb40] ss:$48 sps:$4 sm:$0xff] (%p777_p13)   ;;  %v18179_v16 = vld [vmem:[#allocation14 + $0xba4] ss:$48 sps:$4 sm:$0xff] (%p777_p13)  }
0x1275   : >> { %18078 = vrsqrt.f32 %v6811_v49  ;;  %v6803_v12 = vmul.f32 0.015625, %v6785_v20  ;;  %v18097_v49 = vld [vmem:[#allocation14 + $0x60] ss:$48 sps:$4 sm:$0xff] (%p777_p13)   ;;  %v18099_v20 = vld [vmem:[#allocation14 + $0xc4] ss:$48 sps:$4 sm:$0xff] (%p777_p13)  }
0x1277   : >> { %v18073_v40 = vpop.eup %18072  ;;  %v6815_v62 = vadd.f32 1e-12, %v6803_v12  ;;  %v18103_v12 = vld [vmem:[#allocation14 + $0xc0] ss:$48 sps:$4 sm:$0xff] (%p777_p13)  }
0x1278   : >> { %v6842_v45 = vmul.f32 %v18073_v40, %v22607_v36  ;;  %v6801_v36 = vmul.f32 0.015625, %v6779_v22  ;;  %v18095_v22 = vld [vmem:[#allocation14 + $0x664] ss:$48 sps:$4 sm:$0xff] (%p777_p13)  }
0x1279   : > { %10504 = vmatprep.subr.bf16.mxu0 (%p777_p13), %v18095_v22  ;;  %v18182_v22 = vld [vmem:[#allocation14 + $0xba0] ss:$48 sps:$4 sm:$0xff] (%p777_p13)  }
0x127a   : >> { %v6860_v58 = vmul.f32 %v23285_v25, %v6842_v45  ;;  %v6813_v33 = vadd.f32 1e-12, %v6801_v36  ;;  %v6805_v45 = vmul.f32 0.015625, %v6791_v61  ;;  %v18098_v36 = vld [vmem:[#allocation14 + $0x660] ss:$48 sps:$4 sm:$0xff] (%p777_p13)  }
0x127b   : >> { %v18075_v47 = vpop.eup %18074  ;;  %10505 = vmatpush1.bf16.msra.mxu0 (%p777_p13), %v18098_v36  ;;  %v18140_v61 = vld [vmem:[#allocation14 + $0x900] ss:$48 sps:$4 sm:$0xff] (%p777_p13)   ;;  %v18185_v36 = vld [vmem:[#allocation14 + $0xc04] ss:$48 sps:$4 sm:$0xff] (%p777_p13)  }
0x127c   : >> { %v6878_v1 = vadd.f32 %v23286_v18, %v6860_v58  ;;  %18080 = vrsqrt.f32 %v6813_v33  ;;  %v6831_v42 = vmul.f32 %v18075_v47, %v22616_v14  ;;  %v18077_v56 = vpop.eup %18076  ;;  %v18101_v33 = vld [vmem:[#allocation14 + $0x6c4] ss:$48 sps:$4 sm:$0xff] (%p777_p13)   ;;  %v18104_v47 = vld [vmem:[#allocation14 + $0x6c0] ss:$48 sps:$4 sm:$0xff] (%p777_p13)  }
0x127d   : >> { %18082 = vrsqrt.f32 %v6815_v62  ;;  %v6833_v26 = vmul.f32 %v18077_v56, %v22605_v19  ;;  %10506 = vmatprep.subr.bf16.mxu0 (%p777_p13), %v18101_v33  ;;  %v18125_v62 = vld [vmem:[#allocation14 + $0x844] ss:$48 sps:$4 sm:$0xff] (%p777_p13)   ;;  %v18128_v56 = vld [vmem:[#allocation14 + $0x840] ss:$48 sps:$4 sm:$0xff] (%p777_p13)  }
0x127e   : >> { %6900 = vrot.lane.b32.xlu0 %v6878_v1, %s19761_s30  ;;  %s6910_s30 = sshra.s32 %s14589_s25, 3  ;;  %v6849_v24 = vmul.f32 %v23285_v25, %v6831_v42  ;;  %v18127_v42 = vld [vmem:[#allocation14 + $0x240] ss:$48 sps:$4 sm:$0xff] (%p777_p13)  }
0x127f   : >> { %s15485_s18 = smul.u32 48, %s6910_s30  ;;  %v18079_v57 = vpop.eup %18078  ;;  %v6851_v32 = vmul.f32 %v23285_v25, %v6833_v26  ;;  %10507 = vmatpush1.bf16.msra.mxu0 (%p777_p13), %v18104_v47  ;;  %v18131_v26 = vld [vmem:[#allocation14 + $0x8a4] ss:$48 sps:$4 sm:$0xff] (%p777_p13)   ;;  %v18188_v47 = vld [vmem:[#allocation14 + $0xc] ss:$48 sps:$4 sm:$0xff] (%p777_p13)  }
0x1280   : >> { %v6867_v7 = vadd.f32 %v23286_v18, %v6849_v24  ;;  %v6835_v6 = vmul.f32 %v18079_v57, %v22625_v23  ;;  %10508 = vmatprep.subr.bf16.mxu0 (%p777_p13), %v18107_v5  ;;  %v18129_v24 = vld [vmem:[#allocation14 + $0x2a4] ss:$48 sps:$4 sm:$0xff] (%p777_p13)   ;;  %v18133_v57 = vld [vmem:[#allocation14 + $0x2a0] ss:$48 sps:$4 sm:$0xff] (%p777_p13)   ;;  %v18186_v5 = vld [vmem:[#allocation14 + $0x8] ss:$48 sps:$4 sm:$0xff] (%p777_p13)  }
0x1281   : >> { %s22675_s16 = scalar_lea.vmem [#allocation2], %s15485_s18  ;;  %v6869_v19 = vadd.f32 %v23286_v18, %v6851_v32  ;;  %v18135_v32 = vld [vmem:[#allocation14 + $0x304] ss:$48 sps:$4 sm:$0xff] (%p777_p13)  }
0x1282   : >> { %v6853_v52 = vmul.f32 %v23285_v25, %v6835_v6  ;;  %v18137_v6 = vld [vmem:[#allocation14 + $0x904] ss:$48 sps:$4 sm:$0xff] (%p777_p13)  }
0x1283   : > { %10509 = vmatpush1.bf16.msra.mxu0 (%p777_p13), %v18110_v9 }
0x1284   : >> { %v6871_v15 = vadd.f32 %v23286_v18, %v6853_v52  ;;  %10510 = vmatprep.subr.bf16.mxu0 (%p777_p13), %v18113_v11  ;;  %v18146_v52 = vld [vmem:[#allocation14 + $0x960] ss:$48 sps:$4 sm:$0xff] (%p777_p13)   ;;  %v18194_v11 = vld [vmem:[#allocation14 + $0x6c] ss:$48 sps:$4 sm:$0xff] (%p777_p13)  }
0x1286   : >> { %v18081_v60 = vpop.eup %18080 }
0x1287   : >> { %v6837_v48 = vmul.f32 %v18081_v60, %v22614_v43  ;;  %v18083_v39 = vpop.eup %18082  ;;  %10511 = vmatpush1.bf16.msra.mxu0 (%p777_p13), %v18116_v17  ;;  %v18139_v60 = vld [vmem:[#allocation14 + $0x300] ss:$48 sps:$4 sm:$0xff] (%p777_p13)   ;;  %v18192_v17 = vld [vmem:[#allocation14 + $0x68] ss:$48 sps:$4 sm:$0xff] (%p777_p13)  }
0x1288   : >> { %v6839_v28 = vmul.f32 %v18083_v39, %v22633_v46  ;;  %v6817_v46 = vadd.f32 1e-12, %v6805_v45  ;;  %10512 = vmatprep.subr.bf16.mxu0 (%p777_p13), %v18119_v37  ;;  %v18149_v39 = vld [vmem:[#allocation14 + $0x9c4] ss:$48 sps:$4 sm:$0xff] (%p777_p13)   ;;  %v18163_v45 = vld [vmem:[#allocation14 + $0x480] ss:$48 sps:$4 sm:$0xff] (%p777_p13)  }
0x1289   : >> { %v6855_v38 = vmul.f32 %v23285_v25, %v6837_v48  ;;  %v18147_v48 = vld [vmem:[#allocation14 + $0x3c4] ss:$48 sps:$4 sm:$0xff] (%p777_p13)   ;;  %v18200_v37 = vld [vmem:[#allocation14 + $0xcc] ss:$48 sps:$4 sm:$0xff] (%p777_p13)  }
0x128a   : >> { %v6857_v43 = vmul.f32 %v23285_v25, %v6839_v28  ;;  %18084 = vrsqrt.f32 %v6817_v46  ;;  %v18157_v28 = vld [vmem:[#allocation14 + $0x420] ss:$48 sps:$4 sm:$0xff] (%p777_p13)  }
0x128b   : >> { %v6873_v55 = vadd.f32 %v23286_v18, %v6855_v38  ;;  %v18155_v38 = vld [vmem:[#allocation14 + $0xa24] ss:$48 sps:$4 sm:$0xff] (%p777_p13)   ;;  %v18164_v46 = vld [vmem:[#allocation14 + $0xa80] ss:$48 sps:$4 sm:$0xff] (%p777_p13)  }
0x128c   : >> { %v6875_v13 = vadd.f32 %v23286_v18, %v6857_v43 }
0x1294   : >> { %v18085_v58 = vpop.eup %18084 }
0x1295   : >> { %v6841_v1 = vmul.f32 %v18085_v58, %v22623_v30  ;;  %v18093_v30 = vld [vmem:[#allocation14 + $0x64] ss:$48 sps:$4 sm:$0xff] (%p777_p13)  }
0x1296   : > { %10461 = vmatprep.subr.bf16.mxu1 (%p777_p13), %v18093_v30  ;;  %v18165_v58 = vld [vmem:[#allocation14 + $0x4e4] ss:$48 sps:$4 sm:$0xff] (%p777_p13)   ;;  %v18181_v30 = vld [vmem:[#allocation14 + $0x5a0] ss:$48 sps:$4 sm:$0xff] (%p777_p13)  }
0x1297   : >> { %v6859_v34 = vmul.f32 %v23285_v25, %v6841_v1  ;;  %10462 = vmatpush1.bf16.msra.mxu1 (%p777_p13), %v18097_v49  ;;  %v18122_v25 = vld [vmem:[#allocation14 + $0x7e0] ss:$48 sps:$4 sm:$0xff] (%p777_p13)   ;;  %v18167_v1 = vld [vmem:[#allocation14 + $0xae4] ss:$48 sps:$4 sm:$0xff] (%p777_p13)  }
0x1298   : > { %10463 = vmatprep.subr.bf16.mxu1 (%p777_p13), %v18099_v20  ;;  %10513 = vmatpush1.bf16.msra.mxu0 (%p777_p13), %v18122_v25  ;;  %v18198_v25 = vld [vmem:[#allocation14 + $0xc8] ss:$48 sps:$4 sm:$0xff] (%p777_p13)  }
0x1299   : >> { %v6877_v51 = vadd.f32 %v23286_v18, %v6859_v34  ;;  %v18123_v18 = vld [vmem:[#allocation14 + $0x244] ss:$48 sps:$4 sm:$0xff] (%p777_p13)   ;;  %10514 = vmatprep.subr.bf16.mxu0 (%p777_p13), %v18125_v62  ;;  %v18169_v34 = vld [vmem:[#allocation14 + $0x4e0] ss:$48 sps:$4 sm:$0xff] (%p777_p13)   ;;  %v18206_v62 = vld [vmem:[#allocation14 + $0x12c] ss:$48 sps:$4 sm:$0xff] (%p777_p13)  }
0x129b   : > { %10464 = vmatpush1.bf16.msra.mxu1 (%p777_p13), %v18103_v12 }
0x129c   : > { %10465 = vmatprep.subr.bf16.mxu1 (%p777_p13), %v18105_v4  ;;  %10515 = vmatpush1.bf16.msra.mxu0 (%p777_p13), %v18128_v56  ;;  %v18183_v4 = vld [vmem:[#allocation14 + $0xc00] ss:$48 sps:$4 sm:$0xff] (%p777_p13)   ;;  %v18204_v56 = vld [vmem:[#allocation14 + $0x128] ss:$48 sps:$4 sm:$0xff] (%p777_p13)  }
0x129d   : > { %10516 = vmatprep.subr.bf16.mxu0 (%p777_p13), %v18131_v26  ;;  %v18212_v26 = vld [vmem:[#allocation14 + $0x18c] ss:$48 sps:$4 sm:$0xff] (%p777_p13)  }
0x129f   : > { %10466 = vmatpush1.bf16.msra.mxu1 (%p777_p13), %v18109_v8 }
0x12a0   : > { %10467 = vmatprep.subr.bf16.mxu1 (%p777_p13), %v18111_v10  ;;  %v18191_v10 = vld [vmem:[#allocation14 + $0xc64] ss:$48 sps:$4 sm:$0xff] (%p777_p13)  }
0x12a3   : > { %10468 = vmatpush1.bf16.msra.mxu1 (%p777_p13), %v18115_v53  ;;  %v18189_v53 = vld [vmem:[#allocation14 + $0xc60] ss:$48 sps:$4 sm:$0xff] (%p777_p13)  }
0x12a4   : > { %10469 = vmatprep.subr.bf16.mxu1 (%p777_p13), %v18117_v41  ;;  %v18197_v41 = vld [vmem:[#allocation14 + $0xcc4] ss:$48 sps:$4 sm:$0xff] (%p777_p13)  }
0x12a7   : > { %10470 = vmatpush1.bf16.msra.mxu1 (%p777_p13), %v18121_v50  ;;  %v18195_v50 = vld [vmem:[#allocation14 + $0xcc0] ss:$48 sps:$4 sm:$0xff] (%p777_p13)  }
0x12a8   : > { %10471 = vmatprep.subr.bf16.mxu1 (%p777_p13), %v18123_v18  ;;  %v18203_v18 = vld [vmem:[#allocation14 + $0xd24] ss:$48 sps:$4 sm:$0xff] (%p777_p13)  }
0x12ab   : > { %10472 = vmatpush1.bf16.msra.mxu1 (%p777_p13), %v18127_v42  ;;  %v18201_v42 = vld [vmem:[#allocation14 + $0xd20] ss:$48 sps:$4 sm:$0xff] (%p777_p13)  }
0x12ac   : > { %10473 = vmatprep.subr.bf16.mxu1 (%p777_p13), %v18129_v24  ;;  %v18209_v24 = vld [vmem:[#allocation14 + $0xd84] ss:$48 sps:$4 sm:$0xff] (%p777_p13)  }
0x12af   : > { %10474 = vmatpush1.bf16.msra.mxu1 (%p777_p13), %v18133_v57  ;;  %v18207_v57 = vld [vmem:[#allocation14 + $0xd80] ss:$48 sps:$4 sm:$0xff] (%p777_p13)  }
0x12b0   : > { %10475 = vmatprep.subr.bf16.mxu1 (%p777_p13), %v18135_v32  ;;  %v18215_v32 = vld [vmem:[#allocation14 + $0xde4] ss:$48 sps:$4 sm:$0xff] (%p777_p13)  }
0x12b3   : > { %10476 = vmatpush1.bf16.msra.mxu1 (%p777_p13), %v18139_v60  ;;  %v18213_v60 = vld [vmem:[#allocation14 + $0xde0] ss:$48 sps:$4 sm:$0xff] (%p777_p13)  }
0x12c0   : >> { %v6881_v2 = vpop.permute.xlu0 %6880 }
0x12c1   : >> { %v6903_v14 = vsel %vm807_vm12, %v6867_v7, %v6881_v2  ;;  %v18134_v7 = vld [vmem:[#allocation14 + $0x8a0] ss:$48 sps:$4 sm:$0xff] (%p777_p13)   ;;  %v18141_v2 = vld [vmem:[#allocation14 + $0x364] ss:$48 sps:$4 sm:$0xff] (%p777_p13)  }
0x12c2   : >> { %6915 = vst [vmem:[%s22675_s16] sm:$0xff] %v6903_v14  ;;  %10517 = vmatpush1.bf16.msra.mxu0 (%p777_p13), %v18134_v7  ;;  %v18143_v14 = vld [vmem:[#allocation14 + $0x964] ss:$48 sps:$4 sm:$0xff] (%p777_p13)   ;;  %10477 = vmatprep.subr.bf16.mxu1 (%p777_p13), %v18141_v2  ;;  %v18210_v7 = vld [vmem:[#allocation14 + $0x188] ss:$48 sps:$4 sm:$0xff] (%p777_p13)  }
0x12c3   : > { %10518 = vmatprep.subr.bf16.mxu0 (%p777_p13), %v18137_v6  ;;  %v18218_v6 = vld [vmem:[#allocation14 + $0x1ec] ss:$48 sps:$4 sm:$0xff] (%p777_p13)   ;;  %v18221_v2 = vld [vmem:[#allocation14 + $0xe44] ss:$48 sps:$4 sm:$0xff] (%p777_p13)  }
0x12c4   : >> { %v6885_v23 = vpop.permute.xlu1 %6884 }
0x12c5   : >> { %v6904_v29 = vsel %vm807_vm12, %v6869_v19, %v6885_v23  ;;  %v18145_v19 = vld [vmem:[#allocation14 + $0x360] ss:$48 sps:$4 sm:$0xff] (%p777_p13)  }
0x12c6   : >> { %6916 = vst [vmem:[%s22675_s16 + $0x8] sm:$0xff] %v6904_v29  ;;  %10519 = vmatpush1.bf16.msra.mxu0 (%p777_p13), %v18140_v61  ;;  %v18151_v23 = vld [vmem:[#allocation14 + $0x3c0] ss:$48 sps:$4 sm:$0xff] (%p777_p13)   ;;  %10478 = vmatpush1.bf16.msra.mxu1 (%p777_p13), %v18145_v19  ;;  %v18216_v61 = vld [vmem:[#allocation14 + $0x1e8] ss:$48 sps:$4 sm:$0xff] (%p777_p13)  }
0x12c7   : > { %10520 = vmatprep.subr.bf16.mxu0 (%p777_p13), %v18143_v14  ;;  %v18152_v29 = vld [vmem:[#allocation14 + $0x9c0] ss:$48 sps:$4 sm:$0xff] (%p777_p13)   ;;  %10479 = vmatprep.subr.bf16.mxu1 (%p777_p13), %v18147_v48  ;;  %v18224_v14 = vld [vmem:[#allocation14 + $0x24c] ss:$48 sps:$4 sm:$0xff] (%p777_p13)   ;;  %v18227_v48 = vld [vmem:[#allocation14 + $0xea4] ss:$48 sps:$4 sm:$0xff] (%p777_p13)  }
0x12c8   : >> { %v6889_v44 = vpop.permute.xlu1 %6888  ;;  %v18219_v19 = vld [vmem:[#allocation14 + $0xe40] ss:$48 sps:$4 sm:$0xff] (%p777_p13)  }
0x12c9   : >> { %v6905_v21 = vsel %vm807_vm12, %v6871_v15, %v6889_v44  ;;  %v18153_v15 = vld [vmem:[#allocation14 + $0x424] ss:$48 sps:$4 sm:$0xff] (%p777_p13)   ;;  %v18158_v44 = vld [vmem:[#allocation14 + $0xa20] ss:$48 sps:$4 sm:$0xff] (%p777_p13)  }
0x12ca   : >> { %6917 = vst [vmem:[%s22675_s16 + $0x10] sm:$0xff] %v6905_v21  ;;  %10521 = vmatpush1.bf16.msra.mxu0 (%p777_p13), %v18146_v52  ;;  %10480 = vmatpush1.bf16.msra.mxu1 (%p777_p13), %v18151_v23  ;;  %v18222_v52 = vld [vmem:[#allocation14 + $0x248] ss:$48 sps:$4 sm:$0xff] (%p777_p13)  }
0x12cb   : > { %10522 = vmatprep.subr.bf16.mxu0 (%p777_p13), %v18149_v39  ;;  %10481 = vmatprep.subr.bf16.mxu1 (%p777_p13), %v18153_v15 }
0x12cc   : >> { %v6893_v31 = vpop.permute.xlu0 %6892 }
0x12cd   : >> { %v6906_v27 = vsel %vm807_vm12, %v6873_v55, %v6893_v31 }
0x12ce   : >> { %6918 = vst [vmem:[%s22675_s16 + $0x18] sm:$0xff] %v6906_v27  ;;  %10523 = vmatpush1.bf16.msra.mxu0 (%p777_p13), %v18152_v29  ;;  %v18159_v27 = vld [vmem:[#allocation14 + $0x484] ss:$48 sps:$4 sm:$0xff] (%p777_p13)   ;;  %10482 = vmatpush1.bf16.msra.mxu1 (%p777_p13), %v18157_v28  ;;  %v18230_v29 = vld [vmem:[#allocation14 + $0x2ac] ss:$48 sps:$4 sm:$0xff] (%p777_p13)  }
0x12cf   : > { %10524 = vmatprep.subr.bf16.mxu0 (%p777_p13), %v18155_v38  ;;  %10483 = vmatprep.subr.bf16.mxu1 (%p777_p13), %v18159_v27  ;;  %v18225_v38 = vld [vmem:[#allocation14 + $0xea0] ss:$48 sps:$4 sm:$0xff] (%p777_p13)   ;;  %v18228_v28 = vld [vmem:[#allocation14 + $0x2a8] ss:$48 sps:$4 sm:$0xff] (%p777_p13)   ;;  %v18242_v27 = vld [vmem:[#allocation14 + $0x36c] ss:$48 sps:$4 sm:$0xff] (%p777_p13)  }
0x12d0   : >> { %v6897_v3 = vpop.permute.xlu1 %6896 }
0x12d1   : >> { %v6907_v40 = vsel %vm807_vm12, %v6875_v13, %v6897_v3 }
0x12d2   : >> { %6919 = vst [vmem:[%s22675_s16 + $0x20] sm:$0xff] %v6907_v40  ;;  %v18161_v40 = vld [vmem:[#allocation14 + $0xa84] ss:$48 sps:$4 sm:$0xff] (%p777_p13)   ;;  %10525 = vmatpush1.bf16.msra.mxu0 (%p777_p13), %v18158_v44  ;;  %10484 = vmatpush1.bf16.msra.mxu1 (%p777_p13), %v18163_v45  ;;  %v18240_v45 = vld [vmem:[#allocation14 + $0x368] ss:$48 sps:$4 sm:$0xff] (%p777_p13)  }
0x12d3   : > { %10526 = vmatprep.subr.bf16.mxu0 (%p777_p13), %v18161_v40  ;;  %10485 = vmatprep.subr.bf16.mxu1 (%p777_p13), %v18165_v58  ;;  %v18233_v44 = vld [vmem:[#allocation14 + $0xf04] ss:$48 sps:$4 sm:$0xff] (%p777_p13)   ;;  %v18237_v40 = vld [vmem:[#allocation14 + $0xf60] ss:$48 sps:$4 sm:$0xff] (%p777_p13)   ;;  %v18248_v58 = vld [vmem:[#allocation14 + $0x3cc] ss:$48 sps:$4 sm:$0xff] (%p777_p13)  }
0x12d6   : > { %10527 = vmatpush1.bf16.msra.mxu0 (%p777_p13), %v18164_v46  ;;  %10486 = vmatpush1.bf16.msra.mxu1 (%p777_p13), %v18169_v34  ;;  %v18245_v46 = vld [vmem:[#allocation14 + $0xfc4] ss:$48 sps:$4 sm:$0xff] (%p777_p13)   ;;  %v18246_v34 = vld [vmem:[#allocation14 + $0x3c8] ss:$48 sps:$4 sm:$0xff] (%p777_p13)  }
0x12d7   : > { %10528 = vmatprep.subr.bf16.mxu0 (%p777_p13), %v18167_v1  ;;  %v18243_v1 = vld [vmem:[#allocation14 + $0xfc0] ss:$48 sps:$4 sm:$0xff] (%p777_p13)  }
0x12ec   : > { %779 = sbr.rel (!%p777_p13) target bundleno = 348 (0x15c), region = 172 }
0x12f0   : >> { %v6901_v54 = vpop.permute.xlu0 %6900 }
0x12f1   : >> { %v6908_v59 = vsel %vm807_vm12, %v6877_v51, %v6901_v54  ;;  %v18170_v51 = vld [vmem:[#allocation14 + $0xae0] ss:$48 sps:$4 sm:$0xff] (%p777_p13)   ;;  %v18171_v54 = vld [vmem:[#allocation14 + $0x544] ss:$48 sps:$4 sm:$0xff] (%p777_p13)  }
0x12f2   : >> { %6920 = vst [vmem:[%s22675_s16 + $0x28] sm:$0xff] %v6908_v59  ;;  %v18173_v59 = vld [vmem:[#allocation14 + $0xb44] ss:$48 sps:$4 sm:$0xff] (%p777_p13)   ;;  %10529 = vmatpush1.bf16.msra.mxu0 (%p777_p13), %v18170_v51  ;;  %10487 = vmatprep.subr.bf16.mxu1 (%p777_p13), %v18171_v54  ;;  %v18254_v54 = vld [vmem:[#allocation14 + $0x42c] ss:$48 sps:$4 sm:$0xff] (%p777_p13)  }
0x12f3   : > { %10530 = vmatprep.subr.bf16.mxu0 %v18173_v59  ;;  %10488 = vmatpush1.bf16.msra.mxu1 %v18175_v0  ;;  %v18251_v51 = vld [vmem:[#allocation14 + $0x1024] ss:$48 sps:$4 sm:$0xff]   ;;  %v18249_v59 = vld [vmem:[#allocation14 + $0x1020] ss:$48 sps:$4 sm:$0xff]   ;;  %v18252_v0 = vld [vmem:[#allocation14 + $0x428] ss:$48 sps:$4 sm:$0xff]  }
0x12f4   : > { %10489 = vmatprep.subr.bf16.mxu1 %v18177_v35  ;;  %v18260_v35 = vld [vmem:[#allocation14 + $0x48c] ss:$48 sps:$4 sm:$0xff]  }
0x12f6   : > { %10531 = vmatpush1.bf16.msra.mxu0 %v18176_v63  ;;  %v18257_v63 = vld [vmem:[#allocation14 + $0x1084] ss:$48 sps:$4 sm:$0xff]  }
0x12f7   : > { %10532 = vmatprep.subr.bf16.mxu0 %v18179_v16  ;;  %10490 = vmatpush1.bf16.msra.mxu1 %v18181_v30  ;;  %v18255_v16 = vld [vmem:[#allocation14 + $0x1080] ss:$48 sps:$4 sm:$0xff]   ;;  %v18258_v30 = vld [vmem:[#allocation14 + $0x488] ss:$48 sps:$4 sm:$0xff]  }
0x12f8   : > { %10588 = vmatprep.subr.bf16.mxu1 %v18188_v47  ;;  %v18267_v47 = vld [vmem:[#allocation14 + $0x1140] ss:$48 sps:$4 sm:$0xff]  }
0x12f9   : > { %v6922_v21 = vld [vmem:[#allocation2 + $0x8] sm:$0xff]  ;;  %v6928_v55 = vld [vmem:[#allocation2 + $0x38] sm:$0xff]  ;;  %v6921_v49 = vld [vmem:[#allocation2] sm:$0xff] }
0x12fa   : > { %v6924_v43 = vld [vmem:[#allocation2 + $0x18] sm:$0xff]  ;;  %v6930_v31 = vld [vmem:[#allocation2 + $0x48] sm:$0xff]  ;;  %v22703_v13 = vpack.c.bf16 %v6928_v55, %v6922_v21  ;;  %v6927_v20 = vld [vmem:[#allocation2 + $0x30] sm:$0xff]  ;;  %10533 = vmatpush1.bf16.msra.mxu0 %v18182_v22 }
0x12fb   : > { %v22705_v3 = vpack.c.bf16 %v6930_v31, %v6924_v43  ;;  %v6923_v33 = vld [vmem:[#allocation2 + $0x10] sm:$0xff]  ;;  %v6929_v12 = vld [vmem:[#allocation2 + $0x40] sm:$0xff]  ;;  %v22709_v8 = vpack.c.bf16 %v6927_v20, %v6921_v49  ;;  %10545 = vmatprep.subr.bf16.mxu0 %v18185_v36  ;;  %v6926_v39 = vld [vmem:[#allocation2 + $0x28] sm:$0xff] }
0x12fc   : > { %10491 = vmatprep.mubr.bf16.mxu1 %v22703_v13  ;;  %v22711_v9 = vpack.c.bf16 %v6929_v12, %v6923_v33  ;;  %v6932_v23 = vld [vmem:[#allocation2 + $0x58] sm:$0xff]  ;;  %v18236_v21 = vld [vmem:[#allocation14 + $0x30c] ss:$48 sps:$4 sm:$0xff]  }
0x12fd   : > { %10534 = vmatprep.mubr.bf16.mxu0 %v22705_v3  ;;  %10492 = vmatmul.mubr.bf16.vlgmr.msra.gmra.mrb[0].mxu1 %v22709_v8  ;;  %v22716_v15 = vpack.c.bf16 %v6932_v23, %v6926_v39  ;;  %v18231_v55 = vld [vmem:[#allocation14 + $0xf00] ss:$48 sps:$4 sm:$0xff]   ;;  %v18234_v43 = vld [vmem:[#allocation14 + $0x308] ss:$48 sps:$4 sm:$0xff]   ;;  %v18239_v31 = vld [vmem:[#allocation14 + $0xf64] ss:$48 sps:$4 sm:$0xff]  }
0x12fe   : > { %10535 = vmatmul.mubr.bf16.vlgmr.msra.gmra.mrb[0].mxu0 %v22711_v9  ;;  %10589 = vmatpush1.bf16.msra.mxu1 %v18186_v5  ;;  %v18263_v22 = vld [vmem:[#allocation14 + $0x10e4] ss:$48 sps:$4 sm:$0xff]   ;;  %v18266_v49 = vld [vmem:[#allocation14 + $0x4ec] ss:$48 sps:$4 sm:$0xff]   ;;  %v18261_v36 = vld [vmem:[#allocation14 + $0x10e0] ss:$48 sps:$4 sm:$0xff]  }
0x12ff   : > { %10546 = vmatpush1.bf16.msra.mxu0 %v18183_v4  ;;  %10590 = vmatprep.subr.bf16.mxu1 %v18194_v11  ;;  %v18264_v20 = vld [vmem:[#allocation14 + $0x4e8] ss:$48 sps:$4 sm:$0xff]   ;;  %v18269_v33 = vld [vmem:[#allocation14 + $0x1144] ss:$48 sps:$4 sm:$0xff]   ;;  %v18272_v12 = vld [vmem:[#allocation14 + $0x54c] ss:$48 sps:$4 sm:$0xff]  }
0x1300   : > { %10547 = vmatprep.subr.bf16.mxu0 %v18191_v10  ;;  %10620 = vmatprep.mubr.bf16.mxu1 %v22703_v13  ;;  %v18270_v4 = vld [vmem:[#allocation14 + $0x548] ss:$48 sps:$4 sm:$0xff]   ;;  %v18275_v5 = vld [vmem:[#allocation14 + $0x11a4] ss:$48 sps:$4 sm:$0xff]   ;;  %v18278_v10 = vld [vmem:[#allocation14 + $0x5ac] ss:$48 sps:$4 sm:$0xff]  }
0x1301   : > { %10577 = vmatprep.mubr.bf16.mxu0 %v22716_v15  ;;  %v18273_v11 = vld [vmem:[#allocation14 + $0x11a0] ss:$48 sps:$4 sm:$0xff]   ;;  %v18311_v23 = vld [vmem:[#allocation14 + $0x7ec] ss:$48 sps:$4 sm:$0xff]  }
0x1302   : > { %10591 = vmatpush1.bf16.msra.mxu1 %v18192_v17  ;;  %v6925_v17 = vld [vmem:[#allocation2 + $0x20] sm:$0xff] }
0x1303   : > { %10548 = vmatpush1.bf16.msra.mxu0 %v18189_v53  ;;  %10592 = vmatprep.subr.bf16.mxu1 %v18200_v37  ;;  %v18276_v53 = vld [vmem:[#allocation14 + $0x5a8] ss:$48 sps:$4 sm:$0xff]   ;;  %v18281_v37 = vld [vmem:[#allocation14 + $0x60c] ss:$48 sps:$4 sm:$0xff]   ;;  %v18306_v39 = vld [vmem:[#allocation14 + $0x190] ss:$48 sps:$4 sm:$0xff]  }
0x1304   : > { %10549 = vmatprep.subr.bf16.mxu0 %v18197_v41  ;;  %v6931_v41 = vld [vmem:[#allocation2 + $0x50] sm:$0xff] }
0x1306   : > { %10593 = vmatpush1.bf16.msra.mxu1 %v18198_v25  ;;  %v22719_v25 = vpack.c.bf16 %v6931_v41, %v6925_v17  ;;  %v18365_v17 = vld [vmem:[#allocation14 + $0xb4c] ss:$48 sps:$4 sm:$0xff]   ;;  %v18368_v41 = vld [vmem:[#allocation14 + $0x554] ss:$48 sps:$4 sm:$0xff]  }
0x1307   : > { %10550 = vmatpush1.bf16.msra.mxu0 %v18195_v50  ;;  %10594 = vmatprep.subr.bf16.mxu1 %v18206_v62  ;;  %v18284_v50 = vld [vmem:[#allocation14 + $0x14] ss:$48 sps:$4 sm:$0xff]   ;;  %v18282_v62 = vld [vmem:[#allocation14 + $0x10] ss:$48 sps:$4 sm:$0xff]  }
0x1308   : > { %10551 = vmatprep.subr.bf16.mxu0 %v18203_v18  ;;  %v18279_v18 = vld [vmem:[#allocation14 + $0x608] ss:$48 sps:$4 sm:$0xff]  }
0x130a   : > { %10595 = vmatpush1.bf16.msra.mxu1 %v18204_v56  ;;  %v18290_v56 = vld [vmem:[#allocation14 + $0x74] ss:$48 sps:$4 sm:$0xff]  }
0x130b   : > { %10552 = vmatpush1.bf16.msra.mxu0 %v18201_v42  ;;  %10596 = vmatprep.subr.bf16.mxu1 %v18212_v26  ;;  %v18287_v42 = vld [vmem:[#allocation14 + $0x66c] ss:$48 sps:$4 sm:$0xff]   ;;  %v18288_v26 = vld [vmem:[#allocation14 + $0x70] ss:$48 sps:$4 sm:$0xff]  }
0x130c   : > { %10553 = vmatprep.subr.bf16.mxu0 %v18209_v24  ;;  %v18285_v24 = vld [vmem:[#allocation14 + $0x668] ss:$48 sps:$4 sm:$0xff]  }
0x130e   : > { %10597 = vmatpush1.bf16.msra.mxu1 %v18210_v7  ;;  %v18296_v7 = vld [vmem:[#allocation14 + $0xd4] ss:$48 sps:$4 sm:$0xff]  }
0x130f   : > { %10554 = vmatpush1.bf16.msra.mxu0 %v18207_v57  ;;  %10598 = vmatprep.subr.bf16.mxu1 %v18218_v6  ;;  %v18293_v57 = vld [vmem:[#allocation14 + $0x6cc] ss:$48 sps:$4 sm:$0xff]   ;;  %v18294_v6 = vld [vmem:[#allocation14 + $0xd0] ss:$48 sps:$4 sm:$0xff]  }
0x1310   : > { %10555 = vmatprep.subr.bf16.mxu0 %v18215_v32  ;;  %v18291_v32 = vld [vmem:[#allocation14 + $0x6c8] ss:$48 sps:$4 sm:$0xff]  }
0x1312   : > { %10599 = vmatpush1.bf16.msra.mxu1 %v18216_v61  ;;  %v18302_v61 = vld [vmem:[#allocation14 + $0x134] ss:$48 sps:$4 sm:$0xff]  }
0x1313   : > { %10556 = vmatpush1.bf16.msra.mxu0 %v18213_v60  ;;  %10600 = vmatprep.subr.bf16.mxu1 %v18224_v14  ;;  %v18299_v60 = vld [vmem:[#allocation14 + $0x72c] ss:$48 sps:$4 sm:$0xff]   ;;  %v18300_v14 = vld [vmem:[#allocation14 + $0x130] ss:$48 sps:$4 sm:$0xff]  }
0x1314   : > { %10557 = vmatprep.subr.bf16.mxu0 %v18221_v2  ;;  %v18297_v2 = vld [vmem:[#allocation14 + $0x728] ss:$48 sps:$4 sm:$0xff]  }
0x1316   : > { %10601 = vmatpush1.bf16.msra.mxu1 %v18222_v52  ;;  %v18308_v52 = vld [vmem:[#allocation14 + $0x194] ss:$48 sps:$4 sm:$0xff]  }
0x1317   : > { %10558 = vmatpush1.bf16.msra.mxu0 %v18219_v19  ;;  %10602 = vmatprep.subr.bf16.mxu1 %v18230_v29  ;;  %v18305_v19 = vld [vmem:[#allocation14 + $0x78c] ss:$48 sps:$4 sm:$0xff]   ;;  %v18314_v29 = vld [vmem:[#allocation14 + $0x1f4] ss:$48 sps:$4 sm:$0xff]  }
0x1318   : > { %10559 = vmatprep.subr.bf16.mxu0 %v18227_v48  ;;  %v18303_v48 = vld [vmem:[#allocation14 + $0x788] ss:$48 sps:$4 sm:$0xff]  }
0x131a   : > { %10603 = vmatpush1.bf16.msra.mxu1 %v18228_v28  ;;  %v18312_v28 = vld [vmem:[#allocation14 + $0x1f0] ss:$48 sps:$4 sm:$0xff]  }
0x131b   : > { %10560 = vmatpush1.bf16.msra.mxu0 %v18225_v38  ;;  %10604 = vmatprep.subr.bf16.mxu1 %v18236_v21  ;;  %v18309_v38 = vld [vmem:[#allocation14 + $0x7e8] ss:$48 sps:$4 sm:$0xff]   ;;  %v18320_v21 = vld [vmem:[#allocation14 + $0x254] ss:$48 sps:$4 sm:$0xff]  }
0x131c   : > { %10561 = vmatprep.subr.bf16.mxu0 %v18233_v44  ;;  %v18317_v44 = vld [vmem:[#allocation14 + $0x84c] ss:$48 sps:$4 sm:$0xff]  }
0x131e   : > { %10605 = vmatpush1.bf16.msra.mxu1 %v18234_v43  ;;  %v18318_v43 = vld [vmem:[#allocation14 + $0x250] ss:$48 sps:$4 sm:$0xff]  }
0x131f   : > { %10562 = vmatpush1.bf16.msra.mxu0 %v18231_v55  ;;  %10606 = vmatprep.subr.bf16.mxu1 %v18242_v27  ;;  %v18315_v55 = vld [vmem:[#allocation14 + $0x848] ss:$48 sps:$4 sm:$0xff]   ;;  %v18326_v27 = vld [vmem:[#allocation14 + $0x2b4] ss:$48 sps:$4 sm:$0xff]  }
0x1320   : > { %10563 = vmatprep.subr.bf16.mxu0 %v18239_v31  ;;  %v18323_v31 = vld [vmem:[#allocation14 + $0x8ac] ss:$48 sps:$4 sm:$0xff]  }
0x1322   : > { %10607 = vmatpush1.bf16.msra.mxu1 %v18240_v45  ;;  %v18324_v45 = vld [vmem:[#allocation14 + $0x2b0] ss:$48 sps:$4 sm:$0xff]  }
0x1323   : > { %10564 = vmatpush1.bf16.msra.mxu0 %v18237_v40  ;;  %10608 = vmatprep.subr.bf16.mxu1 %v18248_v58  ;;  %v18321_v40 = vld [vmem:[#allocation14 + $0x8a8] ss:$48 sps:$4 sm:$0xff]   ;;  %v18332_v58 = vld [vmem:[#allocation14 + $0x314] ss:$48 sps:$4 sm:$0xff]  }
0x1324   : > { %10565 = vmatprep.subr.bf16.mxu0 %v18245_v46  ;;  %v18329_v46 = vld [vmem:[#allocation14 + $0x90c] ss:$48 sps:$4 sm:$0xff]  }
0x1326   : > { %10609 = vmatpush1.bf16.msra.mxu1 %v18246_v34  ;;  %v18330_v34 = vld [vmem:[#allocation14 + $0x310] ss:$48 sps:$4 sm:$0xff]  }
0x1327   : > { %10566 = vmatpush1.bf16.msra.mxu0 %v18243_v1  ;;  %10610 = vmatprep.subr.bf16.mxu1 %v18254_v54  ;;  %v18327_v1 = vld [vmem:[#allocation14 + $0x908] ss:$48 sps:$4 sm:$0xff]   ;;  %v18338_v54 = vld [vmem:[#allocation14 + $0x374] ss:$48 sps:$4 sm:$0xff]  }
0x1328   : > { %10567 = vmatprep.subr.bf16.mxu0 %v18251_v51  ;;  %v18335_v51 = vld [vmem:[#allocation14 + $0x96c] ss:$48 sps:$4 sm:$0xff]  }
0x132a   : > { %10611 = vmatpush1.bf16.msra.mxu1 %v18252_v0  ;;  %v18336_v0 = vld [vmem:[#allocation14 + $0x370] ss:$48 sps:$4 sm:$0xff]  }
0x132b   : > { %10568 = vmatpush1.bf16.msra.mxu0 %v18249_v59  ;;  %10612 = vmatprep.subr.bf16.mxu1 %v18260_v35  ;;  %v18333_v59 = vld [vmem:[#allocation14 + $0x968] ss:$48 sps:$4 sm:$0xff]   ;;  %v18344_v35 = vld [vmem:[#allocation14 + $0x3d4] ss:$48 sps:$4 sm:$0xff]  }
0x132c   : > { %10569 = vmatprep.subr.bf16.mxu0 %v18257_v63  ;;  %v18341_v63 = vld [vmem:[#allocation14 + $0x9cc] ss:$48 sps:$4 sm:$0xff]  }
0x132e   : > { %10613 = vmatpush1.bf16.msra.mxu1 %v18258_v30  ;;  %v18342_v30 = vld [vmem:[#allocation14 + $0x3d0] ss:$48 sps:$4 sm:$0xff]  }
0x132f   : > { %10570 = vmatpush1.bf16.msra.mxu0 %v18255_v16  ;;  %10614 = vmatprep.subr.bf16.mxu1 %v18266_v49  ;;  %v18339_v16 = vld [vmem:[#allocation14 + $0x9c8] ss:$48 sps:$4 sm:$0xff]   ;;  %v18350_v49 = vld [vmem:[#allocation14 + $0x434] ss:$48 sps:$4 sm:$0xff]  }
0x1330   : > { %10571 = vmatprep.subr.bf16.mxu0 %v18263_v22  ;;  %v18347_v22 = vld [vmem:[#allocation14 + $0xa2c] ss:$48 sps:$4 sm:$0xff]  }
0x1332   : > { %10615 = vmatpush1.bf16.msra.mxu1 %v18264_v20  ;;  %v18348_v20 = vld [vmem:[#allocation14 + $0x430] ss:$48 sps:$4 sm:$0xff]  }
0x1333   : > { %10572 = vmatpush1.bf16.msra.mxu0 %v18261_v36  ;;  %10616 = vmatprep.subr.bf16.mxu1 %v18272_v12  ;;  %v18345_v36 = vld [vmem:[#allocation14 + $0xa28] ss:$48 sps:$4 sm:$0xff]   ;;  %v18356_v12 = vld [vmem:[#allocation14 + $0x494] ss:$48 sps:$4 sm:$0xff]  }
0x1334   : > { %10573 = vmatprep.subr.bf16.mxu0 %v18269_v33  ;;  %v18353_v33 = vld [vmem:[#allocation14 + $0xa8c] ss:$48 sps:$4 sm:$0xff]  }
0x1336   : > { %10617 = vmatpush1.bf16.msra.mxu1 %v18270_v4  ;;  %v18354_v4 = vld [vmem:[#allocation14 + $0x490] ss:$48 sps:$4 sm:$0xff]  }
0x1337   : > { %10574 = vmatpush1.bf16.msra.mxu0 %v18267_v47  ;;  %10618 = vmatprep.subr.bf16.mxu1 %v18278_v10  ;;  %v18351_v47 = vld [vmem:[#allocation14 + $0xa88] ss:$48 sps:$4 sm:$0xff]   ;;  %v18362_v10 = vld [vmem:[#allocation14 + $0x4f4] ss:$48 sps:$4 sm:$0xff]  }
0x1338   : > { %10575 = vmatprep.subr.bf16.mxu0 %v18275_v5  ;;  %v18359_v5 = vld [vmem:[#allocation14 + $0xaec] ss:$48 sps:$4 sm:$0xff]  }
0x133a   : > { %10619 = vmatpush1.bf16.msra.mxu1 %v18276_v53  ;;  %v18360_v53 = vld [vmem:[#allocation14 + $0x4f0] ss:$48 sps:$4 sm:$0xff]  }
0x133b   : > { %10576 = vmatpush1.bf16.msra.mxu0 %v18273_v11  ;;  %10631 = vmatprep.subr.bf16.mxu1 %v18281_v37  ;;  %v18357_v11 = vld [vmem:[#allocation14 + $0xae8] ss:$48 sps:$4 sm:$0xff]  }
0x133c   : > { %10717 = vmatprep.subr.bf16.mxu0 %v18284_v50  ;;  %v18363_v37 = vld [vmem:[#allocation14 + $0xb48] ss:$48 sps:$4 sm:$0xff]   ;;  %v18366_v50 = vld [vmem:[#allocation14 + $0x550] ss:$48 sps:$4 sm:$0xff]  }
0x133d   : > { %10621 = vmatmul.mubr.bf16.vlgmr.msra.gmra.mrb[4].mxu1 %v22709_v8 }
0x133e   : > { %10578 = vmatmul.mubr.bf16.vlgmr.msra.gmra.mrb[0].mxu0 %v22719_v25  ;;  %10632 = vmatpush1.bf16.msra.mxu1 %v18279_v18  ;;  %v18371_v18 = vld [vmem:[#allocation14 + $0xbac] ss:$48 sps:$4 sm:$0xff]  }
0x133f   : > { %10718 = vmatpush1.bf16.msra.mxu0 %v18282_v62  ;;  %10633 = vmatprep.subr.bf16.mxu1 %v18287_v42  ;;  %v18374_v62 = vld [vmem:[#allocation14 + $0x5b4] ss:$48 sps:$4 sm:$0xff]   ;;  %v18369_v42 = vld [vmem:[#allocation14 + $0xba8] ss:$48 sps:$4 sm:$0xff]  }
0x1340   : > { %10719 = vmatprep.subr.bf16.mxu0 %v18290_v56  ;;  %10663 = vmatprep.mubr.bf16.mxu1 %v22705_v3  ;;  %v18372_v56 = vld [vmem:[#allocation14 + $0x5b0] ss:$48 sps:$4 sm:$0xff]  }
0x1341   : > { %10749 = vmatprep.mubr.bf16.mxu0 %v22703_v13 }
0x1342   : > { %10634 = vmatpush1.bf16.msra.mxu1 %v18285_v24  ;;  %v18377_v24 = vld [vmem:[#allocation14 + $0xc0c] ss:$48 sps:$4 sm:$0xff]  }
0x1343   : > { %10720 = vmatpush1.bf16.msra.mxu0 %v18288_v26  ;;  %10635 = vmatprep.subr.bf16.mxu1 %v18293_v57  ;;  %v18380_v26 = vld [vmem:[#allocation14 + $0x614] ss:$48 sps:$4 sm:$0xff]   ;;  %v18375_v57 = vld [vmem:[#allocation14 + $0xc08] ss:$48 sps:$4 sm:$0xff]  }
0x1344   : > { %10721 = vmatprep.subr.bf16.mxu0 %v18296_v7  ;;  %v18378_v7 = vld [vmem:[#allocation14 + $0x610] ss:$48 sps:$4 sm:$0xff]  }
0x1346   : > { %10636 = vmatpush1.bf16.msra.mxu1 %v18291_v32  ;;  %v18383_v32 = vld [vmem:[#allocation14 + $0xc6c] ss:$48 sps:$4 sm:$0xff]  }
0x1347   : > { %10722 = vmatpush1.bf16.msra.mxu0 %v18294_v6  ;;  %10637 = vmatprep.subr.bf16.mxu1 %v18299_v60  ;;  %v18386_v6 = vld [vmem:[#allocation14 + $0x674] ss:$48 sps:$4 sm:$0xff]   ;;  %v18381_v60 = vld [vmem:[#allocation14 + $0xc68] ss:$48 sps:$4 sm:$0xff]  }
0x1348   : > { %10723 = vmatprep.subr.bf16.mxu0 %v18302_v61  ;;  %v18384_v61 = vld [vmem:[#allocation14 + $0x670] ss:$48 sps:$4 sm:$0xff]  }
0x134a   : > { %10638 = vmatpush1.bf16.msra.mxu1 %v18297_v2  ;;  %v18389_v2 = vld [vmem:[#allocation14 + $0xccc] ss:$48 sps:$4 sm:$0xff]  }
0x134b   : > { %10724 = vmatpush1.bf16.msra.mxu0 %v18300_v14  ;;  %10639 = vmatprep.subr.bf16.mxu1 %v18305_v19  ;;  %v18392_v14 = vld [vmem:[#allocation14 + $0x6d4] ss:$48 sps:$4 sm:$0xff]   ;;  %v18387_v19 = vld [vmem:[#allocation14 + $0xcc8] ss:$48 sps:$4 sm:$0xff]  }
0x134c   : > { %10725 = vmatprep.subr.bf16.mxu0 %v18308_v52  ;;  %v18390_v52 = vld [vmem:[#allocation14 + $0x6d0] ss:$48 sps:$4 sm:$0xff]  }
0x134e   : > { %10640 = vmatpush1.bf16.msra.mxu1 %v18303_v48  ;;  %v18395_v48 = vld [vmem:[#allocation14 + $0xd2c] ss:$48 sps:$4 sm:$0xff]  }
0x134f   : > { %10726 = vmatpush1.bf16.msra.mxu0 %v18306_v39  ;;  %10641 = vmatprep.subr.bf16.mxu1 %v18311_v23  ;;  %v18398_v39 = vld [vmem:[#allocation14 + $0x734] ss:$48 sps:$4 sm:$0xff]   ;;  %v18393_v23 = vld [vmem:[#allocation14 + $0xd28] ss:$48 sps:$4 sm:$0xff]  }
0x1350   : > { %10727 = vmatprep.subr.bf16.mxu0 %v18314_v29  ;;  %v18396_v29 = vld [vmem:[#allocation14 + $0x730] ss:$48 sps:$4 sm:$0xff]  }
0x1352   : > { %10642 = vmatpush1.bf16.msra.mxu1 %v18309_v38  ;;  %v18401_v38 = vld [vmem:[#allocation14 + $0xd8c] ss:$48 sps:$4 sm:$0xff]  }
0x1353   : > { %10728 = vmatpush1.bf16.msra.mxu0 %v18312_v28  ;;  %10643 = vmatprep.subr.bf16.mxu1 %v18317_v44  ;;  %v18404_v28 = vld [vmem:[#allocation14 + $0x794] ss:$48 sps:$4 sm:$0xff]   ;;  %v18399_v44 = vld [vmem:[#allocation14 + $0xd88] ss:$48 sps:$4 sm:$0xff]  }
0x1354   : > { %10729 = vmatprep.subr.bf16.mxu0 %v18320_v21  ;;  %v18402_v21 = vld [vmem:[#allocation14 + $0x790] ss:$48 sps:$4 sm:$0xff]  }
0x1356   : > { %10644 = vmatpush1.bf16.msra.mxu1 %v18315_v55  ;;  %v18407_v55 = vld [vmem:[#allocation14 + $0xdec] ss:$48 sps:$4 sm:$0xff]  }
0x1357   : > { %10730 = vmatpush1.bf16.msra.mxu0 %v18318_v43  ;;  %10645 = vmatprep.subr.bf16.mxu1 %v18323_v31  ;;  %v18410_v43 = vld [vmem:[#allocation14 + $0x7f4] ss:$48 sps:$4 sm:$0xff]   ;;  %v18405_v31 = vld [vmem:[#allocation14 + $0xde8] ss:$48 sps:$4 sm:$0xff]  }
0x1358   : > { %10731 = vmatprep.subr.bf16.mxu0 %v18326_v27  ;;  %v18408_v27 = vld [vmem:[#allocation14 + $0x7f0] ss:$48 sps:$4 sm:$0xff]  }
0x135a   : > { %10646 = vmatpush1.bf16.msra.mxu1 %v18321_v40  ;;  %v18413_v40 = vld [vmem:[#allocation14 + $0xe4c] ss:$48 sps:$4 sm:$0xff]  }
0x135b   : > { %10732 = vmatpush1.bf16.msra.mxu0 %v18324_v45  ;;  %10647 = vmatprep.subr.bf16.mxu1 %v18329_v46  ;;  %v18416_v45 = vld [vmem:[#allocation14 + $0x854] ss:$48 sps:$4 sm:$0xff]   ;;  %v18411_v46 = vld [vmem:[#allocation14 + $0xe48] ss:$48 sps:$4 sm:$0xff]  }
0x135c   : > { %10733 = vmatprep.subr.bf16.mxu0 %v18332_v58  ;;  %v18414_v58 = vld [vmem:[#allocation14 + $0x850] ss:$48 sps:$4 sm:$0xff]  }
0x135e   : > { %10648 = vmatpush1.bf16.msra.mxu1 %v18327_v1  ;;  %v18419_v1 = vld [vmem:[#allocation14 + $0xeac] ss:$48 sps:$4 sm:$0xff]  }
0x135f   : > { %10734 = vmatpush1.bf16.msra.mxu0 %v18330_v34  ;;  %10649 = vmatprep.subr.bf16.mxu1 %v18335_v51  ;;  %v18422_v34 = vld [vmem:[#allocation14 + $0x8b4] ss:$48 sps:$4 sm:$0xff]   ;;  %v18417_v51 = vld [vmem:[#allocation14 + $0xea8] ss:$48 sps:$4 sm:$0xff]  }
0x1360   : > { %10735 = vmatprep.subr.bf16.mxu0 %v18338_v54  ;;  %v18420_v54 = vld [vmem:[#allocation14 + $0x8b0] ss:$48 sps:$4 sm:$0xff]  }
0x1362   : > { %10650 = vmatpush1.bf16.msra.mxu1 %v18333_v59  ;;  %v18425_v59 = vld [vmem:[#allocation14 + $0xf0c] ss:$48 sps:$4 sm:$0xff]  }
0x1363   : > { %10736 = vmatpush1.bf16.msra.mxu0 %v18336_v0  ;;  %10651 = vmatprep.subr.bf16.mxu1 %v18341_v63  ;;  %v18428_v0 = vld [vmem:[#allocation14 + $0x914] ss:$48 sps:$4 sm:$0xff]   ;;  %v18423_v63 = vld [vmem:[#allocation14 + $0xf08] ss:$48 sps:$4 sm:$0xff]  }
0x1364   : > { %10737 = vmatprep.subr.bf16.mxu0 %v18344_v35  ;;  %v18426_v35 = vld [vmem:[#allocation14 + $0x910] ss:$48 sps:$4 sm:$0xff]  }
0x1366   : > { %10652 = vmatpush1.bf16.msra.mxu1 %v18339_v16  ;;  %v18431_v16 = vld [vmem:[#allocation14 + $0xf6c] ss:$48 sps:$4 sm:$0xff]  }
0x1367   : > { %10738 = vmatpush1.bf16.msra.mxu0 %v18342_v30  ;;  %10653 = vmatprep.subr.bf16.mxu1 %v18347_v22  ;;  %v18434_v30 = vld [vmem:[#allocation14 + $0x974] ss:$48 sps:$4 sm:$0xff]   ;;  %v18429_v22 = vld [vmem:[#allocation14 + $0xf68] ss:$48 sps:$4 sm:$0xff]  }
0x1368   : > { %10739 = vmatprep.subr.bf16.mxu0 %v18350_v49  ;;  %v18432_v49 = vld [vmem:[#allocation14 + $0x970] ss:$48 sps:$4 sm:$0xff]  }
0x136a   : > { %10654 = vmatpush1.bf16.msra.mxu1 %v18345_v36  ;;  %v18437_v36 = vld [vmem:[#allocation14 + $0xfcc] ss:$48 sps:$4 sm:$0xff]  }
0x136b   : > { %10740 = vmatpush1.bf16.msra.mxu0 %v18348_v20  ;;  %10655 = vmatprep.subr.bf16.mxu1 %v18353_v33  ;;  %v18440_v20 = vld [vmem:[#allocation14 + $0x9d4] ss:$48 sps:$4 sm:$0xff]   ;;  %v18435_v33 = vld [vmem:[#allocation14 + $0xfc8] ss:$48 sps:$4 sm:$0xff]  }
0x136c   : > { %10741 = vmatprep.subr.bf16.mxu0 %v18356_v12  ;;  %v18438_v12 = vld [vmem:[#allocation14 + $0x9d0] ss:$48 sps:$4 sm:$0xff]  }
0x136e   : > { %10656 = vmatpush1.bf16.msra.mxu1 %v18351_v47  ;;  %v18443_v47 = vld [vmem:[#allocation14 + $0x102c] ss:$48 sps:$4 sm:$0xff]  }
0x136f   : > { %10742 = vmatpush1.bf16.msra.mxu0 %v18354_v4  ;;  %10657 = vmatprep.subr.bf16.mxu1 %v18359_v5  ;;  %v18446_v4 = vld [vmem:[#allocation14 + $0xa34] ss:$48 sps:$4 sm:$0xff]   ;;  %v18441_v5 = vld [vmem:[#allocation14 + $0x1028] ss:$48 sps:$4 sm:$0xff]  }
0x1370   : > { %10743 = vmatprep.subr.bf16.mxu0 %v18362_v10  ;;  %v18444_v10 = vld [vmem:[#allocation14 + $0xa30] ss:$48 sps:$4 sm:$0xff]  }
0x1372   : > { %10658 = vmatpush1.bf16.msra.mxu1 %v18357_v11  ;;  %v18449_v11 = vld [vmem:[#allocation14 + $0x108c] ss:$48 sps:$4 sm:$0xff]  }
0x1373   : > { %10744 = vmatpush1.bf16.msra.mxu0 %v18360_v53  ;;  %10659 = vmatprep.subr.bf16.mxu1 %v18365_v17  ;;  %v18452_v53 = vld [vmem:[#allocation14 + $0xa94] ss:$48 sps:$4 sm:$0xff]   ;;  %v18447_v17 = vld [vmem:[#allocation14 + $0x1088] ss:$48 sps:$4 sm:$0xff]  }
0x1374   : > { %10745 = vmatprep.subr.bf16.mxu0 %v18368_v41  ;;  %v18450_v41 = vld [vmem:[#allocation14 + $0xa90] ss:$48 sps:$4 sm:$0xff]  }
0x1376   : > { %10660 = vmatpush1.bf16.msra.mxu1 %v18363_v37  ;;  %v18455_v37 = vld [vmem:[#allocation14 + $0x10ec] ss:$48 sps:$4 sm:$0xff]  }
0x1377   : > { %10746 = vmatpush1.bf16.msra.mxu0 %v18366_v50  ;;  %10661 = vmatprep.subr.bf16.mxu1 %v18371_v18  ;;  %v18458_v50 = vld [vmem:[#allocation14 + $0xaf4] ss:$48 sps:$4 sm:$0xff]   ;;  %v18453_v18 = vld [vmem:[#allocation14 + $0x10e8] ss:$48 sps:$4 sm:$0xff]  }
0x1378   : > { %10747 = vmatprep.subr.bf16.mxu0 %v18374_v62  ;;  %v18456_v62 = vld [vmem:[#allocation14 + $0xaf0] ss:$48 sps:$4 sm:$0xff]  }
0x137a   : > { %10662 = vmatpush1.bf16.msra.mxu1 %v18369_v42  ;;  %v18461_v42 = vld [vmem:[#allocation14 + $0x114c] ss:$48 sps:$4 sm:$0xff]  }
0x137b   : > { %10748 = vmatpush1.bf16.msra.mxu0 %v18372_v56  ;;  %10674 = vmatprep.subr.bf16.mxu1 %v18377_v24  ;;  %v18464_v56 = vld [vmem:[#allocation14 + $0xb54] ss:$48 sps:$4 sm:$0xff]   ;;  %v18459_v24 = vld [vmem:[#allocation14 + $0x1148] ss:$48 sps:$4 sm:$0xff]  }
0x137c   : > { %10760 = vmatprep.subr.bf16.mxu0 %v18380_v26  ;;  %v18462_v26 = vld [vmem:[#allocation14 + $0xb50] ss:$48 sps:$4 sm:$0xff]  }
0x137d   : > { %10664 = vmatmul.mubr.bf16.vlgmr.msra.gmra.mrb[4].mxu1 %v22711_v9 }
0x137e   : > { %10750 = vmatmul.mubr.bf16.vlgmr.msra.gmra.mrb[4].mxu0 %v22709_v8  ;;  %10675 = vmatpush1.bf16.msra.mxu1 %v18375_v57  ;;  %v18467_v57 = vld [vmem:[#allocation14 + $0x11ac] ss:$48 sps:$4 sm:$0xff]  }
0x137f   : > { %10761 = vmatpush1.bf16.msra.mxu0 %v18378_v7  ;;  %10676 = vmatprep.subr.bf16.mxu1 %v18383_v32  ;;  %v18470_v7 = vld [vmem:[#allocation14 + $0xbb4] ss:$48 sps:$4 sm:$0xff]   ;;  %v18465_v32 = vld [vmem:[#allocation14 + $0x11a8] ss:$48 sps:$4 sm:$0xff]  }
0x1380   : > { %10762 = vmatprep.subr.bf16.mxu0 %v18386_v6  ;;  %10706 = vmatprep.mubr.bf16.mxu1 %v22716_v15  ;;  %v18468_v6 = vld [vmem:[#allocation14 + $0xbb0] ss:$48 sps:$4 sm:$0xff]  }
0x1381   : > { %10792 = vmatprep.mubr.bf16.mxu0 %v22705_v3 }
0x1382   : > { %10677 = vmatpush1.bf16.msra.mxu1 %v18381_v60  ;;  %v18473_v60 = vld [vmem:[#allocation14 + $0xc14] ss:$48 sps:$4 sm:$0xff]  }
0x1383   : > { %10763 = vmatpush1.bf16.msra.mxu0 %v18384_v61  ;;  %10678 = vmatprep.subr.bf16.mxu1 %v18389_v2  ;;  %v18476_v61 = vld [vmem:[#allocation14 + $0x1c] ss:$48 sps:$4 sm:$0xff]   ;;  %v18471_v2 = vld [vmem:[#allocation14 + $0xc10] ss:$48 sps:$4 sm:$0xff]  }
0x1384   : > { %10764 = vmatprep.subr.bf16.mxu0 %v18392_v14  ;;  %v18474_v14 = vld [vmem:[#allocation14 + $0x18] ss:$48 sps:$4 sm:$0xff]  }
0x1386   : > { %10679 = vmatpush1.bf16.msra.mxu1 %v18387_v19  ;;  %v18479_v19 = vld [vmem:[#allocation14 + $0xc74] ss:$48 sps:$4 sm:$0xff]  }
0x1387   : > { %10765 = vmatpush1.bf16.msra.mxu0 %v18390_v52  ;;  %10680 = vmatprep.subr.bf16.mxu1 %v18395_v48  ;;  %v18482_v52 = vld [vmem:[#allocation14 + $0x7c] ss:$48 sps:$4 sm:$0xff]   ;;  %v18477_v48 = vld [vmem:[#allocation14 + $0xc70] ss:$48 sps:$4 sm:$0xff]  }
0x1388   : > { %10766 = vmatprep.subr.bf16.mxu0 %v18398_v39  ;;  %v18480_v39 = vld [vmem:[#allocation14 + $0x78] ss:$48 sps:$4 sm:$0xff]  }
0x138a   : > { %10681 = vmatpush1.bf16.msra.mxu1 %v18393_v23  ;;  %v18485_v23 = vld [vmem:[#allocation14 + $0xcd4] ss:$48 sps:$4 sm:$0xff]  }
0x138b   : > { %10767 = vmatpush1.bf16.msra.mxu0 %v18396_v29  ;;  %10682 = vmatprep.subr.bf16.mxu1 %v18401_v38  ;;  %v18488_v29 = vld [vmem:[#allocation14 + $0xdc] ss:$48 sps:$4 sm:$0xff]   ;;  %v18483_v38 = vld [vmem:[#allocation14 + $0xcd0] ss:$48 sps:$4 sm:$0xff]  }
0x138c   : > { %10768 = vmatprep.subr.bf16.mxu0 %v18404_v28  ;;  %v18486_v28 = vld [vmem:[#allocation14 + $0xd8] ss:$48 sps:$4 sm:$0xff]  }
0x138e   : > { %10683 = vmatpush1.bf16.msra.mxu1 %v18399_v44  ;;  %v18491_v44 = vld [vmem:[#allocation14 + $0xd34] ss:$48 sps:$4 sm:$0xff]  }
0x138f   : > { %10769 = vmatpush1.bf16.msra.mxu0 %v18402_v21  ;;  %10684 = vmatprep.subr.bf16.mxu1 %v18407_v55  ;;  %v18494_v21 = vld [vmem:[#allocation14 + $0x13c] ss:$48 sps:$4 sm:$0xff]   ;;  %v18489_v55 = vld [vmem:[#allocation14 + $0xd30] ss:$48 sps:$4 sm:$0xff]  }
0x1390   : > { %10770 = vmatprep.subr.bf16.mxu0 %v18410_v43  ;;  %v18492_v43 = vld [vmem:[#allocation14 + $0x138] ss:$48 sps:$4 sm:$0xff]  }
0x1392   : > { %10685 = vmatpush1.bf16.msra.mxu1 %v18405_v31  ;;  %v18497_v31 = vld [vmem:[#allocation14 + $0xd94] ss:$48 sps:$4 sm:$0xff]  }
0x1393   : > { %10771 = vmatpush1.bf16.msra.mxu0 %v18408_v27  ;;  %10686 = vmatprep.subr.bf16.mxu1 %v18413_v40  ;;  %v18500_v27 = vld [vmem:[#allocation14 + $0x19c] ss:$48 sps:$4 sm:$0xff]   ;;  %v18495_v40 = vld [vmem:[#allocation14 + $0xd90] ss:$48 sps:$4 sm:$0xff]  }
0x1394   : > { %10772 = vmatprep.subr.bf16.mxu0 %v18416_v45  ;;  %v18498_v45 = vld [vmem:[#allocation14 + $0x198] ss:$48 sps:$4 sm:$0xff]  }
0x1396   : > { %10687 = vmatpush1.bf16.msra.mxu1 %v18411_v46  ;;  %v18503_v46 = vld [vmem:[#allocation14 + $0xdf4] ss:$48 sps:$4 sm:$0xff]  }
0x1397   : > { %10773 = vmatpush1.bf16.msra.mxu0 %v18414_v58  ;;  %10688 = vmatprep.subr.bf16.mxu1 %v18419_v1  ;;  %v18506_v58 = vld [vmem:[#allocation14 + $0x1fc] ss:$48 sps:$4 sm:$0xff]   ;;  %v18501_v1 = vld [vmem:[#allocation14 + $0xdf0] ss:$48 sps:$4 sm:$0xff]  }
0x1398   : > { %10774 = vmatprep.subr.bf16.mxu0 %v18422_v34  ;;  %v18504_v34 = vld [vmem:[#allocation14 + $0x1f8] ss:$48 sps:$4 sm:$0xff]  }
0x139a   : > { %10689 = vmatpush1.bf16.msra.mxu1 %v18417_v51  ;;  %v18509_v51 = vld [vmem:[#allocation14 + $0xe54] ss:$48 sps:$4 sm:$0xff]  }
0x139b   : > { %10775 = vmatpush1.bf16.msra.mxu0 %v18420_v54  ;;  %10690 = vmatprep.subr.bf16.mxu1 %v18425_v59  ;;  %v18512_v54 = vld [vmem:[#allocation14 + $0x25c] ss:$48 sps:$4 sm:$0xff]  }
0x139c   : > { %10776 = vmatprep.subr.bf16.mxu0 %v18428_v0 }
0x139e   : > { %10691 = vmatpush1.bf16.msra.mxu1 %v18423_v63  ;;  %v18507_v63 = vld [vmem:[#allocation14 + $0xe50] ss:$48 sps:$4 sm:$0xff]  }
0x139f   : > { %10777 = vmatpush1.bf16.msra.mxu0 %v18426_v35  ;;  %10692 = vmatprep.subr.bf16.mxu1 %v18431_v16  ;;  %v18510_v35 = vld [vmem:[#allocation14 + $0x258] ss:$48 sps:$4 sm:$0xff]  }
0x13a0   : > { %10778 = vmatprep.subr.bf16.mxu0 %v18434_v30  ;;  %v18515_v30 = vld [vmem:[#allocation14 + $0xeb4] ss:$48 sps:$4 sm:$0xff]  }
0x13a2   : > { %10693 = vmatpush1.bf16.msra.mxu1 %v18429_v22  ;;  %v18518_v22 = vld [vmem:[#allocation14 + $0x2bc] ss:$48 sps:$4 sm:$0xff]  }
0x13a3   : > { %10779 = vmatpush1.bf16.msra.mxu0 %v18432_v49  ;;  %10694 = vmatprep.subr.bf16.mxu1 %v18437_v36  ;;  %v18513_v36 = vld [vmem:[#allocation14 + $0xeb0] ss:$48 sps:$4 sm:$0xff]  }
0x13a4   : > { %10780 = vmatprep.subr.bf16.mxu0 %v18440_v20  ;;  %v18516_v20 = vld [vmem:[#allocation14 + $0x2b8] ss:$48 sps:$4 sm:$0xff]  }
0x13a6   : > { %10695 = vmatpush1.bf16.msra.mxu1 %v18435_v33  ;;  %v18521_v33 = vld [vmem:[#allocation14 + $0xf14] ss:$48 sps:$4 sm:$0xff]  }
0x13a7   : > { %10781 = vmatpush1.bf16.msra.mxu0 %v18438_v12  ;;  %10696 = vmatprep.subr.bf16.mxu1 %v18443_v47  ;;  %v18524_v12 = vld [vmem:[#allocation14 + $0x31c] ss:$48 sps:$4 sm:$0xff]   ;;  %v18519_v47 = vld [vmem:[#allocation14 + $0xf10] ss:$48 sps:$4 sm:$0xff]  }
0x13a8   : > { %10782 = vmatprep.subr.bf16.mxu0 %v18446_v4  ;;  %v18522_v4 = vld [vmem:[#allocation14 + $0x318] ss:$48 sps:$4 sm:$0xff]  }
0x13aa   : > { %10697 = vmatpush1.bf16.msra.mxu1 %v18441_v5  ;;  %v18527_v5 = vld [vmem:[#allocation14 + $0xf74] ss:$48 sps:$4 sm:$0xff]  }
0x13ab   : > { %10783 = vmatpush1.bf16.msra.mxu0 %v18444_v10  ;;  %10698 = vmatprep.subr.bf16.mxu1 %v18449_v11  ;;  %v18530_v10 = vld [vmem:[#allocation14 + $0x37c] ss:$48 sps:$4 sm:$0xff]   ;;  %v18525_v11 = vld [vmem:[#allocation14 + $0xf70] ss:$48 sps:$4 sm:$0xff]  }
0x13ac   : > { %10784 = vmatprep.subr.bf16.mxu0 %v18452_v53  ;;  %v18528_v53 = vld [vmem:[#allocation14 + $0x378] ss:$48 sps:$4 sm:$0xff]  }
0x13ae   : > { %10699 = vmatpush1.bf16.msra.mxu1 %v18447_v17  ;;  %v18533_v17 = vld [vmem:[#allocation14 + $0xfd4] ss:$48 sps:$4 sm:$0xff]  }
0x13af   : > { %10785 = vmatpush1.bf16.msra.mxu0 %v18450_v41  ;;  %10700 = vmatprep.subr.bf16.mxu1 %v18455_v37  ;;  %v18536_v41 = vld [vmem:[#allocation14 + $0x3dc] ss:$48 sps:$4 sm:$0xff]   ;;  %v18531_v37 = vld [vmem:[#allocation14 + $0xfd0] ss:$48 sps:$4 sm:$0xff]  }
0x13b0   : > { %10786 = vmatprep.subr.bf16.mxu0 %v18458_v50  ;;  %v18534_v50 = vld [vmem:[#allocation14 + $0x3d8] ss:$48 sps:$4 sm:$0xff]  }
0x13b2   : > { %10701 = vmatpush1.bf16.msra.mxu1 %v18453_v18  ;;  %v18539_v18 = vld [vmem:[#allocation14 + $0x1034] ss:$48 sps:$4 sm:$0xff]  }
0x13b3   : > { %10787 = vmatpush1.bf16.msra.mxu0 %v18456_v62  ;;  %10702 = vmatprep.subr.bf16.mxu1 %v18461_v42  ;;  %v18542_v62 = vld [vmem:[#allocation14 + $0x43c] ss:$48 sps:$4 sm:$0xff]   ;;  %v18537_v42 = vld [vmem:[#allocation14 + $0x1030] ss:$48 sps:$4 sm:$0xff]  }
0x13b4   : > { %10788 = vmatprep.subr.bf16.mxu0 %v18464_v56  ;;  %v18540_v56 = vld [vmem:[#allocation14 + $0x438] ss:$48 sps:$4 sm:$0xff]  }
0x13b6   : > { %10703 = vmatpush1.bf16.msra.mxu1 %v18459_v24  ;;  %v18545_v24 = vld [vmem:[#allocation14 + $0x1094] ss:$48 sps:$4 sm:$0xff]  }
0x13b7   : > { %10789 = vmatpush1.bf16.msra.mxu0 %v18462_v26  ;;  %10704 = vmatprep.subr.bf16.mxu1 %v18467_v57  ;;  %v18548_v26 = vld [vmem:[#allocation14 + $0x49c] ss:$48 sps:$4 sm:$0xff]   ;;  %v18543_v57 = vld [vmem:[#allocation14 + $0x1090] ss:$48 sps:$4 sm:$0xff]  }
0x13b8   : > { %10790 = vmatprep.subr.bf16.mxu0 %v18470_v7  ;;  %v18546_v7 = vld [vmem:[#allocation14 + $0x498] ss:$48 sps:$4 sm:$0xff]  }
0x13ba   : > { %10705 = vmatpush1.bf16.msra.mxu1 %v18465_v32  ;;  %v18551_v32 = vld [vmem:[#allocation14 + $0x10f4] ss:$48 sps:$4 sm:$0xff]  }
0x13bb   : > { %10791 = vmatpush1.bf16.msra.mxu0 %v18468_v6  ;;  %10846 = vmatprep.subr.bf16.mxu1 %v18476_v61  ;;  %v18554_v6 = vld [vmem:[#allocation14 + $0x4fc] ss:$48 sps:$4 sm:$0xff]   ;;  %v18552_v61 = vld [vmem:[#allocation14 + $0x4f8] ss:$48 sps:$4 sm:$0xff]  }
0x13bc   : > { %10803 = vmatprep.subr.bf16.mxu0 %v18473_v60  ;;  %v18549_v60 = vld [vmem:[#allocation14 + $0x10f0] ss:$48 sps:$4 sm:$0xff]  }
0x13bd   : > { %10707 = vmatmul.mubr.bf16.vlgmr.msra.gmra.mrb[4].mxu1 %v22719_v25 }
0x13be   : > { %10793 = vmatmul.mubr.bf16.vlgmr.msra.gmra.mrb[4].mxu0 %v22711_v9  ;;  %10847 = vmatpush1.bf16.msra.mxu1 %v18474_v14  ;;  %v18560_v14 = vld [vmem:[#allocation14 + $0x55c] ss:$48 sps:$4 sm:$0xff]  }
0x13bf   : > { %10804 = vmatpush1.bf16.msra.mxu0 %v18471_v2  ;;  %10848 = vmatprep.subr.bf16.mxu1 %v18482_v52  ;;  %v18557_v2 = vld [vmem:[#allocation14 + $0x1154] ss:$48 sps:$4 sm:$0xff]   ;;  %v18558_v52 = vld [vmem:[#allocation14 + $0x558] ss:$48 sps:$4 sm:$0xff]  }
0x13c0   : > { %10805 = vmatprep.subr.bf16.mxu0 %v18479_v19  ;;  %10835 = vmatprep.mubr.bf16.mxu0 %v22716_v15  ;;  %v18555_v19 = vld [vmem:[#allocation14 + $0x1150] ss:$48 sps:$4 sm:$0xff]  }
0x13c1   : > { %10878 = vmatprep.mubr.bf16.mxu1 %v22703_v13 }
0x13c2   : > { %10849 = vmatpush1.bf16.msra.mxu1 %v18480_v39  ;;  %v18566_v39 = vld [vmem:[#allocation14 + $0x5bc] ss:$48 sps:$4 sm:$0xff]  }
0x13c3   : > { %10806 = vmatpush1.bf16.msra.mxu0 %v18477_v48  ;;  %10850 = vmatprep.subr.bf16.mxu1 %v18488_v29  ;;  %v18563_v48 = vld [vmem:[#allocation14 + $0x11b4] ss:$48 sps:$4 sm:$0xff]   ;;  %v18564_v29 = vld [vmem:[#allocation14 + $0x5b8] ss:$48 sps:$4 sm:$0xff]  }
0x13c4   : > { %10807 = vmatprep.subr.bf16.mxu0 %v18485_v23  ;;  %v18561_v23 = vld [vmem:[#allocation14 + $0x11b0] ss:$48 sps:$4 sm:$0xff]  }
0x13c6   : > { %10851 = vmatpush1.bf16.msra.mxu1 %v18486_v28  ;;  %v18572_v28 = vld [vmem:[#allocation14 + $0x24] ss:$48 sps:$4 sm:$0xff]  }
0x13c7   : > { %10808 = vmatpush1.bf16.msra.mxu0 %v18483_v38  ;;  %10852 = vmatprep.subr.bf16.mxu1 %v18494_v21  ;;  %v18569_v38 = vld [vmem:[#allocation14 + $0x61c] ss:$48 sps:$4 sm:$0xff]   ;;  %v18570_v21 = vld [vmem:[#allocation14 + $0x20] ss:$48 sps:$4 sm:$0xff]  }
0x13c8   : > { %10809 = vmatprep.subr.bf16.mxu0 %v18491_v44  ;;  %v18567_v44 = vld [vmem:[#allocation14 + $0x618] ss:$48 sps:$4 sm:$0xff]  }
0x13ca   : > { %10853 = vmatpush1.bf16.msra.mxu1 %v18492_v43  ;;  %v18578_v43 = vld [vmem:[#allocation14 + $0x84] ss:$48 sps:$4 sm:$0xff]  }
0x13cb   : > { %10810 = vmatpush1.bf16.msra.mxu0 %v18489_v55  ;;  %10854 = vmatprep.subr.bf16.mxu1 %v18500_v27  ;;  %v18575_v55 = vld [vmem:[#allocation14 + $0x67c] ss:$48 sps:$4 sm:$0xff]   ;;  %v18576_v27 = vld [vmem:[#allocation14 + $0x80] ss:$48 sps:$4 sm:$0xff]  }
0x13cc   : > { %10811 = vmatprep.subr.bf16.mxu0 %v18497_v31  ;;  %v18573_v31 = vld [vmem:[#allocation14 + $0x678] ss:$48 sps:$4 sm:$0xff]  }
0x13ce   : > { %10855 = vmatpush1.bf16.msra.mxu1 %v18498_v45  ;;  %v18584_v45 = vld [vmem:[#allocation14 + $0xe4] ss:$48 sps:$4 sm:$0xff]  }
0x13cf   : > { %10812 = vmatpush1.bf16.msra.mxu0 %v18495_v40  ;;  %10856 = vmatprep.subr.bf16.mxu1 %v18506_v58  ;;  %v18581_v40 = vld [vmem:[#allocation14 + $0x6dc] ss:$48 sps:$4 sm:$0xff]   ;;  %v18582_v58 = vld [vmem:[#allocation14 + $0xe0] ss:$48 sps:$4 sm:$0xff]  }
0x13d0   : > { %10813 = vmatprep.subr.bf16.mxu0 %v18503_v46  ;;  %v22733_v59 = vpop.f32.mrb[0].mxu1  ;;  %v18579_v46 = vld [vmem:[#allocation14 + $0x6d8] ss:$48 sps:$4 sm:$0xff]  }
0x13d1   : > { %v22735_v0 = vpop.f32.mrb[1].mxu1 }
0x13d2   : > { %10857 = vmatpush1.bf16.msra.mxu1 %v18504_v34  ;;  %v22737_v16 = vpop.f32.mrb[2].mxu1  ;;  %v18590_v34 = vld [vmem:[#allocation14 + $0x144] ss:$48 sps:$4 sm:$0xff]  }
0x13d3   : > { %10814 = vmatpush1.bf16.msra.mxu0 %v18501_v1  ;;  %10858 = vmatprep.subr.bf16.mxu1 %v18512_v54  ;;  %v22739_v49 = vpop.f32.mrb[3].mxu1  ;;  %v18587_v1 = vld [vmem:[#allocation14 + $0x73c] ss:$48 sps:$4 sm:$0xff]   ;;  %v18585_v54 = vld [vmem:[#allocation14 + $0x738] ss:$48 sps:$4 sm:$0xff]  }
0x13d4   : > { %10815 = vmatprep.subr.bf16.mxu0 %v18509_v51  ;;  %v7515_v51 = vld [vmem:[#allocation15] sm:$0xff] }
0x13d6   : > { %10859 = vmatpush1.bf16.msra.mxu1 %v18510_v35  ;;  %v23287_v35 = vld [vmem:[#allocation31_spill] sm:$0xff] }
0x13d7   : > { %10816 = vmatpush1.bf16.msra.mxu0 %v18507_v63  ;;  %10860 = vmatprep.subr.bf16.mxu1 %v18518_v22  ;;  %v18588_v63 = vld [vmem:[#allocation14 + $0x140] ss:$48 sps:$4 sm:$0xff]   ;;  %v18593_v22 = vld [vmem:[#allocation14 + $0x79c] ss:$48 sps:$4 sm:$0xff]  }
0x13d8   : > { %10817 = vmatprep.subr.bf16.mxu0 %v18515_v30  ;;  %v22746_v30 = vsub.s32 0, %v23287_v35 }
0x13da   : > { %10861 = vmatpush1.bf16.msra.mxu1 %v18516_v20  ;;  %v22749_v20 = vsub.s32 1, %v23287_v35 }
0x13db   : > { %10818 = vmatpush1.bf16.msra.mxu0 %v18513_v36  ;;  %10862 = vmatprep.subr.bf16.mxu1 %v18524_v12  ;;  %v18596_v36 = vld [vmem:[#allocation14 + $0x1a4] ss:$48 sps:$4 sm:$0xff]   ;;  %v18594_v12 = vld [vmem:[#allocation14 + $0x1a0] ss:$48 sps:$4 sm:$0xff]  }
0x13dc   : > { %10819 = vmatprep.subr.bf16.mxu0 %v18521_v33  ;;  %v18591_v33 = vld [vmem:[#allocation14 + $0x798] ss:$48 sps:$4 sm:$0xff]  }
0x13de   : > { %10863 = vmatpush1.bf16.msra.mxu1 %v18522_v4  ;;  %v18599_v4 = vld [vmem:[#allocation14 + $0x7fc] ss:$48 sps:$4 sm:$0xff]  }
0x13df   : > { %10820 = vmatpush1.bf16.msra.mxu0 %v18519_v47  ;;  %10864 = vmatprep.subr.bf16.mxu1 %v18530_v10  ;;  %v7522_v47 = vrot.slane %v7515_v51, %v22746_v30  ;;  %v7526_v10 = vrot.slane %v7515_v51, %v22749_v20  ;;  %v18647_v51 = vld [vmem:[#allocation14 + $0xafc] ss:$48 sps:$4 sm:$0xff]  }
0x13e0   : > { %10821 = vmatprep.subr.bf16.mxu0 %v18527_v5  ;;  %v18602_v5 = vld [vmem:[#allocation14 + $0x204] ss:$48 sps:$4 sm:$0xff]  }
0x13e2   : > { %10865 = vmatpush1.bf16.msra.mxu1 %v18528_v53  ;;  %v18600_v53 = vld [vmem:[#allocation14 + $0x200] ss:$48 sps:$4 sm:$0xff]  }
0x13e3   : > { %10822 = vmatpush1.bf16.msra.mxu0 %v18525_v11  ;;  %10866 = vmatprep.subr.bf16.mxu1 %v18536_v41  ;;  %v18597_v11 = vld [vmem:[#allocation14 + $0x7f8] ss:$48 sps:$4 sm:$0xff]   ;;  %v18605_v41 = vld [vmem:[#allocation14 + $0x85c] ss:$48 sps:$4 sm:$0xff]  }
0x13e4   : > { %10823 = vmatprep.subr.bf16.mxu0 %v18533_v17  ;;  %v10494_v17 = vadd.f32 %v22733_v59, %v7522_v47 }
0x13e6   : > { %10867 = vmatpush1.bf16.msra.mxu1 %v18534_v50  ;;  %v10496_v50 = vadd.f32 %v22735_v0, %v7526_v10 }
0x13e7   : > { %10824 = vmatpush1.bf16.msra.mxu0 %v18531_v37  ;;  %10868 = vmatprep.subr.bf16.mxu1 %v18542_v62  ;;  %v18608_v37 = vld [vmem:[#allocation14 + $0x264] ss:$48 sps:$4 sm:$0xff]   ;;  %v18603_v62 = vld [vmem:[#allocation14 + $0x858] ss:$48 sps:$4 sm:$0xff]  }
0x13e8   : > { %10825 = vmatprep.subr.bf16.mxu0 %v18539_v18 }
0x13ea   : > { %10869 = vmatpush1.bf16.msra.mxu1 %v18540_v56  ;;  %v10498_v56 = vadd.f32 %v22737_v16, %v7522_v47  ;;  %v18609_v16 = vld [vmem:[#allocation14 + $0x8b8] ss:$48 sps:$4 sm:$0xff]   ;;  %v18654_v47 = vld [vmem:[#allocation14 + $0x560] ss:$48 sps:$4 sm:$0xff]  }
0x13eb   : > { %10826 = vmatpush1.bf16.msra.mxu0 %v18537_v42  ;;  %10870 = vmatprep.subr.bf16.mxu1 %v18548_v26  ;;  %v18606_v42 = vld [vmem:[#allocation14 + $0x260] ss:$48 sps:$4 sm:$0xff]  }
0x13ec   : > { %10827 = vmatprep.subr.bf16.mxu0 %v18545_v24 }
0x13ee   : > { %10871 = vmatpush1.bf16.msra.mxu1 %v18546_v7 }
0x13ef   : > { %10828 = vmatpush1.bf16.msra.mxu0 %v18543_v57  ;;  %10872 = vmatprep.subr.bf16.mxu1 %v18554_v6  ;;  %v10500_v57 = vadd.f32 %v22739_v49, %v7526_v10  ;;  %v18617_v49 = vld [vmem:[#allocation14 + $0x91c] ss:$48 sps:$4 sm:$0xff]   ;;  %v18657_v10 = vld [vmem:[#allocation14 + $0xbb8] ss:$48 sps:$4 sm:$0xff]  }
0x13f0   : > { %10829 = vmatprep.subr.bf16.mxu0 %v18551_v32 }
0x13f2   : > { %10873 = vmatpush1.bf16.msra.mxu1 %v18552_v61  ;;  %v18614_v61 = vld [vmem:[#allocation14 + $0x2c4] ss:$48 sps:$4 sm:$0xff]  }
0x13f3   : > { %10830 = vmatpush1.bf16.msra.mxu0 %v18549_v60  ;;  %10874 = vmatprep.subr.bf16.mxu1 %v18560_v14  ;;  %v18611_v60 = vld [vmem:[#allocation14 + $0x8bc] ss:$48 sps:$4 sm:$0xff]  }
0x13f4   : > { %10831 = vmatprep.subr.bf16.mxu0 %v18557_v2 }
0x13f6   : > { %10875 = vmatpush1.bf16.msra.mxu1 %v18558_v52  ;;  %v18620_v52 = vld [vmem:[#allocation14 + $0x324] ss:$48 sps:$4 sm:$0xff]  }
0x13f7   : > { %10832 = vmatpush1.bf16.msra.mxu0 %v18555_v19  ;;  %10876 = vmatprep.subr.bf16.mxu1 %v18566_v39  ;;  %v18612_v19 = vld [vmem:[#allocation14 + $0x2c0] ss:$48 sps:$4 sm:$0xff]  }
0x13f8   : > { %10833 = vmatprep.subr.bf16.mxu0 %v18563_v48  ;;  %v18615_v48 = vld [vmem:[#allocation14 + $0x918] ss:$48 sps:$4 sm:$0xff]   ;;  %v18618_v39 = vld [vmem:[#allocation14 + $0x320] ss:$48 sps:$4 sm:$0xff]  }
0x13fa   : > { %10877 = vmatpush1.bf16.msra.mxu1 %v18564_v29  ;;  %v18626_v29 = vld [vmem:[#allocation14 + $0x384] ss:$48 sps:$4 sm:$0xff]  }
0x13fb   : > { %10834 = vmatpush1.bf16.msra.mxu0 %v18561_v23  ;;  %10889 = vmatprep.subr.bf16.mxu1 %v18569_v38  ;;  %v18623_v23 = vld [vmem:[#allocation14 + $0x97c] ss:$48 sps:$4 sm:$0xff]   ;;  %v18621_v38 = vld [vmem:[#allocation14 + $0x978] ss:$48 sps:$4 sm:$0xff]  }
0x13fc   : > { %10975 = vmatprep.subr.bf16.mxu0 %v18572_v28  ;;  %v18624_v28 = vld [vmem:[#allocation14 + $0x380] ss:$48 sps:$4 sm:$0xff]  }
0x13fd   : > { %10879 = vmatmul.mubr.bf16.vlgmr.msra.gmra.mrb[8].mxu1 %v22709_v8 }
0x13fe   : > { %10836 = vmatmul.mubr.bf16.vlgmr.msra.gmra.mrb[4].mxu0 %v22719_v25  ;;  %10890 = vmatpush1.bf16.msra.mxu1 %v18567_v44  ;;  %v18629_v44 = vld [vmem:[#allocation14 + $0x9dc] ss:$48 sps:$4 sm:$0xff]  }
0x13ff   : > { %10976 = vmatpush1.bf16.msra.mxu0 %v18570_v21  ;;  %10891 = vmatprep.subr.bf16.mxu1 %v18575_v55  ;;  %v18632_v21 = vld [vmem:[#allocation14 + $0x3e4] ss:$48 sps:$4 sm:$0xff]   ;;  %v18627_v55 = vld [vmem:[#allocation14 + $0x9d8] ss:$48 sps:$4 sm:$0xff]  }
0x1400   : > { %10977 = vmatprep.subr.bf16.mxu0 %v18578_v43  ;;  %10921 = vmatprep.mubr.bf16.mxu1 %v22705_v3  ;;  %v18630_v43 = vld [vmem:[#allocation14 + $0x3e0] ss:$48 sps:$4 sm:$0xff]  }
0x1401   : > { %11007 = vmatprep.mubr.bf16.mxu0 %v22703_v13 }
0x1402   : > { %10892 = vmatpush1.bf16.msra.mxu1 %v18573_v31  ;;  %v18635_v31 = vld [vmem:[#allocation14 + $0xa3c] ss:$48 sps:$4 sm:$0xff]  }
0x1403   : > { %10978 = vmatpush1.bf16.msra.mxu0 %v18576_v27  ;;  %10893 = vmatprep.subr.bf16.mxu1 %v18581_v40  ;;  %v18638_v27 = vld [vmem:[#allocation14 + $0x444] ss:$48 sps:$4 sm:$0xff]   ;;  %v18633_v40 = vld [vmem:[#allocation14 + $0xa38] ss:$48 sps:$4 sm:$0xff]  }
0x1404   : > { %10979 = vmatprep.subr.bf16.mxu0 %v18584_v45  ;;  %v18636_v45 = vld [vmem:[#allocation14 + $0x440] ss:$48 sps:$4 sm:$0xff]  }
0x1406   : > { %10894 = vmatpush1.bf16.msra.mxu1 %v18579_v46  ;;  %v18641_v46 = vld [vmem:[#allocation14 + $0xa9c] ss:$48 sps:$4 sm:$0xff]  }
0x1407   : > { %10980 = vmatpush1.bf16.msra.mxu0 %v18582_v58  ;;  %10895 = vmatprep.subr.bf16.mxu1 %v18587_v1  ;;  %v18644_v58 = vld [vmem:[#allocation14 + $0x4a4] ss:$48 sps:$4 sm:$0xff]   ;;  %v18639_v1 = vld [vmem:[#allocation14 + $0xa98] ss:$48 sps:$4 sm:$0xff]  }
0x1408   : > { %10981 = vmatprep.subr.bf16.mxu0 %v18590_v34  ;;  %v18642_v34 = vld [vmem:[#allocation14 + $0x4a0] ss:$48 sps:$4 sm:$0xff]  }
0x140a   : > { %10896 = vmatpush1.bf16.msra.mxu1 %v18585_v54  ;;  %v18650_v54 = vld [vmem:[#allocation14 + $0x504] ss:$48 sps:$4 sm:$0xff]  }
0x140b   : > { %10982 = vmatpush1.bf16.msra.mxu0 %v18588_v63  ;;  %10897 = vmatprep.subr.bf16.mxu1 %v18593_v22  ;;  %v18645_v63 = vld [vmem:[#allocation14 + $0xaf8] ss:$48 sps:$4 sm:$0xff]   ;;  %v18648_v22 = vld [vmem:[#allocation14 + $0x500] ss:$48 sps:$4 sm:$0xff]  }
0x140c   : > { %10983 = vmatprep.subr.bf16.mxu0 %v18596_v36  ;;  %v18653_v36 = vld [vmem:[#allocation14 + $0xb5c] ss:$48 sps:$4 sm:$0xff]  }
0x140e   : > { %10898 = vmatpush1.bf16.msra.mxu1 %v18591_v33  ;;  %v18656_v33 = vld [vmem:[#allocation14 + $0x564] ss:$48 sps:$4 sm:$0xff]  }
0x140f   : > { %10984 = vmatpush1.bf16.msra.mxu0 %v18594_v12  ;;  %10899 = vmatprep.subr.bf16.mxu1 %v18599_v4  ;;  %v18651_v12 = vld [vmem:[#allocation14 + $0xb58] ss:$48 sps:$4 sm:$0xff]   ;;  %v18659_v4 = vld [vmem:[#allocation14 + $0xbbc] ss:$48 sps:$4 sm:$0xff]  }
0x1410   : > { %10985 = vmatprep.subr.bf16.mxu0 %v18602_v5  ;;  %v18662_v5 = vld [vmem:[#allocation14 + $0x5c4] ss:$48 sps:$4 sm:$0xff]  }
0x1411   : > { %v10579_v18 = vpop.f32.mrb[0].mxu0 }
0x1412   : > { %v17180_v24 = vadd.f32 %v10579_v18, %v10494_v17  ;;  %v10581_v26 = vpop.f32.mrb[1].mxu0  ;;  %10900 = vmatpush1.bf16.msra.mxu1 %v18597_v11  ;;  %v18660_v11 = vld [vmem:[#allocation14 + $0x5c0] ss:$48 sps:$4 sm:$0xff]   ;;  %v18668_v17 = vld [vmem:[#allocation14 + $0x624] ss:$48 sps:$4 sm:$0xff]  }
0x1413   : > { %v17182_v7 = vadd.f32 %v10581_v26, %v10496_v50  ;;  %v10583_v32 = vpop.f32.mrb[2].mxu0  ;;  %10986 = vmatpush1.bf16.msra.mxu0 %v18600_v53  ;;  %10901 = vmatprep.subr.bf16.mxu1 %v18605_v41  ;;  %v18665_v53 = vld [vmem:[#allocation14 + $0xc1c] ss:$48 sps:$4 sm:$0xff]   ;;  %v18663_v41 = vld [vmem:[#allocation14 + $0xc18] ss:$48 sps:$4 sm:$0xff]  }
0x1414   : > { %v17184_v59 = vadd.f32 %v10583_v32, %v10498_v56  ;;  %v10585_v6 = vpop.f32.mrb[3].mxu0  ;;  %10987 = vmatprep.subr.bf16.mxu0 %v18608_v37  ;;  %v18666_v37 = vld [vmem:[#allocation14 + $0x620] ss:$48 sps:$4 sm:$0xff]   ;;  %v18671_v50 = vld [vmem:[#allocation14 + $0xc7c] ss:$48 sps:$4 sm:$0xff]  }
0x1415   : > { %v17186_v0 = vadd.f32 %v10585_v6, %v10500_v57  ;;  %v18674_v18 = vld [vmem:[#allocation14 + $0x684] ss:$48 sps:$4 sm:$0xff]   ;;  %v18677_v56 = vld [vmem:[#allocation14 + $0xcdc] ss:$48 sps:$4 sm:$0xff]   ;;  %v18675_v26 = vld [vmem:[#allocation14 + $0xcd8] ss:$48 sps:$4 sm:$0xff]  }
0x1416   : > { %v22757_v2 = vpack.c.bf16 %v17184_v59, %v17180_v24  ;;  %10902 = vmatpush1.bf16.msra.mxu1 %v18603_v62  ;;  %v18669_v62 = vld [vmem:[#allocation14 + $0xc78] ss:$48 sps:$4 sm:$0xff]   ;;  %v18680_v24 = vld [vmem:[#allocation14 + $0x6e4] ss:$48 sps:$4 sm:$0xff]   ;;  %v18678_v57 = vld [vmem:[#allocation14 + $0x6e0] ss:$48 sps:$4 sm:$0xff]  }
0x1417   : > { %v22759_v14 = vpack.c.bf16 %v17186_v0, %v17182_v7  ;;  %10988 = vmatpush1.bf16.msra.mxu0 %v18606_v42  ;;  %10903 = vmatprep.subr.bf16.mxu1 %v18611_v60  ;;  %v18672_v42 = vld [vmem:[#allocation14 + $0x680] ss:$48 sps:$4 sm:$0xff]   ;;  %v18683_v7 = vld [vmem:[#allocation14 + $0xd3c] ss:$48 sps:$4 sm:$0xff]   ;;  %v18686_v32 = vld [vmem:[#allocation14 + $0x744] ss:$48 sps:$4 sm:$0xff]  }
0x1418   : > { %10989 = vmatprep.subr.bf16.mxu0 %v18614_v61  ;;  %v18681_v59 = vld [vmem:[#allocation14 + $0xd38] ss:$48 sps:$4 sm:$0xff]   ;;  %v18684_v6 = vld [vmem:[#allocation14 + $0x740] ss:$48 sps:$4 sm:$0xff]   ;;  %v18689_v60 = vld [vmem:[#allocation14 + $0xd9c] ss:$48 sps:$4 sm:$0xff]  }
0x1419   : > { %v18692_v61 = vld [vmem:[#allocation14 + $0x7a4] ss:$48 sps:$4 sm:$0xff]   ;;  %v18687_v0 = vld [vmem:[#allocation14 + $0xd98] ss:$48 sps:$4 sm:$0xff]  }
0x141a   : > { %10904 = vmatpush1.bf16.msra.mxu1 %v18609_v16  ;;  %v18690_v16 = vld [vmem:[#allocation14 + $0x7a0] ss:$48 sps:$4 sm:$0xff]  }
0x141b   : > { %10990 = vmatpush1.bf16.msra.mxu0 %v18612_v19  ;;  %10905 = vmatprep.subr.bf16.mxu1 %v18617_v49  ;;  %v18695_v19 = vld [vmem:[#allocation14 + $0xdfc] ss:$48 sps:$4 sm:$0xff]   ;;  %v18698_v49 = vld [vmem:[#allocation14 + $0x804] ss:$48 sps:$4 sm:$0xff]  }
0x141c   : > { %10991 = vmatprep.subr.bf16.mxu0 %v18620_v52  ;;  %v18693_v52 = vld [vmem:[#allocation14 + $0xdf8] ss:$48 sps:$4 sm:$0xff]  }
0x141e   : > { %10906 = vmatpush1.bf16.msra.mxu1 %v18615_v48  ;;  %v18696_v48 = vld [vmem:[#allocation14 + $0x800] ss:$48 sps:$4 sm:$0xff]  }
0x141f   : > { %10992 = vmatpush1.bf16.msra.mxu0 %v18618_v39  ;;  %10907 = vmatprep.subr.bf16.mxu1 %v18623_v23  ;;  %v18701_v39 = vld [vmem:[#allocation14 + $0xe5c] ss:$48 sps:$4 sm:$0xff]   ;;  %v18704_v23 = vld [vmem:[#allocation14 + $0x864] ss:$48 sps:$4 sm:$0xff]  }
0x1420   : > { %10993 = vmatprep.subr.bf16.mxu0 %v18626_v29  ;;  %v18699_v29 = vld [vmem:[#allocation14 + $0xe58] ss:$48 sps:$4 sm:$0xff]  }
0x1422   : > { %10908 = vmatpush1.bf16.msra.mxu1 %v18621_v38  ;;  %v18702_v38 = vld [vmem:[#allocation14 + $0x860] ss:$48 sps:$4 sm:$0xff]  }
0x1423   : > { %10994 = vmatpush1.bf16.msra.mxu0 %v18624_v28  ;;  %10909 = vmatprep.subr.bf16.mxu1 %v18629_v44  ;;  %v18707_v28 = vld [vmem:[#allocation14 + $0xebc] ss:$48 sps:$4 sm:$0xff]   ;;  %v18710_v44 = vld [vmem:[#allocation14 + $0x8c4] ss:$48 sps:$4 sm:$0xff]  }
0x1424   : > { %10995 = vmatprep.subr.bf16.mxu0 %v18632_v21  ;;  %v18705_v21 = vld [vmem:[#allocation14 + $0xeb8] ss:$48 sps:$4 sm:$0xff]  }
0x1426   : > { %10910 = vmatpush1.bf16.msra.mxu1 %v18627_v55  ;;  %v18708_v55 = vld [vmem:[#allocation14 + $0x8c0] ss:$48 sps:$4 sm:$0xff]  }
0x1427   : > { %10996 = vmatpush1.bf16.msra.mxu0 %v18630_v43  ;;  %10911 = vmatprep.subr.bf16.mxu1 %v18635_v31  ;;  %v18713_v43 = vld [vmem:[#allocation14 + $0xf1c] ss:$48 sps:$4 sm:$0xff]   ;;  %v18716_v31 = vld [vmem:[#allocation14 + $0x924] ss:$48 sps:$4 sm:$0xff]  }
0x1428   : > { %10997 = vmatprep.subr.bf16.mxu0 %v18638_v27  ;;  %v18711_v27 = vld [vmem:[#allocation14 + $0xf18] ss:$48 sps:$4 sm:$0xff]  }
0x142a   : > { %10912 = vmatpush1.bf16.msra.mxu1 %v18633_v40  ;;  %v18714_v40 = vld [vmem:[#allocation14 + $0x920] ss:$48 sps:$4 sm:$0xff]  }
0x142b   : > { %10998 = vmatpush1.bf16.msra.mxu0 %v18636_v45  ;;  %10913 = vmatprep.subr.bf16.mxu1 %v18641_v46  ;;  %v18719_v45 = vld [vmem:[#allocation14 + $0xf7c] ss:$48 sps:$4 sm:$0xff]   ;;  %v18722_v46 = vld [vmem:[#allocation14 + $0x984] ss:$48 sps:$4 sm:$0xff]  }
0x142c   : > { %10999 = vmatprep.subr.bf16.mxu0 %v18644_v58  ;;  %v18717_v58 = vld [vmem:[#allocation14 + $0xf78] ss:$48 sps:$4 sm:$0xff]  }
0x142e   : > { %10914 = vmatpush1.bf16.msra.mxu1 %v18639_v1  ;;  %v18720_v1 = vld [vmem:[#allocation14 + $0x980] ss:$48 sps:$4 sm:$0xff]  }
0x142f   : > { %11000 = vmatpush1.bf16.msra.mxu0 %v18642_v34  ;;  %10915 = vmatprep.subr.bf16.mxu1 %v18647_v51  ;;  %v18725_v34 = vld [vmem:[#allocation14 + $0xfdc] ss:$48 sps:$4 sm:$0xff]   ;;  %v18728_v51 = vld [vmem:[#allocation14 + $0x9e4] ss:$48 sps:$4 sm:$0xff]  }
0x1430   : > { %11001 = vmatprep.subr.bf16.mxu0 %v18650_v54  ;;  %v18723_v54 = vld [vmem:[#allocation14 + $0xfd8] ss:$48 sps:$4 sm:$0xff]  }
0x1432   : > { %10916 = vmatpush1.bf16.msra.mxu1 %v18645_v63  ;;  %v18726_v63 = vld [vmem:[#allocation14 + $0x9e0] ss:$48 sps:$4 sm:$0xff]  }
0x1433   : > { %11002 = vmatpush1.bf16.msra.mxu0 %v18648_v22  ;;  %10917 = vmatprep.subr.bf16.mxu1 %v18653_v36  ;;  %v18731_v22 = vld [vmem:[#allocation14 + $0x103c] ss:$48 sps:$4 sm:$0xff]   ;;  %v18734_v36 = vld [vmem:[#allocation14 + $0xa44] ss:$48 sps:$4 sm:$0xff]  }
0x1434   : > { %11003 = vmatprep.subr.bf16.mxu0 %v18656_v33  ;;  %v18729_v33 = vld [vmem:[#allocation14 + $0x1038] ss:$48 sps:$4 sm:$0xff]  }
0x1436   : > { %10918 = vmatpush1.bf16.msra.mxu1 %v18651_v12  ;;  %v18732_v12 = vld [vmem:[#allocation14 + $0xa40] ss:$48 sps:$4 sm:$0xff]  }
0x1437   : > { %11004 = vmatpush1.bf16.msra.mxu0 %v18654_v47  ;;  %10919 = vmatprep.subr.bf16.mxu1 %v18659_v4  ;;  %v18737_v47 = vld [vmem:[#allocation14 + $0x109c] ss:$48 sps:$4 sm:$0xff]   ;;  %v18740_v4 = vld [vmem:[#allocation14 + $0xaa4] ss:$48 sps:$4 sm:$0xff]  }
0x1438   : > { %11005 = vmatprep.subr.bf16.mxu0 %v18662_v5  ;;  %v18735_v5 = vld [vmem:[#allocation14 + $0x1098] ss:$48 sps:$4 sm:$0xff]  }
0x143a   : > { %10920 = vmatpush1.bf16.msra.mxu1 %v18657_v10  ;;  %v18738_v10 = vld [vmem:[#allocation14 + $0xaa0] ss:$48 sps:$4 sm:$0xff]  }
0x143b   : > { %11006 = vmatpush1.bf16.msra.mxu0 %v18660_v11  ;;  %10932 = vmatprep.subr.bf16.mxu1 %v18665_v53  ;;  %v18743_v11 = vld [vmem:[#allocation14 + $0x10fc] ss:$48 sps:$4 sm:$0xff]   ;;  %v18746_v53 = vld [vmem:[#allocation14 + $0xb04] ss:$48 sps:$4 sm:$0xff]  }
0x143c   : > { %11018 = vmatprep.subr.bf16.mxu0 %v18668_v17  ;;  %v18741_v17 = vld [vmem:[#allocation14 + $0x10f8] ss:$48 sps:$4 sm:$0xff]  }
0x143d   : > { %10922 = vmatmul.mubr.bf16.vlgmr.msra.gmra.mrb[8].mxu1 %v22711_v9 }
0x143e   : > { %11008 = vmatmul.mubr.bf16.vlgmr.msra.gmra.mrb[8].mxu0 %v22709_v8  ;;  %10933 = vmatpush1.bf16.msra.mxu1 %v18663_v41  ;;  %v18744_v41 = vld [vmem:[#allocation14 + $0xb00] ss:$48 sps:$4 sm:$0xff]  }
0x143f   : > { %11019 = vmatpush1.bf16.msra.mxu0 %v18666_v37  ;;  %10934 = vmatprep.subr.bf16.mxu1 %v18671_v50  ;;  %v18749_v37 = vld [vmem:[#allocation14 + $0x115c] ss:$48 sps:$4 sm:$0xff]   ;;  %v18752_v50 = vld [vmem:[#allocation14 + $0xb64] ss:$48 sps:$4 sm:$0xff]  }
0x1440   : > { %11020 = vmatprep.subr.bf16.mxu0 %v18674_v18  ;;  %10964 = vmatprep.mubr.bf16.mxu1 %v22716_v15  ;;  %v18747_v18 = vld [vmem:[#allocation14 + $0x1158] ss:$48 sps:$4 sm:$0xff]  }
0x1441   : > { %11050 = vmatprep.mubr.bf16.mxu0 %v22705_v3 }
0x1442   : > { %10935 = vmatpush1.bf16.msra.mxu1 %v18669_v62  ;;  %v18750_v62 = vld [vmem:[#allocation14 + $0xb60] ss:$48 sps:$4 sm:$0xff]  }
0x1443   : > { %11021 = vmatpush1.bf16.msra.mxu0 %v18672_v42  ;;  %10936 = vmatprep.subr.bf16.mxu1 %v18677_v56  ;;  %v18755_v42 = vld [vmem:[#allocation14 + $0x11bc] ss:$48 sps:$4 sm:$0xff]   ;;  %v18758_v56 = vld [vmem:[#allocation14 + $0xbc4] ss:$48 sps:$4 sm:$0xff]  }
0x1444   : > { %11022 = vmatprep.subr.bf16.mxu0 %v18680_v24  ;;  %v18753_v24 = vld [vmem:[#allocation14 + $0x11b8] ss:$48 sps:$4 sm:$0xff]  }
0x1446   : > { %10937 = vmatpush1.bf16.msra.mxu1 %v18675_v26  ;;  %v18756_v26 = vld [vmem:[#allocation14 + $0xbc0] ss:$48 sps:$4 sm:$0xff]  }
0x1447   : > { %11023 = vmatpush1.bf16.msra.mxu0 %v18678_v57  ;;  %10938 = vmatprep.subr.bf16.mxu1 %v18683_v7  ;;  %v18761_v57 = vld [vmem:[#allocation14 + $0xc24] ss:$48 sps:$4 sm:$0xff]   ;;  %v18764_v7 = vld [vmem:[#allocation14 + $0x2c] ss:$48 sps:$4 sm:$0xff]  }
0x1448   : > { %11024 = vmatprep.subr.bf16.mxu0 %v18686_v32  ;;  %v18759_v32 = vld [vmem:[#allocation14 + $0xc20] ss:$48 sps:$4 sm:$0xff]  }
0x144a   : > { %10939 = vmatpush1.bf16.msra.mxu1 %v18681_v59  ;;  %v18762_v59 = vld [vmem:[#allocation14 + $0x28] ss:$48 sps:$4 sm:$0xff]  }
0x144b   : > { %11025 = vmatpush1.bf16.msra.mxu0 %v18684_v6  ;;  %10940 = vmatprep.subr.bf16.mxu1 %v18689_v60  ;;  %v18767_v6 = vld [vmem:[#allocation14 + $0xc84] ss:$48 sps:$4 sm:$0xff]   ;;  %v18770_v60 = vld [vmem:[#allocation14 + $0x8c] ss:$48 sps:$4 sm:$0xff]  }
0x144c   : > { %11026 = vmatprep.subr.bf16.mxu0 %v18692_v61  ;;  %v18765_v61 = vld [vmem:[#allocation14 + $0xc80] ss:$48 sps:$4 sm:$0xff]  }
0x144e   : > { %10941 = vmatpush1.bf16.msra.mxu1 %v18687_v0  ;;  %v18768_v0 = vld [vmem:[#allocation14 + $0x88] ss:$48 sps:$4 sm:$0xff]  }
0x144f   : > { %11027 = vmatpush1.bf16.msra.mxu0 %v18690_v16  ;;  %10942 = vmatprep.subr.bf16.mxu1 %v18695_v19  ;;  %v18773_v16 = vld [vmem:[#allocation14 + $0xce4] ss:$48 sps:$4 sm:$0xff]   ;;  %v18776_v19 = vld [vmem:[#allocation14 + $0xec] ss:$48 sps:$4 sm:$0xff]  }
0x1450   : > { %11028 = vmatprep.subr.bf16.mxu0 %v18698_v49  ;;  %v18771_v49 = vld [vmem:[#allocation14 + $0xce0] ss:$48 sps:$4 sm:$0xff]  }
0x1452   : > { %10943 = vmatpush1.bf16.msra.mxu1 %v18693_v52  ;;  %v18774_v52 = vld [vmem:[#allocation14 + $0xe8] ss:$48 sps:$4 sm:$0xff]  }
0x1453   : > { %11029 = vmatpush1.bf16.msra.mxu0 %v18696_v48  ;;  %10944 = vmatprep.subr.bf16.mxu1 %v18701_v39  ;;  %v18779_v48 = vld [vmem:[#allocation14 + $0xd44] ss:$48 sps:$4 sm:$0xff]   ;;  %v18782_v39 = vld [vmem:[#allocation14 + $0x14c] ss:$48 sps:$4 sm:$0xff]  }
0x1454   : > { %11030 = vmatprep.subr.bf16.mxu0 %v18704_v23  ;;  %v18777_v23 = vld [vmem:[#allocation14 + $0xd40] ss:$48 sps:$4 sm:$0xff]  }
0x1456   : > { %10945 = vmatpush1.bf16.msra.mxu1 %v18699_v29  ;;  %v18780_v29 = vld [vmem:[#allocation14 + $0x148] ss:$48 sps:$4 sm:$0xff]  }
0x1457   : > { %11031 = vmatpush1.bf16.msra.mxu0 %v18702_v38  ;;  %10946 = vmatprep.subr.bf16.mxu1 %v18707_v28  ;;  %v18785_v38 = vld [vmem:[#allocation14 + $0xda4] ss:$48 sps:$4 sm:$0xff]   ;;  %v18788_v28 = vld [vmem:[#allocation14 + $0x1ac] ss:$48 sps:$4 sm:$0xff]  }
0x1458   : > { %11032 = vmatprep.subr.bf16.mxu0 %v18710_v44  ;;  %v18783_v44 = vld [vmem:[#allocation14 + $0xda0] ss:$48 sps:$4 sm:$0xff]  }
0x145a   : > { %10947 = vmatpush1.bf16.msra.mxu1 %v18705_v21  ;;  %v22770_v21 = vsub.s32 2, %v23287_v35 }
0x145b   : > { %11033 = vmatpush1.bf16.msra.mxu0 %v18708_v55  ;;  %10948 = vmatprep.subr.bf16.mxu1 %v18713_v43  ;;  %v18791_v55 = vld [vmem:[#allocation14 + $0xe04] ss:$48 sps:$4 sm:$0xff]   ;;  %v18794_v43 = vld [vmem:[#allocation14 + $0x20c] ss:$48 sps:$4 sm:$0xff]  }
0x145c   : > { %11034 = vmatprep.subr.bf16.mxu0 %v18716_v31  ;;  %v7533_v31 = vsub.s32 3, %v23287_v35 }
0x145e   : > { %10949 = vmatpush1.bf16.msra.mxu1 %v18711_v27  ;;  %v18789_v27 = vld [vmem:[#allocation14 + $0xe00] ss:$48 sps:$4 sm:$0xff]  }
0x145f   : > { %11035 = vmatpush1.bf16.msra.mxu0 %v18714_v40  ;;  %10950 = vmatprep.subr.bf16.mxu1 %v18719_v45  ;;  %v18792_v40 = vld [vmem:[#allocation14 + $0x208] ss:$48 sps:$4 sm:$0xff]   ;;  %v22773_v45 = vld [vmem:[#allocation15] sm:$0xff] }
0x1460   : > { %11036 = vmatprep.subr.bf16.mxu0 %v18722_v46  ;;  %v7530_v46 = vrot.slane %v22773_v45, %v22770_v21 }
0x1462   : > { %10951 = vmatpush1.bf16.msra.mxu1 %v18717_v58  ;;  %v18797_v58 = vld [vmem:[#allocation14 + $0xe64] ss:$48 sps:$4 sm:$0xff]  }
0x1463   : > { %11037 = vmatpush1.bf16.msra.mxu0 %v18720_v1  ;;  %10952 = vmatprep.subr.bf16.mxu1 %v18725_v34  ;;  %v18800_v1 = vld [vmem:[#allocation14 + $0x26c] ss:$48 sps:$4 sm:$0xff]  }
0x1464   : > { %11038 = vmatprep.subr.bf16.mxu0 %v18728_v51  ;;  %v7534_v51 = vrot.slane %v22773_v45, %v7533_v31 }
0x1466   : > { %10953 = vmatpush1.bf16.msra.mxu1 %v18723_v54 }
0x1467   : > { %11039 = vmatpush1.bf16.msra.mxu0 %v18726_v63  ;;  %10954 = vmatprep.subr.bf16.mxu1 %v18731_v22  ;;  %v18795_v22 = vld [vmem:[#allocation14 + $0xe60] ss:$48 sps:$4 sm:$0xff]  }
0x1468   : > { %11040 = vmatprep.subr.bf16.mxu0 %v18734_v36  ;;  %v18798_v36 = vld [vmem:[#allocation14 + $0x268] ss:$48 sps:$4 sm:$0xff]  }
0x146a   : > { %10955 = vmatpush1.bf16.msra.mxu1 %v18729_v33 }
0x146b   : > { %11041 = vmatpush1.bf16.msra.mxu0 %v18732_v12  ;;  %10956 = vmatprep.subr.bf16.mxu1 %v18737_v47 }
0x146c   : > { %11042 = vmatprep.subr.bf16.mxu0 %v18740_v4  ;;  %v18803_v4 = vld [vmem:[#allocation14 + $0xec4] ss:$48 sps:$4 sm:$0xff]  }
0x146e   : > { %10957 = vmatpush1.bf16.msra.mxu1 %v18735_v5  ;;  %v18806_v5 = vld [vmem:[#allocation14 + $0x2cc] ss:$48 sps:$4 sm:$0xff]  }
0x146f   : > { %11043 = vmatpush1.bf16.msra.mxu0 %v18738_v10  ;;  %10958 = vmatprep.subr.bf16.mxu1 %v18743_v11 }
0x1470   : > { %11044 = vmatprep.subr.bf16.mxu0 %v18746_v53 }
0x1472   : > { %10959 = vmatpush1.bf16.msra.mxu1 %v18741_v17 }
0x1473   : > { %11045 = vmatpush1.bf16.msra.mxu0 %v18744_v41  ;;  %10960 = vmatprep.subr.bf16.mxu1 %v18749_v37  ;;  %v18801_v41 = vld [vmem:[#allocation14 + $0xec0] ss:$48 sps:$4 sm:$0xff]   ;;  %v18804_v37 = vld [vmem:[#allocation14 + $0x2c8] ss:$48 sps:$4 sm:$0xff]  }
0x1474   : > { %11046 = vmatprep.subr.bf16.mxu0 %v18752_v50  ;;  %v18809_v50 = vld [vmem:[#allocation14 + $0xf24] ss:$48 sps:$4 sm:$0xff]  }
0x1476   : > { %10961 = vmatpush1.bf16.msra.mxu1 %v18747_v18  ;;  %v18812_v18 = vld [vmem:[#allocation14 + $0x32c] ss:$48 sps:$4 sm:$0xff]  }
0x1477   : > { %11047 = vmatpush1.bf16.msra.mxu0 %v18750_v62  ;;  %10962 = vmatprep.subr.bf16.mxu1 %v18755_v42  ;;  %v18807_v62 = vld [vmem:[#allocation14 + $0xf20] ss:$48 sps:$4 sm:$0xff]   ;;  %v18810_v42 = vld [vmem:[#allocation14 + $0x328] ss:$48 sps:$4 sm:$0xff]  }
0x1478   : > { %11048 = vmatprep.subr.bf16.mxu0 %v18758_v56  ;;  %v18815_v56 = vld [vmem:[#allocation14 + $0xf84] ss:$48 sps:$4 sm:$0xff]  }
0x147a   : > { %10963 = vmatpush1.bf16.msra.mxu1 %v18753_v24  ;;  %v18818_v24 = vld [vmem:[#allocation14 + $0x38c] ss:$48 sps:$4 sm:$0xff]  }
0x147b   : > { %11049 = vmatpush1.bf16.msra.mxu0 %v18756_v26  ;;  %11104 = vmatprep.subr.bf16.mxu1 %v18764_v7  ;;  %v18813_v26 = vld [vmem:[#allocation14 + $0xf80] ss:$48 sps:$4 sm:$0xff]   ;;  %v18821_v7 = vld [vmem:[#allocation14 + $0xfe4] ss:$48 sps:$4 sm:$0xff]  }
0x147c   : > { %11061 = vmatprep.subr.bf16.mxu0 %v18761_v57  ;;  %v18816_v57 = vld [vmem:[#allocation14 + $0x388] ss:$48 sps:$4 sm:$0xff]  }
0x147d   : > { %10965 = vmatmul.mubr.bf16.vlgmr.msra.gmra.mrb[8].mxu1 %v22719_v25 }
0x147e   : > { %11051 = vmatmul.mubr.bf16.vlgmr.msra.gmra.mrb[8].mxu0 %v22711_v9  ;;  %11105 = vmatpush1.bf16.msra.mxu1 %v18762_v59  ;;  %v18819_v59 = vld [vmem:[#allocation14 + $0xfe0] ss:$48 sps:$4 sm:$0xff]  }
0x147f   : > { %11062 = vmatpush1.bf16.msra.mxu0 %v18759_v32  ;;  %11106 = vmatprep.subr.bf16.mxu1 %v18770_v60  ;;  %v18824_v32 = vld [vmem:[#allocation14 + $0x3ec] ss:$48 sps:$4 sm:$0xff]   ;;  %v18827_v60 = vld [vmem:[#allocation14 + $0x1044] ss:$48 sps:$4 sm:$0xff]  }
0x1480   : > { %11063 = vmatprep.subr.bf16.mxu0 %v18767_v6  ;;  %11093 = vmatprep.mubr.bf16.mxu0 %v22716_v15  ;;  %v18822_v6 = vld [vmem:[#allocation14 + $0x3e8] ss:$48 sps:$4 sm:$0xff]  }
0x1481   : > { %11136 = vmatprep.mubr.bf16.mxu1 %v22703_v13  ;;  %v18786_v13 = vld [vmem:[#allocation14 + $0x1a8] ss:$48 sps:$4 sm:$0xff]  }
0x1482   : > { %11107 = vmatpush1.bf16.msra.mxu1 %v18768_v0  ;;  %v18825_v0 = vld [vmem:[#allocation14 + $0x1040] ss:$48 sps:$4 sm:$0xff]  }
0x1483   : > { %11064 = vmatpush1.bf16.msra.mxu0 %v18765_v61  ;;  %11108 = vmatprep.subr.bf16.mxu1 %v18776_v19  ;;  %v18830_v61 = vld [vmem:[#allocation14 + $0x44c] ss:$48 sps:$4 sm:$0xff]   ;;  %v18833_v19 = vld [vmem:[#allocation14 + $0x10a4] ss:$48 sps:$4 sm:$0xff]  }
0x1484   : > { %11065 = vmatprep.subr.bf16.mxu0 %v18773_v16  ;;  %v18828_v16 = vld [vmem:[#allocation14 + $0x448] ss:$48 sps:$4 sm:$0xff]  }
0x1486   : > { %11109 = vmatpush1.bf16.msra.mxu1 %v18774_v52  ;;  %v18831_v52 = vld [vmem:[#allocation14 + $0x10a0] ss:$48 sps:$4 sm:$0xff]  }
0x1487   : > { %11066 = vmatpush1.bf16.msra.mxu0 %v18771_v49  ;;  %11110 = vmatprep.subr.bf16.mxu1 %v18782_v39  ;;  %v18836_v49 = vld [vmem:[#allocation14 + $0x4ac] ss:$48 sps:$4 sm:$0xff]   ;;  %v18839_v39 = vld [vmem:[#allocation14 + $0x1104] ss:$48 sps:$4 sm:$0xff]  }
0x1488   : > { %11067 = vmatprep.subr.bf16.mxu0 %v18779_v48  ;;  %v18834_v48 = vld [vmem:[#allocation14 + $0x4a8] ss:$48 sps:$4 sm:$0xff]  }
0x148a   : > { %11111 = vmatpush1.bf16.msra.mxu1 %v18780_v29  ;;  %v18837_v29 = vld [vmem:[#allocation14 + $0x1100] ss:$48 sps:$4 sm:$0xff]  }
0x148b   : > { %11068 = vmatpush1.bf16.msra.mxu0 %v18777_v23  ;;  %11112 = vmatprep.subr.bf16.mxu1 %v18788_v28  ;;  %v18842_v23 = vld [vmem:[#allocation14 + $0x50c] ss:$48 sps:$4 sm:$0xff]   ;;  %v18845_v28 = vld [vmem:[#allocation14 + $0x1164] ss:$48 sps:$4 sm:$0xff]  }
0x148c   : > { %11069 = vmatprep.subr.bf16.mxu0 %v18785_v38  ;;  %v18840_v38 = vld [vmem:[#allocation14 + $0x508] ss:$48 sps:$4 sm:$0xff]  }
0x148e   : > { %11113 = vmatpush1.bf16.msra.mxu1 %v18786_v13  ;;  %v18843_v13 = vld [vmem:[#allocation14 + $0x1160] ss:$48 sps:$4 sm:$0xff]  }
0x148f   : > { %11070 = vmatpush1.bf16.msra.mxu0 %v18783_v44  ;;  %11114 = vmatprep.subr.bf16.mxu1 %v18794_v43  ;;  %v18848_v44 = vld [vmem:[#allocation14 + $0x56c] ss:$48 sps:$4 sm:$0xff]   ;;  %v18851_v43 = vld [vmem:[#allocation14 + $0x11c4] ss:$48 sps:$4 sm:$0xff]  }
0x1490   : > { %11071 = vmatprep.subr.bf16.mxu0 %v18791_v55  ;;  %v10708_v34 = vpop.f32.mrb[4].mxu1  ;;  %v18846_v55 = vld [vmem:[#allocation14 + $0x568] ss:$48 sps:$4 sm:$0xff]  }
0x1491   : > { %v10710_v54 = vpop.f32.mrb[5].mxu1  ;;  %v17187_v33 = vadd.f32 %v10708_v34, %v7530_v46  ;;  %v18855_v34 = vld [vmem:[#allocation14 + $0x628] ss:$48 sps:$4 sm:$0xff]  }
0x1492   : > { %v10712_v63 = vpop.f32.mrb[6].mxu1  ;;  %11115 = vmatpush1.bf16.msra.mxu1 %v18792_v40  ;;  %v17188_v10 = vadd.f32 %v10710_v54, %v7534_v51  ;;  %v18849_v40 = vld [vmem:[#allocation14 + $0x11c0] ss:$48 sps:$4 sm:$0xff]   ;;  %v18863_v54 = vld [vmem:[#allocation14 + $0x68c] ss:$48 sps:$4 sm:$0xff]  }
0x1493   : > { %11072 = vmatpush1.bf16.msra.mxu0 %v18789_v27  ;;  %v17189_v12 = vadd.f32 %v10712_v63, %v7530_v46  ;;  %v10714_v47 = vpop.f32.mrb[7].mxu1  ;;  %11116 = vmatprep.subr.bf16.mxu1 %v18800_v1  ;;  %v18854_v27 = vld [vmem:[#allocation14 + $0x5cc] ss:$48 sps:$4 sm:$0xff]   ;;  %v18852_v46 = vld [vmem:[#allocation14 + $0x5c8] ss:$48 sps:$4 sm:$0xff]  }
0x1494   : > { %11073 = vmatprep.subr.bf16.mxu0 %v18797_v58  ;;  %v17190_v11 = vadd.f32 %v10714_v47, %v7534_v51  ;;  %v18857_v58 = vld [vmem:[#allocation14 + $0x62c] ss:$48 sps:$4 sm:$0xff]   ;;  %v18866_v63 = vld [vmem:[#allocation17 + $0x1c] ss:$12 sps:$4 sm:$0xff]  }
0x1495   : > { %v22780_v53 = vpack.c.bf16 %v17189_v12, %v17187_v33  ;;  %v18860_v1 = vld [vmem:[#allocation17 + $0x4] ss:$12 sps:$4 sm:$0xff]   ;;  %v18858_v51 = vld [vmem:[#allocation17] ss:$12 sps:$4 sm:$0xff]  }
0x1496   : > { %v22782_v17 = vpack.c.bf16 %v17190_v11, %v17188_v10  ;;  %11117 = vmatpush1.bf16.msra.mxu1 %v18798_v36  ;;  %v18864_v36 = vld [vmem:[#allocation17 + $0x18] ss:$12 sps:$4 sm:$0xff]   ;;  %v18869_v33 = vld [vmem:[#allocation14 + $0x6ec] ss:$48 sps:$4 sm:$0xff]   ;;  %v18867_v47 = vld [vmem:[#allocation14 + $0x6e8] ss:$48 sps:$4 sm:$0xff]  }
0x1497   : > { %11074 = vmatpush1.bf16.msra.mxu0 %v18795_v22  ;;  %11118 = vmatprep.subr.bf16.mxu1 %v18806_v5  ;;  %v18861_v22 = vld [vmem:[#allocation14 + $0x688] ss:$48 sps:$4 sm:$0xff]   ;;  %v18872_v12 = vld [vmem:[#allocation17 + $0x34] ss:$12 sps:$4 sm:$0xff]  }
0x1498   : > { %11075 = vmatprep.subr.bf16.mxu0 %v18803_v4  ;;  %v18870_v4 = vld [vmem:[#allocation17 + $0x30] ss:$12 sps:$4 sm:$0xff]   ;;  %v18876_v11 = vld [vmem:[#allocation17 + $0x48] ss:$12 sps:$4 sm:$0xff]  }
0x1499   : > { %v18875_v5 = vld [vmem:[#allocation14 + $0x74c] ss:$48 sps:$4 sm:$0xff]   ;;  %v18873_v10 = vld [vmem:[#allocation14 + $0x748] ss:$48 sps:$4 sm:$0xff]  }
0x149a   : > { %11119 = vmatpush1.bf16.msra.mxu1 %v18804_v37  ;;  %v18884_v37 = vld [vmem:[#allocation17 + $0x64] ss:$12 sps:$4 sm:$0xff]  }
0x149b   : > { %11076 = vmatpush1.bf16.msra.mxu0 %v18801_v41  ;;  %11120 = vmatprep.subr.bf16.mxu1 %v18812_v18  ;;  %v18881_v41 = vld [vmem:[#allocation14 + $0x7ac] ss:$48 sps:$4 sm:$0xff]  }
0x149c   : > { %11077 = vmatprep.subr.bf16.mxu0 %v18809_v50  ;;  %v18879_v50 = vld [vmem:[#allocation14 + $0x7a8] ss:$48 sps:$4 sm:$0xff]  }
0x149d   : > { %v18882_v18 = vld [vmem:[#allocation17 + $0x60] ss:$12 sps:$4 sm:$0xff]  }
0x149e   : > { %11121 = vmatpush1.bf16.msra.mxu1 %v18810_v42  ;;  %v18890_v42 = vld [vmem:[#allocation17 + $0x7c] ss:$12 sps:$4 sm:$0xff]  }
0x149f   : > { %11078 = vmatpush1.bf16.msra.mxu0 %v18807_v62  ;;  %11122 = vmatprep.subr.bf16.mxu1 %v18818_v24  ;;  %v18887_v62 = vld [vmem:[#allocation14 + $0x80c] ss:$48 sps:$4 sm:$0xff]   ;;  %v18885_v24 = vld [vmem:[#allocation14 + $0x808] ss:$48 sps:$4 sm:$0xff]  }
0x14a0   : > { %11079 = vmatprep.subr.bf16.mxu0 %v18815_v56  ;;  %v7541_v56 = vsub.s32 5, %v23287_v35 }
0x14a2   : > { %11123 = vmatpush1.bf16.msra.mxu1 %v18816_v57  ;;  %v18893_v57 = vld [vmem:[#allocation14 + $0x86c] ss:$48 sps:$4 sm:$0xff]  }
0x14a3   : > { %11080 = vmatpush1.bf16.msra.mxu0 %v18813_v26  ;;  %11124 = vmatprep.subr.bf16.mxu1 %v18824_v32  ;;  %v18888_v26 = vld [vmem:[#allocation17 + $0x78] ss:$12 sps:$4 sm:$0xff]  }
0x14a4   : > { %11081 = vmatprep.subr.bf16.mxu0 %v18821_v7  ;;  %v18896_v7 = vld [vmem:[#allocation17 + $0x94] ss:$12 sps:$4 sm:$0xff]  }
0x14a6   : > { %11125 = vmatpush1.bf16.msra.mxu1 %v18822_v6  ;;  %v7542_v6 = vrot.slane %v22773_v45, %v7541_v56  ;;  %v18950_v56 = vld [vmem:[#allocation17 + $0x16c] ss:$12 sps:$4 sm:$0xff]  }
0x14a7   : > { %11082 = vmatpush1.bf16.msra.mxu0 %v18819_v59  ;;  %11126 = vmatprep.subr.bf16.mxu1 %v18830_v61  ;;  %v18894_v61 = vld [vmem:[#allocation17 + $0x90] ss:$12 sps:$4 sm:$0xff]  }
0x14a8   : > { %11083 = vmatprep.subr.bf16.mxu0 %v18827_v60  ;;  %v18891_v60 = vld [vmem:[#allocation14 + $0x868] ss:$48 sps:$4 sm:$0xff]  }
0x14aa   : > { %11127 = vmatpush1.bf16.msra.mxu1 %v18828_v16  ;;  %v18899_v16 = vld [vmem:[#allocation14 + $0x8cc] ss:$48 sps:$4 sm:$0xff]  }
0x14ab   : > { %11084 = vmatpush1.bf16.msra.mxu0 %v18825_v0  ;;  %11128 = vmatprep.subr.bf16.mxu1 %v18836_v49 }
0x14ac   : > { %11085 = vmatprep.subr.bf16.mxu0 %v18833_v19  ;;  %v18902_v19 = vld [vmem:[#allocation17 + $0xac] ss:$12 sps:$4 sm:$0xff]  }
0x14ae   : > { %11129 = vmatpush1.bf16.msra.mxu1 %v18834_v48 }
0x14af   : > { %11086 = vmatpush1.bf16.msra.mxu0 %v18831_v52  ;;  %11130 = vmatprep.subr.bf16.mxu1 %v18842_v23 }
0x14b0   : > { %11087 = vmatprep.subr.bf16.mxu0 %v18839_v39 }
0x14b2   : > { %11131 = vmatpush1.bf16.msra.mxu1 %v18840_v38 }
0x14b3   : > { %11088 = vmatpush1.bf16.msra.mxu0 %v18837_v29  ;;  %11132 = vmatprep.subr.bf16.mxu1 %v18848_v44  ;;  %v18900_v44 = vld [vmem:[#allocation17 + $0xa8] ss:$12 sps:$4 sm:$0xff]  }
0x14b4   : > { %11089 = vmatprep.subr.bf16.mxu0 %v18845_v28  ;;  %v18897_v28 = vld [vmem:[#allocation14 + $0x8c8] ss:$48 sps:$4 sm:$0xff]  }
0x14b6   : > { %11133 = vmatpush1.bf16.msra.mxu1 %v18846_v55  ;;  %v18908_v55 = vld [vmem:[#allocation17 + $0xc4] ss:$12 sps:$4 sm:$0xff]  }
0x14b7   : > { %11090 = vmatpush1.bf16.msra.mxu0 %v18843_v13  ;;  %11134 = vmatprep.subr.bf16.mxu1 %v18854_v27  ;;  %v18905_v13 = vld [vmem:[#allocation14 + $0x92c] ss:$48 sps:$4 sm:$0xff]  }
0x14b8   : > { %11091 = vmatprep.subr.bf16.mxu0 %v18851_v43  ;;  %v18903_v43 = vld [vmem:[#allocation14 + $0x928] ss:$48 sps:$4 sm:$0xff]  }
0x14b9   : > { %v18906_v27 = vld [vmem:[#allocation17 + $0xc0] ss:$12 sps:$4 sm:$0xff]  }
0x14ba   : > { %11135 = vmatpush1.bf16.msra.mxu1 %v18852_v46  ;;  %v18914_v46 = vld [vmem:[#allocation17 + $0xdc] ss:$12 sps:$4 sm:$0xff]  }
0x14bb   : > { %11092 = vmatpush1.bf16.msra.mxu0 %v18849_v40  ;;  %11147 = vmatprep.subr.bf16.mxu1 %v18857_v58  ;;  %v18911_v40 = vld [vmem:[#allocation14 + $0x98c] ss:$48 sps:$4 sm:$0xff]   ;;  %v18909_v58 = vld [vmem:[#allocation14 + $0x988] ss:$48 sps:$4 sm:$0xff]  }
0x14bc   : > { %13182 = vmatprep.subr.bf16.mxu0 %v18860_v1  ;;  %v18912_v1 = vld [vmem:[#allocation17 + $0xd8] ss:$12 sps:$4 sm:$0xff]  }
0x14bd   : > { %11137 = vmatmul.mubr.bf16.vlgmr.msra.gmra.mrb[12].mxu1 %v22709_v8  ;;  %v18878_v8 = vld [vmem:[#allocation17 + $0x4c] ss:$12 sps:$4 sm:$0xff]  }
0x14be   : > { %11094 = vmatmul.mubr.bf16.vlgmr.msra.gmra.mrb[8].mxu0 %v22719_v25  ;;  %11148 = vmatpush1.bf16.msra.mxu1 %v18855_v34  ;;  %v18917_v34 = vld [vmem:[#allocation14 + $0x9ec] ss:$48 sps:$4 sm:$0xff]  }
0x14bf   : > { %13183 = vmatpush1.bf16.msra.mxu0 %v18858_v51  ;;  %13214 = vmatprep.mubr.bf16.mxu0 %v22759_v14  ;;  %v18920_v51 = vld [vmem:[#allocation17 + $0xf4] ss:$12 sps:$4 sm:$0xff]  }
0x14c0   : > { %11149 = vmatprep.subr.bf16.mxu1 %v18863_v54  ;;  %13184 = vmatprep.subr.bf16.mxu0 %v18866_v63  ;;  %v18915_v54 = vld [vmem:[#allocation14 + $0x9e8] ss:$48 sps:$4 sm:$0xff]  }
0x14c1   : > { %11179 = vmatprep.mubr.bf16.mxu1 %v22705_v3  ;;  %v7537_v3 = vsub.s32 4, %v23287_v35  ;;  %v18918_v63 = vld [vmem:[#allocation17 + $0xf0] ss:$12 sps:$4 sm:$0xff]  }
0x14c2   : > { %11150 = vmatpush1.bf16.msra.mxu1 %v18861_v22  ;;  %v18923_v22 = vld [vmem:[#allocation14 + $0xa4c] ss:$48 sps:$4 sm:$0xff]  }
0x14c3   : > { %13185 = vmatpush1.bf16.msra.mxu0 %v18864_v36  ;;  %11151 = vmatprep.subr.bf16.mxu1 %v18869_v33  ;;  %v7538_v32 = vrot.slane %v22773_v45, %v7537_v3  ;;  %v18926_v36 = vld [vmem:[#allocation17 + $0x10c] ss:$12 sps:$4 sm:$0xff]  }
0x14c4   : > { %13186 = vmatprep.subr.bf16.mxu0 %v18872_v12  ;;  %v18921_v33 = vld [vmem:[#allocation14 + $0xa48] ss:$48 sps:$4 sm:$0xff]   ;;  %v18924_v12 = vld [vmem:[#allocation17 + $0x108] ss:$12 sps:$4 sm:$0xff]  }
0x14c5   : > { %v18939_v3 = vld [vmem:[#allocation14 + $0xb68] ss:$48 sps:$4 sm:$0xff]  }
0x14c6   : > { %11152 = vmatpush1.bf16.msra.mxu1 %v18867_v47  ;;  %v18929_v47 = vld [vmem:[#allocation14 + $0xaac] ss:$48 sps:$4 sm:$0xff]  }
0x14c7   : > { %13187 = vmatpush1.bf16.msra.mxu0 %v18870_v4  ;;  %11153 = vmatprep.subr.bf16.mxu1 %v18875_v5  ;;  %v18932_v4 = vld [vmem:[#allocation17 + $0x124] ss:$12 sps:$4 sm:$0xff]   ;;  %v18927_v5 = vld [vmem:[#allocation14 + $0xaa8] ss:$48 sps:$4 sm:$0xff]  }
0x14c8   : > { %13188 = vmatprep.subr.bf16.mxu0 %v18878_v8  ;;  %v18930_v8 = vld [vmem:[#allocation17 + $0x120] ss:$12 sps:$4 sm:$0xff]  }
0x14ca   : > { %11154 = vmatpush1.bf16.msra.mxu1 %v18873_v10  ;;  %v18935_v10 = vld [vmem:[#allocation14 + $0xb0c] ss:$48 sps:$4 sm:$0xff]  }
0x14cb   : > { %13189 = vmatpush1.bf16.msra.mxu0 %v18876_v11  ;;  %11155 = vmatprep.subr.bf16.mxu1 %v18881_v41  ;;  %v18938_v11 = vld [vmem:[#allocation17 + $0x13c] ss:$12 sps:$4 sm:$0xff]  }
0x14cc   : > { %13190 = vmatprep.subr.bf16.mxu0 %v18884_v37  ;;  %v18933_v41 = vld [vmem:[#allocation14 + $0xb08] ss:$48 sps:$4 sm:$0xff]   ;;  %v18936_v37 = vld [vmem:[#allocation17 + $0x138] ss:$12 sps:$4 sm:$0xff]  }
0x14ce   : > { %11156 = vmatpush1.bf16.msra.mxu1 %v18879_v50  ;;  %v18941_v50 = vld [vmem:[#allocation14 + $0xb6c] ss:$48 sps:$4 sm:$0xff]  }
0x14cf   : > { %13191 = vmatpush1.bf16.msra.mxu0 %v18882_v18  ;;  %11157 = vmatprep.subr.bf16.mxu1 %v18887_v62  ;;  %v18944_v18 = vld [vmem:[#allocation17 + $0x154] ss:$12 sps:$4 sm:$0xff]   ;;  %v18942_v62 = vld [vmem:[#allocation17 + $0x150] ss:$12 sps:$4 sm:$0xff]  }
0x14d0   : > { %13192 = vmatprep.subr.bf16.mxu0 %v18890_v42  ;;  %v18947_v42 = vld [vmem:[#allocation14 + $0xbcc] ss:$48 sps:$4 sm:$0xff]  }
0x14d1   : > { %v10837_v59 = vpop.f32.mrb[4].mxu0 }
0x14d2   : > { %v10839_v0 = vpop.f32.mrb[5].mxu0  ;;  %11158 = vmatpush1.bf16.msra.mxu1 %v18885_v24  ;;  %v17191_v52 = vadd.f32 %v10837_v59, %v7538_v32  ;;  %v18945_v24 = vld [vmem:[#allocation14 + $0xbc8] ss:$48 sps:$4 sm:$0xff]  }
0x14d3   : > { %v10841_v49 = vpop.f32.mrb[6].mxu0  ;;  %13193 = vmatpush1.bf16.msra.mxu0 %v18888_v26  ;;  %11159 = vmatprep.subr.bf16.mxu1 %v18893_v57  ;;  %v17192_v23 = vadd.f32 %v10839_v0, %v7542_v6  ;;  %v18948_v26 = vld [vmem:[#allocation17 + $0x168] ss:$12 sps:$4 sm:$0xff]   ;;  %v18953_v57 = vld [vmem:[#allocation14 + $0xc2c] ss:$48 sps:$4 sm:$0xff]  }
0x14d4   : > { %v17193_v48 = vadd.f32 %v10841_v49, %v7538_v32  ;;  %v10843_v39 = vpop.f32.mrb[7].mxu0  ;;  %13194 = vmatprep.subr.bf16.mxu0 %v18896_v7  ;;  %v18956_v7 = vld [vmem:[#allocation17 + $0x184] ss:$12 sps:$4 sm:$0xff]   ;;  %v18951_v32 = vld [vmem:[#allocation14 + $0xc28] ss:$48 sps:$4 sm:$0xff]  }
0x14d5   : > { %v17194_v29 = vadd.f32 %v10843_v39, %v7542_v6  ;;  %v18954_v59 = vld [vmem:[#allocation17 + $0x180] ss:$12 sps:$4 sm:$0xff]   ;;  %v18960_v0 = vld [vmem:[#allocation17 + $0x198] ss:$12 sps:$4 sm:$0xff]  }
0x14d6   : > { %v22792_v38 = vpack.c.bf16 %v17193_v48, %v17191_v52  ;;  %11160 = vmatpush1.bf16.msra.mxu1 %v18891_v60  ;;  %v18959_v6 = vld [vmem:[#allocation14 + $0xc8c] ss:$48 sps:$4 sm:$0xff]   ;;  %v18962_v60 = vld [vmem:[#allocation17 + $0x19c] ss:$12 sps:$4 sm:$0xff]  }
0x14d7   : > { %v22794_v45 = vpack.c.bf16 %v17194_v29, %v17192_v23  ;;  %13195 = vmatpush1.bf16.msra.mxu0 %v18894_v61  ;;  %11161 = vmatprep.subr.bf16.mxu1 %v18899_v16  ;;  %v18957_v61 = vld [vmem:[#allocation14 + $0xc88] ss:$48 sps:$4 sm:$0xff]   ;;  %v18965_v16 = vld [vmem:[#allocation14 + $0xcec] ss:$48 sps:$4 sm:$0xff]   ;;  %v18972_v23 = vld [vmem:[#allocation17 + $0x1c8] ss:$12 sps:$4 sm:$0xff]  }
0x14d8   : > { %13196 = vmatprep.subr.bf16.mxu0 %v18902_v19  ;;  %v18968_v19 = vld [vmem:[#allocation17 + $0x1b4] ss:$12 sps:$4 sm:$0xff]   ;;  %v18963_v49 = vld [vmem:[#allocation14 + $0xce8] ss:$48 sps:$4 sm:$0xff]  }
0x14d9   : > { %v18966_v52 = vld [vmem:[#allocation17 + $0x1b0] ss:$12 sps:$4 sm:$0xff]  }
0x14da   : > { %11162 = vmatpush1.bf16.msra.mxu1 %v18897_v28  ;;  %v18971_v48 = vld [vmem:[#allocation14 + $0xd4c] ss:$48 sps:$4 sm:$0xff]   ;;  %v18969_v39 = vld [vmem:[#allocation14 + $0xd48] ss:$48 sps:$4 sm:$0xff]  }
0x14db   : > { %13197 = vmatpush1.bf16.msra.mxu0 %v18900_v44  ;;  %11163 = vmatprep.subr.bf16.mxu1 %v18905_v13  ;;  %v18977_v29 = vld [vmem:[#allocation14 + $0xdac] ss:$48 sps:$4 sm:$0xff]   ;;  %v18975_v44 = vld [vmem:[#allocation14 + $0xda8] ss:$48 sps:$4 sm:$0xff]  }
0x14dc   : > { %13198 = vmatprep.subr.bf16.mxu0 %v18908_v55  ;;  %v18980_v28 = vld [vmem:[#allocation17 + $0x1e4] ss:$12 sps:$4 sm:$0xff]   ;;  %v18986_v55 = vld [vmem:[#allocation17 + $0x1fc] ss:$12 sps:$4 sm:$0xff]  }
0x14dd   : > { %v18983_v13 = vld [vmem:[#allocation14 + $0xe0c] ss:$48 sps:$4 sm:$0xff]  }
0x14de   : > { %11164 = vmatpush1.bf16.msra.mxu1 %v18903_v43  ;;  %v18981_v43 = vld [vmem:[#allocation14 + $0xe08] ss:$48 sps:$4 sm:$0xff]  }
0x14df   : > { %13199 = vmatpush1.bf16.msra.mxu0 %v18906_v27  ;;  %11165 = vmatprep.subr.bf16.mxu1 %v18911_v40  ;;  %v18984_v27 = vld [vmem:[#allocation17 + $0x1f8] ss:$12 sps:$4 sm:$0xff]   ;;  %v18989_v40 = vld [vmem:[#allocation14 + $0xe6c] ss:$48 sps:$4 sm:$0xff]  }
0x14e0   : > { %13200 = vmatprep.subr.bf16.mxu0 %v18914_v46  ;;  %v18992_v46 = vld [vmem:[#allocation17 + $0x214] ss:$12 sps:$4 sm:$0xff]  }
0x14e2   : > { %11166 = vmatpush1.bf16.msra.mxu1 %v18909_v58  ;;  %v18987_v58 = vld [vmem:[#allocation14 + $0xe68] ss:$48 sps:$4 sm:$0xff]  }
0x14e3   : > { %13201 = vmatpush1.bf16.msra.mxu0 %v18912_v1  ;;  %11167 = vmatprep.subr.bf16.mxu1 %v18917_v34  ;;  %v18990_v1 = vld [vmem:[#allocation17 + $0x210] ss:$12 sps:$4 sm:$0xff]  }
0x14e4   : > { %13202 = vmatprep.subr.bf16.mxu0 %v18920_v51  ;;  %v18995_v34 = vld [vmem:[#allocation14 + $0xecc] ss:$48 sps:$4 sm:$0xff]   ;;  %v18998_v51 = vld [vmem:[#allocation17 + $0x22c] ss:$12 sps:$4 sm:$0xff]  }
0x14e6   : > { %11168 = vmatpush1.bf16.msra.mxu1 %v18915_v54  ;;  %v18993_v54 = vld [vmem:[#allocation14 + $0xec8] ss:$48 sps:$4 sm:$0xff]  }
0x14e7   : > { %13203 = vmatpush1.bf16.msra.mxu0 %v18918_v63  ;;  %11169 = vmatprep.subr.bf16.mxu1 %v18923_v22  ;;  %v18996_v63 = vld [vmem:[#allocation17 + $0x228] ss:$12 sps:$4 sm:$0xff]   ;;  %v19001_v22 = vld [vmem:[#allocation14 + $0xf2c] ss:$48 sps:$4 sm:$0xff]  }
0x14e8   : > { %13204 = vmatprep.subr.bf16.mxu0 %v18926_v36  ;;  %v19004_v36 = vld [vmem:[#allocation17 + $0x244] ss:$12 sps:$4 sm:$0xff]  }
0x14ea   : > { %11170 = vmatpush1.bf16.msra.mxu1 %v18921_v33  ;;  %v18999_v33 = vld [vmem:[#allocation14 + $0xf28] ss:$48 sps:$4 sm:$0xff]  }
0x14eb   : > { %13205 = vmatpush1.bf16.msra.mxu0 %v18924_v12  ;;  %11171 = vmatprep.subr.bf16.mxu1 %v18929_v47  ;;  %v19002_v12 = vld [vmem:[#allocation17 + $0x240] ss:$12 sps:$4 sm:$0xff]  }
0x14ec   : > { %13206 = vmatprep.subr.bf16.mxu0 %v18932_v4  ;;  %v19007_v47 = vld [vmem:[#allocation14 + $0xf8c] ss:$48 sps:$4 sm:$0xff]   ;;  %v19010_v4 = vld [vmem:[#allocation17 + $0x25c] ss:$12 sps:$4 sm:$0xff]  }
0x14ee   : > { %11172 = vmatpush1.bf16.msra.mxu1 %v18927_v5  ;;  %v19005_v5 = vld [vmem:[#allocation14 + $0xf88] ss:$48 sps:$4 sm:$0xff]  }
0x14ef   : > { %13207 = vmatpush1.bf16.msra.mxu0 %v18930_v8  ;;  %11173 = vmatprep.subr.bf16.mxu1 %v18935_v10  ;;  %v19008_v8 = vld [vmem:[#allocation17 + $0x258] ss:$12 sps:$4 sm:$0xff]   ;;  %v19013_v10 = vld [vmem:[#allocation14 + $0xfec] ss:$48 sps:$4 sm:$0xff]  }
0x14f0   : > { %13208 = vmatprep.subr.bf16.mxu0 %v18938_v11  ;;  %v19016_v11 = vld [vmem:[#allocation17 + $0x274] ss:$12 sps:$4 sm:$0xff]  }
0x14f2   : > { %11174 = vmatpush1.bf16.msra.mxu1 %v18933_v41  ;;  %v19011_v41 = vld [vmem:[#allocation14 + $0xfe8] ss:$48 sps:$4 sm:$0xff]  }
0x14f3   : > { %13209 = vmatpush1.bf16.msra.mxu0 %v18936_v37  ;;  %11175 = vmatprep.subr.bf16.mxu1 %v18941_v50  ;;  %v19014_v37 = vld [vmem:[#allocation17 + $0x270] ss:$12 sps:$4 sm:$0xff]  }
0x14f4   : > { %13210 = vmatprep.subr.bf16.mxu0 %v18944_v18  ;;  %v19019_v50 = vld [vmem:[#allocation14 + $0x104c] ss:$48 sps:$4 sm:$0xff]   ;;  %v19022_v18 = vld [vmem:[#allocation17 + $0x28c] ss:$12 sps:$4 sm:$0xff]  }
0x14f6   : > { %11176 = vmatpush1.bf16.msra.mxu1 %v18939_v3  ;;  %v19017_v3 = vld [vmem:[#allocation14 + $0x1048] ss:$48 sps:$4 sm:$0xff]  }
0x14f7   : > { %13211 = vmatpush1.bf16.msra.mxu0 %v18942_v62  ;;  %11177 = vmatprep.subr.bf16.mxu1 %v18947_v42  ;;  %v19020_v62 = vld [vmem:[#allocation17 + $0x288] ss:$12 sps:$4 sm:$0xff]   ;;  %v19025_v42 = vld [vmem:[#allocation14 + $0x10ac] ss:$48 sps:$4 sm:$0xff]  }
0x14f8   : > { %13212 = vmatprep.subr.bf16.mxu0 %v18950_v56  ;;  %v19028_v56 = vld [vmem:[#allocation17 + $0x2a4] ss:$12 sps:$4 sm:$0xff]  }
0x14fa   : > { %11178 = vmatpush1.bf16.msra.mxu1 %v18945_v24  ;;  %v19023_v24 = vld [vmem:[#allocation14 + $0x10a8] ss:$48 sps:$4 sm:$0xff]  }
0x14fb   : > { %13213 = vmatpush1.bf16.msra.mxu0 %v18948_v26  ;;  %11190 = vmatprep.subr.bf16.mxu1 %v18953_v57  ;;  %v19026_v26 = vld [vmem:[#allocation17 + $0x2a0] ss:$12 sps:$4 sm:$0xff]  }
0x14fc   : > { %13225 = vmatprep.subr.bf16.mxu0 %v18956_v7  ;;  %v19031_v57 = vld [vmem:[#allocation14 + $0x110c] ss:$48 sps:$4 sm:$0xff]   ;;  %v19034_v7 = vld [vmem:[#allocation17 + $0x2bc] ss:$12 sps:$4 sm:$0xff]  }
0x14fd   : > { %11180 = vmatmul.mubr.bf16.vlgmr.msra.gmra.mrb[12].mxu1 %v22711_v9  ;;  %v18974_v9 = vld [vmem:[#allocation17 + $0x1cc] ss:$12 sps:$4 sm:$0xff]  }
0x14fe   : > { %13215 = vmatmul.mubr.bf16.vlgmr.msra.gmra.mrb[12].mxu0 %v22757_v2  ;;  %11191 = vmatpush1.bf16.msra.mxu1 %v18951_v32  ;;  %v19029_v32 = vld [vmem:[#allocation14 + $0x1108] ss:$48 sps:$4 sm:$0xff]  }
0x14ff   : > { %13226 = vmatpush1.bf16.msra.mxu0 %v18954_v59  ;;  %13257 = vmatprep.mubr.bf16.mxu0 %v22782_v17  ;;  %v19032_v59 = vld [vmem:[#allocation17 + $0x2b8] ss:$12 sps:$4 sm:$0xff]  }
0x1500   : > { %11192 = vmatprep.subr.bf16.mxu1 %v18959_v6  ;;  %13227 = vmatprep.subr.bf16.mxu0 %v18962_v60  ;;  %v19037_v6 = vld [vmem:[#allocation14 + $0x116c] ss:$48 sps:$4 sm:$0xff]  }
0x1501   : > { %11222 = vmatprep.mubr.bf16.mxu1 %v22716_v15  ;;  %v18978_v15 = vld [vmem:[#allocation17 + $0x1e0] ss:$12 sps:$4 sm:$0xff]  }
0x1502   : > { %11193 = vmatpush1.bf16.msra.mxu1 %v18957_v61  ;;  %v19040_v60 = vld [vmem:[#allocation17 + $0x2d4] ss:$12 sps:$4 sm:$0xff]   ;;  %v19035_v61 = vld [vmem:[#allocation14 + $0x1168] ss:$48 sps:$4 sm:$0xff]  }
0x1503   : > { %13228 = vmatpush1.bf16.msra.mxu0 %v18960_v0  ;;  %11194 = vmatprep.subr.bf16.mxu1 %v18965_v16  ;;  %v19038_v0 = vld [vmem:[#allocation17 + $0x2d0] ss:$12 sps:$4 sm:$0xff]  }
0x1504   : > { %13229 = vmatprep.subr.bf16.mxu0 %v18968_v19  ;;  %v19043_v16 = vld [vmem:[#allocation14 + $0x11cc] ss:$48 sps:$4 sm:$0xff]   ;;  %v19046_v19 = vld [vmem:[#allocation17 + $0x2ec] ss:$12 sps:$4 sm:$0xff]  }
0x1506   : > { %11195 = vmatpush1.bf16.msra.mxu1 %v18963_v49  ;;  %v19041_v49 = vld [vmem:[#allocation14 + $0x11c8] ss:$48 sps:$4 sm:$0xff]  }
0x1507   : > { %13230 = vmatpush1.bf16.msra.mxu0 %v18966_v52  ;;  %11196 = vmatprep.subr.bf16.mxu1 %v18971_v48  ;;  %v19044_v52 = vld [vmem:[#allocation17 + $0x2e8] ss:$12 sps:$4 sm:$0xff]   ;;  %v19049_v48 = vld [vmem:[#allocation17 + $0x304] ss:$12 sps:$4 sm:$0xff]  }
0x1508   : > { %13231 = vmatprep.subr.bf16.mxu0 %v18974_v9  ;;  %v19050_v9 = vld [vmem:[#allocation17 + $0xc8] ss:$12 sps:$4 sm:$0xff]  }
0x150a   : > { %11197 = vmatpush1.bf16.msra.mxu1 %v18969_v39  ;;  %v19047_v39 = vld [vmem:[#allocation17 + $0x300] ss:$12 sps:$4 sm:$0xff]  }
0x150b   : > { %13232 = vmatpush1.bf16.msra.mxu0 %v18972_v23  ;;  %11198 = vmatprep.subr.bf16.mxu1 %v18977_v29  ;;  %v19051_v23 = vld [vmem:[#allocation17 + $0x8] ss:$12 sps:$4 sm:$0xff]  }
0x150c   : > { %13233 = vmatprep.subr.bf16.mxu0 %v18980_v28  ;;  %v19054_v29 = vld [vmem:[#allocation17 + $0x31c] ss:$12 sps:$4 sm:$0xff]   ;;  %v19055_v28 = vld [vmem:[#allocation17 + $0xe0] ss:$12 sps:$4 sm:$0xff]  }
0x150e   : > { %11199 = vmatpush1.bf16.msra.mxu1 %v18975_v44  ;;  %v19052_v44 = vld [vmem:[#allocation17 + $0x318] ss:$12 sps:$4 sm:$0xff]  }
0x150f   : > { %13234 = vmatpush1.bf16.msra.mxu0 %v18978_v15  ;;  %11200 = vmatprep.subr.bf16.mxu1 %v18983_v13  ;;  %v19056_v15 = vld [vmem:[#allocation17 + $0x20] ss:$12 sps:$4 sm:$0xff]  }
0x1510   : > { %13235 = vmatprep.subr.bf16.mxu0 %v18986_v55  ;;  %v19059_v13 = vld [vmem:[#allocation17 + $0x334] ss:$12 sps:$4 sm:$0xff]   ;;  %v19060_v55 = vld [vmem:[#allocation17 + $0xf8] ss:$12 sps:$4 sm:$0xff]  }
0x1512   : > { %11201 = vmatpush1.bf16.msra.mxu1 %v18981_v43  ;;  %v19057_v43 = vld [vmem:[#allocation17 + $0x330] ss:$12 sps:$4 sm:$0xff]  }
0x1513   : > { %13236 = vmatpush1.bf16.msra.mxu0 %v18984_v27  ;;  %11202 = vmatprep.subr.bf16.mxu1 %v18989_v40  ;;  %v19061_v27 = vld [vmem:[#allocation17 + $0x38] ss:$12 sps:$4 sm:$0xff]   ;;  %v19065_v40 = vld [vmem:[#allocation17 + $0x110] ss:$12 sps:$4 sm:$0xff]  }
0x1514   : > { %13237 = vmatprep.subr.bf16.mxu0 %v18992_v46  ;;  %v19062_v46 = vld [vmem:[#allocation17 + $0x348] ss:$12 sps:$4 sm:$0xff]  }
0x1516   : > { %11203 = vmatpush1.bf16.msra.mxu1 %v18987_v58  ;;  %v19066_v58 = vld [vmem:[#allocation17 + $0x50] ss:$12 sps:$4 sm:$0xff]  }
0x1517   : > { %13238 = vmatpush1.bf16.msra.mxu0 %v18990_v1  ;;  %11204 = vmatprep.subr.bf16.mxu1 %v18995_v34  ;;  %v19069_v1 = vld [vmem:[#allocation17 + $0x364] ss:$12 sps:$4 sm:$0xff]   ;;  %v19067_v34 = vld [vmem:[#allocation17 + $0x360] ss:$12 sps:$4 sm:$0xff]  }
0x1518   : > { %13239 = vmatprep.subr.bf16.mxu0 %v18998_v51  ;;  %v19071_v51 = vld [vmem:[#allocation17 + $0x68] ss:$12 sps:$4 sm:$0xff]  }
0x151a   : > { %11205 = vmatpush1.bf16.msra.mxu1 %v18993_v54  ;;  %v7545_v54 = vsub.s32 6, %v23287_v35 }
0x151b   : > { %13240 = vmatpush1.bf16.msra.mxu0 %v18996_v63  ;;  %11206 = vmatprep.subr.bf16.mxu1 %v19001_v22  ;;  %v19074_v63 = vld [vmem:[#allocation17 + $0x37c] ss:$12 sps:$4 sm:$0xff]   ;;  %v7549_v22 = vsub.s32 7, %v23287_v35  ;;  %v19311_v35 = vld [vmem:[#allocation17 + $0x840] ss:$12 sps:$4 sm:$0xff]  }
0x151c   : > { %13241 = vmatprep.subr.bf16.mxu0 %v19004_v36  ;;  %v19075_v36 = vld [vmem:[#allocation17 + $0x140] ss:$12 sps:$4 sm:$0xff]  }
0x151e   : > { %11207 = vmatpush1.bf16.msra.mxu1 %v18999_v33  ;;  %v19072_v33 = vld [vmem:[#allocation17 + $0x378] ss:$12 sps:$4 sm:$0xff]  }
0x151f   : > { %13242 = vmatpush1.bf16.msra.mxu0 %v19002_v12  ;;  %11208 = vmatprep.subr.bf16.mxu1 %v19007_v47  ;;  %v19360_v12 = vld [vmem:[#allocation15] sm:$0xff] }
0x1520   : > { %13243 = vmatprep.subr.bf16.mxu0 %v19010_v4  ;;  %v7546_v47 = vrot.slane %v19360_v12, %v7545_v54  ;;  %v19076_v4 = vld [vmem:[#allocation17 + $0x80] ss:$12 sps:$4 sm:$0xff]   ;;  %v19125_v54 = vld [vmem:[#allocation17 + $0x2f0] ss:$12 sps:$4 sm:$0xff]  }
0x1522   : > { %11209 = vmatpush1.bf16.msra.mxu1 %v19005_v5  ;;  %v19079_v5 = vld [vmem:[#allocation17 + $0x394] ss:$12 sps:$4 sm:$0xff]  }
0x1523   : > { %13244 = vmatpush1.bf16.msra.mxu0 %v19008_v8  ;;  %11210 = vmatprep.subr.bf16.mxu1 %v19013_v10  ;;  %v7550_v10 = vrot.slane %v19360_v12, %v7549_v22  ;;  %v19126_v22 = vld [vmem:[#allocation17 + $0x230] ss:$12 sps:$4 sm:$0xff]   ;;  %v19127_v12 = vld [vmem:[#allocation17 + $0x480] ss:$12 sps:$4 sm:$0xff]  }
0x1524   : > { %13245 = vmatprep.subr.bf16.mxu0 %v19016_v11  ;;  %v19080_v11 = vld [vmem:[#allocation17 + $0x158] ss:$12 sps:$4 sm:$0xff]  }
0x1526   : > { %11211 = vmatpush1.bf16.msra.mxu1 %v19011_v41 }
0x1527   : > { %13246 = vmatpush1.bf16.msra.mxu0 %v19014_v37  ;;  %11212 = vmatprep.subr.bf16.mxu1 %v19019_v50  ;;  %v19077_v50 = vld [vmem:[#allocation17 + $0x390] ss:$12 sps:$4 sm:$0xff]  }
0x1528   : > { %13247 = vmatprep.subr.bf16.mxu0 %v19022_v18 }
0x152a   : > { %11213 = vmatpush1.bf16.msra.mxu1 %v19017_v3 }
0x152b   : > { %13248 = vmatpush1.bf16.msra.mxu0 %v19020_v62  ;;  %11214 = vmatprep.subr.bf16.mxu1 %v19025_v42  ;;  %v19081_v42 = vld [vmem:[#allocation17 + $0x98] ss:$12 sps:$4 sm:$0xff]  }
0x152c   : > { %13249 = vmatprep.subr.bf16.mxu0 %v19028_v56  ;;  %v19084_v56 = vld [vmem:[#allocation17 + $0x3ac] ss:$12 sps:$4 sm:$0xff]  }
0x152e   : > { %11215 = vmatpush1.bf16.msra.mxu1 %v19023_v24 }
0x152f   : > { %13250 = vmatpush1.bf16.msra.mxu0 %v19026_v26  ;;  %11216 = vmatprep.subr.bf16.mxu1 %v19031_v57  ;;  %v19085_v57 = vld [vmem:[#allocation17 + $0x170] ss:$12 sps:$4 sm:$0xff]  }
0x1530   : > { %13251 = vmatprep.subr.bf16.mxu0 %v19034_v7 }
0x1532   : > { %11217 = vmatpush1.bf16.msra.mxu1 %v19029_v32 }
0x1533   : > { %13252 = vmatpush1.bf16.msra.mxu0 %v19032_v59  ;;  %11218 = vmatprep.subr.bf16.mxu1 %v19037_v6  ;;  %v19082_v59 = vld [vmem:[#allocation17 + $0x3a8] ss:$12 sps:$4 sm:$0xff]   ;;  %v19086_v6 = vld [vmem:[#allocation17 + $0xb0] ss:$12 sps:$4 sm:$0xff]  }
0x1534   : > { %13253 = vmatprep.subr.bf16.mxu0 %v19040_v60  ;;  %v19089_v60 = vld [vmem:[#allocation17 + $0x3c4] ss:$12 sps:$4 sm:$0xff]  }
0x1536   : > { %11219 = vmatpush1.bf16.msra.mxu1 %v19035_v61  ;;  %v19090_v61 = vld [vmem:[#allocation17 + $0x248] ss:$12 sps:$4 sm:$0xff]  }
0x1537   : > { %13254 = vmatpush1.bf16.msra.mxu0 %v19038_v0  ;;  %11220 = vmatprep.subr.bf16.mxu1 %v19043_v16  ;;  %v19087_v0 = vld [vmem:[#allocation17 + $0x3c0] ss:$12 sps:$4 sm:$0xff]   ;;  %v19091_v16 = vld [vmem:[#allocation17 + $0x188] ss:$12 sps:$4 sm:$0xff]  }
0x1538   : > { %13255 = vmatprep.subr.bf16.mxu0 %v19046_v19  ;;  %v19094_v19 = vld [vmem:[#allocation17 + $0x3dc] ss:$12 sps:$4 sm:$0xff]  }
0x153a   : > { %11221 = vmatpush1.bf16.msra.mxu1 %v19041_v49  ;;  %v19095_v49 = vld [vmem:[#allocation17 + $0x260] ss:$12 sps:$4 sm:$0xff]  }
0x153b   : > { %13256 = vmatpush1.bf16.msra.mxu0 %v19044_v52  ;;  %15926 = vmatprep.subr.bf16.mxu1 %v19050_v9  ;;  %v19092_v52 = vld [vmem:[#allocation17 + $0x3d8] ss:$12 sps:$4 sm:$0xff]   ;;  %v19099_v9 = vld [vmem:[#allocation17 + $0x3f4] ss:$12 sps:$4 sm:$0xff]  }
0x153c   : > { %13268 = vmatprep.subr.bf16.mxu0 %v19049_v48  ;;  %v19096_v48 = vld [vmem:[#allocation17 + $0x1a0] ss:$12 sps:$4 sm:$0xff]  }
0x153d   : > { %11223 = vmatmul.mubr.bf16.vlgmr.msra.gmra.mrb[12].mxu1 %v22719_v25  ;;  %v19064_v25 = vld [vmem:[#allocation17 + $0x34c] ss:$12 sps:$4 sm:$0xff]  }
0x153e   : > { %13258 = vmatmul.mubr.bf16.vlgmr.msra.gmra.mrb[12].mxu0 %v22780_v53  ;;  %15927 = vmatpush3.bf16.msra.mxu1 %v19051_v23  ;;  %v19097_v23 = vld [vmem:[#allocation17 + $0x3f0] ss:$12 sps:$4 sm:$0xff]  }
0x153f   : > { %13269 = vmatpush1.bf16.msra.mxu0 %v19047_v39  ;;  %13300 = vmatprep.mubr.bf16.mxu0 %v22794_v45  ;;  %v19100_v39 = vld [vmem:[#allocation17 + $0x278] ss:$12 sps:$4 sm:$0xff]  }
0x1540   : > { %13472 = vmatprep.mubr.bf16.mxu1 %v22759_v14  ;;  %13270 = vmatprep.subr.bf16.mxu0 %v19054_v29  ;;  %v19070_v14 = vld [vmem:[#allocation17 + $0x128] ss:$12 sps:$4 sm:$0xff]   ;;  %v19101_v29 = vld [vmem:[#allocation17 + $0x1b8] ss:$12 sps:$4 sm:$0xff]  }
0x1541   : > { %15928 = vmatprep.subr.bf16.mxu1 %v19055_v28  ;;  %v19104_v28 = vld [vmem:[#allocation17 + $0x40c] ss:$12 sps:$4 sm:$0xff]  }
0x1542   : > { %15929 = vmatpush3.bf16.msra.mxu1 %v19056_v15  ;;  %v19106_v15 = vld [vmem:[#allocation17 + $0x1d0] ss:$12 sps:$4 sm:$0xff]  }
0x1543   : > { %13271 = vmatpush1.bf16.msra.mxu0 %v19052_v44  ;;  %15930 = vmatprep.subr.bf16.mxu1 %v19060_v55  ;;  %v19105_v44 = vld [vmem:[#allocation17 + $0x290] ss:$12 sps:$4 sm:$0xff]   ;;  %v19107_v55 = vld [vmem:[#allocation17 + $0x420] ss:$12 sps:$4 sm:$0xff]  }
0x1544   : > { %13272 = vmatprep.subr.bf16.mxu0 %v19059_v13  ;;  %v19109_v13 = vld [vmem:[#allocation17 + $0x424] ss:$12 sps:$4 sm:$0xff]  }
0x1546   : > { %15931 = vmatpush3.bf16.msra.mxu1 %v19061_v27  ;;  %v19114_v27 = vld [vmem:[#allocation17 + $0x43c] ss:$12 sps:$4 sm:$0xff]  }
0x1547   : > { %13273 = vmatpush1.bf16.msra.mxu0 %v19057_v43  ;;  %15932 = vmatprep.subr.bf16.mxu1 %v19065_v40  ;;  %v19111_v43 = vld [vmem:[#allocation17 + $0x1e8] ss:$12 sps:$4 sm:$0xff]   ;;  %v19112_v40 = vld [vmem:[#allocation17 + $0x438] ss:$12 sps:$4 sm:$0xff]  }
0x1548   : > { %13274 = vmatprep.subr.bf16.mxu0 %v19064_v25  ;;  %v19115_v25 = vld [vmem:[#allocation17 + $0x2c0] ss:$12 sps:$4 sm:$0xff]  }
0x154a   : > { %15933 = vmatpush3.bf16.msra.mxu1 %v19066_v58  ;;  %v19119_v58 = vld [vmem:[#allocation17 + $0x454] ss:$12 sps:$4 sm:$0xff]  }
0x154b   : > { %13275 = vmatpush1.bf16.msra.mxu0 %v19062_v46  ;;  %15934 = vmatprep.subr.bf16.mxu1 %v19070_v14  ;;  %v19116_v46 = vld [vmem:[#allocation17 + $0x200] ss:$12 sps:$4 sm:$0xff]   ;;  %v19117_v14 = vld [vmem:[#allocation17 + $0x450] ss:$12 sps:$4 sm:$0xff]  }
0x154c   : > { %13276 = vmatprep.subr.bf16.mxu0 %v19069_v1  ;;  %v19120_v1 = vld [vmem:[#allocation17 + $0x2d8] ss:$12 sps:$4 sm:$0xff]  }
0x154e   : > { %15935 = vmatpush3.bf16.msra.mxu1 %v19071_v51  ;;  %v19124_v51 = vld [vmem:[#allocation17 + $0x46c] ss:$12 sps:$4 sm:$0xff]  }
0x154f   : > { %13277 = vmatpush1.bf16.msra.mxu0 %v19067_v34  ;;  %15936 = vmatprep.subr.bf16.mxu1 %v19075_v36  ;;  %v19121_v34 = vld [vmem:[#allocation17 + $0x218] ss:$12 sps:$4 sm:$0xff]  }
0x1550   : > { %13278 = vmatprep.subr.bf16.mxu0 %v19074_v63  ;;  %v10966_v8 = vpop.f32.mrb[8].mxu1  ;;  %v19122_v63 = vld [vmem:[#allocation17 + $0x468] ss:$12 sps:$4 sm:$0xff]   ;;  %v19129_v36 = vld [vmem:[#allocation17 + $0x484] ss:$12 sps:$4 sm:$0xff]  }
0x1551   : > { %v10968_v41 = vpop.f32.mrb[9].mxu1  ;;  %v17195_v18 = vadd.f32 %v10966_v8, %v7546_v47  ;;  %v19132_v8 = vld [vmem:[#allocation17 + $0x498] ss:$12 sps:$4 sm:$0xff]  }
0x1552   : > { %v10970_v37 = vpop.f32.mrb[10].mxu1  ;;  %15937 = vmatpush3.bf16.msra.mxu1 %v19076_v4  ;;  %v17196_v24 = vadd.f32 %v10968_v41, %v7550_v10  ;;  %v19134_v4 = vld [vmem:[#allocation17 + $0x49c] ss:$12 sps:$4 sm:$0xff]   ;;  %v19140_v41 = vld [vmem:[#allocation17 + $0x3f8] ss:$12 sps:$4 sm:$0xff]  }
0x1553   : > { %13279 = vmatpush1.bf16.msra.mxu0 %v19072_v33  ;;  %v17197_v3 = vadd.f32 %v10970_v37, %v7546_v47  ;;  %v10972_v62 = vpop.f32.mrb[11].mxu1  ;;  %15938 = vmatprep.subr.bf16.mxu1 %v19080_v11  ;;  %v19130_v33 = vld [vmem:[#allocation17 + $0x3c8] ss:$12 sps:$4 sm:$0xff]   ;;  %v19137_v37 = vld [vmem:[#allocation17 + $0x4b0] ss:$12 sps:$4 sm:$0xff]  }
0x1554   : > { %13280 = vmatprep.subr.bf16.mxu0 %v19079_v5  ;;  %v17198_v26 = vadd.f32 %v10972_v62, %v7550_v10  ;;  %v19131_v47 = vld [vmem:[#allocation17 + $0x308] ss:$12 sps:$4 sm:$0xff]   ;;  %v19135_v5 = vld [vmem:[#allocation17 + $0x3e0] ss:$12 sps:$4 sm:$0xff]   ;;  %v19146_v62 = vld [vmem:[#allocation17 + $0x350] ss:$12 sps:$4 sm:$0xff]  }
0x1555   : > { %v22806_v7 = vpack.c.bf16 %v17197_v3, %v17195_v18  ;;  %v19136_v10 = vld [vmem:[#allocation17 + $0x320] ss:$12 sps:$4 sm:$0xff]   ;;  %v19142_v3 = vld [vmem:[#allocation17 + $0x4c8] ss:$12 sps:$4 sm:$0xff]  }
0x1556   : > { %v22808_v32 = vpack.c.bf16 %v17198_v26, %v17196_v24  ;;  %15939 = vmatpush3.bf16.msra.mxu1 %v19081_v42  ;;  %v19139_v11 = vld [vmem:[#allocation17 + $0x4b4] ss:$12 sps:$4 sm:$0xff]   ;;  %v19144_v18 = vld [vmem:[#allocation17 + $0x4cc] ss:$12 sps:$4 sm:$0xff]   ;;  %v19149_v42 = vld [vmem:[#allocation17 + $0x4e4] ss:$12 sps:$4 sm:$0xff]  }
0x1557   : > { %13281 = vmatpush1.bf16.msra.mxu0 %v19077_v50  ;;  %15940 = vmatprep.subr.bf16.mxu1 %v19085_v57  ;;  %v19141_v50 = vld [vmem:[#allocation17 + $0x338] ss:$12 sps:$4 sm:$0xff]   ;;  %v19151_v24 = vld [vmem:[#allocation17 + $0x368] ss:$12 sps:$4 sm:$0xff]   ;;  %v22816_v57 = vld [vmem:[#allocation15 + $0x8] sm:$0xf] }
0x1558   : > { %13282 = vmatprep.subr.bf16.mxu0 %v19084_v56  ;;  %v19150_v56 = vld [vmem:[#allocation17 + $0x428] ss:$12 sps:$4 sm:$0xff]  }
0x1559   : > { %v19154_v26 = vld [vmem:[#allocation17 + $0x4fc] ss:$12 sps:$4 sm:$0xff]  }
0x155a   : > { %15941 = vmatpush3.bf16.msra.mxu1 %v19086_v6  ;;  %v19152_v6 = vld [vmem:[#allocation17 + $0x4f8] ss:$12 sps:$4 sm:$0xff]  }
0x155b   : > { %13283 = vmatpush1.bf16.msra.mxu0 %v19082_v59  ;;  %15948 = vmatprep.subr.bf16.mxu1 %v19090_v61  ;;  %v19155_v59 = vld [vmem:[#allocation17 + $0x440] ss:$12 sps:$4 sm:$0xff]  }
0x155c   : > { %13284 = vmatprep.subr.bf16.mxu0 %v19089_v60  ;;  %v7554_v60 = vrot.slane %v22816_v57, %v22746_v30  ;;  %v19156_v61 = vld [vmem:[#allocation17 + $0x380] ss:$12 sps:$4 sm:$0xff]  }
0x155d   : > { %13473 = vmatmul.mubr.bf16.vlgmr.msra.gmra.mrb[16].mxu1 %v22757_v2  ;;  %v19102_v2 = vld [vmem:[#allocation17 + $0x408] ss:$12 sps:$4 sm:$0xff]  }
0x155e   : > { %15949 = vmatpush3.bf16.msra.mxu1 %v19091_v16  ;;  %13513 = vmatprep.mubr.bf16.mxu1 %v22782_v17  ;;  %v19110_v17 = vld [vmem:[#allocation17 + $0x2a8] ss:$12 sps:$4 sm:$0xff]  }
0x155f   : > { %13285 = vmatpush1.bf16.msra.mxu0 %v19087_v0  ;;  %15950 = vmatprep.subr.bf16.mxu1 %v19095_v49  ;;  %v19159_v0 = vld [vmem:[#allocation17 + $0x514] ss:$12 sps:$4 sm:$0xff]   ;;  %v19160_v49 = vld [vmem:[#allocation17 + $0x458] ss:$12 sps:$4 sm:$0xff]  }
0x1560   : > { %13286 = vmatprep.subr.bf16.mxu0 %v19094_v19  ;;  %v7558_v19 = vrot.slane %v22816_v57, %v22749_v20 }
0x1562   : > { %15951 = vmatpush3.bf16.msra.mxu1 %v19096_v48 }
0x1563   : > { %13287 = vmatpush1.bf16.msra.mxu0 %v19092_v52  ;;  %15952 = vmatprep.subr.bf16.mxu1 %v19100_v39 }
0x1564   : > { %13288 = vmatprep.subr.bf16.mxu0 %v19099_v9  ;;  %v19157_v9 = vld [vmem:[#allocation17 + $0x510] ss:$12 sps:$4 sm:$0xff]  }
0x1566   : > { %15953 = vmatpush3.bf16.msra.mxu1 %v19101_v29 }
0x1567   : > { %13289 = vmatpush1.bf16.msra.mxu0 %v19097_v23  ;;  %15954 = vmatprep.subr.bf16.mxu1 %v19105_v44  ;;  %v19164_v44 = vld [vmem:[#allocation17 + $0x52c] ss:$12 sps:$4 sm:$0xff]  }
0x1568   : > { %13290 = vmatprep.subr.bf16.mxu0 %v19104_v28  ;;  %v19161_v28 = vld [vmem:[#allocation17 + $0x398] ss:$12 sps:$4 sm:$0xff]  }
0x156a   : > { %15955 = vmatpush3.bf16.msra.mxu1 %v19106_v15 }
0x156b   : > { %13291 = vmatpush1.bf16.msra.mxu0 %v19102_v2  ;;  %15956 = vmatprep.subr.bf16.mxu1 %v19110_v17 }
0x156c   : > { %13292 = vmatprep.subr.bf16.mxu0 %v19109_v13  ;;  %v19165_v13 = vld [vmem:[#allocation17 + $0x470] ss:$12 sps:$4 sm:$0xff]  }
0x156e   : > { %15957 = vmatpush3.bf16.msra.mxu1 %v19111_v43  ;;  %v19162_v43 = vld [vmem:[#allocation17 + $0x528] ss:$12 sps:$4 sm:$0xff]  }
0x156f   : > { %13293 = vmatpush1.bf16.msra.mxu0 %v19107_v55  ;;  %15958 = vmatprep.subr.bf16.mxu1 %v19115_v25  ;;  %v19169_v25 = vld [vmem:[#allocation17 + $0x544] ss:$12 sps:$4 sm:$0xff]  }
0x1570   : > { %13294 = vmatprep.subr.bf16.mxu0 %v19114_v27  ;;  %v19166_v27 = vld [vmem:[#allocation17 + $0x3b0] ss:$12 sps:$4 sm:$0xff]  }
0x1572   : > { %15959 = vmatpush3.bf16.msra.mxu1 %v19116_v46  ;;  %v19167_v46 = vld [vmem:[#allocation17 + $0x540] ss:$12 sps:$4 sm:$0xff]  }
0x1573   : > { %13295 = vmatpush1.bf16.msra.mxu0 %v19112_v40  ;;  %15960 = vmatprep.subr.bf16.mxu1 %v19120_v1  ;;  %v19170_v40 = vld [vmem:[#allocation17 + $0x548] ss:$12 sps:$4 sm:$0xff]  }
0x1574   : > { %13296 = vmatprep.subr.bf16.mxu0 %v19119_v58  ;;  %v19171_v58 = vld [vmem:[#allocation17 + $0x488] ss:$12 sps:$4 sm:$0xff]  }
0x1575   : > { %v19174_v1 = vld [vmem:[#allocation17 + $0x55c] ss:$12 sps:$4 sm:$0xff]  }
0x1576   : > { %15961 = vmatpush3.bf16.msra.mxu1 %v19121_v34  ;;  %v19172_v34 = vld [vmem:[#allocation17 + $0x558] ss:$12 sps:$4 sm:$0xff]  }
0x1577   : > { %13297 = vmatpush1.bf16.msra.mxu0 %v19117_v14  ;;  %15962 = vmatprep.subr.bf16.mxu1 %v19125_v54  ;;  %v19175_v14 = vld [vmem:[#allocation17 + $0x560] ss:$12 sps:$4 sm:$0xff]  }
0x1578   : > { %13298 = vmatprep.subr.bf16.mxu0 %v19124_v51  ;;  %v19176_v51 = vld [vmem:[#allocation17 + $0x4a0] ss:$12 sps:$4 sm:$0xff]  }
0x1579   : > { %v19179_v54 = vld [vmem:[#allocation17 + $0x574] ss:$12 sps:$4 sm:$0xff]  }
0x157a   : > { %15963 = vmatpush3.bf16.msra.mxu1 %v19126_v22  ;;  %v19177_v22 = vld [vmem:[#allocation17 + $0x570] ss:$12 sps:$4 sm:$0xff]  }
0x157b   : > { %13299 = vmatpush1.bf16.msra.mxu0 %v19122_v63  ;;  %15970 = vmatprep.subr.bf16.mxu1 %v19130_v33  ;;  %v19180_v63 = vld [vmem:[#allocation17 + $0x578] ss:$12 sps:$4 sm:$0xff]  }
0x157c   : > { %13311 = vmatprep.subr.bf16.mxu0 %v19129_v36  ;;  %v19181_v36 = vld [vmem:[#allocation17 + $0x4b8] ss:$12 sps:$4 sm:$0xff]  }
0x157d   : > { %13514 = vmatmul.mubr.bf16.vlgmr.msra.gmra.mrb[20].mxu1 %v22780_v53  ;;  %v19145_v53 = vld [vmem:[#allocation17 + $0x410] ss:$12 sps:$4 sm:$0xff]   ;;  %v19184_v33 = vld [vmem:[#allocation17 + $0x58c] ss:$12 sps:$4 sm:$0xff]  }
0x157e   : > { %13301 = vmatmul.mubr.bf16.vlgmr.msra.gmra.mrb[12].mxu0 %v22792_v38  ;;  %15971 = vmatpush3.bf16.msra.mxu1 %v19131_v47  ;;  %v19186_v47 = vld [vmem:[#allocation17 + $0x4d0] ss:$12 sps:$4 sm:$0xff]  }
0x157f   : > { %13312 = vmatpush1.bf16.msra.mxu0 %v19127_v12  ;;  %13343 = vmatprep.mubr.bf16.mxu0 %v22808_v32  ;;  %v19185_v12 = vld [vmem:[#allocation17 + $0x590] ss:$12 sps:$4 sm:$0xff]  }
0x1580   : > { %13554 = vmatprep.mubr.bf16.mxu1 %v22794_v45  ;;  %13313 = vmatprep.subr.bf16.mxu0 %v19134_v4  ;;  %v19147_v45 = vld [vmem:[#allocation17 + $0x4e0] ss:$12 sps:$4 sm:$0xff]   ;;  %v19189_v4 = vld [vmem:[#allocation17 + $0x5a4] ss:$12 sps:$4 sm:$0xff]  }
0x1581   : > { %15972 = vmatprep.subr.bf16.mxu1 %v19135_v5  ;;  %v19187_v5 = vld [vmem:[#allocation17 + $0x5a0] ss:$12 sps:$4 sm:$0xff]  }
0x1582   : > { %15973 = vmatpush3.bf16.msra.mxu1 %v19136_v10  ;;  %v19194_v10 = vld [vmem:[#allocation17 + $0x5bc] ss:$12 sps:$4 sm:$0xff]  }
0x1583   : > { %13314 = vmatpush1.bf16.msra.mxu0 %v19132_v8  ;;  %15974 = vmatprep.subr.bf16.mxu1 %v19140_v41  ;;  %v19191_v8 = vld [vmem:[#allocation17 + $0x4e8] ss:$12 sps:$4 sm:$0xff]   ;;  %v19192_v41 = vld [vmem:[#allocation17 + $0x5b8] ss:$12 sps:$4 sm:$0xff]  }
0x1584   : > { %13315 = vmatprep.subr.bf16.mxu0 %v19139_v11  ;;  %v19195_v11 = vld [vmem:[#allocation17 + $0x5c0] ss:$12 sps:$4 sm:$0xff]  }
0x1586   : > { %15975 = vmatpush3.bf16.msra.mxu1 %v19141_v50  ;;  %v19199_v50 = vld [vmem:[#allocation17 + $0x5d4] ss:$12 sps:$4 sm:$0xff]  }
0x1587   : > { %13316 = vmatpush1.bf16.msra.mxu0 %v19137_v37  ;;  %15976 = vmatprep.subr.bf16.mxu1 %v19145_v53  ;;  %v19196_v37 = vld [vmem:[#allocation17 + $0x500] ss:$12 sps:$4 sm:$0xff]   ;;  %v19197_v53 = vld [vmem:[#allocation17 + $0x5d0] ss:$12 sps:$4 sm:$0xff]  }
0x1588   : > { %13317 = vmatprep.subr.bf16.mxu0 %v19144_v18  ;;  %v19200_v18 = vld [vmem:[#allocation17 + $0x5d8] ss:$12 sps:$4 sm:$0xff]  }
0x158a   : > { %15977 = vmatpush3.bf16.msra.mxu1 %v19146_v62  ;;  %v19204_v62 = vld [vmem:[#allocation17 + $0x5ec] ss:$12 sps:$4 sm:$0xff]  }
0x158b   : > { %13318 = vmatpush1.bf16.msra.mxu0 %v19142_v3  ;;  %15978 = vmatprep.subr.bf16.mxu1 %v19150_v56  ;;  %v19201_v3 = vld [vmem:[#allocation17 + $0x518] ss:$12 sps:$4 sm:$0xff]   ;;  %v19202_v56 = vld [vmem:[#allocation17 + $0x5e8] ss:$12 sps:$4 sm:$0xff]  }
0x158c   : > { %13319 = vmatprep.subr.bf16.mxu0 %v19149_v42  ;;  %v19205_v42 = vld [vmem:[#allocation17 + $0x5f0] ss:$12 sps:$4 sm:$0xff]  }
0x158e   : > { %15979 = vmatpush3.bf16.msra.mxu1 %v19151_v24  ;;  %v19209_v24 = vld [vmem:[#allocation17 + $0x604] ss:$12 sps:$4 sm:$0xff]  }
0x158f   : > { %13320 = vmatpush1.bf16.msra.mxu0 %v19147_v45  ;;  %15980 = vmatprep.subr.bf16.mxu1 %v19155_v59  ;;  %v19206_v45 = vld [vmem:[#allocation17 + $0x530] ss:$12 sps:$4 sm:$0xff]   ;;  %v19207_v59 = vld [vmem:[#allocation17 + $0x600] ss:$12 sps:$4 sm:$0xff]  }
0x1590   : > { %13321 = vmatprep.subr.bf16.mxu0 %v19154_v26  ;;  %v19210_v26 = vld [vmem:[#allocation17 + $0x6c8] ss:$12 sps:$4 sm:$0xff]  }
0x1591   : > { %v11095_v16 = vpop.f32.mrb[8].mxu0 }
0x1592   : > { %v11097_v52 = vpop.f32.mrb[9].mxu0  ;;  %v17199_v39 = vadd.f32 %v11095_v16, %v7554_v60  ;;  %15981 = vmatpush3.bf16.msra.mxu1 %v19156_v61  ;;  %v19215_v61 = vld [vmem:[#allocation17 + $0x6e0] ss:$12 sps:$4 sm:$0xff]  }
0x1593   : > { %v11099_v48 = vpop.f32.mrb[10].mxu0  ;;  %13322 = vmatpush1.bf16.msra.mxu0 %v19152_v6  ;;  %v17200_v2 = vadd.f32 %v11097_v52, %v7558_v19  ;;  %15982 = vmatprep.subr.bf16.mxu1 %v19160_v49  ;;  %v19211_v6 = vld [vmem:[#allocation17 + $0x608] ss:$12 sps:$4 sm:$0xff]   ;;  %v19216_v16 = vld [vmem:[#allocation17 + $0x620] ss:$12 sps:$4 sm:$0xff]  }
0x1594   : > { %v17201_v23 = vadd.f32 %v11099_v48, %v7554_v60  ;;  %v11101_v29 = vpop.f32.mrb[11].mxu0  ;;  %13323 = vmatprep.subr.bf16.mxu0 %v19159_v0  ;;  %v19214_v60 = vld [vmem:[#allocation17 + $0x61c] ss:$12 sps:$4 sm:$0xff]   ;;  %v19212_v0 = vld [vmem:[#allocation17 + $0x618] ss:$12 sps:$4 sm:$0xff]  }
0x1595   : > { %v17202_v15 = vadd.f32 %v11101_v29, %v7558_v19  ;;  %v19219_v19 = vld [vmem:[#allocation17 + $0x634] ss:$12 sps:$4 sm:$0xff]   ;;  %v19220_v49 = vld [vmem:[#allocation17 + $0x6f8] ss:$12 sps:$4 sm:$0xff]   ;;  %v19217_v52 = vld [vmem:[#allocation17 + $0x630] ss:$12 sps:$4 sm:$0xff]  }
0x1596   : > { %v22822_v17 = vpack.c.bf16 %v17201_v23, %v17199_v39  ;;  %15983 = vmatpush3.bf16.msra.mxu1 %v19161_v28  ;;  %v19221_v48 = vld [vmem:[#allocation17 + $0x638] ss:$12 sps:$4 sm:$0xff]   ;;  %v19222_v39 = vld [vmem:[#allocation17 + $0x648] ss:$12 sps:$4 sm:$0xff]   ;;  %v19226_v23 = vld [vmem:[#allocation17 + $0x650] ss:$12 sps:$4 sm:$0xff]  }
0x1597   : > { %v22824_v55 = vpack.c.bf16 %v17202_v15, %v17200_v2  ;;  %13324 = vmatpush1.bf16.msra.mxu0 %v19157_v9  ;;  %15984 = vmatprep.subr.bf16.mxu1 %v19165_v13  ;;  %v19224_v9 = vld [vmem:[#allocation17 + $0x64c] ss:$12 sps:$4 sm:$0xff]   ;;  %v19229_v29 = vld [vmem:[#allocation17 + $0x664] ss:$12 sps:$4 sm:$0xff]   ;;  %v19230_v28 = vld [vmem:[#allocation17 + $0x728] ss:$12 sps:$4 sm:$0xff]  }
0x1598   : > { %13325 = vmatprep.subr.bf16.mxu0 %v19164_v44  ;;  %v19227_v44 = vld [vmem:[#allocation17 + $0x660] ss:$12 sps:$4 sm:$0xff]   ;;  %v19231_v2 = vld [vmem:[#allocation17 + $0x668] ss:$12 sps:$4 sm:$0xff]  }
0x1599   : > { %v19234_v15 = vld [vmem:[#allocation17 + $0x67c] ss:$12 sps:$4 sm:$0xff]   ;;  %v19235_v13 = vld [vmem:[#allocation17 + $0x740] ss:$12 sps:$4 sm:$0xff]  }
0x159a   : > { %15985 = vmatpush3.bf16.msra.mxu1 %v19166_v27  ;;  %v19239_v27 = vld [vmem:[#allocation17 + $0x694] ss:$12 sps:$4 sm:$0xff]  }
0x159b   : > { %13326 = vmatpush1.bf16.msra.mxu0 %v19162_v43  ;;  %15992 = vmatprep.subr.bf16.mxu1 %v19170_v40  ;;  %v19236_v43 = vld [vmem:[#allocation17 + $0x680] ss:$12 sps:$4 sm:$0xff]   ;;  %v19237_v40 = vld [vmem:[#allocation17 + $0x690] ss:$12 sps:$4 sm:$0xff]  }
0x159c   : > { %13327 = vmatprep.subr.bf16.mxu0 %v19169_v25  ;;  %v19240_v25 = vld [vmem:[#allocation17 + $0x758] ss:$12 sps:$4 sm:$0xff]  }
0x159d   : > { %13555 = vmatmul.mubr.bf16.vlgmr.msra.gmra.mrb[24].mxu1 %v22792_v38  ;;  %v19182_v38 = vld [vmem:[#allocation17 + $0x588] ss:$12 sps:$4 sm:$0xff]  }
0x159e   : > { %15993 = vmatpush3.bf16.msra.mxu1 %v19171_v58  ;;  %13595 = vmatprep.mubr.bf16.mxu1 %v22808_v32  ;;  %v19190_v32 = vld [vmem:[#allocation17 + $0x5a8] ss:$12 sps:$4 sm:$0xff]   ;;  %v19244_v58 = vld [vmem:[#allocation17 + $0x6ac] ss:$12 sps:$4 sm:$0xff]  }
0x159f   : > { %13328 = vmatpush1.bf16.msra.mxu0 %v19167_v46  ;;  %15994 = vmatprep.subr.bf16.mxu1 %v19175_v14  ;;  %v19241_v46 = vld [vmem:[#allocation17 + $0x698] ss:$12 sps:$4 sm:$0xff]   ;;  %v19242_v14 = vld [vmem:[#allocation17 + $0x6a8] ss:$12 sps:$4 sm:$0xff]  }
0x15a0   : > { %13329 = vmatprep.subr.bf16.mxu0 %v19174_v1  ;;  %v19245_v1 = vld [vmem:[#allocation17 + $0x770] ss:$12 sps:$4 sm:$0xff]  }
0x15a2   : > { %15995 = vmatpush3.bf16.msra.mxu1 %v19176_v51  ;;  %v19249_v51 = vld [vmem:[#allocation17 + $0x6c4] ss:$12 sps:$4 sm:$0xff]  }
0x15a3   : > { %13330 = vmatpush1.bf16.msra.mxu0 %v19172_v34  ;;  %15996 = vmatprep.subr.bf16.mxu1 %v19180_v63  ;;  %v19246_v34 = vld [vmem:[#allocation17 + $0x6b0] ss:$12 sps:$4 sm:$0xff]   ;;  %v19247_v63 = vld [vmem:[#allocation17 + $0x6c0] ss:$12 sps:$4 sm:$0xff]  }
0x15a4   : > { %13331 = vmatprep.subr.bf16.mxu0 %v19179_v54  ;;  %v19271_v54 = vld [vmem:[#allocation17 + $0x848] ss:$12 sps:$4 sm:$0xff]  }
0x15a6   : > { %15997 = vmatpush3.bf16.msra.mxu1 %v19181_v36  ;;  %v19272_v36 = vld [vmem:[#allocation17 + $0x788] ss:$12 sps:$4 sm:$0xff]  }
0x15a7   : > { %13332 = vmatpush1.bf16.msra.mxu0 %v19177_v22  ;;  %15998 = vmatprep.subr.bf16.mxu1 %v19185_v12  ;;  %v19252_v22 = vld [vmem:[#allocation17 + $0x6dc] ss:$12 sps:$4 sm:$0xff]   ;;  %v19250_v12 = vld [vmem:[#allocation17 + $0x6d8] ss:$12 sps:$4 sm:$0xff]  }
0x15a8   : > { %13333 = vmatprep.subr.bf16.mxu0 %v19184_v33  ;;  %v19276_v33 = vld [vmem:[#allocation17 + $0x860] ss:$12 sps:$4 sm:$0xff]  }
0x15aa   : > { %15999 = vmatpush3.bf16.msra.mxu1 %v19186_v47  ;;  %v19277_v47 = vld [vmem:[#allocation17 + $0x7a0] ss:$12 sps:$4 sm:$0xff]  }
0x15ab   : > { %13334 = vmatpush1.bf16.msra.mxu0 %v19182_v38  ;;  %16000 = vmatprep.subr.bf16.mxu1 %v19190_v32  ;;  %v19255_v38 = vld [vmem:[#allocation17 + $0x6f4] ss:$12 sps:$4 sm:$0xff]   ;;  %v19253_v32 = vld [vmem:[#allocation17 + $0x6f0] ss:$12 sps:$4 sm:$0xff]  }
0x15ac   : > { %13335 = vmatprep.subr.bf16.mxu0 %v19189_v4  ;;  %v19281_v4 = vld [vmem:[#allocation17 + $0x878] ss:$12 sps:$4 sm:$0xff]  }
0x15ae   : > { %16001 = vmatpush3.bf16.msra.mxu1 %v19191_v8  ;;  %v19282_v8 = vld [vmem:[#allocation17 + $0x7b8] ss:$12 sps:$4 sm:$0xff]  }
0x15af   : > { %13336 = vmatpush1.bf16.msra.mxu0 %v19187_v5  ;;  %16002 = vmatprep.subr.bf16.mxu1 %v19195_v11  ;;  %v19258_v5 = vld [vmem:[#allocation17 + $0x70c] ss:$12 sps:$4 sm:$0xff]   ;;  %v19256_v11 = vld [vmem:[#allocation17 + $0x708] ss:$12 sps:$4 sm:$0xff]  }
0x15b0   : > { %13337 = vmatprep.subr.bf16.mxu0 %v19194_v10  ;;  %v19286_v10 = vld [vmem:[#allocation17 + $0x890] ss:$12 sps:$4 sm:$0xff]  }
0x15b2   : > { %16003 = vmatpush3.bf16.msra.mxu1 %v19196_v37  ;;  %v19287_v37 = vld [vmem:[#allocation17 + $0x7d0] ss:$12 sps:$4 sm:$0xff]  }
0x15b3   : > { %13338 = vmatpush1.bf16.msra.mxu0 %v19192_v41  ;;  %16004 = vmatprep.subr.bf16.mxu1 %v19200_v18  ;;  %v19261_v41 = vld [vmem:[#allocation17 + $0x724] ss:$12 sps:$4 sm:$0xff]   ;;  %v19259_v18 = vld [vmem:[#allocation17 + $0x720] ss:$12 sps:$4 sm:$0xff]  }
0x15b4   : > { %13339 = vmatprep.subr.bf16.mxu0 %v19199_v50  ;;  %v19291_v50 = vld [vmem:[#allocation17 + $0x8a8] ss:$12 sps:$4 sm:$0xff]  }
0x15b6   : > { %16005 = vmatpush3.bf16.msra.mxu1 %v19201_v3  ;;  %v19292_v3 = vld [vmem:[#allocation17 + $0x7e8] ss:$12 sps:$4 sm:$0xff]  }
0x15b7   : > { %13340 = vmatpush1.bf16.msra.mxu0 %v19197_v53  ;;  %16006 = vmatprep.subr.bf16.mxu1 %v19205_v42  ;;  %v19264_v53 = vld [vmem:[#allocation17 + $0x73c] ss:$12 sps:$4 sm:$0xff]   ;;  %v19262_v42 = vld [vmem:[#allocation17 + $0x738] ss:$12 sps:$4 sm:$0xff]  }
0x15b8   : > { %13341 = vmatprep.subr.bf16.mxu0 %v19204_v62  ;;  %v19296_v62 = vld [vmem:[#allocation17 + $0x8c0] ss:$12 sps:$4 sm:$0xff]  }
0x15ba   : > { %16007 = vmatpush3.bf16.msra.mxu1 %v19206_v45  ;;  %v19297_v45 = vld [vmem:[#allocation17 + $0x800] ss:$12 sps:$4 sm:$0xff]  }
0x15bb   : > { %13342 = vmatpush1.bf16.msra.mxu0 %v19202_v56  ;;  %16014 = vmatprep.subr.bf16.mxu1 %v19210_v26  ;;  %v19267_v56 = vld [vmem:[#allocation17 + $0x754] ss:$12 sps:$4 sm:$0xff]   ;;  %v19265_v26 = vld [vmem:[#allocation17 + $0x750] ss:$12 sps:$4 sm:$0xff]  }
0x15bc   : > { %13354 = vmatprep.subr.bf16.mxu0 %v19209_v24  ;;  %v19301_v24 = vld [vmem:[#allocation17 + $0x8d8] ss:$12 sps:$4 sm:$0xff]  }
0x15bd   : > { %13596 = vmatmul.mubr.bf16.vlgmr.msra.gmra.mrb[28].mxu1 %v22806_v7 }
0x15be   : > { %13344 = vmatmul.mubr.bf16.vlgmr.msra.gmra.mrb[12].mxu0 %v22806_v7  ;;  %16015 = vmatpush3.bf16.msra.mxu1 %v19211_v6  ;;  %v19225_v7 = vld [vmem:[#allocation17 + $0x710] ss:$12 sps:$4 sm:$0xff]   ;;  %v19302_v6 = vld [vmem:[#allocation17 + $0x818] ss:$12 sps:$4 sm:$0xff]  }
0x15bf   : > { %13355 = vmatpush1.bf16.msra.mxu0 %v19207_v59  ;;  %13386 = vmatprep.mubr.bf16.mxu0 %v22824_v55  ;;  %v19270_v59 = vld [vmem:[#allocation17 + $0x76c] ss:$12 sps:$4 sm:$0xff]  }
0x15c0   : > { %13636 = vmatprep.mubr.bf16.mxu1 %v22824_v55  ;;  %13356 = vmatprep.subr.bf16.mxu0 %v19214_v60  ;;  %v19232_v55 = vld [vmem:[#allocation17 + $0x678] ss:$12 sps:$4 sm:$0xff]   ;;  %v19306_v60 = vld [vmem:[#allocation17 + $0x8f0] ss:$12 sps:$4 sm:$0xff]  }
0x15c1   : > { %16016 = vmatprep.subr.bf16.mxu1 %v19215_v61  ;;  %v19268_v61 = vld [vmem:[#allocation17 + $0x768] ss:$12 sps:$4 sm:$0xff]  }
0x15c2   : > { %16017 = vmatpush3.bf16.msra.mxu1 %v19216_v16  ;;  %v19307_v16 = vld [vmem:[#allocation17 + $0x830] ss:$12 sps:$4 sm:$0xff]  }
0x15c3   : > { %13357 = vmatpush1.bf16.msra.mxu0 %v19212_v0  ;;  %16018 = vmatprep.subr.bf16.mxu1 %v19220_v49  ;;  %v19275_v0 = vld [vmem:[#allocation17 + $0x784] ss:$12 sps:$4 sm:$0xff]   ;;  %v19280_v49 = vld [vmem:[#allocation17 + $0x79c] ss:$12 sps:$4 sm:$0xff]  }
0x15c4   : > { %13358 = vmatprep.subr.bf16.mxu0 %v19219_v19  ;;  %v19273_v19 = vld [vmem:[#allocation17 + $0x780] ss:$12 sps:$4 sm:$0xff]  }
0x15c6   : > { %16019 = vmatpush3.bf16.msra.mxu1 %v19221_v48  ;;  %v19285_v48 = vld [vmem:[#allocation17 + $0x7b4] ss:$12 sps:$4 sm:$0xff]  }
0x15c7   : > { %13359 = vmatpush1.bf16.msra.mxu0 %v19217_v52  ;;  %16020 = vmatprep.subr.bf16.mxu1 %v19225_v7  ;;  %v19278_v52 = vld [vmem:[#allocation17 + $0x798] ss:$12 sps:$4 sm:$0xff]  }
0x15c8   : > { %13360 = vmatprep.subr.bf16.mxu0 %v19224_v9  ;;  %v19283_v9 = vld [vmem:[#allocation17 + $0x7b0] ss:$12 sps:$4 sm:$0xff]   ;;  %v19290_v7 = vld [vmem:[#allocation17 + $0x7cc] ss:$12 sps:$4 sm:$0xff]  }
0x15ca   : > { %16021 = vmatpush3.bf16.msra.mxu1 %v19226_v23  ;;  %v19295_v23 = vld [vmem:[#allocation17 + $0x7e4] ss:$12 sps:$4 sm:$0xff]  }
0x15cb   : > { %13361 = vmatpush1.bf16.msra.mxu0 %v19222_v39  ;;  %16022 = vmatprep.subr.bf16.mxu1 %v19230_v28  ;;  %v19288_v39 = vld [vmem:[#allocation17 + $0x7c8] ss:$12 sps:$4 sm:$0xff]  }
0x15cc   : > { %13362 = vmatprep.subr.bf16.mxu0 %v19229_v29  ;;  %v19293_v29 = vld [vmem:[#allocation17 + $0x7e0] ss:$12 sps:$4 sm:$0xff]   ;;  %v19300_v28 = vld [vmem:[#allocation17 + $0x7fc] ss:$12 sps:$4 sm:$0xff]  }
0x15ce   : > { %16023 = vmatpush3.bf16.msra.mxu1 %v19231_v2  ;;  %v19305_v2 = vld [vmem:[#allocation17 + $0x814] ss:$12 sps:$4 sm:$0xff]  }
0x15cf   : > { %13363 = vmatpush1.bf16.msra.mxu0 %v19227_v44  ;;  %16024 = vmatprep.subr.bf16.mxu1 %v19235_v13  ;;  %v19298_v44 = vld [vmem:[#allocation17 + $0x7f8] ss:$12 sps:$4 sm:$0xff]   ;;  %v7566_v13 = vrot.slane %v22816_v57, %v7533_v31  ;;  %v19316_v31 = vld [vmem:[#allocation17 + $0x85c] ss:$12 sps:$4 sm:$0xff]  }
0x15d0   : > { %13364 = vmatprep.subr.bf16.mxu0 %v19234_v15 }
0x15d2   : > { %16025 = vmatpush3.bf16.msra.mxu1 %v19236_v43 }
0x15d3   : > { %13365 = vmatpush1.bf16.msra.mxu0 %v19232_v55  ;;  %16026 = vmatprep.subr.bf16.mxu1 %v19240_v25 }
0x15d4   : > { %13366 = vmatprep.subr.bf16.mxu0 %v19239_v27  ;;  %v19303_v27 = vld [vmem:[#allocation17 + $0x810] ss:$12 sps:$4 sm:$0xff]  }
0x15d6   : > { %16027 = vmatpush3.bf16.msra.mxu1 %v19241_v46 }
0x15d7   : > { %13367 = vmatpush1.bf16.msra.mxu0 %v19237_v40  ;;  %16028 = vmatprep.subr.bf16.mxu1 %v19245_v1 }
0x15d8   : > { %13368 = vmatprep.subr.bf16.mxu0 %v19244_v58  ;;  %v19310_v58 = vld [vmem:[#allocation17 + $0x82c] ss:$12 sps:$4 sm:$0xff]  }
0x15da   : > { %16029 = vmatpush3.bf16.msra.mxu1 %v19246_v34 }
0x15db   : > { %13369 = vmatpush1.bf16.msra.mxu0 %v19242_v14  ;;  %16036 = vmatprep.subr.bf16.mxu1 %v19271_v54  ;;  %v19308_v54 = vld [vmem:[#allocation17 + $0x828] ss:$12 sps:$4 sm:$0xff]  }
0x15dc   : > { %13370 = vmatprep.subr.bf16.mxu0 %v19249_v51 }
0x15dd   : > { %13637 = vmatmul.mubr.bf16.vlgmr.msra.gmra.mrb[32].mxu1 %v22822_v17 }
0x15de   : > { %16037 = vmatpush3.bf16.msra.mxu1 %v19272_v36  ;;  %v19317_v36 = vld [vmem:[#allocation17 + $0x870] ss:$12 sps:$4 sm:$0xff]  }
0x15df   : > { %13371 = vmatpush1.bf16.msra.mxu0 %v19247_v63  ;;  %16038 = vmatprep.subr.bf16.mxu1 %v19276_v33  ;;  %v19313_v63 = vld [vmem:[#allocation17 + $0x844] ss:$12 sps:$4 sm:$0xff]   ;;  %v19322_v33 = vld [vmem:[#allocation17 + $0x88c] ss:$12 sps:$4 sm:$0xff]  }
0x15e0   : > { %13372 = vmatprep.subr.bf16.mxu0 %v19252_v22  ;;  %v19319_v22 = vld [vmem:[#allocation17 + $0x874] ss:$12 sps:$4 sm:$0xff]  }
0x15e2   : > { %16039 = vmatpush3.bf16.msra.mxu1 %v19277_v47  ;;  %v19323_v47 = vld [vmem:[#allocation17 + $0x8a0] ss:$12 sps:$4 sm:$0xff]  }
0x15e3   : > { %13373 = vmatpush1.bf16.msra.mxu0 %v19250_v12  ;;  %16040 = vmatprep.subr.bf16.mxu1 %v19281_v4  ;;  %v19320_v12 = vld [vmem:[#allocation17 + $0x888] ss:$12 sps:$4 sm:$0xff]  }
0x15e4   : > { %13374 = vmatprep.subr.bf16.mxu0 %v19255_v38  ;;  %v19325_v38 = vld [vmem:[#allocation17 + $0x8a4] ss:$12 sps:$4 sm:$0xff]   ;;  %v19328_v4 = vld [vmem:[#allocation17 + $0x8bc] ss:$12 sps:$4 sm:$0xff]  }
0x15e6   : > { %16041 = vmatpush3.bf16.msra.mxu1 %v19282_v8 }
0x15e7   : > { %13375 = vmatpush1.bf16.msra.mxu0 %v19253_v32  ;;  %16042 = vmatprep.subr.bf16.mxu1 %v19286_v10  ;;  %v19326_v32 = vld [vmem:[#allocation17 + $0x8b8] ss:$12 sps:$4 sm:$0xff]  }
0x15e8   : > { %13376 = vmatprep.subr.bf16.mxu0 %v19258_v5  ;;  %v19331_v5 = vld [vmem:[#allocation17 + $0x8d4] ss:$12 sps:$4 sm:$0xff]  }
0x15ea   : > { %16043 = vmatpush3.bf16.msra.mxu1 %v19287_v37 }
0x15eb   : > { %13377 = vmatpush1.bf16.msra.mxu0 %v19256_v11  ;;  %16044 = vmatprep.subr.bf16.mxu1 %v19291_v50  ;;  %v19329_v11 = vld [vmem:[#allocation17 + $0x8d0] ss:$12 sps:$4 sm:$0xff]   ;;  %v19334_v50 = vld [vmem:[#allocation17 + $0x8ec] ss:$12 sps:$4 sm:$0xff]  }
0x15ec   : > { %13378 = vmatprep.subr.bf16.mxu0 %v19261_v41 }
0x15ee   : > { %16045 = vmatpush3.bf16.msra.mxu1 %v19292_v3  ;;  %v19332_v3 = vld [vmem:[#allocation17 + $0x8e8] ss:$12 sps:$4 sm:$0xff]  }
0x15ef   : > { %13379 = vmatpush1.bf16.msra.mxu0 %v19259_v18  ;;  %16046 = vmatprep.subr.bf16.mxu1 %v19296_v62  ;;  %v22839_v62 = vld [vmem:[#allocation18] sm:$0x7] }
0x15f0   : > { %13380 = vmatprep.subr.bf16.mxu0 %v19264_v53 }
0x15f2   : > { %16047 = vmatpush3.bf16.msra.mxu1 %v19297_v45 }
0x15f3   : > { %13381 = vmatpush1.bf16.msra.mxu0 %v19262_v42  ;;  %16048 = vmatprep.subr.bf16.mxu1 %v19301_v24  ;;  %v11642_v42 = vrot.slane %v22839_v62, %v22770_v21 }
0x15f4   : > { %13382 = vmatprep.subr.bf16.mxu0 %v19267_v56 }
0x15f6   : > { %16049 = vmatpush3.bf16.msra.mxu1 %v19302_v6 }
0x15f7   : > { %13383 = vmatpush1.bf16.msra.mxu0 %v19265_v26  ;;  %16050 = vmatprep.subr.bf16.mxu1 %v19306_v60 }
0x15f8   : > { %13384 = vmatprep.subr.bf16.mxu0 %v19270_v59 }
0x15fa   : > { %16051 = vmatpush3.bf16.msra.mxu1 %v19307_v16 }
0x15fb   : > { %13385 = vmatpush1.bf16.msra.mxu0 %v19268_v61 }
0x15fc   : > { %13397 = vmatprep.subr.bf16.mxu0 %v19275_v0 }
0x15fe   : > { %13387 = vmatmul.mubr.bf16.vlgmr.msra.gmra.mrb[12].mxu0 %v22822_v17  ;;  %v7562_v17 = vrot.slane %v22816_v57, %v22770_v21  ;;  %v19314_v57 = vld [vmem:[#allocation17 + $0x858] ss:$12 sps:$4 sm:$0xff]   ;;  %v19336_v21 = vld [vmem:[%s23288_s2] sm:$0xff]  }
0x15ff   : > { %13398 = vmatpush1.bf16.msra.mxu0 %v19273_v19 }
0x1600   : > { %13399 = vmatprep.subr.bf16.mxu0 %v19280_v49 }
0x1603   : > { %13400 = vmatpush1.bf16.msra.mxu0 %v19278_v52 }
0x1604   : > { %13401 = vmatprep.subr.bf16.mxu0 %v19285_v48 }
0x1607   : > { %13402 = vmatpush1.bf16.msra.mxu0 %v19283_v9 }
0x1608   : > { %13403 = vmatprep.subr.bf16.mxu0 %v19290_v7  ;;  %v19335_v7 = vld [vmem:[%s23288_s2 + $0x40] sm:$0xff]  }
0x1609   : > { %16058 = vmatprep.subr.bf16.mxu1 %v19335_v7  ;;  %v19357_v7 = vld [vmem:[%s23288_s2 + $0xb0] sm:$0xff]  }
0x160b   : > { %13404 = vmatpush1.bf16.msra.mxu0 %v19288_v39  ;;  %v19337_v39 = vld [vmem:[%s23288_s2 + $0x48] sm:$0xff]  }
0x160c   : > { %13405 = vmatprep.subr.bf16.mxu0 %v19295_v23 }
0x160f   : > { %13406 = vmatpush1.bf16.msra.mxu0 %v19293_v29 }
0x1610   : > { %13407 = vmatprep.subr.bf16.mxu0 %v19300_v28  ;;  %v11224_v15 = vpop.f32.mrb[12].mxu1 }
0x1611   : > { %v11226_v55 = vpop.f32.mrb[13].mxu1  ;;  %v17203_v25 = vadd.f32 %v11224_v15, %v7562_v17  ;;  %v19341_v15 = vld [vmem:[%s23288_s2 + $0x58] sm:$0xff]  }
0x1612   : > { %v11228_v43 = vpop.f32.mrb[14].mxu1  ;;  %v17204_v1 = vadd.f32 %v11226_v55, %v7566_v13  ;;  %v19343_v55 = vld [vmem:[%s23288_s2 + $0x60] sm:$0xff]  }
0x1613   : > { %13408 = vmatpush1.bf16.msra.mxu0 %v19298_v44  ;;  %v17205_v40 = vadd.f32 %v11228_v43, %v7562_v17  ;;  %v11230_v46 = vpop.f32.mrb[15].mxu1  ;;  %v19338_v44 = vld [vmem:[%s23288_s2 + $0x8] sm:$0xff]   ;;  %v19339_v17 = vld [vmem:[%s23288_s2 + $0x50] sm:$0xff]   ;;  %v19344_v43 = vld [vmem:[%s23288_s2 + $0x20] sm:$0xff]  }
0x1614   : > { %13409 = vmatprep.subr.bf16.mxu0 %v19305_v2  ;;  %v17206_v14 = vadd.f32 %v11230_v46, %v7566_v13  ;;  %v19340_v2 = vld [vmem:[%s23288_s2 + $0x10] sm:$0xff]   ;;  %v19342_v13 = vld [vmem:[%s23288_s2 + $0x18] sm:$0xff]  }
0x1615   : > { %v11243_v34 = vpack.c.bf16 %v17205_v40, %v17203_v25  ;;  %v19346_v25 = vld [vmem:[%s23288_s2 + $0x28] sm:$0xff]   ;;  %v19347_v40 = vld [vmem:[%s23288_s2 + $0x70] sm:$0xff]  }
0x1616   : > { %v11244_v51 = vpack.c.bf16 %v17206_v14, %v17204_v1 }
0x1617   : > { %13410 = vmatpush1.bf16.msra.mxu0 %v19303_v27  ;;  %v19345_v27 = vld [vmem:[%s23288_s2 + $0x68] sm:$0xff]  }
0x1618   : > { %13411 = vmatprep.subr.bf16.mxu0 %v19310_v58  ;;  %13429 = vmatprep.mubr.bf16.mxu0 %v11244_v51  ;;  %v19348_v58 = vld [vmem:[%s23288_s2 + $0x30] sm:$0xff]  }
0x1619   : > { %13677 = vmatprep.mubr.bf16.mxu1 %v11244_v51 }
0x161a   : > { %13678 = vmatmul.mubr.bf16.vlgmr.msra.gmra.mrb[36].mxu1 %v11243_v34 }
0x161b   : > { %13412 = vmatpush1.bf16.msra.mxu0 %v19308_v54  ;;  %16059 = vmatpush3.bf16.msra.mxu1 %v19336_v21  ;;  %v19349_v54 = vld [vmem:[%s23288_s2 + $0x78] sm:$0xff]  }
0x161c   : > { %13413 = vmatprep.subr.bf16.mxu0 %v19313_v63  ;;  %16060 = vmatprep.subr.bf16.mxu1 %v19337_v39  ;;  %v19358_v21 = vld [vmem:[%s23288_s2 + $0xb8] sm:$0xff]   ;;  %v19777_v39 = vmov 0.0|0.0  }
0x161f   : > { %13414 = vmatpush1.bf16.msra.mxu0 %v19311_v35  ;;  %16061 = vmatpush3.bf16.msra.mxu1 %v19338_v44 }
0x1620   : > { %13415 = vmatprep.subr.bf16.mxu0 %v19316_v31  ;;  %16062 = vmatprep.subr.bf16.mxu1 %v19339_v17  ;;  %v19350_v31 = vld [vmem:[%s23288_s2 + $0x38] sm:$0xff]  }
0x1623   : > { %13416 = vmatpush1.bf16.msra.mxu0 %v19314_v57  ;;  %16063 = vmatpush3.bf16.msra.mxu1 %v19340_v2 }
0x1624   : > { %13417 = vmatprep.subr.bf16.mxu0 %v19319_v22  ;;  %16064 = vmatprep.subr.bf16.mxu1 %v19341_v15  ;;  %v19775_v22 = vmov 0.0  }
0x1627   : > { %13418 = vmatpush1.bf16.msra.mxu0 %v19317_v36  ;;  %16065 = vmatpush3.bf16.msra.mxu1 %v19342_v13 }
0x1628   : > { %13419 = vmatprep.subr.bf16.mxu0 %v19322_v33  ;;  %16066 = vmatprep.subr.bf16.mxu1 %v19343_v55  ;;  %v15455_v55 = vld [vmem:[#allocation20] ss:$0 sm:$0xff] }
0x162b   : > { %13420 = vmatpush1.bf16.msra.mxu0 %v19320_v12  ;;  %16067 = vmatpush3.bf16.msra.mxu1 %v19344_v43 }
0x162c   : > { %13421 = vmatprep.subr.bf16.mxu0 %v19325_v38  ;;  %16068 = vmatprep.subr.bf16.mxu1 %v19345_v27 }
0x162f   : > { %13422 = vmatpush1.bf16.msra.mxu0 %v19323_v47  ;;  %16069 = vmatpush3.bf16.msra.mxu1 %v19346_v25 }
0x1630   : > { %13423 = vmatprep.subr.bf16.mxu0 %v19328_v4  ;;  %v15942_v8 = vpop.f32.mrb[16].mxu1  ;;  %16070 = vmatprep.subr.bf16.mxu1 %v19347_v40 }
0x1631   : > { %v15943_v10 = vpop.f32.mrb[17].mxu1 }
0x1632   : > { %v15944_v41 = vadd.f32 %v15943_v10, %v15942_v8  ;;  %v15945_v37 = vpop.f32.mrb[18].mxu1 }
0x1633   : > { %13424 = vmatpush1.bf16.msra.mxu0 %v19326_v32  ;;  %v15946_v18 = vpop.f32.mrb[19].mxu1  ;;  %16071 = vmatpush3.bf16.msra.mxu1 %v19348_v58 }
0x1634   : > { %13425 = vmatprep.subr.bf16.mxu0 %v19331_v5  ;;  %v15947_v53 = vadd.f32 %v15946_v18, %v15945_v37  ;;  %v13475_v24 = vadd.f32 %v15944_v41, %v11642_v42  ;;  %16072 = vmatprep.subr.bf16.mxu1 %v19349_v54  ;;  %v13970_v54 = vld [vmem:[#allocation21] sm:$0x1] }
0x1636   : > { %v13478_v60 = vadd.f32 %v15947_v53, %v11642_v42  ;;  %v11634_v42 = vrot.slane %v22839_v62, %v22746_v30 }
0x1637   : > { %13426 = vmatpush1.bf16.msra.mxu0 %v19329_v11  ;;  %16073 = vmatpush3.bf16.msra.mxu1 %v19350_v31 }
0x1638   : > { %13427 = vmatprep.subr.bf16.mxu0 %v19334_v50  ;;  %16818 = vmatprep.subr.bf16.mxu1 %v19775_v22 }
0x163b   : > { %13428 = vmatpush1.bf16.msra.mxu0 %v19332_v3 }
0x163e   : > { %13430 = vmatmul.mubr.bf16.vlgmr.msra.gmra.mrb[12].mxu0 %v11243_v34 }
0x1650   : > { %v15964_v56 = vpop.f32.mrb[20].mxu1 }
0x1651   : > { %v15965_v45 = vpop.f32.mrb[21].mxu1 }
0x1652   : > { %v15966_v26 = vadd.f32 %v15965_v45, %v15964_v56  ;;  %v15967_v59 = vpop.f32.mrb[22].mxu1  ;;  %v11638_v45 = vrot.slane %v22839_v62, %v22749_v20  ;;  %v19352_v20 = vld [vmem:[%s23288_s2 + $0x88] sm:$0xff]   ;;  %v19353_v62 = vld [vmem:[%s23288_s2 + $0x90] sm:$0xff]  }
0x1653   : > { %v15968_v6 = vpop.f32.mrb[23].mxu1 }
0x1654   : > { %v13516_v61 = vadd.f32 %v15966_v26, %v13475_v24  ;;  %v15969_v0 = vadd.f32 %v15968_v6, %v15967_v59 }
0x1656   : > { %v13519_v16 = vadd.f32 %v15969_v0, %v13478_v60 }
0x1670   : > { %v15986_v19 = vpop.f32.mrb[24].mxu1 }
0x1671   : > { %v15987_v49 = vpop.f32.mrb[25].mxu1 }
0x1672   : > { %v15988_v52 = vadd.f32 %v15987_v49, %v15986_v19  ;;  %v15989_v48 = vpop.f32.mrb[26].mxu1  ;;  %v19351_v49 = vld [vmem:[%s23288_s2 + $0x80] sm:$0xff]  }
0x1673   : > { %v15990_v9 = vpop.f32.mrb[27].mxu1 }
0x1674   : > { %v13557_v23 = vadd.f32 %v15988_v52, %v13516_v61  ;;  %v15991_v29 = vadd.f32 %v15990_v9, %v15989_v48  ;;  %v19354_v52 = vld [vmem:[%s23288_s2 + $0x98] sm:$0xff]   ;;  %v19355_v48 = vld [vmem:[%s23288_s2 + $0xa0] sm:$0xff]   ;;  %v19356_v9 = vld [vmem:[%s23288_s2 + $0xa8] sm:$0xff]  }
0x1676   : > { %v13560_v28 = vadd.f32 %v15991_v29, %v13519_v16  ;;  %v19778_v29 = vmov 0  }
0x1677   : > { %18086 = vset.pattern.permute.xlu0 %v19778_v29 }
0x1690   : > { %v16008_v46 = vpop.f32.mrb[28].mxu1 }
0x1691   : > { %v16009_v1 = vpop.f32.mrb[29].mxu1 }
0x1692   : > { %v16010_v14 = vadd.f32 %v16009_v1, %v16008_v46  ;;  %v16011_v34 = vpop.f32.mrb[30].mxu1 }
0x1693   : > { %v16012_v51 = vpop.f32.mrb[31].mxu1 }
0x1694   : > { %v13598_v63 = vadd.f32 %v16010_v14, %v13557_v23  ;;  %v16013_v35 = vadd.f32 %v16012_v51, %v16011_v34  ;;  %v13971_v23 = vld [vmem:[#allocation3] sm:$0x1] }
0x1695   : > { %13974 = vperm.xlu0 %18086, %v13971_v23  }
0x1696   : > { %v13601_v57 = vadd.f32 %v16013_v35, %v13560_v28 }
0x16b0   : > { %v16030_v36 = vpop.f32.mrb[32].mxu1 }
0x16b1   : > { %v16031_v33 = vpop.f32.mrb[33].mxu1 }
0x16b2   : > { %v16032_v12 = vadd.f32 %v16031_v33, %v16030_v36  ;;  %v16033_v38 = vpop.f32.mrb[34].mxu1 }
0x16b3   : > { %v16034_v47 = vpop.f32.mrb[35].mxu1 }
0x16b4   : > { %v13639_v4 = vadd.f32 %v16032_v12, %v13598_v63  ;;  %v16035_v32 = vadd.f32 %v16034_v47, %v16033_v38 }
0x16b6   : > { %v13642_v5 = vadd.f32 %v16035_v32, %v13601_v57 }
0x16ed   : > { %v16052_v8 = vpop.f32.mrb[36].mxu1 }
0x16ee   : > { %v16053_v10 = vpop.f32.mrb[37].mxu1 }
0x16ef   : > { %v16054_v11 = vadd.f32 %v16053_v10, %v16052_v8  ;;  %v16055_v41 = vpop.f32.mrb[38].mxu1 }
0x16f0   : > { %v16056_v37 = vpop.f32.mrb[39].mxu1 }
0x16f1   : > { %v13680_v50 = vadd.f32 %v16054_v11, %v13639_v4  ;;  %v16057_v18 = vadd.f32 %v16056_v37, %v16055_v41 }
0x16f3   : > { %v13683_v53 = vadd.f32 %v16057_v18, %v13642_v5 }
0x16f5   : > { %v13688_v3 = vpack.c.bf16 %v13683_v53, %v13680_v50 }
0x1711   : > { %v13431_v56 = vpop.f32.mrb[12].mxu0 }
0x1712   : > { %v13433_v24 = vpop.f32.mrb[13].mxu0  ;;  %v17207_v59 = vadd.f32 %v13431_v56, %v11634_v42 }
0x1713   : > { %v13435_v26 = vpop.f32.mrb[14].mxu0  ;;  %v17208_v61 = vadd.f32 %v13433_v24, %v11638_v45 }
0x1714   : > { %v17209_v6 = vadd.f32 %v13435_v26, %v11634_v42  ;;  %v13437_v60 = vpop.f32.mrb[15].mxu0  ;;  %v13975_v63 = vpop.permute.xlu0 %13974 }
0x1715   : > { %v17210_v0 = vadd.f32 %v13437_v60, %v11638_v45  ;;  %v13980_v35 = vrot.slane %v13975_v63, %v22746_v30 }
0x1716   : > { %v13686_v16 = vpack.c.bf16 %v17209_v6, %v17207_v59 }
0x1717   : > { %v13687_v19 = vpack.c.bf16 %v17210_v0, %v17208_v61 }
0x1719   : > { %13920 = vmatprep.mubr.bf16.mxu1 %v13687_v19 }
0x171a   : > { %13921 = vmatmul.mubr.bf16.vlgmr.msra.gmra.mrb[40].mxu1 %v13686_v16 }
0x171b   : > { %16819 = vmatpush3.bf16.msra.mxu1 %v19351_v49  ;;  %16834 = vmatprep.mubr.msk.bf16.mxu1 %vm19776_vm0, %v19775_v22 }
0x171c   : > { %16820 = vmatprep.subr.bf16.mxu1 %v19775_v22 }
0x171f   : > { %16821 = vmatpush3.bf16.msra.mxu1 %v19352_v20 }
0x1720   : > { %16822 = vmatprep.subr.bf16.mxu1 %v19775_v22 }
0x1723   : > { %16823 = vmatpush3.bf16.msra.mxu1 %v19353_v62 }
0x1724   : > { %16824 = vmatprep.subr.bf16.mxu1 %v19775_v22 }
0x1727   : > { %16825 = vmatpush3.bf16.msra.mxu1 %v19354_v52 }
0x1728   : > { %16826 = vmatprep.subr.bf16.mxu1 %v19775_v22 }
0x172b   : > { %16827 = vmatpush3.bf16.msra.mxu1 %v19355_v48 }
0x172c   : > { %16828 = vmatprep.subr.bf16.mxu1 %v19775_v22 }
0x172f   : > { %16829 = vmatpush3.bf16.msra.mxu1 %v19356_v9 }
0x1730   : > { %16830 = vmatprep.subr.bf16.mxu1 %v19775_v22 }
0x1733   : > { %16831 = vmatpush3.bf16.msra.mxu1 %v19357_v7 }
0x1734   : > { %16832 = vmatprep.subr.bf16.mxu1 %v19775_v22 }
0x1737   : > { %16833 = vmatpush3.bf16.msra.mxu1 %v19358_v21 }
0x1738   : > { %17089 = vmatprep.subr.bf16.mxu1 %v19777_v39 }
0x173a   : > { %16835 = vmatmul.mubr.bf16.vlgmr.msra.gmra.mrb[44].mxu1 %v13688_v3 }
0x173b   : > { %16842 = vmatprep.mubr.msk.f32.mxu1 %vm19776_vm0, %v19775_v22 }
0x17ed   : > { %v16074_v28 = vpop.f32.mrb[40].mxu1 }
0x17ee   : > { %v16075_v44 = vpop.f32.mrb[41].mxu1 }
0x17ef   : > { %v16076_v17 = vadd.f32 %v16075_v44, %v16074_v28  ;;  %v16077_v2 = vpop.f32.mrb[42].mxu1 }
0x17f0   : > { %v16078_v15 = vpop.f32.mrb[43].mxu1 }
0x17f1   : > { %v16079_v13 = vadd.f32 %v16078_v15, %v16077_v2  ;;  %v13923_v43 = vadd.f32 %v16076_v17, %v15455_v55 }
0x17f3   : > { %v13926_v46 = vadd.f32 %v16079_v13, %v15455_v55 }
0x180d   : > { %v13963_v27 = vpop.f32.mrb[44].mxu1 }
0x180e   : > { %v13964_v25 = vadd.f32 %v13963_v27, %v13923_v43  ;;  %v16836_v40 = vpop.f32.mrb[45].mxu1 }
0x180f   : > { %v13966_v58 = vpop.f32.mrb[46].mxu1 }
0x1810   : > { %v13967_v1 = vadd.f32 %v13966_v58, %v13926_v46  ;;  %v16837_v14 = vpop.f32.mrb[47].mxu1 }
0x1812   : > { %v17090_v34 = vpack.c.bf16 %v13967_v1, %v13964_v25 }
0x1814   : > { %17092 = vmatpush3.bf16.xpose.msk.msra.mxu1 %vm20447_vm13, %v17090_v34 }
0x181b   : > { %16843 = vmatmul.mubr.msk.f32.vlgmr.msra.gmra.mrb[48].mxu1 %vm807_vm12, %v13970_v54 }
0x18ee   : > { %v14057_v31 = vpop.f32.mrb[48].mxu1 }
0x18ef   : > { %v14058_v57 = vadd.f32 %v14057_v31, %v13980_v35  ;;  %v16844_v22 = vpop.f32.mrb[49].mxu1 }
0x18f1   : > { %14062 = vst.msk [vmem:[%s682_s22] sm:$0x1] %vm14061_vm1, %v14058_v57 }
0x18f2 PF: > { %s23291_s1 = sld [smem:[#allocation30_spill]] }
0x18f8   : > { %s35_s23 = sadd.s32 1, %s23291_s1  }
0x18f9   : > { %p32_p0 = scmp.ge.s32.totalorder %s35_s23, 4  }
0x18fb   :  { %34 = sbr.rel (!%p32_p0) target bundleno = 13 (0xd), region = 183 }
0x1902   :  { %14080 = vsyncpa [#allocation5], 1 }
0x1903   :  { %14082 = vsyncpa [#allocation5 + $0x1], 1 }
0x1904   :  { %14083 = vsyncpa [#allocation7], 1 }
0x1905   :  { %14084 = vsyncpa [#allocation10], 1 }
0x1906   :  { %14085 = vsyncpa [#allocation13], 1 }
0x1907   :  { %14086 = vsyncpa [#allocation16], 1 }
0x1908   :  { %14087 = vsyncpa [#allocation19], 1 }
0x1909   :  { %14088 = vsyncpa [#allocation22], 1 }

</bundles_post_ra>
